<compile_context>
chip_gen: v7x
topology: tpu7x:2x2x1
jax: 0.10.0
libtpu: 0.0.40
codegen_flags: <defaults>
</compile_context>

<pallas_src>
import jax
import jax.numpy as jnp
from jax import lax
from jax.experimental import pallas as pl
from jax.experimental.pallas import tpu as pltpu


def _round_up(x, m):
    return (x + m - 1) // m * m


def _pad_gates_cols(m, H, Hp):
    """(rows, 3H) -> (rows, 3Hp): each gate block zero-padded to Hp lanes."""
    rows = m.shape[0]
    m3 = m.reshape(rows, 3, H)
    out = jnp.zeros((rows, 3, Hp), m.dtype).at[:, :, :H].set(m3)
    return out.reshape(rows, 3 * Hp)


# --------------------------------------------------------------------------
# Kernel 1: parallel input projection for all timesteps (unfused, bf16 MXU)
#   gi = ((onehot @ emb_w) @ W_ih^T) + b_ih
# --------------------------------------------------------------------------
def _gi_matmul_kernel(x_ref, embw_ref, wih_ref, bih_ref, gi_ref):
    # (tile_m, V) @ (V, Ep): embedding lookup as a matmul (one-hot input).
    emb = jnp.dot(x_ref[...], embw_ref[...], preferred_element_type=jnp.float32)
    # (tile_m, Ep) @ (Ep, 3Hp): input gate projection.
    gi = jnp.dot(emb.astype(jnp.bfloat16), wih_ref[...],
                 preferred_element_type=jnp.float32)
    gi_ref[...] = (gi + bih_ref[...]).astype(gi_ref.dtype)


# --------------------------------------------------------------------------
# Kernel 2: serial GRU recurrence over time chunks
#   grid step = one chunk of TB timesteps; hidden state lives in VMEM scratch.
# --------------------------------------------------------------------------
def _gru_recurrent_kernel(maxlen_ref, gi_ref, whh_ref, bhh_ref, len_ref,
                          out_ref, h_ref):
    c = pl.program_id(0)
    TB = gi_ref.shape[0]
    Hp = h_ref.shape[1]

    @pl.when(c == 0)
    def _():
        h_ref[...] = jnp.zeros_like(h_ref)        # PyTorch default h0 = 0

    # Skip chunks entirely past the longest sequence (dead work).
    @pl.when(c * TB < maxlen_ref[0])
    def _():
        # Loop-invariant loads hoisted out of the unrolled step loop.
        whh = whh_ref[...]
        bhh = bhh_ref[...]
        lengths = len_ref[...]                    # (Bp, 1) int32

        def step(s, h):
            t = c * TB + s                        # global time index
            gi = gi_ref[s].astype(jnp.float32)    # (Bp, 3Hp) precomputed slab
            gh = jnp.dot(h, whh, preferred_element_type=jnp.float32) + bhh
            # PyTorch gate order (r, z, n); slices are 128-lane aligned.
            r = jax.nn.sigmoid(gi[:, 0:Hp] + gh[:, 0:Hp])
            z = jax.nn.sigmoid(gi[:, Hp:2 * Hp] + gh[:, Hp:2 * Hp])
            n = jnp.tanh(gi[:, 2 * Hp:3 * Hp] + r * gh[:, 2 * Hp:3 * Hp])
            h_new = (1.0 - z) * n + z * h
            # pack_padded_sequence semantics: only advance while t < length[b]
            return jnp.where(t < lengths, h_new, h)

        h_ref[...] = lax.fori_loop(0, TB, step, h_ref[...], unroll=True)

    @pl.when(c == pl.num_programs(0) - 1)
    def _():
        out_ref[...] = h_ref[...]                 # lane-dense (Bp, Hp) store


@jax.jit
def rnn_encoder_forward(seq, length, emb_w, w_ih, w_hh, b_ih, b_hh):
    """seq: (B, T, V) one-hot float; length: (B,) int.

    Returns hidden: (B, H) float32 — GRU hidden state at step length[b] for
    each batch element (== PyTorch pack_padded_sequence + GRU final hidden).
    """
    B, T, V = seq.shape
    E = emb_w.shape[1]
    H = w_hh.shape[1]
    f32, bf16 = jnp.float32, jnp.bfloat16

    Hp = _round_up(H, 128)        # lane-aligned gate width
    Ep = _round_up(E, 128)        # lane-aligned embedding width
    Bp = _round_up(B, 8)          # full sublane group
    TB = 32                       # timesteps per recurrent grid step
    Tp = _round_up(T, TB)         # time padded (masked by t < length)
    n_chunks = Tp // TB

    # ---- parameters: unfused path, gate/lane padded (all pads are zero) ----
    emb_w_p = jnp.zeros((V, Ep), bf16).at[:, :E].set(emb_w.astype(bf16))
    w_ihT_p = jnp.zeros((Ep, 3 * Hp), bf16).at[:E, :].set(
        _pad_gates_cols(jnp.transpose(w_ih).astype(bf16), H, Hp))
    b_ih_p = _pad_gates_cols(b_ih.reshape(1, 3 * H).astype(f32), H, Hp)
    b_hh_p = _pad_gates_cols(b_hh.reshape(1, 3 * H).astype(f32), H, Hp)
    w_hhT_p = jnp.zeros((Hp, 3 * Hp), f32).at[:H, :].set(
        _pad_gates_cols(jnp.transpose(w_hh).astype(f32), H, Hp))

    # ---- time-major layout, batch padded to Bp, time padded to Tp ----
    seq_tm = jnp.transpose(seq, (1, 0, 2)).astype(bf16)            # (T, B, V)
    seq_tm = jnp.pad(seq_tm, ((0, Tp - T), (0, Bp - B), (0, 0)))   # (Tp, Bp, V)
    x_flat = seq_tm.reshape(Tp * Bp, V)

    len_p = jnp.pad(length.astype(jnp.int32), (0, Bp - B)).reshape(Bp, 1)
    max_len = jnp.max(length).astype(jnp.int32).reshape(1)

    # ---- kernel 1: gi for all timesteps (fully parallel matmul, bf16) ----
    R = Tp * Bp
    tile_m = next(t for t in (1024, 512, 256, 128, 64, 32, 16, 8)
                  if t <= R and R % t == 0)
    gi_flat = pl.pallas_call(
        _gi_matmul_kernel,
        out_shape=jax.ShapeDtypeStruct((R, 3 * Hp), bf16),
        grid_spec=pltpu.PrefetchScalarGridSpec(
            num_scalar_prefetch=0,
            grid=(R // tile_m,),
            in_specs=[
                pl.BlockSpec((tile_m, V), lambda i: (i, 0)),       # one-hot rows
                pl.BlockSpec((V, Ep), lambda i: (0, 0)),           # emb_w (bf16)
                pl.BlockSpec((Ep, 3 * Hp), lambda i: (0, 0)),      # W_ih^T (bf16)
                pl.BlockSpec((1, 3 * Hp), lambda i: (0, 0)),       # b_ih
            ],
            out_specs=pl.BlockSpec((tile_m, 3 * Hp), lambda i: (i, 0)),
        ),
        compiler_params=pltpu.CompilerParams(
            dimension_semantics=("parallel",)),
    )(x_flat, emb_w_p, w_ihT_p, b_ih_p)
    gi = gi_flat.reshape(Tp, Bp, 3 * Hp)

    # ---- kernel 2: serial recurrence over time chunks ----
    h_pad = pl.pallas_call(
        _gru_recurrent_kernel,
        out_shape=jax.ShapeDtypeStruct((Bp, Hp), f32),
        grid_spec=pltpu.PrefetchScalarGridSpec(
            num_scalar_prefetch=1,                 # max(length) -> SMEM
            grid=(n_chunks,),
            in_specs=[
                pl.BlockSpec((TB, Bp, 3 * Hp), lambda c, ml: (c, 0, 0)),  # gi chunk
                pl.BlockSpec((Hp, 3 * Hp), lambda c, ml: (0, 0)),         # W_hh^T
                pl.BlockSpec((1, 3 * Hp), lambda c, ml: (0, 0)),          # b_hh
                pl.BlockSpec((Bp, 1), lambda c, ml: (0, 0)),              # lengths
            ],
            out_specs=pl.BlockSpec((Bp, Hp), lambda c, ml: (0, 0)),
            scratch_shapes=[pltpu.VMEM((Bp, Hp), f32)],
        ),
        compiler_params=pltpu.CompilerParams(
            dimension_semantics=("arbitrary",)),   # sequential recurrence
    )(max_len, gi, w_hhT_p, b_hh_p, len_p)

    return h_pad[:B, :H]


def _reference_forward(seq, length, emb_w, w_ih, w_hh, b_ih, b_hh):
    """Pure-JAX f32 reference (lax.scan) mirroring PyTorch GRU + packing."""
    B, T, V = seq.shape
    H = w_hh.shape[1]
    seq_tm = jnp.transpose(seq, (1, 0, 2)).astype(jnp.float32)
    emb_seq = seq_tm @ emb_w                                   # (T, B, E)

    def step(h, inp):
        x_t, t = inp
        gi = x_t @ w_ih.T + b_ih
        gh = h @ w_hh.T + b_hh
        r = jax.nn.sigmoid(gi[:, :H] + gh[:, :H])
        z = jax.nn.sigmoid(gi[:, H:2 * H] + gh[:, H:2 * H])
        n = jnp.tanh(gi[:, 2 * H:] + r * gh[:, 2 * H:])
        h_new = (1.0 - z) * n + z * h
        mask = (t < length)[:, None]
        return jnp.where(mask, h_new, h), None

    h0 = jnp.zeros((B, H), jnp.float32)
    hT, _ = jax.lax.scan(step, h0, (emb_seq, jnp.arange(T)))
    return hT


if __name__ == "__main__":
    # Small shapes consistent with the module.
    B, T, V = 2, 8, 16          # batch, seq len, vocab (one-hot width)
    E, H = 8, 32                # embedding_dim, hidden_size

    key = jax.random.PRNGKey(0)
    k1, k2, k3, k4, k5, k6 = jax.random.split(key, 6)

    # Deterministic synthetic parameters (shapes match nn.Embedding / nn.GRU).
    emb_w = jax.random.normal(k1, (V, E), jnp.float32) * 0.1
    bound = 1.0 / jnp.sqrt(H)
    w_ih = jax.random.uniform(k2, (3 * H, E), jnp.float32, -bound, bound)
    w_hh = jax.random.uniform(k3, (3 * H, H), jnp.float32, -bound, bound)
    b_ih = jax.random.uniform(k4, (3 * H,), jnp.float32, -bound, bound)
    b_hh = jax.random.uniform(k5, (3 * H,), jnp.float32, -bound, bound)

    # One-hot token sequences + valid lengths (>= 1, <= T).
    tokens = jax.random.randint(k6, (B, T), 0, V)
    seq = jax.nn.one_hot(tokens, V, dtype=jnp.float32)          # (B, T, V)
    length = jnp.array([5, 8], dtype=jnp.int32)

    out = rnn_encoder_forward(seq, length, emb_w, w_ih, w_hh, b_ih, b_hh)
    out = jax.block_until_ready(out)

    ref = _reference_forward(seq, length, emb_w, w_ih, w_hh, b_ih, b_hh)
    assert out.shape == (B, H)
    # bf16 input-projection weights / bf16 gi storage -> bf16-level tolerance
    # against the f32 reference.
    assert jnp.allclose(out, ref, atol=1e-2, rtol=1e-2), "mismatch vs reference"

    print("KERNEL_OK")
</pallas_src>

<mosaic_0001>
module attributes {stable_mosaic.version = 11 : i64} {
  func.func @_gi_matmul_kernel(%arg0: i32, %arg1: memref<256x16xbf16, #tpu.memory_space<vmem>>, %arg2: memref<16x128xbf16, #tpu.memory_space<vmem>>, %arg3: memref<128x384xbf16, #tpu.memory_space<vmem>>, %arg4: memref<1x384xf32, #tpu.memory_space<vmem>>, %arg5: memref<256x384xbf16, #tpu.memory_space<vmem>>) attributes {dimension_semantics = [#tpu.dimension_semantics<parallel>], iteration_bounds = array<i64: 1>, scalar_prefetch = 0 : i64, scratch_operands = 0 : i64, tpu.core_type = #tpu.core_type<tc>, window_params = [{transform_indices = @transform_0, window_bounds = array<i64: 256, 16>}, {pipeline_mode = #tpu.pipeline_mode<synchronous>, transform_indices = @transform_1, window_bounds = array<i64: 16, 128>}, {pipeline_mode = #tpu.pipeline_mode<synchronous>, transform_indices = @transform_2, window_bounds = array<i64: 128, 384>}, {pipeline_mode = #tpu.pipeline_mode<synchronous>, transform_indices = @transform_3, window_bounds = array<i64: 1, 384>}, {transform_indices = @transform_4, window_bounds = array<i64: 256, 384>}]} {
    %c0 = arith.constant 0 : index
    %c0_0 = arith.constant 0 : index
    %0 = vector.load %arg1[%c0, %c0_0] : memref<256x16xbf16, #tpu.memory_space<vmem>>, vector<256x16xbf16>
    %c0_1 = arith.constant 0 : index
    %c0_2 = arith.constant 0 : index
    %1 = vector.load %arg2[%c0_1, %c0_2] : memref<16x128xbf16, #tpu.memory_space<vmem>>, vector<16x128xbf16>
    %cst = arith.constant dense<0.000000e+00> : vector<256x128xf32>
    %2 = tpu.matmul %0, %1, %cst {dimension_numbers = #tpu.dot_dimension_numbers<[1], [0], [0], [1], [0, 0, 1, 1], [], []>} : vector<256x16xbf16>, vector<16x128xbf16>, vector<256x128xf32> -> vector<256x128xf32>
    %3 = arith.truncf %2 : vector<256x128xf32> to vector<256x128xbf16>
    %c0_3 = arith.constant 0 : index
    %c0_4 = arith.constant 0 : index
    %4 = vector.load %arg3[%c0_3, %c0_4] : memref<128x384xbf16, #tpu.memory_space<vmem>>, vector<128x384xbf16>
    %cst_5 = arith.constant dense<0.000000e+00> : vector<256x384xf32>
    %5 = tpu.matmul %3, %4, %cst_5 {dimension_numbers = #tpu.dot_dimension_numbers<[1], [0], [0], [1], [0, 0, 1, 1], [], []>} : vector<256x128xbf16>, vector<128x384xbf16>, vector<256x384xf32> -> vector<256x384xf32>
    %c0_6 = arith.constant 0 : index
    %c0_7 = arith.constant 0 : index
    %6 = vector.load %arg4[%c0_6, %c0_7] : memref<1x384xf32, #tpu.memory_space<vmem>>, vector<1x384xf32>
    %7 = vector.broadcast %6 : vector<1x384xf32> to vector<256x384xf32>
    %8 = arith.addf %5, %7 : vector<256x384xf32>
    %9 = arith.truncf %8 : vector<256x384xf32> to vector<256x384xbf16>
    %c0_8 = arith.constant 0 : index
    %c0_9 = arith.constant 0 : index
    %10 = vector.load %arg5[%c0_8, %c0_9] : memref<256x384xbf16, #tpu.memory_space<vmem>>, vector<256x384xbf16>
    tpu.vector_store %arg5[%c0_8, %c0_9], %9 {strides = array<i32>} : memref<256x384xbf16, #tpu.memory_space<vmem>>, vector<256x384xbf16>,
    return
  }
  func.func @transform_0(%arg0: i32) -> (i32, i32) {
    %c0_i32 = arith.constant 0 : i32
    %c0_i32_0 = arith.constant 0 : i32
    return %arg0, %c0_i32 : i32, i32
  }
  func.func @transform_1(%arg0: i32) -> (i32, i32) {
    %c0_i32 = arith.constant 0 : i32
    %c0_i32_0 = arith.constant 0 : i32
    %c0_i32_1 = arith.constant 0 : i32
    return %c0_i32, %c0_i32_0 : i32, i32
  }
  func.func @transform_2(%arg0: i32) -> (i32, i32) {
    %c0_i32 = arith.constant 0 : i32
    %c0_i32_0 = arith.constant 0 : i32
    %c0_i32_1 = arith.constant 0 : i32
    return %c0_i32, %c0_i32_0 : i32, i32
  }
  func.func @transform_3(%arg0: i32) -> (i32, i32) {
    %c0_i32 = arith.constant 0 : i32
    %c0_i32_0 = arith.constant 0 : i32
    %c0_i32_1 = arith.constant 0 : i32
    return %c0_i32, %c0_i32_0 : i32, i32
  }
  func.func @transform_4(%arg0: i32) -> (i32, i32) {
    %c0_i32 = arith.constant 0 : i32
    %c0_i32_0 = arith.constant 0 : i32
    return %arg0, %c0_i32 : i32, i32
  }
}

module attributes {stable_mosaic.version = 11 : i64} {
  func.func @_gru_recurrent_kernel(%arg0: i32, %arg1: memref<1xi32, #tpu.memory_space<smem>>, %arg2: memref<32x8x384xbf16, #tpu.memory_space<vmem>>, %arg3: memref<128x384xf32, #tpu.memory_space<vmem>>, %arg4: memref<1x384xf32, #tpu.memory_space<vmem>>, %arg5: memref<8x1xi32, #tpu.memory_space<vmem>>, %arg6: memref<8x128xf32, #tpu.memory_space<vmem>>, %arg7: memref<8x128xf32, #tpu.memory_space<vmem>>) attributes {dimension_semantics = [#tpu.dimension_semantics<arbitrary>], iteration_bounds = array<i64: 1>, scalar_prefetch = 1 : i64, scratch_operands = 1 : i64, tpu.core_type = #tpu.core_type<tc>, window_params = [{transform_indices = @transform_0, window_bounds = array<i64: 32, 8, 384>}, {pipeline_mode = #tpu.pipeline_mode<synchronous>, transform_indices = @transform_1, window_bounds = array<i64: 128, 384>}, {pipeline_mode = #tpu.pipeline_mode<synchronous>, transform_indices = @transform_2, window_bounds = array<i64: 1, 384>}, {pipeline_mode = #tpu.pipeline_mode<synchronous>, transform_indices = @transform_3, window_bounds = array<i64: 8, 1>}, {pipeline_mode = #tpu.pipeline_mode<synchronous>, transform_indices = @transform_4, window_bounds = array<i64: 8, 128>}]} {
    %c0_i32 = arith.constant 0 : i32
    %0 = arith.cmpi eq, %arg0, %c0_i32 : i32
    %1 = arith.extui %0 : i1 to i32
    %c0_i32_0 = arith.constant 0 : i32
    %2 = arith.cmpi ne, %1, %c0_i32_0 : i32
    scf.if %2 {
      %cst = arith.constant 0.000000e+00 : f32
      %11 = vector.broadcast %cst : f32 to vector<8x128xf32>
      %c0_4 = arith.constant 0 : index
      %c0_5 = arith.constant 0 : index
      %12 = vector.load %arg7[%c0_4, %c0_5] : memref<8x128xf32, #tpu.memory_space<vmem>>, vector<8x128xf32>
      tpu.vector_store %arg7[%c0_4, %c0_5], %11 {strides = array<i32>} : memref<8x128xf32, #tpu.memory_space<vmem>>, vector<8x128xf32>,
    } else {
    }
    %c32_i32 = arith.constant 32 : i32
    %3 = arith.muli %arg0, %c32_i32 : i32
    %c0 = arith.constant 0 : index
    %4 = memref.load %arg1[%c0] : memref<1xi32, #tpu.memory_space<smem>>
    %5 = arith.cmpi slt, %3, %4 : i32
    %6 = arith.extui %5 : i1 to i32
    %c0_i32_1 = arith.constant 0 : i32
    %7 = arith.cmpi ne, %6, %c0_i32_1 : i32
    scf.if %7 {
      %c0_4 = arith.constant 0 : index
      %c0_5 = arith.constant 0 : index
      %11 = vector.load %arg3[%c0_4, %c0_5] : memref<128x384xf32, #tpu.memory_space<vmem>>, vector<128x384xf32>
      %c0_6 = arith.constant 0 : index
      %c0_7 = arith.constant 0 : index
      %12 = vector.load %arg4[%c0_6, %c0_7] : memref<1x384xf32, #tpu.memory_space<vmem>>, vector<1x384xf32>
      %c0_8 = arith.constant 0 : index
      %c0_9 = arith.constant 0 : index
      %13 = vector.load %arg5[%c0_8, %c0_9] : memref<8x1xi32, #tpu.memory_space<vmem>>, vector<8x1xi32>
      %c0_10 = arith.constant 0 : index
      %c0_11 = arith.constant 0 : index
      %14 = vector.load %arg7[%c0_10, %c0_11] : memref<8x128xf32, #tpu.memory_space<vmem>>, vector<8x128xf32>
      %c0_i32_12 = arith.constant 0 : i32
      %c32_i32_13 = arith.constant 32 : i32
      %15 = arith.muli %arg0, %c32_i32_13 : i32
      %16 = arith.addi %15, %c0_i32_12 : i32
      %17 = arith.index_cast %c0_i32_12 : i32 to index
      %c0_14 = arith.constant 0 : index
      %c0_15 = arith.constant 0 : index
      %18 = vector.load %arg2[%17, %c0_14, %c0_15] : memref<32x8x384xbf16, #tpu.memory_space<vmem>>, vector<1x8x384xbf16>
      %19 = vector.shape_cast %18 : vector<1x8x384xbf16> to vector<8x384xbf16>
      %20 = arith.extf %19 : vector<8x384xbf16> to vector<8x384xf32>
      %cst = arith.constant dense<0.000000e+00> : vector<8x384xf32>
      %21 = tpu.matmul %14, %11, %cst {dimension_numbers = #tpu.dot_dimension_numbers<[1], [0], [0], [1], [0, 0, 1, 1], [], []>} : vector<8x128xf32>, vector<128x384xf32>, vector<8x384xf32> -> vector<8x384xf32>
      %22 = vector.broadcast %12 : vector<1x384xf32> to vector<8x384xf32>
      %23 = arith.addf %21, %22 : vector<8x384xf32>
      %24 = vector.extract_strided_slice %20 {offsets = [0, 0], sizes = [8, 128], strides = [1, 1]} : vector<8x384xf32> to vector<8x128xf32>
      %25 = vector.extract_strided_slice %23 {offsets = [0, 0], sizes = [8, 128], strides = [1, 1]} : vector<8x384xf32> to vector<8x128xf32>
      %26 = arith.addf %24, %25 : vector<8x128xf32>
      %27 = arith.negf %26 : vector<8x128xf32>
      %28 = math.exp %27 : vector<8x128xf32>
      %cst_16 = arith.constant 1.000000e+00 : f32
      %29 = vector.broadcast %cst_16 : f32 to vector<8x128xf32>
      %30 = arith.addf %29, %28 : vector<8x128xf32>
      %31 = arith.divf %29, %30 : vector<8x128xf32>
      %32 = vector.extract_strided_slice %20 {offsets = [0, 128], sizes = [8, 128], strides = [1, 1]} : vector<8x384xf32> to vector<8x128xf32>
      %33 = vector.extract_strided_slice %23 {offsets = [0, 128], sizes = [8, 128], strides = [1, 1]} : vector<8x384xf32> to vector<8x128xf32>
      %34 = arith.addf %32, %33 : vector<8x128xf32>
      %35 = arith.negf %34 : vector<8x128xf32>
      %36 = math.exp %35 : vector<8x128xf32>
      %cst_17 = arith.constant 1.000000e+00 : f32
      %37 = vector.broadcast %cst_17 : f32 to vector<8x128xf32>
      %38 = arith.addf %37, %36 : vector<8x128xf32>
      %39 = arith.divf %37, %38 : vector<8x128xf32>
      %40 = vector.extract_strided_slice %20 {offsets = [0, 256], sizes = [8, 128], strides = [1, 1]} : vector<8x384xf32> to vector<8x128xf32>
      %41 = vector.extract_strided_slice %23 {offsets = [0, 256], sizes = [8, 128], strides = [1, 1]} : vector<8x384xf32> to vector<8x128xf32>
      %42 = arith.mulf %31, %41 : vector<8x128xf32>
      %43 = arith.addf %40, %42 : vector<8x128xf32>
      %44 = math.tanh %43 : vector<8x128xf32>
      %cst_18 = arith.constant 1.000000e+00 : f32
      %45 = vector.broadcast %cst_18 : f32 to vector<8x128xf32>
      %46 = arith.subf %45, %39 : vector<8x128xf32>
      %47 = arith.mulf %46, %44 : vector<8x128xf32>
      %48 = arith.mulf %39, %14 : vector<8x128xf32>
      %49 = arith.addf %47, %48 : vector<8x128xf32>
      %50 = vector.broadcast %16 : i32 to vector<8x1xi32>
      %51 = arith.cmpi slt, %50, %13 : vector<8x1xi32>
      %52 = vector.shape_cast %51 : vector<8x1xi1> to vector<8x1xi1>
      %53 = vector.broadcast %52 : vector<8x1xi1> to vector<8x128xi1>
      %54 = arith.select %53, %49, %14 : vector<8x128xi1>, vector<8x128xf32>
      %c1_i32 = arith.constant 1 : i32
      %c32_i32_19 = arith.constant 32 : i32
      %55 = arith.muli %arg0, %c32_i32_19 : i32
      %56 = arith.addi %55, %c1_i32 : i32
      %57 = arith.index_cast %c1_i32 : i32 to index
      %c0_20 = arith.constant 0 : index
      %c0_21 = arith.constant 0 : index
      %58 = vector.load %arg2[%57, %c0_20, %c0_21] : memref<32x8x384xbf16, #tpu.memory_space<vmem>>, vector<1x8x384xbf16>
      %59 = vector.shape_cast %58 : vector<1x8x384xbf16> to vector<8x384xbf16>
      %60 = arith.extf %59 : vector<8x384xbf16> to vector<8x384xf32>
      %cst_22 = arith.constant dense<0.000000e+00> : vector<8x384xf32>
      %61 = tpu.matmul %54, %11, %cst_22 {dimension_numbers = #tpu.dot_dimension_numbers<[1], [0], [0], [1], [0, 0, 1, 1], [], []>} : vector<8x128xf32>, vector<128x384xf32>, vector<8x384xf32> -> vector<8x384xf32>
      %62 = vector.broadcast %12 : vector<1x384xf32> to vector<8x384xf32>
      %63 = arith.addf %61, %62 : vector<8x384xf32>
      %64 = vector.extract_strided_slice %60 {offsets = [0, 0], sizes = [8, 128], strides = [1, 1]} : vector<8x384xf32> to vector<8x128xf32>
      %65 = vector.extract_strided_slice %63 {offsets = [0, 0], sizes = [8, 128], strides = [1, 1]} : vector<8x384xf32> to vector<8x128xf32>
      %66 = arith.addf %64, %65 : vector<8x128xf32>
      %67 = arith.negf %66 : vector<8x128xf32>
      %68 = math.exp %67 : vector<8x128xf32>
      %cst_23 = arith.constant 1.000000e+00 : f32
      %69 = vector.broadcast %cst_23 : f32 to vector<8x128xf32>
      %70 = arith.addf %69, %68 : vector<8x128xf32>
      %71 = arith.divf %69, %70 : vector<8x128xf32>
      %72 = vector.extract_strided_slice %60 {offsets = [0, 128], sizes = [8, 128], strides = [1, 1]} : vector<8x384xf32> to vector<8x128xf32>
      %73 = vector.extract_strided_slice %63 {offsets = [0, 128], sizes = [8, 128], strides = [1, 1]} : vector<8x384xf32> to vector<8x128xf32>
      %74 = arith.addf %72, %73 : vector<8x128xf32>
      %75 = arith.negf %74 : vector<8x128xf32>
      %76 = math.exp %75 : vector<8x128xf32>
      %cst_24 = arith.constant 1.000000e+00 : f32
      %77 = vector.broadcast %cst_24 : f32 to vector<8x128xf32>
      %78 = arith.addf %77, %76 : vector<8x128xf32>
      %79 = arith.divf %77, %78 : vector<8x128xf32>
      %80 = vector.extract_strided_slice %60 {offsets = [0, 256], sizes = [8, 128], strides = [1, 1]} : vector<8x384xf32> to vector<8x128xf32>
      %81 = vector.extract_strided_slice %63 {offsets = [0, 256], sizes = [8, 128], strides = [1, 1]} : vector<8x384xf32> to vector<8x128xf32>
      %82 = arith.mulf %71, %81 : vector<8x128xf32>
      %83 = arith.addf %80, %82 : vector<8x128xf32>
      %84 = math.tanh %83 : vector<8x128xf32>
      %cst_25 = arith.constant 1.000000e+00 : f32
      %85 = vector.broadcast %cst_25 : f32 to vector<8x128xf32>
      %86 = arith.subf %85, %79 : vector<8x128xf32>
      %87 = arith.mulf %86, %84 : vector<8x128xf32>
      %88 = arith.mulf %79, %54 : vector<8x128xf32>
      %89 = arith.addf %87, %88 : vector<8x128xf32>
      %90 = vector.broadcast %56 : i32 to vector<8x1xi32>
      %91 = arith.cmpi slt, %90, %13 : vector<8x1xi32>
      %92 = vector.shape_cast %91 : vector<8x1xi1> to vector<8x1xi1>
      %93 = vector.broadcast %92 : vector<8x1xi1> to vector<8x128xi1>
      %94 = arith.select %93, %89, %54 : vector<8x128xi1>, vector<8x128xf32>
      %c2_i32 = arith.constant 2 : i32
      %c32_i32_26 = arith.constant 32 : i32
      %95 = arith.muli %arg0, %c32_i32_26 : i32
      %96 = arith.addi %95, %c2_i32 : i32
      %97 = arith.index_cast %c2_i32 : i32 to index
      %c0_27 = arith.constant 0 : index
      %c0_28 = arith.constant 0 : index
      %98 = vector.load %arg2[%97, %c0_27, %c0_28] : memref<32x8x384xbf16, #tpu.memory_space<vmem>>, vector<1x8x384xbf16>
      %99 = vector.shape_cast %98 : vector<1x8x384xbf16> to vector<8x384xbf16>
      %100 = arith.extf %99 : vector<8x384xbf16> to vector<8x384xf32>
      %cst_29 = arith.constant dense<0.000000e+00> : vector<8x384xf32>
      %101 = tpu.matmul %94, %11, %cst_29 {dimension_numbers = #tpu.dot_dimension_numbers<[1], [0], [0], [1], [0, 0, 1, 1], [], []>} : vector<8x128xf32>, vector<128x384xf32>, vector<8x384xf32> -> vector<8x384xf32>
      %102 = vector.broadcast %12 : vector<1x384xf32> to vector<8x384xf32>
      %103 = arith.addf %101, %102 : vector<8x384xf32>
      %104 = vector.extract_strided_slice %100 {offsets = [0, 0], sizes = [8, 128], strides = [1, 1]} : vector<8x384xf32> to vector<8x128xf32>
      %105 = vector.extract_strided_slice %103 {offsets = [0, 0], sizes = [8, 128], strides = [1, 1]} : vector<8x384xf32> to vector<8x128xf32>
      %106 = arith.addf %104, %105 : vector<8x128xf32>
      %107 = arith.negf %106 : vector<8x128xf32>
      %108 = math.exp %107 : vector<8x128xf32>
      %cst_30 = arith.constant 1.000000e+00 : f32
      %109 = vector.broadcast %cst_30 : f32 to vector<8x128xf32>
      %110 = arith.addf %109, %108 : vector<8x128xf32>
      %111 = arith.divf %109, %110 : vector<8x128xf32>
      %112 = vector.extract_strided_slice %100 {offsets = [0, 128], sizes = [8, 128], strides = [1, 1]} : vector<8x384xf32> to vector<8x128xf32>
      %113 = vector.extract_strided_slice %103 {offsets = [0, 128], sizes = [8, 128], strides = [1, 1]} : vector<8x384xf32> to vector<8x128xf32>
      %114 = arith.addf %112, %113 : vector<8x128xf32>
      %115 = arith.negf %114 : vector<8x128xf32>
      %116 = math.exp %115 : vector<8x128xf32>
      %cst_31 = arith.constant 1.000000e+00 : f32
      %117 = vector.broadcast %cst_31 : f32 to vector<8x128xf32>
      %118 = arith.addf %117, %116 : vector<8x128xf32>
      %119 = arith.divf %117, %118 : vector<8x128xf32>
      %120 = vector.extract_strided_slice %100 {offsets = [0, 256], sizes = [8, 128], strides = [1, 1]} : vector<8x384xf32> to vector<8x128xf32>
      %121 = vector.extract_strided_slice %103 {offsets = [0, 256], sizes = [8, 128], strides = [1, 1]} : vector<8x384xf32> to vector<8x128xf32>
      %122 = arith.mulf %111, %121 : vector<8x128xf32>
      %123 = arith.addf %120, %122 : vector<8x128xf32>
      %124 = math.tanh %123 : vector<8x128xf32>
      %cst_32 = arith.constant 1.000000e+00 : f32
      %125 = vector.broadcast %cst_32 : f32 to vector<8x128xf32>
      %126 = arith.subf %125, %119 : vector<8x128xf32>
      %127 = arith.mulf %126, %124 : vector<8x128xf32>
      %128 = arith.mulf %119, %94 : vector<8x128xf32>
      %129 = arith.addf %127, %128 : vector<8x128xf32>
      %130 = vector.broadcast %96 : i32 to vector<8x1xi32>
      %131 = arith.cmpi slt, %130, %13 : vector<8x1xi32>
      %132 = vector.shape_cast %131 : vector<8x1xi1> to vector<8x1xi1>
      %133 = vector.broadcast %132 : vector<8x1xi1> to vector<8x128xi1>
      %134 = arith.select %133, %129, %94 : vector<8x128xi1>, vector<8x128xf32>
      %c3_i32 = arith.constant 3 : i32
      %c32_i32_33 = arith.constant 32 : i32
      %135 = arith.muli %arg0, %c32_i32_33 : i32
      %136 = arith.addi %135, %c3_i32 : i32
      %137 = arith.index_cast %c3_i32 : i32 to index
      %c0_34 = arith.constant 0 : index
      %c0_35 = arith.constant 0 : index
      %138 = vector.load %arg2[%137, %c0_34, %c0_35] : memref<32x8x384xbf16, #tpu.memory_space<vmem>>, vector<1x8x384xbf16>
      %139 = vector.shape_cast %138 : vector<1x8x384xbf16> to vector<8x384xbf16>
      %140 = arith.extf %139 : vector<8x384xbf16> to vector<8x384xf32>
      %cst_36 = arith.constant dense<0.000000e+00> : vector<8x384xf32>
      %141 = tpu.matmul %134, %11, %cst_36 {dimension_numbers = #tpu.dot_dimension_numbers<[1], [0], [0], [1], [0, 0, 1, 1], [], []>} : vector<8x128xf32>, vector<128x384xf32>, vector<8x384xf32> -> vector<8x384xf32>
      %142 = vector.broadcast %12 : vector<1x384xf32> to vector<8x384xf32>
      %143 = arith.addf %141, %142 : vector<8x384xf32>
      %144 = vector.extract_strided_slice %140 {offsets = [0, 0], sizes = [8, 128], strides = [1, 1]} : vector<8x384xf32> to vector<8x128xf32>
      %145 = vector.extract_strided_slice %143 {offsets = [0, 0], sizes = [8, 128], strides = [1, 1]} : vector<8x384xf32> to vector<8x128xf32>
      %146 = arith.addf %144, %145 : vector<8x128xf32>
      %147 = arith.negf %146 : vector<8x128xf32>
      %148 = math.exp %147 : vector<8x128xf32>
      %cst_37 = arith.constant 1.000000e+00 : f32
      %149 = vector.broadcast %cst_37 : f32 to vector<8x128xf32>
      %150 = arith.addf %149, %148 : vector<8x128xf32>
      %151 = arith.divf %149, %150 : vector<8x128xf32>
      %152 = vector.extract_strided_slice %140 {offsets = [0, 128], sizes = [8, 128], strides = [1, 1]} : vector<8x384xf32> to vector<8x128xf32>
      %153 = vector.extract_strided_slice %143 {offsets = [0, 128], sizes = [8, 128], strides = [1, 1]} : vector<8x384xf32> to vector<8x128xf32>
      %154 = arith.addf %152, %153 : vector<8x128xf32>
      %155 = arith.negf %154 : vector<8x128xf32>
      %156 = math.exp %155 : vector<8x128xf32>
      %cst_38 = arith.constant 1.000000e+00 : f32
      %157 = vector.broadcast %cst_38 : f32 to vector<8x128xf32>
      %158 = arith.addf %157, %156 : vector<8x128xf32>
      %159 = arith.divf %157, %158 : vector<8x128xf32>
      %160 = vector.extract_strided_slice %140 {offsets = [0, 256], sizes = [8, 128], strides = [1, 1]} : vector<8x384xf32> to vector<8x128xf32>
      %161 = vector.extract_strided_slice %143 {offsets = [0, 256], sizes = [8, 128], strides = [1, 1]} : vector<8x384xf32> to vector<8x128xf32>
      %162 = arith.mulf %151, %161 : vector<8x128xf32>
      %163 = arith.addf %160, %162 : vector<8x128xf32>
      %164 = math.tanh %163 : vector<8x128xf32>
      %cst_39 = arith.constant 1.000000e+00 : f32
      %165 = vector.broadcast %cst_39 : f32 to vector<8x128xf32>
      %166 = arith.subf %165, %159 : vector<8x128xf32>
      %167 = arith.mulf %166, %164 : vector<8x128xf32>
      %168 = arith.mulf %159, %134 : vector<8x128xf32>
      %169 = arith.addf %167, %168 : vector<8x128xf32>
      %170 = vector.broadcast %136 : i32 to vector<8x1xi32>
      %171 = arith.cmpi slt, %170, %13 : vector<8x1xi32>
      %172 = vector.shape_cast %171 : vector<8x1xi1> to vector<8x1xi1>
      %173 = vector.broadcast %172 : vector<8x1xi1> to vector<8x128xi1>
      %174 = arith.select %173, %169, %134 : vector<8x128xi1>, vector<8x128xf32>
      %c4_i32 = arith.constant 4 : i32
      %c32_i32_40 = arith.constant 32 : i32
      %175 = arith.muli %arg0, %c32_i32_40 : i32
      %176 = arith.addi %175, %c4_i32 : i32
      %177 = arith.index_cast %c4_i32 : i32 to index
      %c0_41 = arith.constant 0 : index
      %c0_42 = arith.constant 0 : index
      %178 = vector.load %arg2[%177, %c0_41, %c0_42] : memref<32x8x384xbf16, #tpu.memory_space<vmem>>, vector<1x8x384xbf16>
      %179 = vector.shape_cast %178 : vector<1x8x384xbf16> to vector<8x384xbf16>
      %180 = arith.extf %179 : vector<8x384xbf16> to vector<8x384xf32>
      %cst_43 = arith.constant dense<0.000000e+00> : vector<8x384xf32>
      %181 = tpu.matmul %174, %11, %cst_43 {dimension_numbers = #tpu.dot_dimension_numbers<[1], [0], [0], [1], [0, 0, 1, 1], [], []>} : vector<8x128xf32>, vector<128x384xf32>, vector<8x384xf32> -> vector<8x384xf32>
      %182 = vector.broadcast %12 : vector<1x384xf32> to vector<8x384xf32>
      %183 = arith.addf %181, %182 : vector<8x384xf32>
      %184 = vector.extract_strided_slice %180 {offsets = [0, 0], sizes = [8, 128], strides = [1, 1]} : vector<8x384xf32> to vector<8x128xf32>
      %185 = vector.extract_strided_slice %183 {offsets = [0, 0], sizes = [8, 128], strides = [1, 1]} : vector<8x384xf32> to vector<8x128xf32>
      %186 = arith.addf %184, %185 : vector<8x128xf32>
      %187 = arith.negf %186 : vector<8x128xf32>
      %188 = math.exp %187 : vector<8x128xf32>
      %cst_44 = arith.constant 1.000000e+00 : f32
      %189 = vector.broadcast %cst_44 : f32 to vector<8x128xf32>
      %190 = arith.addf %189, %188 : vector<8x128xf32>
      %191 = arith.divf %189, %190 : vector<8x128xf32>
      %192 = vector.extract_strided_slice %180 {offsets = [0, 128], sizes = [8, 128], strides = [1, 1]} : vector<8x384xf32> to vector<8x128xf32>
      %193 = vector.extract_strided_slice %183 {offsets = [0, 128], sizes = [8, 128], strides = [1, 1]} : vector<8x384xf32> to vector<8x128xf32>
      %194 = arith.addf %192, %193 : vector<8x128xf32>
      %195 = arith.negf %194 : vector<8x128xf32>
      %196 = math.exp %195 : vector<8x128xf32>
      %cst_45 = arith.constant 1.000000e+00 : f32
      %197 = vector.broadcast %cst_45 : f32 to vector<8x128xf32>
      %198 = arith.addf %197, %196 : vector<8x128xf32>
      %199 = arith.divf %197, %198 : vector<8x128xf32>
      %200 = vector.extract_strided_slice %180 {offsets = [0, 256], sizes = [8, 128], strides = [1, 1]} : vector<8x384xf32> to vector<8x128xf32>
      %201 = vector.extract_strided_slice %183 {offsets = [0, 256], sizes = [8, 128], strides = [1, 1]} : vector<8x384xf32> to vector<8x128xf32>
      %202 = arith.mulf %191, %201 : vector<8x128xf32>
      %203 = arith.addf %200, %202 : vector<8x128xf32>
      %204 = math.tanh %203 : vector<8x128xf32>
      %cst_46 = arith.constant 1.000000e+00 : f32
      %205 = vector.broadcast %cst_46 : f32 to vector<8x128xf32>
      %206 = arith.subf %205, %199 : vector<8x128xf32>
      %207 = arith.mulf %206, %204 : vector<8x128xf32>
      %208 = arith.mulf %199, %174 : vector<8x128xf32>
      %209 = arith.addf %207, %208 : vector<8x128xf32>
      %210 = vector.broadcast %176 : i32 to vector<8x1xi32>
      %211 = arith.cmpi slt, %210, %13 : vector<8x1xi32>
      %212 = vector.shape_cast %211 : vector<8x1xi1> to vector<8x1xi1>
      %213 = vector.broadcast %212 : vector<8x1xi1> to vector<8x128xi1>
      %214 = arith.select %213, %209, %174 : vector<8x128xi1>, vector<8x128xf32>
      %c5_i32 = arith.constant 5 : i32
      %c32_i32_47 = arith.constant 32 : i32
      %215 = arith.muli %arg0, %c32_i32_47 : i32
      %216 = arith.addi %215, %c5_i32 : i32
      %217 = arith.index_cast %c5_i32 : i32 to index
      %c0_48 = arith.constant 0 : index
      %c0_49 = arith.constant 0 : index
      %218 = vector.load %arg2[%217, %c0_48, %c0_49] : memref<32x8x384xbf16, #tpu.memory_space<vmem>>, vector<1x8x384xbf16>
      %219 = vector.shape_cast %218 : vector<1x8x384xbf16> to vector<8x384xbf16>
      %220 = arith.extf %219 : vector<8x384xbf16> to vector<8x384xf32>
      %cst_50 = arith.constant dense<0.000000e+00> : vector<8x384xf32>
      %221 = tpu.matmul %214, %11, %cst_50 {dimension_numbers = #tpu.dot_dimension_numbers<[1], [0], [0], [1], [0, 0, 1, 1], [], []>} : vector<8x128xf32>, vector<128x384xf32>, vector<8x384xf32> -> vector<8x384xf32>
      %222 = vector.broadcast %12 : vector<1x384xf32> to vector<8x384xf32>
      %223 = arith.addf %221, %222 : vector<8x384xf32>
      %224 = vector.extract_strided_slice %220 {offsets = [0, 0], sizes = [8, 128], strides = [1, 1]} : vector<8x384xf32> to vector<8x128xf32>
      %225 = vector.extract_strided_slice %223 {offsets = [0, 0], sizes = [8, 128], strides = [1, 1]} : vector<8x384xf32> to vector<8x128xf32>
      %226 = arith.addf %224, %225 : vector<8x128xf32>
      %227 = arith.negf %226 : vector<8x128xf32>
      %228 = math.exp %227 : vector<8x128xf32>
      %cst_51 = arith.constant 1.000000e+00 : f32
      %229 = vector.broadcast %cst_51 : f32 to vector<8x128xf32>
      %230 = arith.addf %229, %228 : vector<8x128xf32>
      %231 = arith.divf %229, %230 : vector<8x128xf32>
      %232 = vector.extract_strided_slice %220 {offsets = [0, 128], sizes = [8, 128], strides = [1, 1]} : vector<8x384xf32> to vector<8x128xf32>
      %233 = vector.extract_strided_slice %223 {offsets = [0, 128], sizes = [8, 128], strides = [1, 1]} : vector<8x384xf32> to vector<8x128xf32>
      %234 = arith.addf %232, %233 : vector<8x128xf32>
      %235 = arith.negf %234 : vector<8x128xf32>
      %236 = math.exp %235 : vector<8x128xf32>
      %cst_52 = arith.constant 1.000000e+00 : f32
      %237 = vector.broadcast %cst_52 : f32 to vector<8x128xf32>
      %238 = arith.addf %237, %236 : vector<8x128xf32>
      %239 = arith.divf %237, %238 : vector<8x128xf32>
      %240 = vector.extract_strided_slice %220 {offsets = [0, 256], sizes = [8, 128], strides = [1, 1]} : vector<8x384xf32> to vector<8x128xf32>
      %241 = vector.extract_strided_slice %223 {offsets = [0, 256], sizes = [8, 128], strides = [1, 1]} : vector<8x384xf32> to vector<8x128xf32>
      %242 = arith.mulf %231, %241 : vector<8x128xf32>
      %243 = arith.addf %240, %242 : vector<8x128xf32>
      %244 = math.tanh %243 : vector<8x128xf32>
      %cst_53 = arith.constant 1.000000e+00 : f32
      %245 = vector.broadcast %cst_53 : f32 to vector<8x128xf32>
      %246 = arith.subf %245, %239 : vector<8x128xf32>
      %247 = arith.mulf %246, %244 : vector<8x128xf32>
      %248 = arith.mulf %239, %214 : vector<8x128xf32>
      %249 = arith.addf %247, %248 : vector<8x128xf32>
      %250 = vector.broadcast %216 : i32 to vector<8x1xi32>
      %251 = arith.cmpi slt, %250, %13 : vector<8x1xi32>
      %252 = vector.shape_cast %251 : vector<8x1xi1> to vector<8x1xi1>
      %253 = vector.broadcast %252 : vector<8x1xi1> to vector<8x128xi1>
      %254 = arith.select %253, %249, %214 : vector<8x128xi1>, vector<8x128xf32>
      %c6_i32 = arith.constant 6 : i32
      %c32_i32_54 = arith.constant 32 : i32
      %255 = arith.muli %arg0, %c32_i32_54 : i32
      %256 = arith.addi %255, %c6_i32 : i32
      %257 = arith.index_cast %c6_i32 : i32 to index
      %c0_55 = arith.constant 0 : index
      %c0_56 = arith.constant 0 : index
      %258 = vector.load %arg2[%257, %c0_55, %c0_56] : memref<32x8x384xbf16, #tpu.memory_space<vmem>>, vector<1x8x384xbf16>
      %259 = vector.shape_cast %258 : vector<1x8x384xbf16> to vector<8x384xbf16>
      %260 = arith.extf %259 : vector<8x384xbf16> to vector<8x384xf32>
      %cst_57 = arith.constant dense<0.000000e+00> : vector<8x384xf32>
      %261 = tpu.matmul %254, %11, %cst_57 {dimension_numbers = #tpu.dot_dimension_numbers<[1], [0], [0], [1], [0, 0, 1, 1], [], []>} : vector<8x128xf32>, vector<128x384xf32>, vector<8x384xf32> -> vector<8x384xf32>
      %262 = vector.broadcast %12 : vector<1x384xf32> to vector<8x384xf32>
      %263 = arith.addf %261, %262 : vector<8x384xf32>
      %264 = vector.extract_strided_slice %260 {offsets = [0, 0], sizes = [8, 128], strides = [1, 1]} : vector<8x384xf32> to vector<8x128xf32>
      %265 = vector.extract_strided_slice %263 {offsets = [0, 0], sizes = [8, 128], strides = [1, 1]} : vector<8x384xf32> to vector<8x128xf32>
      %266 = arith.addf %264, %265 : vector<8x128xf32>
      %267 = arith.negf %266 : vector<8x128xf32>
      %268 = math.exp %267 : vector<8x128xf32>
      %cst_58 = arith.constant 1.000000e+00 : f32
      %269 = vector.broadcast %cst_58 : f32 to vector<8x128xf32>
      %270 = arith.addf %269, %268 : vector<8x128xf32>
      %271 = arith.divf %269, %270 : vector<8x128xf32>
      %272 = vector.extract_strided_slice %260 {offsets = [0, 128], sizes = [8, 128], strides = [1, 1]} : vector<8x384xf32> to vector<8x128xf32>
      %273 = vector.extract_strided_slice %263 {offsets = [0, 128], sizes = [8, 128], strides = [1, 1]} : vector<8x384xf32> to vector<8x128xf32>
      %274 = arith.addf %272, %273 : vector<8x128xf32>
      %275 = arith.negf %274 : vector<8x128xf32>
      %276 = math.exp %275 : vector<8x128xf32>
      %cst_59 = arith.constant 1.000000e+00 : f32
      %277 = vector.broadcast %cst_59 : f32 to vector<8x128xf32>
      %278 = arith.addf %277, %276 : vector<8x128xf32>
      %279 = arith.divf %277, %278 : vector<8x128xf32>
      %280 = vector.extract_strided_slice %260 {offsets = [0, 256], sizes = [8, 128], strides = [1, 1]} : vector<8x384xf32> to vector<8x128xf32>
      %281 = vector.extract_strided_slice %263 {offsets = [0, 256], sizes = [8, 128], strides = [1, 1]} : vector<8x384xf32> to vector<8x128xf32>
      %282 = arith.mulf %271, %281 : vector<8x128xf32>
      %283 = arith.addf %280, %282 : vector<8x128xf32>
      %284 = math.tanh %283 : vector<8x128xf32>
      %cst_60 = arith.constant 1.000000e+00 : f32
      %285 = vector.broadcast %cst_60 : f32 to vector<8x128xf32>
      %286 = arith.subf %285, %279 : vector<8x128xf32>
      %287 = arith.mulf %286, %284 : vector<8x128xf32>
      %288 = arith.mulf %279, %254 : vector<8x128xf32>
      %289 = arith.addf %287, %288 : vector<8x128xf32>
      %290 = vector.broadcast %256 : i32 to vector<8x1xi32>
      %291 = arith.cmpi slt, %290, %13 : vector<8x1xi32>
      %292 = vector.shape_cast %291 : vector<8x1xi1> to vector<8x1xi1>
      %293 = vector.broadcast %292 : vector<8x1xi1> to vector<8x128xi1>
      %294 = arith.select %293, %289, %254 : vector<8x128xi1>, vector<8x128xf32>
      %c7_i32 = arith.constant 7 : i32
      %c32_i32_61 = arith.constant 32 : i32
      %295 = arith.muli %arg0, %c32_i32_61 : i32
      %296 = arith.addi %295, %c7_i32 : i32
      %297 = arith.index_cast %c7_i32 : i32 to index
      %c0_62 = arith.constant 0 : index
      %c0_63 = arith.constant 0 : index
      %298 = vector.load %arg2[%297, %c0_62, %c0_63] : memref<32x8x384xbf16, #tpu.memory_space<vmem>>, vector<1x8x384xbf16>
      %299 = vector.shape_cast %298 : vector<1x8x384xbf16> to vector<8x384xbf16>
      %300 = arith.extf %299 : vector<8x384xbf16> to vector<8x384xf32>
      %cst_64 = arith.constant dense<0.000000e+00> : vector<8x384xf32>
      %301 = tpu.matmul %294, %11, %cst_64 {dimension_numbers = #tpu.dot_dimension_numbers<[1], [0], [0], [1], [0, 0, 1, 1], [], []>} : vector<8x128xf32>, vector<128x384xf32>, vector<8x384xf32> -> vector<8x384xf32>
      %302 = vector.broadcast %12 : vector<1x384xf32> to vector<8x384xf32>
      %303 = arith.addf %301, %302 : vector<8x384xf32>
      %304 = vector.extract_strided_slice %300 {offsets = [0, 0], sizes = [8, 128], strides = [1, 1]} : vector<8x384xf32> to vector<8x128xf32>
      %305 = vector.extract_strided_slice %303 {offsets = [0, 0], sizes = [8, 128], strides = [1, 1]} : vector<8x384xf32> to vector<8x128xf32>
      %306 = arith.addf %304, %305 : vector<8x128xf32>
      %307 = arith.negf %306 : vector<8x128xf32>
      %308 = math.exp %307 : vector<8x128xf32>
      %cst_65 = arith.constant 1.000000e+00 : f32
      %309 = vector.broadcast %cst_65 : f32 to vector<8x128xf32>
      %310 = arith.addf %309, %308 : vector<8x128xf32>
      %311 = arith.divf %309, %310 : vector<8x128xf32>
      %312 = vector.extract_strided_slice %300 {offsets = [0, 128], sizes = [8, 128], strides = [1, 1]} : vector<8x384xf32> to vector<8x128xf32>
      %313 = vector.extract_strided_slice %303 {offsets = [0, 128], sizes = [8, 128], strides = [1, 1]} : vector<8x384xf32> to vector<8x128xf32>
      %314 = arith.addf %312, %313 : vector<8x128xf32>
      %315 = arith.negf %314 : vector<8x128xf32>
      %316 = math.exp %315 : vector<8x128xf32>
      %cst_66 = arith.constant 1.000000e+00 : f32
      %317 = vector.broadcast %cst_66 : f32 to vector<8x128xf32>
      %318 = arith.addf %317, %316 : vector<8x128xf32>
      %319 = arith.divf %317, %318 : vector<8x128xf32>
      %320 = vector.extract_strided_slice %300 {offsets = [0, 256], sizes = [8, 128], strides = [1, 1]} : vector<8x384xf32> to vector<8x128xf32>
      %321 = vector.extract_strided_slice %303 {offsets = [0, 256], sizes = [8, 128], strides = [1, 1]} : vector<8x384xf32> to vector<8x128xf32>
      %322 = arith.mulf %311, %321 : vector<8x128xf32>
      %323 = arith.addf %320, %322 : vector<8x128xf32>
      %324 = math.tanh %323 : vector<8x128xf32>
      %cst_67 = arith.constant 1.000000e+00 : f32
      %325 = vector.broadcast %cst_67 : f32 to vector<8x128xf32>
      %326 = arith.subf %325, %319 : vector<8x128xf32>
      %327 = arith.mulf %326, %324 : vector<8x128xf32>
      %328 = arith.mulf %319, %294 : vector<8x128xf32>
      %329 = arith.addf %327, %328 : vector<8x128xf32>
      %330 = vector.broadcast %296 : i32 to vector<8x1xi32>
      %331 = arith.cmpi slt, %330, %13 : vector<8x1xi32>
      %332 = vector.shape_cast %331 : vector<8x1xi1> to vector<8x1xi1>
      %333 = vector.broadcast %332 : vector<8x1xi1> to vector<8x128xi1>
      %334 = arith.select %333, %329, %294 : vector<8x128xi1>, vector<8x128xf32>
      %c8_i32 = arith.constant 8 : i32
      %c32_i32_68 = arith.constant 32 : i32
      %335 = arith.muli %arg0, %c32_i32_68 : i32
      %336 = arith.addi %335, %c8_i32 : i32
      %337 = arith.index_cast %c8_i32 : i32 to index
      %c0_69 = arith.constant 0 : index
      %c0_70 = arith.constant 0 : index
      %338 = vector.load %arg2[%337, %c0_69, %c0_70] : memref<32x8x384xbf16, #tpu.memory_space<vmem>>, vector<1x8x384xbf16>
      %339 = vector.shape_cast %338 : vector<1x8x384xbf16> to vector<8x384xbf16>
      %340 = arith.extf %339 : vector<8x384xbf16> to vector<8x384xf32>
      %cst_71 = arith.constant dense<0.000000e+00> : vector<8x384xf32>
      %341 = tpu.matmul %334, %11, %cst_71 {dimension_numbers = #tpu.dot_dimension_numbers<[1], [0], [0], [1], [0, 0, 1, 1], [], []>} : vector<8x128xf32>, vector<128x384xf32>, vector<8x384xf32> -> vector<8x384xf32>
      %342 = vector.broadcast %12 : vector<1x384xf32> to vector<8x384xf32>
      %343 = arith.addf %341, %342 : vector<8x384xf32>
      %344 = vector.extract_strided_slice %340 {offsets = [0, 0], sizes = [8, 128], strides = [1, 1]} : vector<8x384xf32> to vector<8x128xf32>
      %345 = vector.extract_strided_slice %343 {offsets = [0, 0], sizes = [8, 128], strides = [1, 1]} : vector<8x384xf32> to vector<8x128xf32>
      %346 = arith.addf %344, %345 : vector<8x128xf32>
      %347 = arith.negf %346 : vector<8x128xf32>
      %348 = math.exp %347 : vector<8x128xf32>
      %cst_72 = arith.constant 1.000000e+00 : f32
      %349 = vector.broadcast %cst_72 : f32 to vector<8x128xf32>
      %350 = arith.addf %349, %348 : vector<8x128xf32>
      %351 = arith.divf %349, %350 : vector<8x128xf32>
      %352 = vector.extract_strided_slice %340 {offsets = [0, 128], sizes = [8, 128], strides = [1, 1]} : vector<8x384xf32> to vector<8x128xf32>
      %353 = vector.extract_strided_slice %343 {offsets = [0, 128], sizes = [8, 128], strides = [1, 1]} : vector<8x384xf32> to vector<8x128xf32>
      %354 = arith.addf %352, %353 : vector<8x128xf32>
      %355 = arith.negf %354 : vector<8x128xf32>
      %356 = math.exp %355 : vector<8x128xf32>
      %cst_73 = arith.constant 1.000000e+00 : f32
      %357 = vector.broadcast %cst_73 : f32 to vector<8x128xf32>
      %358 = arith.addf %357, %356 : vector<8x128xf32>
      %359 = arith.divf %357, %358 : vector<8x128xf32>
      %360 = vector.extract_strided_slice %340 {offsets = [0, 256], sizes = [8, 128], strides = [1, 1]} : vector<8x384xf32> to vector<8x128xf32>
      %361 = vector.extract_strided_slice %343 {offsets = [0, 256], sizes = [8, 128], strides = [1, 1]} : vector<8x384xf32> to vector<8x128xf32>
      %362 = arith.mulf %351, %361 : vector<8x128xf32>
      %363 = arith.addf %360, %362 : vector<8x128xf32>
      %364 = math.tanh %363 : vector<8x128xf32>
      %cst_74 = arith.constant 1.000000e+00 : f32
      %365 = vector.broadcast %cst_74 : f32 to vector<8x128xf32>
      %366 = arith.subf %365, %359 : vector<8x128xf32>
      %367 = arith.mulf %366, %364 : vector<8x128xf32>
      %368 = arith.mulf %359, %334 : vector<8x128xf32>
      %369 = arith.addf %367, %368 : vector<8x128xf32>
      %370 = vector.broadcast %336 : i32 to vector<8x1xi32>
      %371 = arith.cmpi slt, %370, %13 : vector<8x1xi32>
      %372 = vector.shape_cast %371 : vector<8x1xi1> to vector<8x1xi1>
      %373 = vector.broadcast %372 : vector<8x1xi1> to vector<8x128xi1>
      %374 = arith.select %373, %369, %334 : vector<8x128xi1>, vector<8x128xf32>
      %c9_i32 = arith.constant 9 : i32
      %c32_i32_75 = arith.constant 32 : i32
      %375 = arith.muli %arg0, %c32_i32_75 : i32
      %376 = arith.addi %375, %c9_i32 : i32
      %377 = arith.index_cast %c9_i32 : i32 to index
      %c0_76 = arith.constant 0 : index
      %c0_77 = arith.constant 0 : index
      %378 = vector.load %arg2[%377, %c0_76, %c0_77] : memref<32x8x384xbf16, #tpu.memory_space<vmem>>, vector<1x8x384xbf16>
      %379 = vector.shape_cast %378 : vector<1x8x384xbf16> to vector<8x384xbf16>
      %380 = arith.extf %379 : vector<8x384xbf16> to vector<8x384xf32>
      %cst_78 = arith.constant dense<0.000000e+00> : vector<8x384xf32>
      %381 = tpu.matmul %374, %11, %cst_78 {dimension_numbers = #tpu.dot_dimension_numbers<[1], [0], [0], [1], [0, 0, 1, 1], [], []>} : vector<8x128xf32>, vector<128x384xf32>, vector<8x384xf32> -> vector<8x384xf32>
      %382 = vector.broadcast %12 : vector<1x384xf32> to vector<8x384xf32>
      %383 = arith.addf %381, %382 : vector<8x384xf32>
      %384 = vector.extract_strided_slice %380 {offsets = [0, 0], sizes = [8, 128], strides = [1, 1]} : vector<8x384xf32> to vector<8x128xf32>
      %385 = vector.extract_strided_slice %383 {offsets = [0, 0], sizes = [8, 128], strides = [1, 1]} : vector<8x384xf32> to vector<8x128xf32>
      %386 = arith.addf %384, %385 : vector<8x128xf32>
      %387 = arith.negf %386 : vector<8x128xf32>
      %388 = math.exp %387 : vector<8x128xf32>
      %cst_79 = arith.constant 1.000000e+00 : f32
      %389 = vector.broadcast %cst_79 : f32 to vector<8x128xf32>
      %390 = arith.addf %389, %388 : vector<8x128xf32>
      %391 = arith.divf %389, %390 : vector<8x128xf32>
      %392 = vector.extract_strided_slice %380 {offsets = [0, 128], sizes = [8, 128], strides = [1, 1]} : vector<8x384xf32> to vector<8x128xf32>
      %393 = vector.extract_strided_slice %383 {offsets = [0, 128], sizes = [8, 128], strides = [1, 1]} : vector<8x384xf32> to vector<8x128xf32>
      %394 = arith.addf %392, %393 : vector<8x128xf32>
      %395 = arith.negf %394 : vector<8x128xf32>
      %396 = math.exp %395 : vector<8x128xf32>
      %cst_80 = arith.constant 1.000000e+00 : f32
      %397 = vector.broadcast %cst_80 : f32 to vector<8x128xf32>
      %398 = arith.addf %397, %396 : vector<8x128xf32>
      %399 = arith.divf %397, %398 : vector<8x128xf32>
      %400 = vector.extract_strided_slice %380 {offsets = [0, 256], sizes = [8, 128], strides = [1, 1]} : vector<8x384xf32> to vector<8x128xf32>
      %401 = vector.extract_strided_slice %383 {offsets = [0, 256], sizes = [8, 128], strides = [1, 1]} : vector<8x384xf32> to vector<8x128xf32>
      %402 = arith.mulf %391, %401 : vector<8x128xf32>
      %403 = arith.addf %400, %402 : vector<8x128xf32>
      %404 = math.tanh %403 : vector<8x128xf32>
      %cst_81 = arith.constant 1.000000e+00 : f32
      %405 = vector.broadcast %cst_81 : f32 to vector<8x128xf32>
      %406 = arith.subf %405, %399 : vector<8x128xf32>
      %407 = arith.mulf %406, %404 : vector<8x128xf32>
      %408 = arith.mulf %399, %374 : vector<8x128xf32>
      %409 = arith.addf %407, %408 : vector<8x128xf32>
      %410 = vector.broadcast %376 : i32 to vector<8x1xi32>
      %411 = arith.cmpi slt, %410, %13 : vector<8x1xi32>
      %412 = vector.shape_cast %411 : vector<8x1xi1> to vector<8x1xi1>
      %413 = vector.broadcast %412 : vector<8x1xi1> to vector<8x128xi1>
      %414 = arith.select %413, %409, %374 : vector<8x128xi1>, vector<8x128xf32>
      %c10_i32 = arith.constant 10 : i32
      %c32_i32_82 = arith.constant 32 : i32
      %415 = arith.muli %arg0, %c32_i32_82 : i32
      %416 = arith.addi %415, %c10_i32 : i32
      %417 = arith.index_cast %c10_i32 : i32 to index
      %c0_83 = arith.constant 0 : index
      %c0_84 = arith.constant 0 : index
      %418 = vector.load %arg2[%417, %c0_83, %c0_84] : memref<32x8x384xbf16, #tpu.memory_space<vmem>>, vector<1x8x384xbf16>
      %419 = vector.shape_cast %418 : vector<1x8x384xbf16> to vector<8x384xbf16>
      %420 = arith.extf %419 : vector<8x384xbf16> to vector<8x384xf32>
      %cst_85 = arith.constant dense<0.000000e+00> : vector<8x384xf32>
      %421 = tpu.matmul %414, %11, %cst_85 {dimension_numbers = #tpu.dot_dimension_numbers<[1], [0], [0], [1], [0, 0, 1, 1], [], []>} : vector<8x128xf32>, vector<128x384xf32>, vector<8x384xf32> -> vector<8x384xf32>
      %422 = vector.broadcast %12 : vector<1x384xf32> to vector<8x384xf32>
      %423 = arith.addf %421, %422 : vector<8x384xf32>
      %424 = vector.extract_strided_slice %420 {offsets = [0, 0], sizes = [8, 128], strides = [1, 1]} : vector<8x384xf32> to vector<8x128xf32>
      %425 = vector.extract_strided_slice %423 {offsets = [0, 0], sizes = [8, 128], strides = [1, 1]} : vector<8x384xf32> to vector<8x128xf32>
      %426 = arith.addf %424, %425 : vector<8x128xf32>
      %427 = arith.negf %426 : vector<8x128xf32>
      %428 = math.exp %427 : vector<8x128xf32>
      %cst_86 = arith.constant 1.000000e+00 : f32
      %429 = vector.broadcast %cst_86 : f32 to vector<8x128xf32>
      %430 = arith.addf %429, %428 : vector<8x128xf32>
      %431 = arith.divf %429, %430 : vector<8x128xf32>
      %432 = vector.extract_strided_slice %420 {offsets = [0, 128], sizes = [8, 128], strides = [1, 1]} : vector<8x384xf32> to vector<8x128xf32>
      %433 = vector.extract_strided_slice %423 {offsets = [0, 128], sizes = [8, 128], strides = [1, 1]} : vector<8x384xf32> to vector<8x128xf32>
      %434 = arith.addf %432, %433 : vector<8x128xf32>
      %435 = arith.negf %434 : vector<8x128xf32>
      %436 = math.exp %435 : vector<8x128xf32>
      %cst_87 = arith.constant 1.000000e+00 : f32
      %437 = vector.broadcast %cst_87 : f32 to vector<8x128xf32>
      %438 = arith.addf %437, %436 : vector<8x128xf32>
      %439 = arith.divf %437, %438 : vector<8x128xf32>
      %440 = vector.extract_strided_slice %420 {offsets = [0, 256], sizes = [8, 128], strides = [1, 1]} : vector<8x384xf32> to vector<8x128xf32>
      %441 = vector.extract_strided_slice %423 {offsets = [0, 256], sizes = [8, 128], strides = [1, 1]} : vector<8x384xf32> to vector<8x128xf32>
      %442 = arith.mulf %431, %441 : vector<8x128xf32>
      %443 = arith.addf %440, %442 : vector<8x128xf32>
      %444 = math.tanh %443 : vector<8x128xf32>
      %cst_88 = arith.constant 1.000000e+00 : f32
      %445 = vector.broadcast %cst_88 : f32 to vector<8x128xf32>
      %446 = arith.subf %445, %439 : vector<8x128xf32>
      %447 = arith.mulf %446, %444 : vector<8x128xf32>
      %448 = arith.mulf %439, %414 : vector<8x128xf32>
      %449 = arith.addf %447, %448 : vector<8x128xf32>
      %450 = vector.broadcast %416 : i32 to vector<8x1xi32>
      %451 = arith.cmpi slt, %450, %13 : vector<8x1xi32>
      %452 = vector.shape_cast %451 : vector<8x1xi1> to vector<8x1xi1>
      %453 = vector.broadcast %452 : vector<8x1xi1> to vector<8x128xi1>
      %454 = arith.select %453, %449, %414 : vector<8x128xi1>, vector<8x128xf32>
      %c11_i32 = arith.constant 11 : i32
      %c32_i32_89 = arith.constant 32 : i32
      %455 = arith.muli %arg0, %c32_i32_89 : i32
      %456 = arith.addi %455, %c11_i32 : i32
      %457 = arith.index_cast %c11_i32 : i32 to index
      %c0_90 = arith.constant 0 : index
      %c0_91 = arith.constant 0 : index
      %458 = vector.load %arg2[%457, %c0_90, %c0_91] : memref<32x8x384xbf16, #tpu.memory_space<vmem>>, vector<1x8x384xbf16>
      %459 = vector.shape_cast %458 : vector<1x8x384xbf16> to vector<8x384xbf16>
      %460 = arith.extf %459 : vector<8x384xbf16> to vector<8x384xf32>
      %cst_92 = arith.constant dense<0.000000e+00> : vector<8x384xf32>
      %461 = tpu.matmul %454, %11, %cst_92 {dimension_numbers = #tpu.dot_dimension_numbers<[1], [0], [0], [1], [0, 0, 1, 1], [], []>} : vector<8x128xf32>, vector<128x384xf32>, vector<8x384xf32> -> vector<8x384xf32>
      %462 = vector.broadcast %12 : vector<1x384xf32> to vector<8x384xf32>
      %463 = arith.addf %461, %462 : vector<8x384xf32>
      %464 = vector.extract_strided_slice %460 {offsets = [0, 0], sizes = [8, 128], strides = [1, 1]} : vector<8x384xf32> to vector<8x128xf32>
      %465 = vector.extract_strided_slice %463 {offsets = [0, 0], sizes = [8, 128], strides = [1, 1]} : vector<8x384xf32> to vector<8x128xf32>
      %466 = arith.addf %464, %465 : vector<8x128xf32>
      %467 = arith.negf %466 : vector<8x128xf32>
      %468 = math.exp %467 : vector<8x128xf32>
      %cst_93 = arith.constant 1.000000e+00 : f32
      %469 = vector.broadcast %cst_93 : f32 to vector<8x128xf32>
      %470 = arith.addf %469, %468 : vector<8x128xf32>
      %471 = arith.divf %469, %470 : vector<8x128xf32>
      %472 = vector.extract_strided_slice %460 {offsets = [0, 128], sizes = [8, 128], strides = [1, 1]} : vector<8x384xf32> to vector<8x128xf32>
      %473 = vector.extract_strided_slice %463 {offsets = [0, 128], sizes = [8, 128], strides = [1, 1]} : vector<8x384xf32> to vector<8x128xf32>
      %474 = arith.addf %472, %473 : vector<8x128xf32>
      %475 = arith.negf %474 : vector<8x128xf32>
      %476 = math.exp %475 : vector<8x128xf32>
      %cst_94 = arith.constant 1.000000e+00 : f32
      %477 = vector.broadcast %cst_94 : f32 to vector<8x128xf32>
      %478 = arith.addf %477, %476 : vector<8x128xf32>
      %479 = arith.divf %477, %478 : vector<8x128xf32>
      %480 = vector.extract_strided_slice %460 {offsets = [0, 256], sizes = [8, 128], strides = [1, 1]} : vector<8x384xf32> to vector<8x128xf32>
      %481 = vector.extract_strided_slice %463 {offsets = [0, 256], sizes = [8, 128], strides = [1, 1]} : vector<8x384xf32> to vector<8x128xf32>
      %482 = arith.mulf %471, %481 : vector<8x128xf32>
      %483 = arith.addf %480, %482 : vector<8x128xf32>
      %484 = math.tanh %483 : vector<8x128xf32>
      %cst_95 = arith.constant 1.000000e+00 : f32
      %485 = vector.broadcast %cst_95 : f32 to vector<8x128xf32>
      %486 = arith.subf %485, %479 : vector<8x128xf32>
      %487 = arith.mulf %486, %484 : vector<8x128xf32>
      %488 = arith.mulf %479, %454 : vector<8x128xf32>
      %489 = arith.addf %487, %488 : vector<8x128xf32>
      %490 = vector.broadcast %456 : i32 to vector<8x1xi32>
      %491 = arith.cmpi slt, %490, %13 : vector<8x1xi32>
      %492 = vector.shape_cast %491 : vector<8x1xi1> to vector<8x1xi1>
      %493 = vector.broadcast %492 : vector<8x1xi1> to vector<8x128xi1>
      %494 = arith.select %493, %489, %454 : vector<8x128xi1>, vector<8x128xf32>
      %c12_i32 = arith.constant 12 : i32
      %c32_i32_96 = arith.constant 32 : i32
      %495 = arith.muli %arg0, %c32_i32_96 : i32
      %496 = arith.addi %495, %c12_i32 : i32
      %497 = arith.index_cast %c12_i32 : i32 to index
      %c0_97 = arith.constant 0 : index
      %c0_98 = arith.constant 0 : index
      %498 = vector.load %arg2[%497, %c0_97, %c0_98] : memref<32x8x384xbf16, #tpu.memory_space<vmem>>, vector<1x8x384xbf16>
      %499 = vector.shape_cast %498 : vector<1x8x384xbf16> to vector<8x384xbf16>
      %500 = arith.extf %499 : vector<8x384xbf16> to vector<8x384xf32>
      %cst_99 = arith.constant dense<0.000000e+00> : vector<8x384xf32>
      %501 = tpu.matmul %494, %11, %cst_99 {dimension_numbers = #tpu.dot_dimension_numbers<[1], [0], [0], [1], [0, 0, 1, 1], [], []>} : vector<8x128xf32>, vector<128x384xf32>, vector<8x384xf32> -> vector<8x384xf32>
      %502 = vector.broadcast %12 : vector<1x384xf32> to vector<8x384xf32>
      %503 = arith.addf %501, %502 : vector<8x384xf32>
      %504 = vector.extract_strided_slice %500 {offsets = [0, 0], sizes = [8, 128], strides = [1, 1]} : vector<8x384xf32> to vector<8x128xf32>
      %505 = vector.extract_strided_slice %503 {offsets = [0, 0], sizes = [8, 128], strides = [1, 1]} : vector<8x384xf32> to vector<8x128xf32>
      %506 = arith.addf %504, %505 : vector<8x128xf32>
      %507 = arith.negf %506 : vector<8x128xf32>
      %508 = math.exp %507 : vector<8x128xf32>
      %cst_100 = arith.constant 1.000000e+00 : f32
      %509 = vector.broadcast %cst_100 : f32 to vector<8x128xf32>
      %510 = arith.addf %509, %508 : vector<8x128xf32>
      %511 = arith.divf %509, %510 : vector<8x128xf32>
      %512 = vector.extract_strided_slice %500 {offsets = [0, 128], sizes = [8, 128], strides = [1, 1]} : vector<8x384xf32> to vector<8x128xf32>
      %513 = vector.extract_strided_slice %503 {offsets = [0, 128], sizes = [8, 128], strides = [1, 1]} : vector<8x384xf32> to vector<8x128xf32>
      %514 = arith.addf %512, %513 : vector<8x128xf32>
      %515 = arith.negf %514 : vector<8x128xf32>
      %516 = math.exp %515 : vector<8x128xf32>
      %cst_101 = arith.constant 1.000000e+00 : f32
      %517 = vector.broadcast %cst_101 : f32 to vector<8x128xf32>
      %518 = arith.addf %517, %516 : vector<8x128xf32>
      %519 = arith.divf %517, %518 : vector<8x128xf32>
      %520 = vector.extract_strided_slice %500 {offsets = [0, 256], sizes = [8, 128], strides = [1, 1]} : vector<8x384xf32> to vector<8x128xf32>
      %521 = vector.extract_strided_slice %503 {offsets = [0, 256], sizes = [8, 128], strides = [1, 1]} : vector<8x384xf32> to vector<8x128xf32>
      %522 = arith.mulf %511, %521 : vector<8x128xf32>
      %523 = arith.addf %520, %522 : vector<8x128xf32>
      %524 = math.tanh %523 : vector<8x128xf32>
      %cst_102 = arith.constant 1.000000e+00 : f32
      %525 = vector.broadcast %cst_102 : f32 to vector<8x128xf32>
      %526 = arith.subf %525, %519 : vector<8x128xf32>
      %527 = arith.mulf %526, %524 : vector<8x128xf32>
      %528 = arith.mulf %519, %494 : vector<8x128xf32>
      %529 = arith.addf %527, %528 : vector<8x128xf32>
      %530 = vector.broadcast %496 : i32 to vector<8x1xi32>
      %531 = arith.cmpi slt, %530, %13 : vector<8x1xi32>
      %532 = vector.shape_cast %531 : vector<8x1xi1> to vector<8x1xi1>
      %533 = vector.broadcast %532 : vector<8x1xi1> to vector<8x128xi1>
      %534 = arith.select %533, %529, %494 : vector<8x128xi1>, vector<8x128xf32>
      %c13_i32 = arith.constant 13 : i32
      %c32_i32_103 = arith.constant 32 : i32
      %535 = arith.muli %arg0, %c32_i32_103 : i32
      %536 = arith.addi %535, %c13_i32 : i32
      %537 = arith.index_cast %c13_i32 : i32 to index
      %c0_104 = arith.constant 0 : index
      %c0_105 = arith.constant 0 : index
      %538 = vector.load %arg2[%537, %c0_104, %c0_105] : memref<32x8x384xbf16, #tpu.memory_space<vmem>>, vector<1x8x384xbf16>
      %539 = vector.shape_cast %538 : vector<1x8x384xbf16> to vector<8x384xbf16>
      %540 = arith.extf %539 : vector<8x384xbf16> to vector<8x384xf32>
      %cst_106 = arith.constant dense<0.000000e+00> : vector<8x384xf32>
      %541 = tpu.matmul %534, %11, %cst_106 {dimension_numbers = #tpu.dot_dimension_numbers<[1], [0], [0], [1], [0, 0, 1, 1], [], []>} : vector<8x128xf32>, vector<128x384xf32>, vector<8x384xf32> -> vector<8x384xf32>
      %542 = vector.broadcast %12 : vector<1x384xf32> to vector<8x384xf32>
      %543 = arith.addf %541, %542 : vector<8x384xf32>
      %544 = vector.extract_strided_slice %540 {offsets = [0, 0], sizes = [8, 128], strides = [1, 1]} : vector<8x384xf32> to vector<8x128xf32>
      %545 = vector.extract_strided_slice %543 {offsets = [0, 0], sizes = [8, 128], strides = [1, 1]} : vector<8x384xf32> to vector<8x128xf32>
      %546 = arith.addf %544, %545 : vector<8x128xf32>
      %547 = arith.negf %546 : vector<8x128xf32>
      %548 = math.exp %547 : vector<8x128xf32>
      %cst_107 = arith.constant 1.000000e+00 : f32
      %549 = vector.broadcast %cst_107 : f32 to vector<8x128xf32>
      %550 = arith.addf %549, %548 : vector<8x128xf32>
      %551 = arith.divf %549, %550 : vector<8x128xf32>
      %552 = vector.extract_strided_slice %540 {offsets = [0, 128], sizes = [8, 128], strides = [1, 1]} : vector<8x384xf32> to vector<8x128xf32>
      %553 = vector.extract_strided_slice %543 {offsets = [0, 128], sizes = [8, 128], strides = [1, 1]} : vector<8x384xf32> to vector<8x128xf32>
      %554 = arith.addf %552, %553 : vector<8x128xf32>
      %555 = arith.negf %554 : vector<8x128xf32>
      %556 = math.exp %555 : vector<8x128xf32>
      %cst_108 = arith.constant 1.000000e+00 : f32
      %557 = vector.broadcast %cst_108 : f32 to vector<8x128xf32>
      %558 = arith.addf %557, %556 : vector<8x128xf32>
      %559 = arith.divf %557, %558 : vector<8x128xf32>
      %560 = vector.extract_strided_slice %540 {offsets = [0, 256], sizes = [8, 128], strides = [1, 1]} : vector<8x384xf32> to vector<8x128xf32>
      %561 = vector.extract_strided_slice %543 {offsets = [0, 256], sizes = [8, 128], strides = [1, 1]} : vector<8x384xf32> to vector<8x128xf32>
      %562 = arith.mulf %551, %561 : vector<8x128xf32>
      %563 = arith.addf %560, %562 : vector<8x128xf32>
      %564 = math.tanh %563 : vector<8x128xf32>
      %cst_109 = arith.constant 1.000000e+00 : f32
      %565 = vector.broadcast %cst_109 : f32 to vector<8x128xf32>
      %566 = arith.subf %565, %559 : vector<8x128xf32>
      %567 = arith.mulf %566, %564 : vector<8x128xf32>
      %568 = arith.mulf %559, %534 : vector<8x128xf32>
      %569 = arith.addf %567, %568 : vector<8x128xf32>
      %570 = vector.broadcast %536 : i32 to vector<8x1xi32>
      %571 = arith.cmpi slt, %570, %13 : vector<8x1xi32>
      %572 = vector.shape_cast %571 : vector<8x1xi1> to vector<8x1xi1>
      %573 = vector.broadcast %572 : vector<8x1xi1> to vector<8x128xi1>
      %574 = arith.select %573, %569, %534 : vector<8x128xi1>, vector<8x128xf32>
      %c14_i32 = arith.constant 14 : i32
      %c32_i32_110 = arith.constant 32 : i32
      %575 = arith.muli %arg0, %c32_i32_110 : i32
      %576 = arith.addi %575, %c14_i32 : i32
      %577 = arith.index_cast %c14_i32 : i32 to index
      %c0_111 = arith.constant 0 : index
      %c0_112 = arith.constant 0 : index
      %578 = vector.load %arg2[%577, %c0_111, %c0_112] : memref<32x8x384xbf16, #tpu.memory_space<vmem>>, vector<1x8x384xbf16>
      %579 = vector.shape_cast %578 : vector<1x8x384xbf16> to vector<8x384xbf16>
      %580 = arith.extf %579 : vector<8x384xbf16> to vector<8x384xf32>
      %cst_113 = arith.constant dense<0.000000e+00> : vector<8x384xf32>
      %581 = tpu.matmul %574, %11, %cst_113 {dimension_numbers = #tpu.dot_dimension_numbers<[1], [0], [0], [1], [0, 0, 1, 1], [], []>} : vector<8x128xf32>, vector<128x384xf32>, vector<8x384xf32> -> vector<8x384xf32>
      %582 = vector.broadcast %12 : vector<1x384xf32> to vector<8x384xf32>
      %583 = arith.addf %581, %582 : vector<8x384xf32>
      %584 = vector.extract_strided_slice %580 {offsets = [0, 0], sizes = [8, 128], strides = [1, 1]} : vector<8x384xf32> to vector<8x128xf32>
      %585 = vector.extract_strided_slice %583 {offsets = [0, 0], sizes = [8, 128], strides = [1, 1]} : vector<8x384xf32> to vector<8x128xf32>
      %586 = arith.addf %584, %585 : vector<8x128xf32>
      %587 = arith.negf %586 : vector<8x128xf32>
      %588 = math.exp %587 : vector<8x128xf32>
      %cst_114 = arith.constant 1.000000e+00 : f32
      %589 = vector.broadcast %cst_114 : f32 to vector<8x128xf32>
      %590 = arith.addf %589, %588 : vector<8x128xf32>
      %591 = arith.divf %589, %590 : vector<8x128xf32>
      %592 = vector.extract_strided_slice %580 {offsets = [0, 128], sizes = [8, 128], strides = [1, 1]} : vector<8x384xf32> to vector<8x128xf32>
      %593 = vector.extract_strided_slice %583 {offsets = [0, 128], sizes = [8, 128], strides = [1, 1]} : vector<8x384xf32> to vector<8x128xf32>
      %594 = arith.addf %592, %593 : vector<8x128xf32>
      %595 = arith.negf %594 : vector<8x128xf32>
      %596 = math.exp %595 : vector<8x128xf32>
      %cst_115 = arith.constant 1.000000e+00 : f32
      %597 = vector.broadcast %cst_115 : f32 to vector<8x128xf32>
      %598 = arith.addf %597, %596 : vector<8x128xf32>
      %599 = arith.divf %597, %598 : vector<8x128xf32>
      %600 = vector.extract_strided_slice %580 {offsets = [0, 256], sizes = [8, 128], strides = [1, 1]} : vector<8x384xf32> to vector<8x128xf32>
      %601 = vector.extract_strided_slice %583 {offsets = [0, 256], sizes = [8, 128], strides = [1, 1]} : vector<8x384xf32> to vector<8x128xf32>
      %602 = arith.mulf %591, %601 : vector<8x128xf32>
      %603 = arith.addf %600, %602 : vector<8x128xf32>
      %604 = math.tanh %603 : vector<8x128xf32>
      %cst_116 = arith.constant 1.000000e+00 : f32
      %605 = vector.broadcast %cst_116 : f32 to vector<8x128xf32>
      %606 = arith.subf %605, %599 : vector<8x128xf32>
      %607 = arith.mulf %606, %604 : vector<8x128xf32>
      %608 = arith.mulf %599, %574 : vector<8x128xf32>
      %609 = arith.addf %607, %608 : vector<8x128xf32>
      %610 = vector.broadcast %576 : i32 to vector<8x1xi32>
      %611 = arith.cmpi slt, %610, %13 : vector<8x1xi32>
      %612 = vector.shape_cast %611 : vector<8x1xi1> to vector<8x1xi1>
      %613 = vector.broadcast %612 : vector<8x1xi1> to vector<8x128xi1>
      %614 = arith.select %613, %609, %574 : vector<8x128xi1>, vector<8x128xf32>
      %c15_i32 = arith.constant 15 : i32
      %c32_i32_117 = arith.constant 32 : i32
      %615 = arith.muli %arg0, %c32_i32_117 : i32
      %616 = arith.addi %615, %c15_i32 : i32
      %617 = arith.index_cast %c15_i32 : i32 to index
      %c0_118 = arith.constant 0 : index
      %c0_119 = arith.constant 0 : index
      %618 = vector.load %arg2[%617, %c0_118, %c0_119] : memref<32x8x384xbf16, #tpu.memory_space<vmem>>, vector<1x8x384xbf16>
      %619 = vector.shape_cast %618 : vector<1x8x384xbf16> to vector<8x384xbf16>
      %620 = arith.extf %619 : vector<8x384xbf16> to vector<8x384xf32>
      %cst_120 = arith.constant dense<0.000000e+00> : vector<8x384xf32>
      %621 = tpu.matmul %614, %11, %cst_120 {dimension_numbers = #tpu.dot_dimension_numbers<[1], [0], [0], [1], [0, 0, 1, 1], [], []>} : vector<8x128xf32>, vector<128x384xf32>, vector<8x384xf32> -> vector<8x384xf32>
      %622 = vector.broadcast %12 : vector<1x384xf32> to vector<8x384xf32>
      %623 = arith.addf %621, %622 : vector<8x384xf32>
      %624 = vector.extract_strided_slice %620 {offsets = [0, 0], sizes = [8, 128], strides = [1, 1]} : vector<8x384xf32> to vector<8x128xf32>
      %625 = vector.extract_strided_slice %623 {offsets = [0, 0], sizes = [8, 128], strides = [1, 1]} : vector<8x384xf32> to vector<8x128xf32>
      %626 = arith.addf %624, %625 : vector<8x128xf32>
      %627 = arith.negf %626 : vector<8x128xf32>
      %628 = math.exp %627 : vector<8x128xf32>
      %cst_121 = arith.constant 1.000000e+00 : f32
      %629 = vector.broadcast %cst_121 : f32 to vector<8x128xf32>
      %630 = arith.addf %629, %628 : vector<8x128xf32>
      %631 = arith.divf %629, %630 : vector<8x128xf32>
      %632 = vector.extract_strided_slice %620 {offsets = [0, 128], sizes = [8, 128], strides = [1, 1]} : vector<8x384xf32> to vector<8x128xf32>
      %633 = vector.extract_strided_slice %623 {offsets = [0, 128], sizes = [8, 128], strides = [1, 1]} : vector<8x384xf32> to vector<8x128xf32>
      %634 = arith.addf %632, %633 : vector<8x128xf32>
      %635 = arith.negf %634 : vector<8x128xf32>
      %636 = math.exp %635 : vector<8x128xf32>
      %cst_122 = arith.constant 1.000000e+00 : f32
      %637 = vector.broadcast %cst_122 : f32 to vector<8x128xf32>
      %638 = arith.addf %637, %636 : vector<8x128xf32>
      %639 = arith.divf %637, %638 : vector<8x128xf32>
      %640 = vector.extract_strided_slice %620 {offsets = [0, 256], sizes = [8, 128], strides = [1, 1]} : vector<8x384xf32> to vector<8x128xf32>
      %641 = vector.extract_strided_slice %623 {offsets = [0, 256], sizes = [8, 128], strides = [1, 1]} : vector<8x384xf32> to vector<8x128xf32>
      %642 = arith.mulf %631, %641 : vector<8x128xf32>
      %643 = arith.addf %640, %642 : vector<8x128xf32>
      %644 = math.tanh %643 : vector<8x128xf32>
      %cst_123 = arith.constant 1.000000e+00 : f32
      %645 = vector.broadcast %cst_123 : f32 to vector<8x128xf32>
      %646 = arith.subf %645, %639 : vector<8x128xf32>
      %647 = arith.mulf %646, %644 : vector<8x128xf32>
      %648 = arith.mulf %639, %614 : vector<8x128xf32>
      %649 = arith.addf %647, %648 : vector<8x128xf32>
      %650 = vector.broadcast %616 : i32 to vector<8x1xi32>
      %651 = arith.cmpi slt, %650, %13 : vector<8x1xi32>
      %652 = vector.shape_cast %651 : vector<8x1xi1> to vector<8x1xi1>
      %653 = vector.broadcast %652 : vector<8x1xi1> to vector<8x128xi1>
      %654 = arith.select %653, %649, %614 : vector<8x128xi1>, vector<8x128xf32>
      %c16_i32 = arith.constant 16 : i32
      %c32_i32_124 = arith.constant 32 : i32
      %655 = arith.muli %arg0, %c32_i32_124 : i32
      %656 = arith.addi %655, %c16_i32 : i32
      %657 = arith.index_cast %c16_i32 : i32 to index
      %c0_125 = arith.constant 0 : index
      %c0_126 = arith.constant 0 : index
      %658 = vector.load %arg2[%657, %c0_125, %c0_126] : memref<32x8x384xbf16, #tpu.memory_space<vmem>>, vector<1x8x384xbf16>
      %659 = vector.shape_cast %658 : vector<1x8x384xbf16> to vector<8x384xbf16>
      %660 = arith.extf %659 : vector<8x384xbf16> to vector<8x384xf32>
      %cst_127 = arith.constant dense<0.000000e+00> : vector<8x384xf32>
      %661 = tpu.matmul %654, %11, %cst_127 {dimension_numbers = #tpu.dot_dimension_numbers<[1], [0], [0], [1], [0, 0, 1, 1], [], []>} : vector<8x128xf32>, vector<128x384xf32>, vector<8x384xf32> -> vector<8x384xf32>
      %662 = vector.broadcast %12 : vector<1x384xf32> to vector<8x384xf32>
      %663 = arith.addf %661, %662 : vector<8x384xf32>
      %664 = vector.extract_strided_slice %660 {offsets = [0, 0], sizes = [8, 128], strides = [1, 1]} : vector<8x384xf32> to vector<8x128xf32>
      %665 = vector.extract_strided_slice %663 {offsets = [0, 0], sizes = [8, 128], strides = [1, 1]} : vector<8x384xf32> to vector<8x128xf32>
      %666 = arith.addf %664, %665 : vector<8x128xf32>
      %667 = arith.negf %666 : vector<8x128xf32>
      %668 = math.exp %667 : vector<8x128xf32>
      %cst_128 = arith.constant 1.000000e+00 : f32
      %669 = vector.broadcast %cst_128 : f32 to vector<8x128xf32>
      %670 = arith.addf %669, %668 : vector<8x128xf32>
      %671 = arith.divf %669, %670 : vector<8x128xf32>
      %672 = vector.extract_strided_slice %660 {offsets = [0, 128], sizes = [8, 128], strides = [1, 1]} : vector<8x384xf32> to vector<8x128xf32>
      %673 = vector.extract_strided_slice %663 {offsets = [0, 128], sizes = [8, 128], strides = [1, 1]} : vector<8x384xf32> to vector<8x128xf32>
      %674 = arith.addf %672, %673 : vector<8x128xf32>
      %675 = arith.negf %674 : vector<8x128xf32>
      %676 = math.exp %675 : vector<8x128xf32>
      %cst_129 = arith.constant 1.000000e+00 : f32
      %677 = vector.broadcast %cst_129 : f32 to vector<8x128xf32>
      %678 = arith.addf %677, %676 : vector<8x128xf32>
      %679 = arith.divf %677, %678 : vector<8x128xf32>
      %680 = vector.extract_strided_slice %660 {offsets = [0, 256], sizes = [8, 128], strides = [1, 1]} : vector<8x384xf32> to vector<8x128xf32>
      %681 = vector.extract_strided_slice %663 {offsets = [0, 256], sizes = [8, 128], strides = [1, 1]} : vector<8x384xf32> to vector<8x128xf32>
      %682 = arith.mulf %671, %681 : vector<8x128xf32>
      %683 = arith.addf %680, %682 : vector<8x128xf32>
      %684 = math.tanh %683 : vector<8x128xf32>
      %cst_130 = arith.constant 1.000000e+00 : f32
      %685 = vector.broadcast %cst_130 : f32 to vector<8x128xf32>
      %686 = arith.subf %685, %679 : vector<8x128xf32>
      %687 = arith.mulf %686, %684 : vector<8x128xf32>
      %688 = arith.mulf %679, %654 : vector<8x128xf32>
      %689 = arith.addf %687, %688 : vector<8x128xf32>
      %690 = vector.broadcast %656 : i32 to vector<8x1xi32>
      %691 = arith.cmpi slt, %690, %13 : vector<8x1xi32>
      %692 = vector.shape_cast %691 : vector<8x1xi1> to vector<8x1xi1>
      %693 = vector.broadcast %692 : vector<8x1xi1> to vector<8x128xi1>
      %694 = arith.select %693, %689, %654 : vector<8x128xi1>, vector<8x128xf32>
      %c17_i32 = arith.constant 17 : i32
      %c32_i32_131 = arith.constant 32 : i32
      %695 = arith.muli %arg0, %c32_i32_131 : i32
      %696 = arith.addi %695, %c17_i32 : i32
      %697 = arith.index_cast %c17_i32 : i32 to index
      %c0_132 = arith.constant 0 : index
      %c0_133 = arith.constant 0 : index
      %698 = vector.load %arg2[%697, %c0_132, %c0_133] : memref<32x8x384xbf16, #tpu.memory_space<vmem>>, vector<1x8x384xbf16>
      %699 = vector.shape_cast %698 : vector<1x8x384xbf16> to vector<8x384xbf16>
      %700 = arith.extf %699 : vector<8x384xbf16> to vector<8x384xf32>
      %cst_134 = arith.constant dense<0.000000e+00> : vector<8x384xf32>
      %701 = tpu.matmul %694, %11, %cst_134 {dimension_numbers = #tpu.dot_dimension_numbers<[1], [0], [0], [1], [0, 0, 1, 1], [], []>} : vector<8x128xf32>, vector<128x384xf32>, vector<8x384xf32> -> vector<8x384xf32>
      %702 = vector.broadcast %12 : vector<1x384xf32> to vector<8x384xf32>
      %703 = arith.addf %701, %702 : vector<8x384xf32>
      %704 = vector.extract_strided_slice %700 {offsets = [0, 0], sizes = [8, 128], strides = [1, 1]} : vector<8x384xf32> to vector<8x128xf32>
      %705 = vector.extract_strided_slice %703 {offsets = [0, 0], sizes = [8, 128], strides = [1, 1]} : vector<8x384xf32> to vector<8x128xf32>
      %706 = arith.addf %704, %705 : vector<8x128xf32>
      %707 = arith.negf %706 : vector<8x128xf32>
      %708 = math.exp %707 : vector<8x128xf32>
      %cst_135 = arith.constant 1.000000e+00 : f32
      %709 = vector.broadcast %cst_135 : f32 to vector<8x128xf32>
      %710 = arith.addf %709, %708 : vector<8x128xf32>
      %711 = arith.divf %709, %710 : vector<8x128xf32>
      %712 = vector.extract_strided_slice %700 {offsets = [0, 128], sizes = [8, 128], strides = [1, 1]} : vector<8x384xf32> to vector<8x128xf32>
      %713 = vector.extract_strided_slice %703 {offsets = [0, 128], sizes = [8, 128], strides = [1, 1]} : vector<8x384xf32> to vector<8x128xf32>
      %714 = arith.addf %712, %713 : vector<8x128xf32>
      %715 = arith.negf %714 : vector<8x128xf32>
      %716 = math.exp %715 : vector<8x128xf32>
      %cst_136 = arith.constant 1.000000e+00 : f32
      %717 = vector.broadcast %cst_136 : f32 to vector<8x128xf32>
      %718 = arith.addf %717, %716 : vector<8x128xf32>
      %719 = arith.divf %717, %718 : vector<8x128xf32>
      %720 = vector.extract_strided_slice %700 {offsets = [0, 256], sizes = [8, 128], strides = [1, 1]} : vector<8x384xf32> to vector<8x128xf32>
      %721 = vector.extract_strided_slice %703 {offsets = [0, 256], sizes = [8, 128], strides = [1, 1]} : vector<8x384xf32> to vector<8x128xf32>
      %722 = arith.mulf %711, %721 : vector<8x128xf32>
      %723 = arith.addf %720, %722 : vector<8x128xf32>
      %724 = math.tanh %723 : vector<8x128xf32>
      %cst_137 = arith.constant 1.000000e+00 : f32
      %725 = vector.broadcast %cst_137 : f32 to vector<8x128xf32>
      %726 = arith.subf %725, %719 : vector<8x128xf32>
      %727 = arith.mulf %726, %724 : vector<8x128xf32>
      %728 = arith.mulf %719, %694 : vector<8x128xf32>
      %729 = arith.addf %727, %728 : vector<8x128xf32>
      %730 = vector.broadcast %696 : i32 to vector<8x1xi32>
      %731 = arith.cmpi slt, %730, %13 : vector<8x1xi32>
      %732 = vector.shape_cast %731 : vector<8x1xi1> to vector<8x1xi1>
      %733 = vector.broadcast %732 : vector<8x1xi1> to vector<8x128xi1>
      %734 = arith.select %733, %729, %694 : vector<8x128xi1>, vector<8x128xf32>
      %c18_i32 = arith.constant 18 : i32
      %c32_i32_138 = arith.constant 32 : i32
      %735 = arith.muli %arg0, %c32_i32_138 : i32
      %736 = arith.addi %735, %c18_i32 : i32
      %737 = arith.index_cast %c18_i32 : i32 to index
      %c0_139 = arith.constant 0 : index
      %c0_140 = arith.constant 0 : index
      %738 = vector.load %arg2[%737, %c0_139, %c0_140] : memref<32x8x384xbf16, #tpu.memory_space<vmem>>, vector<1x8x384xbf16>
      %739 = vector.shape_cast %738 : vector<1x8x384xbf16> to vector<8x384xbf16>
      %740 = arith.extf %739 : vector<8x384xbf16> to vector<8x384xf32>
      %cst_141 = arith.constant dense<0.000000e+00> : vector<8x384xf32>
      %741 = tpu.matmul %734, %11, %cst_141 {dimension_numbers = #tpu.dot_dimension_numbers<[1], [0], [0], [1], [0, 0, 1, 1], [], []>} : vector<8x128xf32>, vector<128x384xf32>, vector<8x384xf32> -> vector<8x384xf32>
      %742 = vector.broadcast %12 : vector<1x384xf32> to vector<8x384xf32>
      %743 = arith.addf %741, %742 : vector<8x384xf32>
      %744 = vector.extract_strided_slice %740 {offsets = [0, 0], sizes = [8, 128], strides = [1, 1]} : vector<8x384xf32> to vector<8x128xf32>
      %745 = vector.extract_strided_slice %743 {offsets = [0, 0], sizes = [8, 128], strides = [1, 1]} : vector<8x384xf32> to vector<8x128xf32>
      %746 = arith.addf %744, %745 : vector<8x128xf32>
      %747 = arith.negf %746 : vector<8x128xf32>
      %748 = math.exp %747 : vector<8x128xf32>
      %cst_142 = arith.constant 1.000000e+00 : f32
      %749 = vector.broadcast %cst_142 : f32 to vector<8x128xf32>
      %750 = arith.addf %749, %748 : vector<8x128xf32>
      %751 = arith.divf %749, %750 : vector<8x128xf32>
      %752 = vector.extract_strided_slice %740 {offsets = [0, 128], sizes = [8, 128], strides = [1, 1]} : vector<8x384xf32> to vector<8x128xf32>
      %753 = vector.extract_strided_slice %743 {offsets = [0, 128], sizes = [8, 128], strides = [1, 1]} : vector<8x384xf32> to vector<8x128xf32>
      %754 = arith.addf %752, %753 : vector<8x128xf32>
      %755 = arith.negf %754 : vector<8x128xf32>
      %756 = math.exp %755 : vector<8x128xf32>
      %cst_143 = arith.constant 1.000000e+00 : f32
      %757 = vector.broadcast %cst_143 : f32 to vector<8x128xf32>
      %758 = arith.addf %757, %756 : vector<8x128xf32>
      %759 = arith.divf %757, %758 : vector<8x128xf32>
      %760 = vector.extract_strided_slice %740 {offsets = [0, 256], sizes = [8, 128], strides = [1, 1]} : vector<8x384xf32> to vector<8x128xf32>
      %761 = vector.extract_strided_slice %743 {offsets = [0, 256], sizes = [8, 128], strides = [1, 1]} : vector<8x384xf32> to vector<8x128xf32>
      %762 = arith.mulf %751, %761 : vector<8x128xf32>
      %763 = arith.addf %760, %762 : vector<8x128xf32>
      %764 = math.tanh %763 : vector<8x128xf32>
      %cst_144 = arith.constant 1.000000e+00 : f32
      %765 = vector.broadcast %cst_144 : f32 to vector<8x128xf32>
      %766 = arith.subf %765, %759 : vector<8x128xf32>
      %767 = arith.mulf %766, %764 : vector<8x128xf32>
      %768 = arith.mulf %759, %734 : vector<8x128xf32>
      %769 = arith.addf %767, %768 : vector<8x128xf32>
      %770 = vector.broadcast %736 : i32 to vector<8x1xi32>
      %771 = arith.cmpi slt, %770, %13 : vector<8x1xi32>
      %772 = vector.shape_cast %771 : vector<8x1xi1> to vector<8x1xi1>
      %773 = vector.broadcast %772 : vector<8x1xi1> to vector<8x128xi1>
      %774 = arith.select %773, %769, %734 : vector<8x128xi1>, vector<8x128xf32>
      %c19_i32 = arith.constant 19 : i32
      %c32_i32_145 = arith.constant 32 : i32
      %775 = arith.muli %arg0, %c32_i32_145 : i32
      %776 = arith.addi %775, %c19_i32 : i32
      %777 = arith.index_cast %c19_i32 : i32 to index
      %c0_146 = arith.constant 0 : index
      %c0_147 = arith.constant 0 : index
      %778 = vector.load %arg2[%777, %c0_146, %c0_147] : memref<32x8x384xbf16, #tpu.memory_space<vmem>>, vector<1x8x384xbf16>
      %779 = vector.shape_cast %778 : vector<1x8x384xbf16> to vector<8x384xbf16>
      %780 = arith.extf %779 : vector<8x384xbf16> to vector<8x384xf32>
      %cst_148 = arith.constant dense<0.000000e+00> : vector<8x384xf32>
      %781 = tpu.matmul %774, %11, %cst_148 {dimension_numbers = #tpu.dot_dimension_numbers<[1], [0], [0], [1], [0, 0, 1, 1], [], []>} : vector<8x128xf32>, vector<128x384xf32>, vector<8x384xf32> -> vector<8x384xf32>
      %782 = vector.broadcast %12 : vector<1x384xf32> to vector<8x384xf32>
      %783 = arith.addf %781, %782 : vector<8x384xf32>
      %784 = vector.extract_strided_slice %780 {offsets = [0, 0], sizes = [8, 128], strides = [1, 1]} : vector<8x384xf32> to vector<8x128xf32>
      %785 = vector.extract_strided_slice %783 {offsets = [0, 0], sizes = [8, 128], strides = [1, 1]} : vector<8x384xf32> to vector<8x128xf32>
      %786 = arith.addf %784, %785 : vector<8x128xf32>
      %787 = arith.negf %786 : vector<8x128xf32>
      %788 = math.exp %787 : vector<8x128xf32>
      %cst_149 = arith.constant 1.000000e+00 : f32
      %789 = vector.broadcast %cst_149 : f32 to vector<8x128xf32>
      %790 = arith.addf %789, %788 : vector<8x128xf32>
      %791 = arith.divf %789, %790 : vector<8x128xf32>
      %792 = vector.extract_strided_slice %780 {offsets = [0, 128], sizes = [8, 128], strides = [1, 1]} : vector<8x384xf32> to vector<8x128xf32>
      %793 = vector.extract_strided_slice %783 {offsets = [0, 128], sizes = [8, 128], strides = [1, 1]} : vector<8x384xf32> to vector<8x128xf32>
      %794 = arith.addf %792, %793 : vector<8x128xf32>
      %795 = arith.negf %794 : vector<8x128xf32>
      %796 = math.exp %795 : vector<8x128xf32>
      %cst_150 = arith.constant 1.000000e+00 : f32
      %797 = vector.broadcast %cst_150 : f32 to vector<8x128xf32>
      %798 = arith.addf %797, %796 : vector<8x128xf32>
      %799 = arith.divf %797, %798 : vector<8x128xf32>
      %800 = vector.extract_strided_slice %780 {offsets = [0, 256], sizes = [8, 128], strides = [1, 1]} : vector<8x384xf32> to vector<8x128xf32>
      %801 = vector.extract_strided_slice %783 {offsets = [0, 256], sizes = [8, 128], strides = [1, 1]} : vector<8x384xf32> to vector<8x128xf32>
      %802 = arith.mulf %791, %801 : vector<8x128xf32>
      %803 = arith.addf %800, %802 : vector<8x128xf32>
      %804 = math.tanh %803 : vector<8x128xf32>
      %cst_151 = arith.constant 1.000000e+00 : f32
      %805 = vector.broadcast %cst_151 : f32 to vector<8x128xf32>
      %806 = arith.subf %805, %799 : vector<8x128xf32>
      %807 = arith.mulf %806, %804 : vector<8x128xf32>
      %808 = arith.mulf %799, %774 : vector<8x128xf32>
      %809 = arith.addf %807, %808 : vector<8x128xf32>
      %810 = vector.broadcast %776 : i32 to vector<8x1xi32>
      %811 = arith.cmpi slt, %810, %13 : vector<8x1xi32>
      %812 = vector.shape_cast %811 : vector<8x1xi1> to vector<8x1xi1>
      %813 = vector.broadcast %812 : vector<8x1xi1> to vector<8x128xi1>
      %814 = arith.select %813, %809, %774 : vector<8x128xi1>, vector<8x128xf32>
      %c20_i32 = arith.constant 20 : i32
      %c32_i32_152 = arith.constant 32 : i32
      %815 = arith.muli %arg0, %c32_i32_152 : i32
      %816 = arith.addi %815, %c20_i32 : i32
      %817 = arith.index_cast %c20_i32 : i32 to index
      %c0_153 = arith.constant 0 : index
      %c0_154 = arith.constant 0 : index
      %818 = vector.load %arg2[%817, %c0_153, %c0_154] : memref<32x8x384xbf16, #tpu.memory_space<vmem>>, vector<1x8x384xbf16>
      %819 = vector.shape_cast %818 : vector<1x8x384xbf16> to vector<8x384xbf16>
      %820 = arith.extf %819 : vector<8x384xbf16> to vector<8x384xf32>
      %cst_155 = arith.constant dense<0.000000e+00> : vector<8x384xf32>
      %821 = tpu.matmul %814, %11, %cst_155 {dimension_numbers = #tpu.dot_dimension_numbers<[1], [0], [0], [1], [0, 0, 1, 1], [], []>} : vector<8x128xf32>, vector<128x384xf32>, vector<8x384xf32> -> vector<8x384xf32>
      %822 = vector.broadcast %12 : vector<1x384xf32> to vector<8x384xf32>
      %823 = arith.addf %821, %822 : vector<8x384xf32>
      %824 = vector.extract_strided_slice %820 {offsets = [0, 0], sizes = [8, 128], strides = [1, 1]} : vector<8x384xf32> to vector<8x128xf32>
      %825 = vector.extract_strided_slice %823 {offsets = [0, 0], sizes = [8, 128], strides = [1, 1]} : vector<8x384xf32> to vector<8x128xf32>
      %826 = arith.addf %824, %825 : vector<8x128xf32>
      %827 = arith.negf %826 : vector<8x128xf32>
      %828 = math.exp %827 : vector<8x128xf32>
      %cst_156 = arith.constant 1.000000e+00 : f32
      %829 = vector.broadcast %cst_156 : f32 to vector<8x128xf32>
      %830 = arith.addf %829, %828 : vector<8x128xf32>
      %831 = arith.divf %829, %830 : vector<8x128xf32>
      %832 = vector.extract_strided_slice %820 {offsets = [0, 128], sizes = [8, 128], strides = [1, 1]} : vector<8x384xf32> to vector<8x128xf32>
      %833 = vector.extract_strided_slice %823 {offsets = [0, 128], sizes = [8, 128], strides = [1, 1]} : vector<8x384xf32> to vector<8x128xf32>
      %834 = arith.addf %832, %833 : vector<8x128xf32>
      %835 = arith.negf %834 : vector<8x128xf32>
      %836 = math.exp %835 : vector<8x128xf32>
      %cst_157 = arith.constant 1.000000e+00 : f32
      %837 = vector.broadcast %cst_157 : f32 to vector<8x128xf32>
      %838 = arith.addf %837, %836 : vector<8x128xf32>
      %839 = arith.divf %837, %838 : vector<8x128xf32>
      %840 = vector.extract_strided_slice %820 {offsets = [0, 256], sizes = [8, 128], strides = [1, 1]} : vector<8x384xf32> to vector<8x128xf32>
      %841 = vector.extract_strided_slice %823 {offsets = [0, 256], sizes = [8, 128], strides = [1, 1]} : vector<8x384xf32> to vector<8x128xf32>
      %842 = arith.mulf %831, %841 : vector<8x128xf32>
      %843 = arith.addf %840, %842 : vector<8x128xf32>
      %844 = math.tanh %843 : vector<8x128xf32>
      %cst_158 = arith.constant 1.000000e+00 : f32
      %845 = vector.broadcast %cst_158 : f32 to vector<8x128xf32>
      %846 = arith.subf %845, %839 : vector<8x128xf32>
      %847 = arith.mulf %846, %844 : vector<8x128xf32>
      %848 = arith.mulf %839, %814 : vector<8x128xf32>
      %849 = arith.addf %847, %848 : vector<8x128xf32>
      %850 = vector.broadcast %816 : i32 to vector<8x1xi32>
      %851 = arith.cmpi slt, %850, %13 : vector<8x1xi32>
      %852 = vector.shape_cast %851 : vector<8x1xi1> to vector<8x1xi1>
      %853 = vector.broadcast %852 : vector<8x1xi1> to vector<8x128xi1>
      %854 = arith.select %853, %849, %814 : vector<8x128xi1>, vector<8x128xf32>
      %c21_i32 = arith.constant 21 : i32
      %c32_i32_159 = arith.constant 32 : i32
      %855 = arith.muli %arg0, %c32_i32_159 : i32
      %856 = arith.addi %855, %c21_i32 : i32
      %857 = arith.index_cast %c21_i32 : i32 to index
      %c0_160 = arith.constant 0 : index
      %c0_161 = arith.constant 0 : index
      %858 = vector.load %arg2[%857, %c0_160, %c0_161] : memref<32x8x384xbf16, #tpu.memory_space<vmem>>, vector<1x8x384xbf16>
      %859 = vector.shape_cast %858 : vector<1x8x384xbf16> to vector<8x384xbf16>
      %860 = arith.extf %859 : vector<8x384xbf16> to vector<8x384xf32>
      %cst_162 = arith.constant dense<0.000000e+00> : vector<8x384xf32>
      %861 = tpu.matmul %854, %11, %cst_162 {dimension_numbers = #tpu.dot_dimension_numbers<[1], [0], [0], [1], [0, 0, 1, 1], [], []>} : vector<8x128xf32>, vector<128x384xf32>, vector<8x384xf32> -> vector<8x384xf32>
      %862 = vector.broadcast %12 : vector<1x384xf32> to vector<8x384xf32>
      %863 = arith.addf %861, %862 : vector<8x384xf32>
      %864 = vector.extract_strided_slice %860 {offsets = [0, 0], sizes = [8, 128], strides = [1, 1]} : vector<8x384xf32> to vector<8x128xf32>
      %865 = vector.extract_strided_slice %863 {offsets = [0, 0], sizes = [8, 128], strides = [1, 1]} : vector<8x384xf32> to vector<8x128xf32>
      %866 = arith.addf %864, %865 : vector<8x128xf32>
      %867 = arith.negf %866 : vector<8x128xf32>
      %868 = math.exp %867 : vector<8x128xf32>
      %cst_163 = arith.constant 1.000000e+00 : f32
      %869 = vector.broadcast %cst_163 : f32 to vector<8x128xf32>
      %870 = arith.addf %869, %868 : vector<8x128xf32>
      %871 = arith.divf %869, %870 : vector<8x128xf32>
      %872 = vector.extract_strided_slice %860 {offsets = [0, 128], sizes = [8, 128], strides = [1, 1]} : vector<8x384xf32> to vector<8x128xf32>
      %873 = vector.extract_strided_slice %863 {offsets = [0, 128], sizes = [8, 128], strides = [1, 1]} : vector<8x384xf32> to vector<8x128xf32>
      %874 = arith.addf %872, %873 : vector<8x128xf32>
      %875 = arith.negf %874 : vector<8x128xf32>
      %876 = math.exp %875 : vector<8x128xf32>
      %cst_164 = arith.constant 1.000000e+00 : f32
      %877 = vector.broadcast %cst_164 : f32 to vector<8x128xf32>
      %878 = arith.addf %877, %876 : vector<8x128xf32>
      %879 = arith.divf %877, %878 : vector<8x128xf32>
      %880 = vector.extract_strided_slice %860 {offsets = [0, 256], sizes = [8, 128], strides = [1, 1]} : vector<8x384xf32> to vector<8x128xf32>
      %881 = vector.extract_strided_slice %863 {offsets = [0, 256], sizes = [8, 128], strides = [1, 1]} : vector<8x384xf32> to vector<8x128xf32>
      %882 = arith.mulf %871, %881 : vector<8x128xf32>
      %883 = arith.addf %880, %882 : vector<8x128xf32>
      %884 = math.tanh %883 : vector<8x128xf32>
      %cst_165 = arith.constant 1.000000e+00 : f32
      %885 = vector.broadcast %cst_165 : f32 to vector<8x128xf32>
      %886 = arith.subf %885, %879 : vector<8x128xf32>
      %887 = arith.mulf %886, %884 : vector<8x128xf32>
      %888 = arith.mulf %879, %854 : vector<8x128xf32>
      %889 = arith.addf %887, %888 : vector<8x128xf32>
      %890 = vector.broadcast %856 : i32 to vector<8x1xi32>
      %891 = arith.cmpi slt, %890, %13 : vector<8x1xi32>
      %892 = vector.shape_cast %891 : vector<8x1xi1> to vector<8x1xi1>
      %893 = vector.broadcast %892 : vector<8x1xi1> to vector<8x128xi1>
      %894 = arith.select %893, %889, %854 : vector<8x128xi1>, vector<8x128xf32>
      %c22_i32 = arith.constant 22 : i32
      %c32_i32_166 = arith.constant 32 : i32
      %895 = arith.muli %arg0, %c32_i32_166 : i32
      %896 = arith.addi %895, %c22_i32 : i32
      %897 = arith.index_cast %c22_i32 : i32 to index
      %c0_167 = arith.constant 0 : index
      %c0_168 = arith.constant 0 : index
      %898 = vector.load %arg2[%897, %c0_167, %c0_168] : memref<32x8x384xbf16, #tpu.memory_space<vmem>>, vector<1x8x384xbf16>
      %899 = vector.shape_cast %898 : vector<1x8x384xbf16> to vector<8x384xbf16>
      %900 = arith.extf %899 : vector<8x384xbf16> to vector<8x384xf32>
      %cst_169 = arith.constant dense<0.000000e+00> : vector<8x384xf32>
      %901 = tpu.matmul %894, %11, %cst_169 {dimension_numbers = #tpu.dot_dimension_numbers<[1], [0], [0], [1], [0, 0, 1, 1], [], []>} : vector<8x128xf32>, vector<128x384xf32>, vector<8x384xf32> -> vector<8x384xf32>
      %902 = vector.broadcast %12 : vector<1x384xf32> to vector<8x384xf32>
      %903 = arith.addf %901, %902 : vector<8x384xf32>
      %904 = vector.extract_strided_slice %900 {offsets = [0, 0], sizes = [8, 128], strides = [1, 1]} : vector<8x384xf32> to vector<8x128xf32>
      %905 = vector.extract_strided_slice %903 {offsets = [0, 0], sizes = [8, 128], strides = [1, 1]} : vector<8x384xf32> to vector<8x128xf32>
      %906 = arith.addf %904, %905 : vector<8x128xf32>
      %907 = arith.negf %906 : vector<8x128xf32>
      %908 = math.exp %907 : vector<8x128xf32>
      %cst_170 = arith.constant 1.000000e+00 : f32
      %909 = vector.broadcast %cst_170 : f32 to vector<8x128xf32>
      %910 = arith.addf %909, %908 : vector<8x128xf32>
      %911 = arith.divf %909, %910 : vector<8x128xf32>
      %912 = vector.extract_strided_slice %900 {offsets = [0, 128], sizes = [8, 128], strides = [1, 1]} : vector<8x384xf32> to vector<8x128xf32>
      %913 = vector.extract_strided_slice %903 {offsets = [0, 128], sizes = [8, 128], strides = [1, 1]} : vector<8x384xf32> to vector<8x128xf32>
      %914 = arith.addf %912, %913 : vector<8x128xf32>
      %915 = arith.negf %914 : vector<8x128xf32>
      %916 = math.exp %915 : vector<8x128xf32>
      %cst_171 = arith.constant 1.000000e+00 : f32
      %917 = vector.broadcast %cst_171 : f32 to vector<8x128xf32>
      %918 = arith.addf %917, %916 : vector<8x128xf32>
      %919 = arith.divf %917, %918 : vector<8x128xf32>
      %920 = vector.extract_strided_slice %900 {offsets = [0, 256], sizes = [8, 128], strides = [1, 1]} : vector<8x384xf32> to vector<8x128xf32>
      %921 = vector.extract_strided_slice %903 {offsets = [0, 256], sizes = [8, 128], strides = [1, 1]} : vector<8x384xf32> to vector<8x128xf32>
      %922 = arith.mulf %911, %921 : vector<8x128xf32>
      %923 = arith.addf %920, %922 : vector<8x128xf32>
      %924 = math.tanh %923 : vector<8x128xf32>
      %cst_172 = arith.constant 1.000000e+00 : f32
      %925 = vector.broadcast %cst_172 : f32 to vector<8x128xf32>
      %926 = arith.subf %925, %919 : vector<8x128xf32>
      %927 = arith.mulf %926, %924 : vector<8x128xf32>
      %928 = arith.mulf %919, %894 : vector<8x128xf32>
      %929 = arith.addf %927, %928 : vector<8x128xf32>
      %930 = vector.broadcast %896 : i32 to vector<8x1xi32>
      %931 = arith.cmpi slt, %930, %13 : vector<8x1xi32>
      %932 = vector.shape_cast %931 : vector<8x1xi1> to vector<8x1xi1>
      %933 = vector.broadcast %932 : vector<8x1xi1> to vector<8x128xi1>
      %934 = arith.select %933, %929, %894 : vector<8x128xi1>, vector<8x128xf32>
      %c23_i32 = arith.constant 23 : i32
      %c32_i32_173 = arith.constant 32 : i32
      %935 = arith.muli %arg0, %c32_i32_173 : i32
      %936 = arith.addi %935, %c23_i32 : i32
      %937 = arith.index_cast %c23_i32 : i32 to index
      %c0_174 = arith.constant 0 : index
      %c0_175 = arith.constant 0 : index
      %938 = vector.load %arg2[%937, %c0_174, %c0_175] : memref<32x8x384xbf16, #tpu.memory_space<vmem>>, vector<1x8x384xbf16>
      %939 = vector.shape_cast %938 : vector<1x8x384xbf16> to vector<8x384xbf16>
      %940 = arith.extf %939 : vector<8x384xbf16> to vector<8x384xf32>
      %cst_176 = arith.constant dense<0.000000e+00> : vector<8x384xf32>
      %941 = tpu.matmul %934, %11, %cst_176 {dimension_numbers = #tpu.dot_dimension_numbers<[1], [0], [0], [1], [0, 0, 1, 1], [], []>} : vector<8x128xf32>, vector<128x384xf32>, vector<8x384xf32> -> vector<8x384xf32>
      %942 = vector.broadcast %12 : vector<1x384xf32> to vector<8x384xf32>
      %943 = arith.addf %941, %942 : vector<8x384xf32>
      %944 = vector.extract_strided_slice %940 {offsets = [0, 0], sizes = [8, 128], strides = [1, 1]} : vector<8x384xf32> to vector<8x128xf32>
      %945 = vector.extract_strided_slice %943 {offsets = [0, 0], sizes = [8, 128], strides = [1, 1]} : vector<8x384xf32> to vector<8x128xf32>
      %946 = arith.addf %944, %945 : vector<8x128xf32>
      %947 = arith.negf %946 : vector<8x128xf32>
      %948 = math.exp %947 : vector<8x128xf32>
      %cst_177 = arith.constant 1.000000e+00 : f32
      %949 = vector.broadcast %cst_177 : f32 to vector<8x128xf32>
      %950 = arith.addf %949, %948 : vector<8x128xf32>
      %951 = arith.divf %949, %950 : vector<8x128xf32>
      %952 = vector.extract_strided_slice %940 {offsets = [0, 128], sizes = [8, 128], strides = [1, 1]} : vector<8x384xf32> to vector<8x128xf32>
      %953 = vector.extract_strided_slice %943 {offsets = [0, 128], sizes = [8, 128], strides = [1, 1]} : vector<8x384xf32> to vector<8x128xf32>
      %954 = arith.addf %952, %953 : vector<8x128xf32>
      %955 = arith.negf %954 : vector<8x128xf32>
      %956 = math.exp %955 : vector<8x128xf32>
      %cst_178 = arith.constant 1.000000e+00 : f32
      %957 = vector.broadcast %cst_178 : f32 to vector<8x128xf32>
      %958 = arith.addf %957, %956 : vector<8x128xf32>
      %959 = arith.divf %957, %958 : vector<8x128xf32>
      %960 = vector.extract_strided_slice %940 {offsets = [0, 256], sizes = [8, 128], strides = [1, 1]} : vector<8x384xf32> to vector<8x128xf32>
      %961 = vector.extract_strided_slice %943 {offsets = [0, 256], sizes = [8, 128], strides = [1, 1]} : vector<8x384xf32> to vector<8x128xf32>
      %962 = arith.mulf %951, %961 : vector<8x128xf32>
      %963 = arith.addf %960, %962 : vector<8x128xf32>
      %964 = math.tanh %963 : vector<8x128xf32>
      %cst_179 = arith.constant 1.000000e+00 : f32
      %965 = vector.broadcast %cst_179 : f32 to vector<8x128xf32>
      %966 = arith.subf %965, %959 : vector<8x128xf32>
      %967 = arith.mulf %966, %964 : vector<8x128xf32>
      %968 = arith.mulf %959, %934 : vector<8x128xf32>
      %969 = arith.addf %967, %968 : vector<8x128xf32>
      %970 = vector.broadcast %936 : i32 to vector<8x1xi32>
      %971 = arith.cmpi slt, %970, %13 : vector<8x1xi32>
      %972 = vector.shape_cast %971 : vector<8x1xi1> to vector<8x1xi1>
      %973 = vector.broadcast %972 : vector<8x1xi1> to vector<8x128xi1>
      %974 = arith.select %973, %969, %934 : vector<8x128xi1>, vector<8x128xf32>
      %c24_i32 = arith.constant 24 : i32
      %c32_i32_180 = arith.constant 32 : i32
      %975 = arith.muli %arg0, %c32_i32_180 : i32
      %976 = arith.addi %975, %c24_i32 : i32
      %977 = arith.index_cast %c24_i32 : i32 to index
      %c0_181 = arith.constant 0 : index
      %c0_182 = arith.constant 0 : index
      %978 = vector.load %arg2[%977, %c0_181, %c0_182] : memref<32x8x384xbf16, #tpu.memory_space<vmem>>, vector<1x8x384xbf16>
      %979 = vector.shape_cast %978 : vector<1x8x384xbf16> to vector<8x384xbf16>
      %980 = arith.extf %979 : vector<8x384xbf16> to vector<8x384xf32>
      %cst_183 = arith.constant dense<0.000000e+00> : vector<8x384xf32>
      %981 = tpu.matmul %974, %11, %cst_183 {dimension_numbers = #tpu.dot_dimension_numbers<[1], [0], [0], [1], [0, 0, 1, 1], [], []>} : vector<8x128xf32>, vector<128x384xf32>, vector<8x384xf32> -> vector<8x384xf32>
      %982 = vector.broadcast %12 : vector<1x384xf32> to vector<8x384xf32>
      %983 = arith.addf %981, %982 : vector<8x384xf32>
      %984 = vector.extract_strided_slice %980 {offsets = [0, 0], sizes = [8, 128], strides = [1, 1]} : vector<8x384xf32> to vector<8x128xf32>
      %985 = vector.extract_strided_slice %983 {offsets = [0, 0], sizes = [8, 128], strides = [1, 1]} : vector<8x384xf32> to vector<8x128xf32>
      %986 = arith.addf %984, %985 : vector<8x128xf32>
      %987 = arith.negf %986 : vector<8x128xf32>
      %988 = math.exp %987 : vector<8x128xf32>
      %cst_184 = arith.constant 1.000000e+00 : f32
      %989 = vector.broadcast %cst_184 : f32 to vector<8x128xf32>
      %990 = arith.addf %989, %988 : vector<8x128xf32>
      %991 = arith.divf %989, %990 : vector<8x128xf32>
      %992 = vector.extract_strided_slice %980 {offsets = [0, 128], sizes = [8, 128], strides = [1, 1]} : vector<8x384xf32> to vector<8x128xf32>
      %993 = vector.extract_strided_slice %983 {offsets = [0, 128], sizes = [8, 128], strides = [1, 1]} : vector<8x384xf32> to vector<8x128xf32>
      %994 = arith.addf %992, %993 : vector<8x128xf32>
      %995 = arith.negf %994 : vector<8x128xf32>
      %996 = math.exp %995 : vector<8x128xf32>
      %cst_185 = arith.constant 1.000000e+00 : f32
      %997 = vector.broadcast %cst_185 : f32 to vector<8x128xf32>
      %998 = arith.addf %997, %996 : vector<8x128xf32>
      %999 = arith.divf %997, %998 : vector<8x128xf32>
      %1000 = vector.extract_strided_slice %980 {offsets = [0, 256], sizes = [8, 128], strides = [1, 1]} : vector<8x384xf32> to vector<8x128xf32>
      %1001 = vector.extract_strided_slice %983 {offsets = [0, 256], sizes = [8, 128], strides = [1, 1]} : vector<8x384xf32> to vector<8x128xf32>
      %1002 = arith.mulf %991, %1001 : vector<8x128xf32>
      %1003 = arith.addf %1000, %1002 : vector<8x128xf32>
      %1004 = math.tanh %1003 : vector<8x128xf32>
      %cst_186 = arith.constant 1.000000e+00 : f32
      %1005 = vector.broadcast %cst_186 : f32 to vector<8x128xf32>
      %1006 = arith.subf %1005, %999 : vector<8x128xf32>
      %1007 = arith.mulf %1006, %1004 : vector<8x128xf32>
      %1008 = arith.mulf %999, %974 : vector<8x128xf32>
      %1009 = arith.addf %1007, %1008 : vector<8x128xf32>
      %1010 = vector.broadcast %976 : i32 to vector<8x1xi32>
      %1011 = arith.cmpi slt, %1010, %13 : vector<8x1xi32>
      %1012 = vector.shape_cast %1011 : vector<8x1xi1> to vector<8x1xi1>
      %1013 = vector.broadcast %1012 : vector<8x1xi1> to vector<8x128xi1>
      %1014 = arith.select %1013, %1009, %974 : vector<8x128xi1>, vector<8x128xf32>
      %c25_i32 = arith.constant 25 : i32
      %c32_i32_187 = arith.constant 32 : i32
      %1015 = arith.muli %arg0, %c32_i32_187 : i32
      %1016 = arith.addi %1015, %c25_i32 : i32
      %1017 = arith.index_cast %c25_i32 : i32 to index
      %c0_188 = arith.constant 0 : index
      %c0_189 = arith.constant 0 : index
      %1018 = vector.load %arg2[%1017, %c0_188, %c0_189] : memref<32x8x384xbf16, #tpu.memory_space<vmem>>, vector<1x8x384xbf16>
      %1019 = vector.shape_cast %1018 : vector<1x8x384xbf16> to vector<8x384xbf16>
      %1020 = arith.extf %1019 : vector<8x384xbf16> to vector<8x384xf32>
      %cst_190 = arith.constant dense<0.000000e+00> : vector<8x384xf32>
      %1021 = tpu.matmul %1014, %11, %cst_190 {dimension_numbers = #tpu.dot_dimension_numbers<[1], [0], [0], [1], [0, 0, 1, 1], [], []>} : vector<8x128xf32>, vector<128x384xf32>, vector<8x384xf32> -> vector<8x384xf32>
      %1022 = vector.broadcast %12 : vector<1x384xf32> to vector<8x384xf32>
      %1023 = arith.addf %1021, %1022 : vector<8x384xf32>
      %1024 = vector.extract_strided_slice %1020 {offsets = [0, 0], sizes = [8, 128], strides = [1, 1]} : vector<8x384xf32> to vector<8x128xf32>
      %1025 = vector.extract_strided_slice %1023 {offsets = [0, 0], sizes = [8, 128], strides = [1, 1]} : vector<8x384xf32> to vector<8x128xf32>
      %1026 = arith.addf %1024, %1025 : vector<8x128xf32>
      %1027 = arith.negf %1026 : vector<8x128xf32>
      %1028 = math.exp %1027 : vector<8x128xf32>
      %cst_191 = arith.constant 1.000000e+00 : f32
      %1029 = vector.broadcast %cst_191 : f32 to vector<8x128xf32>
      %1030 = arith.addf %1029, %1028 : vector<8x128xf32>
      %1031 = arith.divf %1029, %1030 : vector<8x128xf32>
      %1032 = vector.extract_strided_slice %1020 {offsets = [0, 128], sizes = [8, 128], strides = [1, 1]} : vector<8x384xf32> to vector<8x128xf32>
      %1033 = vector.extract_strided_slice %1023 {offsets = [0, 128], sizes = [8, 128], strides = [1, 1]} : vector<8x384xf32> to vector<8x128xf32>
      %1034 = arith.addf %1032, %1033 : vector<8x128xf32>
      %1035 = arith.negf %1034 : vector<8x128xf32>
      %1036 = math.exp %1035 : vector<8x128xf32>
      %cst_192 = arith.constant 1.000000e+00 : f32
      %1037 = vector.broadcast %cst_192 : f32 to vector<8x128xf32>
      %1038 = arith.addf %1037, %1036 : vector<8x128xf32>
      %1039 = arith.divf %1037, %1038 : vector<8x128xf32>
      %1040 = vector.extract_strided_slice %1020 {offsets = [0, 256], sizes = [8, 128], strides = [1, 1]} : vector<8x384xf32> to vector<8x128xf32>
      %1041 = vector.extract_strided_slice %1023 {offsets = [0, 256], sizes = [8, 128], strides = [1, 1]} : vector<8x384xf32> to vector<8x128xf32>
      %1042 = arith.mulf %1031, %1041 : vector<8x128xf32>
      %1043 = arith.addf %1040, %1042 : vector<8x128xf32>
      %1044 = math.tanh %1043 : vector<8x128xf32>
      %cst_193 = arith.constant 1.000000e+00 : f32
      %1045 = vector.broadcast %cst_193 : f32 to vector<8x128xf32>
      %1046 = arith.subf %1045, %1039 : vector<8x128xf32>
      %1047 = arith.mulf %1046, %1044 : vector<8x128xf32>
      %1048 = arith.mulf %1039, %1014 : vector<8x128xf32>
      %1049 = arith.addf %1047, %1048 : vector<8x128xf32>
      %1050 = vector.broadcast %1016 : i32 to vector<8x1xi32>
      %1051 = arith.cmpi slt, %1050, %13 : vector<8x1xi32>
      %1052 = vector.shape_cast %1051 : vector<8x1xi1> to vector<8x1xi1>
      %1053 = vector.broadcast %1052 : vector<8x1xi1> to vector<8x128xi1>
      %1054 = arith.select %1053, %1049, %1014 : vector<8x128xi1>, vector<8x128xf32>
      %c26_i32 = arith.constant 26 : i32
      %c32_i32_194 = arith.constant 32 : i32
      %1055 = arith.muli %arg0, %c32_i32_194 : i32
      %1056 = arith.addi %1055, %c26_i32 : i32
      %1057 = arith.index_cast %c26_i32 : i32 to index
      %c0_195 = arith.constant 0 : index
      %c0_196 = arith.constant 0 : index
      %1058 = vector.load %arg2[%1057, %c0_195, %c0_196] : memref<32x8x384xbf16, #tpu.memory_space<vmem>>, vector<1x8x384xbf16>
      %1059 = vector.shape_cast %1058 : vector<1x8x384xbf16> to vector<8x384xbf16>
      %1060 = arith.extf %1059 : vector<8x384xbf16> to vector<8x384xf32>
      %cst_197 = arith.constant dense<0.000000e+00> : vector<8x384xf32>
      %1061 = tpu.matmul %1054, %11, %cst_197 {dimension_numbers = #tpu.dot_dimension_numbers<[1], [0], [0], [1], [0, 0, 1, 1], [], []>} : vector<8x128xf32>, vector<128x384xf32>, vector<8x384xf32> -> vector<8x384xf32>
      %1062 = vector.broadcast %12 : vector<1x384xf32> to vector<8x384xf32>
      %1063 = arith.addf %1061, %1062 : vector<8x384xf32>
      %1064 = vector.extract_strided_slice %1060 {offsets = [0, 0], sizes = [8, 128], strides = [1, 1]} : vector<8x384xf32> to vector<8x128xf32>
      %1065 = vector.extract_strided_slice %1063 {offsets = [0, 0], sizes = [8, 128], strides = [1, 1]} : vector<8x384xf32> to vector<8x128xf32>
      %1066 = arith.addf %1064, %1065 : vector<8x128xf32>
      %1067 = arith.negf %1066 : vector<8x128xf32>
      %1068 = math.exp %1067 : vector<8x128xf32>
      %cst_198 = arith.constant 1.000000e+00 : f32
      %1069 = vector.broadcast %cst_198 : f32 to vector<8x128xf32>
      %1070 = arith.addf %1069, %1068 : vector<8x128xf32>
      %1071 = arith.divf %1069, %1070 : vector<8x128xf32>
      %1072 = vector.extract_strided_slice %1060 {offsets = [0, 128], sizes = [8, 128], strides = [1, 1]} : vector<8x384xf32> to vector<8x128xf32>
      %1073 = vector.extract_strided_slice %1063 {offsets = [0, 128], sizes = [8, 128], strides = [1, 1]} : vector<8x384xf32> to vector<8x128xf32>
      %1074 = arith.addf %1072, %1073 : vector<8x128xf32>
      %1075 = arith.negf %1074 : vector<8x128xf32>
      %1076 = math.exp %1075 : vector<8x128xf32>
      %cst_199 = arith.constant 1.000000e+00 : f32
      %1077 = vector.broadcast %cst_199 : f32 to vector<8x128xf32>
      %1078 = arith.addf %1077, %1076 : vector<8x128xf32>
      %1079 = arith.divf %1077, %1078 : vector<8x128xf32>
      %1080 = vector.extract_strided_slice %1060 {offsets = [0, 256], sizes = [8, 128], strides = [1, 1]} : vector<8x384xf32> to vector<8x128xf32>
      %1081 = vector.extract_strided_slice %1063 {offsets = [0, 256], sizes = [8, 128], strides = [1, 1]} : vector<8x384xf32> to vector<8x128xf32>
      %1082 = arith.mulf %1071, %1081 : vector<8x128xf32>
      %1083 = arith.addf %1080, %1082 : vector<8x128xf32>
      %1084 = math.tanh %1083 : vector<8x128xf32>
      %cst_200 = arith.constant 1.000000e+00 : f32
      %1085 = vector.broadcast %cst_200 : f32 to vector<8x128xf32>
      %1086 = arith.subf %1085, %1079 : vector<8x128xf32>
      %1087 = arith.mulf %1086, %1084 : vector<8x128xf32>
      %1088 = arith.mulf %1079, %1054 : vector<8x128xf32>
      %1089 = arith.addf %1087, %1088 : vector<8x128xf32>
      %1090 = vector.broadcast %1056 : i32 to vector<8x1xi32>
      %1091 = arith.cmpi slt, %1090, %13 : vector<8x1xi32>
      %1092 = vector.shape_cast %1091 : vector<8x1xi1> to vector<8x1xi1>
      %1093 = vector.broadcast %1092 : vector<8x1xi1> to vector<8x128xi1>
      %1094 = arith.select %1093, %1089, %1054 : vector<8x128xi1>, vector<8x128xf32>
      %c27_i32 = arith.constant 27 : i32
      %c32_i32_201 = arith.constant 32 : i32
      %1095 = arith.muli %arg0, %c32_i32_201 : i32
      %1096 = arith.addi %1095, %c27_i32 : i32
      %1097 = arith.index_cast %c27_i32 : i32 to index
      %c0_202 = arith.constant 0 : index
      %c0_203 = arith.constant 0 : index
      %1098 = vector.load %arg2[%1097, %c0_202, %c0_203] : memref<32x8x384xbf16, #tpu.memory_space<vmem>>, vector<1x8x384xbf16>
      %1099 = vector.shape_cast %1098 : vector<1x8x384xbf16> to vector<8x384xbf16>
      %1100 = arith.extf %1099 : vector<8x384xbf16> to vector<8x384xf32>
      %cst_204 = arith.constant dense<0.000000e+00> : vector<8x384xf32>
      %1101 = tpu.matmul %1094, %11, %cst_204 {dimension_numbers = #tpu.dot_dimension_numbers<[1], [0], [0], [1], [0, 0, 1, 1], [], []>} : vector<8x128xf32>, vector<128x384xf32>, vector<8x384xf32> -> vector<8x384xf32>
      %1102 = vector.broadcast %12 : vector<1x384xf32> to vector<8x384xf32>
      %1103 = arith.addf %1101, %1102 : vector<8x384xf32>
      %1104 = vector.extract_strided_slice %1100 {offsets = [0, 0], sizes = [8, 128], strides = [1, 1]} : vector<8x384xf32> to vector<8x128xf32>
      %1105 = vector.extract_strided_slice %1103 {offsets = [0, 0], sizes = [8, 128], strides = [1, 1]} : vector<8x384xf32> to vector<8x128xf32>
      %1106 = arith.addf %1104, %1105 : vector<8x128xf32>
      %1107 = arith.negf %1106 : vector<8x128xf32>
      %1108 = math.exp %1107 : vector<8x128xf32>
      %cst_205 = arith.constant 1.000000e+00 : f32
      %1109 = vector.broadcast %cst_205 : f32 to vector<8x128xf32>
      %1110 = arith.addf %1109, %1108 : vector<8x128xf32>
      %1111 = arith.divf %1109, %1110 : vector<8x128xf32>
      %1112 = vector.extract_strided_slice %1100 {offsets = [0, 128], sizes = [8, 128], strides = [1, 1]} : vector<8x384xf32> to vector<8x128xf32>
      %1113 = vector.extract_strided_slice %1103 {offsets = [0, 128], sizes = [8, 128], strides = [1, 1]} : vector<8x384xf32> to vector<8x128xf32>
      %1114 = arith.addf %1112, %1113 : vector<8x128xf32>
      %1115 = arith.negf %1114 : vector<8x128xf32>
      %1116 = math.exp %1115 : vector<8x128xf32>
      %cst_206 = arith.constant 1.000000e+00 : f32
      %1117 = vector.broadcast %cst_206 : f32 to vector<8x128xf32>
      %1118 = arith.addf %1117, %1116 : vector<8x128xf32>
      %1119 = arith.divf %1117, %1118 : vector<8x128xf32>
      %1120 = vector.extract_strided_slice %1100 {offsets = [0, 256], sizes = [8, 128], strides = [1, 1]} : vector<8x384xf32> to vector<8x128xf32>
      %1121 = vector.extract_strided_slice %1103 {offsets = [0, 256], sizes = [8, 128], strides = [1, 1]} : vector<8x384xf32> to vector<8x128xf32>
      %1122 = arith.mulf %1111, %1121 : vector<8x128xf32>
      %1123 = arith.addf %1120, %1122 : vector<8x128xf32>
      %1124 = math.tanh %1123 : vector<8x128xf32>
      %cst_207 = arith.constant 1.000000e+00 : f32
      %1125 = vector.broadcast %cst_207 : f32 to vector<8x128xf32>
      %1126 = arith.subf %1125, %1119 : vector<8x128xf32>
      %1127 = arith.mulf %1126, %1124 : vector<8x128xf32>
      %1128 = arith.mulf %1119, %1094 : vector<8x128xf32>
      %1129 = arith.addf %1127, %1128 : vector<8x128xf32>
      %1130 = vector.broadcast %1096 : i32 to vector<8x1xi32>
      %1131 = arith.cmpi slt, %1130, %13 : vector<8x1xi32>
      %1132 = vector.shape_cast %1131 : vector<8x1xi1> to vector<8x1xi1>
      %1133 = vector.broadcast %1132 : vector<8x1xi1> to vector<8x128xi1>
      %1134 = arith.select %1133, %1129, %1094 : vector<8x128xi1>, vector<8x128xf32>
      %c28_i32 = arith.constant 28 : i32
      %c32_i32_208 = arith.constant 32 : i32
      %1135 = arith.muli %arg0, %c32_i32_208 : i32
      %1136 = arith.addi %1135, %c28_i32 : i32
      %1137 = arith.index_cast %c28_i32 : i32 to index
      %c0_209 = arith.constant 0 : index
      %c0_210 = arith.constant 0 : index
      %1138 = vector.load %arg2[%1137, %c0_209, %c0_210] : memref<32x8x384xbf16, #tpu.memory_space<vmem>>, vector<1x8x384xbf16>
      %1139 = vector.shape_cast %1138 : vector<1x8x384xbf16> to vector<8x384xbf16>
      %1140 = arith.extf %1139 : vector<8x384xbf16> to vector<8x384xf32>
      %cst_211 = arith.constant dense<0.000000e+00> : vector<8x384xf32>
      %1141 = tpu.matmul %1134, %11, %cst_211 {dimension_numbers = #tpu.dot_dimension_numbers<[1], [0], [0], [1], [0, 0, 1, 1], [], []>} : vector<8x128xf32>, vector<128x384xf32>, vector<8x384xf32> -> vector<8x384xf32>
      %1142 = vector.broadcast %12 : vector<1x384xf32> to vector<8x384xf32>
      %1143 = arith.addf %1141, %1142 : vector<8x384xf32>
      %1144 = vector.extract_strided_slice %1140 {offsets = [0, 0], sizes = [8, 128], strides = [1, 1]} : vector<8x384xf32> to vector<8x128xf32>
      %1145 = vector.extract_strided_slice %1143 {offsets = [0, 0], sizes = [8, 128], strides = [1, 1]} : vector<8x384xf32> to vector<8x128xf32>
      %1146 = arith.addf %1144, %1145 : vector<8x128xf32>
      %1147 = arith.negf %1146 : vector<8x128xf32>
      %1148 = math.exp %1147 : vector<8x128xf32>
      %cst_212 = arith.constant 1.000000e+00 : f32
      %1149 = vector.broadcast %cst_212 : f32 to vector<8x128xf32>
      %1150 = arith.addf %1149, %1148 : vector<8x128xf32>
      %1151 = arith.divf %1149, %1150 : vector<8x128xf32>
      %1152 = vector.extract_strided_slice %1140 {offsets = [0, 128], sizes = [8, 128], strides = [1, 1]} : vector<8x384xf32> to vector<8x128xf32>
      %1153 = vector.extract_strided_slice %1143 {offsets = [0, 128], sizes = [8, 128], strides = [1, 1]} : vector<8x384xf32> to vector<8x128xf32>
      %1154 = arith.addf %1152, %1153 : vector<8x128xf32>
      %1155 = arith.negf %1154 : vector<8x128xf32>
      %1156 = math.exp %1155 : vector<8x128xf32>
      %cst_213 = arith.constant 1.000000e+00 : f32
      %1157 = vector.broadcast %cst_213 : f32 to vector<8x128xf32>
      %1158 = arith.addf %1157, %1156 : vector<8x128xf32>
      %1159 = arith.divf %1157, %1158 : vector<8x128xf32>
      %1160 = vector.extract_strided_slice %1140 {offsets = [0, 256], sizes = [8, 128], strides = [1, 1]} : vector<8x384xf32> to vector<8x128xf32>
      %1161 = vector.extract_strided_slice %1143 {offsets = [0, 256], sizes = [8, 128], strides = [1, 1]} : vector<8x384xf32> to vector<8x128xf32>
      %1162 = arith.mulf %1151, %1161 : vector<8x128xf32>
      %1163 = arith.addf %1160, %1162 : vector<8x128xf32>
      %1164 = math.tanh %1163 : vector<8x128xf32>
      %cst_214 = arith.constant 1.000000e+00 : f32
      %1165 = vector.broadcast %cst_214 : f32 to vector<8x128xf32>
      %1166 = arith.subf %1165, %1159 : vector<8x128xf32>
      %1167 = arith.mulf %1166, %1164 : vector<8x128xf32>
      %1168 = arith.mulf %1159, %1134 : vector<8x128xf32>
      %1169 = arith.addf %1167, %1168 : vector<8x128xf32>
      %1170 = vector.broadcast %1136 : i32 to vector<8x1xi32>
      %1171 = arith.cmpi slt, %1170, %13 : vector<8x1xi32>
      %1172 = vector.shape_cast %1171 : vector<8x1xi1> to vector<8x1xi1>
      %1173 = vector.broadcast %1172 : vector<8x1xi1> to vector<8x128xi1>
      %1174 = arith.select %1173, %1169, %1134 : vector<8x128xi1>, vector<8x128xf32>
      %c29_i32 = arith.constant 29 : i32
      %c32_i32_215 = arith.constant 32 : i32
      %1175 = arith.muli %arg0, %c32_i32_215 : i32
      %1176 = arith.addi %1175, %c29_i32 : i32
      %1177 = arith.index_cast %c29_i32 : i32 to index
      %c0_216 = arith.constant 0 : index
      %c0_217 = arith.constant 0 : index
      %1178 = vector.load %arg2[%1177, %c0_216, %c0_217] : memref<32x8x384xbf16, #tpu.memory_space<vmem>>, vector<1x8x384xbf16>
      %1179 = vector.shape_cast %1178 : vector<1x8x384xbf16> to vector<8x384xbf16>
      %1180 = arith.extf %1179 : vector<8x384xbf16> to vector<8x384xf32>
      %cst_218 = arith.constant dense<0.000000e+00> : vector<8x384xf32>
      %1181 = tpu.matmul %1174, %11, %cst_218 {dimension_numbers = #tpu.dot_dimension_numbers<[1], [0], [0], [1], [0, 0, 1, 1], [], []>} : vector<8x128xf32>, vector<128x384xf32>, vector<8x384xf32> -> vector<8x384xf32>
      %1182 = vector.broadcast %12 : vector<1x384xf32> to vector<8x384xf32>
      %1183 = arith.addf %1181, %1182 : vector<8x384xf32>
      %1184 = vector.extract_strided_slice %1180 {offsets = [0, 0], sizes = [8, 128], strides = [1, 1]} : vector<8x384xf32> to vector<8x128xf32>
      %1185 = vector.extract_strided_slice %1183 {offsets = [0, 0], sizes = [8, 128], strides = [1, 1]} : vector<8x384xf32> to vector<8x128xf32>
      %1186 = arith.addf %1184, %1185 : vector<8x128xf32>
      %1187 = arith.negf %1186 : vector<8x128xf32>
      %1188 = math.exp %1187 : vector<8x128xf32>
      %cst_219 = arith.constant 1.000000e+00 : f32
      %1189 = vector.broadcast %cst_219 : f32 to vector<8x128xf32>
      %1190 = arith.addf %1189, %1188 : vector<8x128xf32>
      %1191 = arith.divf %1189, %1190 : vector<8x128xf32>
      %1192 = vector.extract_strided_slice %1180 {offsets = [0, 128], sizes = [8, 128], strides = [1, 1]} : vector<8x384xf32> to vector<8x128xf32>
      %1193 = vector.extract_strided_slice %1183 {offsets = [0, 128], sizes = [8, 128], strides = [1, 1]} : vector<8x384xf32> to vector<8x128xf32>
      %1194 = arith.addf %1192, %1193 : vector<8x128xf32>
      %1195 = arith.negf %1194 : vector<8x128xf32>
      %1196 = math.exp %1195 : vector<8x128xf32>
      %cst_220 = arith.constant 1.000000e+00 : f32
      %1197 = vector.broadcast %cst_220 : f32 to vector<8x128xf32>
      %1198 = arith.addf %1197, %1196 : vector<8x128xf32>
      %1199 = arith.divf %1197, %1198 : vector<8x128xf32>
      %1200 = vector.extract_strided_slice %1180 {offsets = [0, 256], sizes = [8, 128], strides = [1, 1]} : vector<8x384xf32> to vector<8x128xf32>
      %1201 = vector.extract_strided_slice %1183 {offsets = [0, 256], sizes = [8, 128], strides = [1, 1]} : vector<8x384xf32> to vector<8x128xf32>
      %1202 = arith.mulf %1191, %1201 : vector<8x128xf32>
      %1203 = arith.addf %1200, %1202 : vector<8x128xf32>
      %1204 = math.tanh %1203 : vector<8x128xf32>
      %cst_221 = arith.constant 1.000000e+00 : f32
      %1205 = vector.broadcast %cst_221 : f32 to vector<8x128xf32>
      %1206 = arith.subf %1205, %1199 : vector<8x128xf32>
      %1207 = arith.mulf %1206, %1204 : vector<8x128xf32>
      %1208 = arith.mulf %1199, %1174 : vector<8x128xf32>
      %1209 = arith.addf %1207, %1208 : vector<8x128xf32>
      %1210 = vector.broadcast %1176 : i32 to vector<8x1xi32>
      %1211 = arith.cmpi slt, %1210, %13 : vector<8x1xi32>
      %1212 = vector.shape_cast %1211 : vector<8x1xi1> to vector<8x1xi1>
      %1213 = vector.broadcast %1212 : vector<8x1xi1> to vector<8x128xi1>
      %1214 = arith.select %1213, %1209, %1174 : vector<8x128xi1>, vector<8x128xf32>
      %c30_i32 = arith.constant 30 : i32
      %c32_i32_222 = arith.constant 32 : i32
      %1215 = arith.muli %arg0, %c32_i32_222 : i32
      %1216 = arith.addi %1215, %c30_i32 : i32
      %1217 = arith.index_cast %c30_i32 : i32 to index
      %c0_223 = arith.constant 0 : index
      %c0_224 = arith.constant 0 : index
      %1218 = vector.load %arg2[%1217, %c0_223, %c0_224] : memref<32x8x384xbf16, #tpu.memory_space<vmem>>, vector<1x8x384xbf16>
      %1219 = vector.shape_cast %1218 : vector<1x8x384xbf16> to vector<8x384xbf16>
      %1220 = arith.extf %1219 : vector<8x384xbf16> to vector<8x384xf32>
      %cst_225 = arith.constant dense<0.000000e+00> : vector<8x384xf32>
      %1221 = tpu.matmul %1214, %11, %cst_225 {dimension_numbers = #tpu.dot_dimension_numbers<[1], [0], [0], [1], [0, 0, 1, 1], [], []>} : vector<8x128xf32>, vector<128x384xf32>, vector<8x384xf32> -> vector<8x384xf32>
      %1222 = vector.broadcast %12 : vector<1x384xf32> to vector<8x384xf32>
      %1223 = arith.addf %1221, %1222 : vector<8x384xf32>
      %1224 = vector.extract_strided_slice %1220 {offsets = [0, 0], sizes = [8, 128], strides = [1, 1]} : vector<8x384xf32> to vector<8x128xf32>
      %1225 = vector.extract_strided_slice %1223 {offsets = [0, 0], sizes = [8, 128], strides = [1, 1]} : vector<8x384xf32> to vector<8x128xf32>
      %1226 = arith.addf %1224, %1225 : vector<8x128xf32>
      %1227 = arith.negf %1226 : vector<8x128xf32>
      %1228 = math.exp %1227 : vector<8x128xf32>
      %cst_226 = arith.constant 1.000000e+00 : f32
      %1229 = vector.broadcast %cst_226 : f32 to vector<8x128xf32>
      %1230 = arith.addf %1229, %1228 : vector<8x128xf32>
      %1231 = arith.divf %1229, %1230 : vector<8x128xf32>
      %1232 = vector.extract_strided_slice %1220 {offsets = [0, 128], sizes = [8, 128], strides = [1, 1]} : vector<8x384xf32> to vector<8x128xf32>
      %1233 = vector.extract_strided_slice %1223 {offsets = [0, 128], sizes = [8, 128], strides = [1, 1]} : vector<8x384xf32> to vector<8x128xf32>
      %1234 = arith.addf %1232, %1233 : vector<8x128xf32>
      %1235 = arith.negf %1234 : vector<8x128xf32>
      %1236 = math.exp %1235 : vector<8x128xf32>
      %cst_227 = arith.constant 1.000000e+00 : f32
      %1237 = vector.broadcast %cst_227 : f32 to vector<8x128xf32>
      %1238 = arith.addf %1237, %1236 : vector<8x128xf32>
      %1239 = arith.divf %1237, %1238 : vector<8x128xf32>
      %1240 = vector.extract_strided_slice %1220 {offsets = [0, 256], sizes = [8, 128], strides = [1, 1]} : vector<8x384xf32> to vector<8x128xf32>
      %1241 = vector.extract_strided_slice %1223 {offsets = [0, 256], sizes = [8, 128], strides = [1, 1]} : vector<8x384xf32> to vector<8x128xf32>
      %1242 = arith.mulf %1231, %1241 : vector<8x128xf32>
      %1243 = arith.addf %1240, %1242 : vector<8x128xf32>
      %1244 = math.tanh %1243 : vector<8x128xf32>
      %cst_228 = arith.constant 1.000000e+00 : f32
      %1245 = vector.broadcast %cst_228 : f32 to vector<8x128xf32>
      %1246 = arith.subf %1245, %1239 : vector<8x128xf32>
      %1247 = arith.mulf %1246, %1244 : vector<8x128xf32>
      %1248 = arith.mulf %1239, %1214 : vector<8x128xf32>
      %1249 = arith.addf %1247, %1248 : vector<8x128xf32>
      %1250 = vector.broadcast %1216 : i32 to vector<8x1xi32>
      %1251 = arith.cmpi slt, %1250, %13 : vector<8x1xi32>
      %1252 = vector.shape_cast %1251 : vector<8x1xi1> to vector<8x1xi1>
      %1253 = vector.broadcast %1252 : vector<8x1xi1> to vector<8x128xi1>
      %1254 = arith.select %1253, %1249, %1214 : vector<8x128xi1>, vector<8x128xf32>
      %c31_i32 = arith.constant 31 : i32
      %c32_i32_229 = arith.constant 32 : i32
      %1255 = arith.muli %arg0, %c32_i32_229 : i32
      %1256 = arith.addi %1255, %c31_i32 : i32
      %1257 = arith.index_cast %c31_i32 : i32 to index
      %c0_230 = arith.constant 0 : index
      %c0_231 = arith.constant 0 : index
      %1258 = vector.load %arg2[%1257, %c0_230, %c0_231] : memref<32x8x384xbf16, #tpu.memory_space<vmem>>, vector<1x8x384xbf16>
      %1259 = vector.shape_cast %1258 : vector<1x8x384xbf16> to vector<8x384xbf16>
      %1260 = arith.extf %1259 : vector<8x384xbf16> to vector<8x384xf32>
      %cst_232 = arith.constant dense<0.000000e+00> : vector<8x384xf32>
      %1261 = tpu.matmul %1254, %11, %cst_232 {dimension_numbers = #tpu.dot_dimension_numbers<[1], [0], [0], [1], [0, 0, 1, 1], [], []>} : vector<8x128xf32>, vector<128x384xf32>, vector<8x384xf32> -> vector<8x384xf32>
      %1262 = vector.broadcast %12 : vector<1x384xf32> to vector<8x384xf32>
      %1263 = arith.addf %1261, %1262 : vector<8x384xf32>
      %1264 = vector.extract_strided_slice %1260 {offsets = [0, 0], sizes = [8, 128], strides = [1, 1]} : vector<8x384xf32> to vector<8x128xf32>
      %1265 = vector.extract_strided_slice %1263 {offsets = [0, 0], sizes = [8, 128], strides = [1, 1]} : vector<8x384xf32> to vector<8x128xf32>
      %1266 = arith.addf %1264, %1265 : vector<8x128xf32>
      %1267 = arith.negf %1266 : vector<8x128xf32>
      %1268 = math.exp %1267 : vector<8x128xf32>
      %cst_233 = arith.constant 1.000000e+00 : f32
      %1269 = vector.broadcast %cst_233 : f32 to vector<8x128xf32>
      %1270 = arith.addf %1269, %1268 : vector<8x128xf32>
      %1271 = arith.divf %1269, %1270 : vector<8x128xf32>
      %1272 = vector.extract_strided_slice %1260 {offsets = [0, 128], sizes = [8, 128], strides = [1, 1]} : vector<8x384xf32> to vector<8x128xf32>
      %1273 = vector.extract_strided_slice %1263 {offsets = [0, 128], sizes = [8, 128], strides = [1, 1]} : vector<8x384xf32> to vector<8x128xf32>
      %1274 = arith.addf %1272, %1273 : vector<8x128xf32>
      %1275 = arith.negf %1274 : vector<8x128xf32>
      %1276 = math.exp %1275 : vector<8x128xf32>
      %cst_234 = arith.constant 1.000000e+00 : f32
      %1277 = vector.broadcast %cst_234 : f32 to vector<8x128xf32>
      %1278 = arith.addf %1277, %1276 : vector<8x128xf32>
      %1279 = arith.divf %1277, %1278 : vector<8x128xf32>
      %1280 = vector.extract_strided_slice %1260 {offsets = [0, 256], sizes = [8, 128], strides = [1, 1]} : vector<8x384xf32> to vector<8x128xf32>
      %1281 = vector.extract_strided_slice %1263 {offsets = [0, 256], sizes = [8, 128], strides = [1, 1]} : vector<8x384xf32> to vector<8x128xf32>
      %1282 = arith.mulf %1271, %1281 : vector<8x128xf32>
      %1283 = arith.addf %1280, %1282 : vector<8x128xf32>
      %1284 = math.tanh %1283 : vector<8x128xf32>
      %cst_235 = arith.constant 1.000000e+00 : f32
      %1285 = vector.broadcast %cst_235 : f32 to vector<8x128xf32>
      %1286 = arith.subf %1285, %1279 : vector<8x128xf32>
      %1287 = arith.mulf %1286, %1284 : vector<8x128xf32>
      %1288 = arith.mulf %1279, %1254 : vector<8x128xf32>
      %1289 = arith.addf %1287, %1288 : vector<8x128xf32>
      %1290 = vector.broadcast %1256 : i32 to vector<8x1xi32>
      %1291 = arith.cmpi slt, %1290, %13 : vector<8x1xi32>
      %1292 = vector.shape_cast %1291 : vector<8x1xi1> to vector<8x1xi1>
      %1293 = vector.broadcast %1292 : vector<8x1xi1> to vector<8x128xi1>
      %1294 = arith.select %1293, %1289, %1254 : vector<8x128xi1>, vector<8x128xf32>
      %c32_i32_236 = arith.constant 32 : i32
      %c0_237 = arith.constant 0 : index
      %c0_238 = arith.constant 0 : index
      %1295 = vector.load %arg7[%c0_237, %c0_238] : memref<8x128xf32, #tpu.memory_space<vmem>>, vector<8x128xf32>
      tpu.vector_store %arg7[%c0_237, %c0_238], %1294 {strides = array<i32>} : memref<8x128xf32, #tpu.memory_space<vmem>>, vector<8x128xf32>,
    } else {
    }
    %c0_i32_2 = arith.constant 0 : i32
    %8 = arith.cmpi eq, %arg0, %c0_i32_2 : i32
    %9 = arith.extui %8 : i1 to i32
    %c0_i32_3 = arith.constant 0 : i32
    %10 = arith.cmpi ne, %9, %c0_i32_3 : i32
    scf.if %10 {
      %c0_4 = arith.constant 0 : index
      %c0_5 = arith.constant 0 : index
      %11 = vector.load %arg7[%c0_4, %c0_5] : memref<8x128xf32, #tpu.memory_space<vmem>>, vector<8x128xf32>
      %c0_6 = arith.constant 0 : index
      %c0_7 = arith.constant 0 : index
      %12 = vector.load %arg6[%c0_6, %c0_7] : memref<8x128xf32, #tpu.memory_space<vmem>>, vector<8x128xf32>
      tpu.vector_store %arg6[%c0_6, %c0_7], %11 {strides = array<i32>} : memref<8x128xf32, #tpu.memory_space<vmem>>, vector<8x128xf32>,
    } else {
    }
    return
  }
  func.func @transform_0(%arg0: i32, %arg1: memref<1xi32, #tpu.memory_space<smem>>) -> (i32, i32, i32) {
    %c0_i32 = arith.constant 0 : i32
    %c0_i32_0 = arith.constant 0 : i32
    %c0_i32_1 = arith.constant 0 : i32
    return %arg0, %c0_i32, %c0_i32_0 : i32, i32, i32
  }
  func.func @transform_1(%arg0: i32, %arg1: memref<1xi32, #tpu.memory_space<smem>>) -> (i32, i32) {
    %c0_i32 = arith.constant 0 : i32
    %c0_i32_0 = arith.constant 0 : i32
    %c0_i32_1 = arith.constant 0 : i32
    return %c0_i32, %c0_i32_0 : i32, i32
  }
  func.func @transform_2(%arg0: i32, %arg1: memref<1xi32, #tpu.memory_space<smem>>) -> (i32, i32) {
    %c0_i32 = arith.constant 0 : i32
    %c0_i32_0 = arith.constant 0 : i32
    %c0_i32_1 = arith.constant 0 : i32
    return %c0_i32, %c0_i32_0 : i32, i32
  }
  func.func @transform_3(%arg0: i32, %arg1: memref<1xi32, #tpu.memory_space<smem>>) -> (i32, i32) {
    %c0_i32 = arith.constant 0 : i32
    %c0_i32_0 = arith.constant 0 : i32
    %c0_i32_1 = arith.constant 0 : i32
    return %c0_i32, %c0_i32_0 : i32, i32
  }
  func.func @transform_4(%arg0: i32, %arg1: memref<1xi32, #tpu.memory_space<smem>>) -> (i32, i32) {
    %c0_i32 = arith.constant 0 : i32
    %c0_i32_0 = arith.constant 0 : i32
    %c0_i32_1 = arith.constant 0 : i32
    return %c0_i32, %c0_i32_0 : i32, i32
  }
}

</mosaic_0001>

<bundles_post_ra>
// kernel: rnn_encoder_forward.2
= control target key start
LH: loop header
LB: loop body
LE: loop exit
PB: predicated region body
PF: predicated region fallthrough
CT: control target
= control target key end

     0   :  { %vm138_vm0 = vcmask 130048   ;;  %v1641_v41 = vmov 0   ;;  %s2119_s1 = inlined_call_operand.vmem [shape: bf16[16,128], index: 1, kind: input, shape index: {}]   ;;  %s2120_s0 = inlined_call_operand.vmem [shape: bf16[256,16], index: 0, kind: input, shape index: {}]   ;;  %s2121_s2 = inlined_call_operand.vmem [shape: bf16[128,384], index: 2, kind: input, shape index: {}]   ;;  %s2122_s3 = inlined_call_operand.vmem [shape: f32[1,384], index: 3, kind: input, shape index: {}]   ;;  %s2123_s4 = inlined_call_operand.vmem [shape: bf16[256,384], index: 4, kind: output, shape index: {}]  }
   0x1   :  { %v1592_v0 = vld [vmem:[%s2119_s1] sm:$0xff]   ;;  %v1594_v2 = vld [vmem:[%s2120_s0 + $0x8] sm:$0xff]   ;;  %v1595_v3 = vld [vmem:[%s2120_s0 + $0x10] sm:$0xff]   ;;  %573 = vmatprep.mubr.bf16.mxu1 %v1641_v41 }
   0x2   :  { %v1593_v1 = vld [vmem:[%s2120_s0] sm:$0xff]   ;;  %1509 = vmatprep.subr.bf16.mxu0 %v1592_v0  ;;  %v1596_v4 = vld [vmem:[%s2120_s0 + $0x18] sm:$0xff]   ;;  %v1598_v6 = vld [vmem:[%s2120_s0 + $0x28] sm:$0xff]  }
   0x3   :  { %1510 = vmatpush3.bf16.msra.mxu0 %v1592_v0  ;;  %1511 = vmatprep.mubr.msk.bf16.mxu0 %vm138_vm0, %v1593_v1  ;;  %v1597_v5 = vld [vmem:[%s2120_s0 + $0x20] sm:$0xff]   ;;  %v1599_v7 = vld [vmem:[%s2120_s0 + $0x30] sm:$0xff]   ;;  %v1613_v11 = vld [vmem:[%s2121_s2 + $0x1c] ss:$12 sps:$4 sm:$0xff]  }
   0x4   :  { %v1609_v8 = vld [vmem:[%s2121_s2 + $0x4] ss:$12 sps:$4 sm:$0xff]   ;;  %v1611_v9 = vld [vmem:[%s2121_s2] ss:$12 sps:$4 sm:$0xff]   ;;  %v1612_v10 = vld [vmem:[%s2121_s2 + $0x8] ss:$12 sps:$4 sm:$0xff]  }
   0x5   :  { %541 = vmatprep.subr.bf16.mxu1 %v1609_v8  ;;  %v1615_v12 = vld [vmem:[%s2121_s2 + $0x18] ss:$12 sps:$4 sm:$0xff]   ;;  %1543 = vmatprep.subr.bf16.mxu0 %v1612_v10  ;;  %v1616_v13 = vld [vmem:[%s2121_s2 + $0x20] ss:$12 sps:$4 sm:$0xff]   ;;  %v1619_v15 = vld [vmem:[%s2121_s2 + $0x30] ss:$12 sps:$4 sm:$0xff]  }
   0x6   :  { %1512 = vmatmul.mubr.msk.bf16.vlgmr.msra.gmra.mrb[0].mxu0 %vm138_vm0, %v1594_v2  ;;  %542 = vmatpush1.bf16.msra.mxu1 %v1611_v9  ;;  %v1617_v14 = vld [vmem:[%s2121_s2 + $0x34] ss:$12 sps:$4 sm:$0xff]   ;;  %v1620_v16 = vld [vmem:[%s2121_s2 + $0x38] ss:$12 sps:$4 sm:$0xff]   ;;  %v1624_v21 = vld [vmem:[%s2121_s2 + $0x50] ss:$12 sps:$4 sm:$0xff]  }
   0x7   :  { %1515 = vmatprep.mubr.msk.bf16.mxu0 %vm138_vm0, %v1595_v3  ;;  %543 = vmatprep.subr.bf16.mxu1 %v1613_v11  ;;  %v1621_v17 = vld [vmem:[%s2121_s2 + $0x4c] ss:$12 sps:$4 sm:$0xff]   ;;  %v1601_v19 = vld [vmem:[%s2120_s0 + $0x40] sm:$0xff]   ;;  %v1623_v20 = vld [vmem:[%s2121_s2 + $0x48] ss:$12 sps:$4 sm:$0xff]  }
   0x8   :  { %1544 = vmatpush3.bf16.msra.mxu0 %v1612_v10  ;;  %v1600_v18 = vld [vmem:[%s2120_s0 + $0x38] sm:$0xff]   ;;  %v1625_v22 = vld [vmem:[%s2121_s2 + $0x64] ss:$12 sps:$4 sm:$0xff]   ;;  %v1627_v23 = vld [vmem:[%s2121_s2 + $0x60] ss:$12 sps:$4 sm:$0xff]  }
   0x9   :  { %1545 = vmatprep.subr.bf16.mxu0 %v1616_v13  ;;  %v1628_v24 = vld [vmem:[%s2121_s2 + $0x68] ss:$12 sps:$4 sm:$0xff]   ;;  %v1631_v28 = vld [vmem:[%s2121_s2 + $0x78] ss:$12 sps:$4 sm:$0xff]   ;;  %v1632_v29 = vld [vmem:[%s2121_s2 + $0x80] ss:$12 sps:$4 sm:$0xff]  }
   0xa   :  { %544 = vmatpush1.bf16.msra.mxu1 %v1615_v12  ;;  %v1629_v25 = vld [vmem:[%s2121_s2 + $0x7c] ss:$12 sps:$4 sm:$0xff]   ;;  %v1603_v27 = vld [vmem:[%s2120_s0 + $0x50] sm:$0xff]   ;;  %v1636_v32 = vld [vmem:[%s2121_s2 + $0x98] ss:$12 sps:$4 sm:$0xff]  }
   0xb   :  { %545 = vmatprep.subr.bf16.mxu1 %v1617_v14  ;;  %v1602_v26 = vld [vmem:[%s2120_s0 + $0x48] sm:$0xff]   ;;  %v1633_v30 = vld [vmem:[%s2121_s2 + $0x94] ss:$12 sps:$4 sm:$0xff]   ;;  %v1635_v31 = vld [vmem:[%s2121_s2 + $0x90] ss:$12 sps:$4 sm:$0xff]  }
   0xc   :  { %1546 = vmatpush3.bf16.msra.mxu0 %v1616_v13  ;;  %v1604_v33 = vld [vmem:[%s2120_s0 + $0x58] sm:$0xff]   ;;  %v1605_v34 = vld [vmem:[%s2120_s0 + $0x60] sm:$0xff]   ;;  %v1606_v35 = vld [vmem:[%s2120_s0 + $0x68] sm:$0xff]  }
   0xd   :  { %1547 = vmatprep.subr.bf16.mxu0 %v1620_v16  ;;  %v1607_v36 = vld [vmem:[%s2120_s0 + $0x70] sm:$0xff]   ;;  %v1608_v37 = vld [vmem:[%s2120_s0 + $0x78] sm:$0xff]  }
   0xe   :  { %1516 = vmatmul.mubr.msk.bf16.gmra.mrb[4].mxu0 %vm138_vm0, %v1596_v4  ;;  %546 = vmatpush1.bf16.msra.mxu1 %v1619_v15  ;;  %v1637_v38 = vld [vmem:[%s2121_s2 + $0xac] ss:$12 sps:$4 sm:$0xff]   ;;  %v1639_v39 = vld [vmem:[%s2121_s2 + $0xa8] ss:$12 sps:$4 sm:$0xff]   ;;  %v1640_v40 = vld [vmem:[%s2121_s2 + $0xb0] ss:$12 sps:$4 sm:$0xff]  }
   0xf   :  { %1519 = vmatprep.mubr.msk.bf16.mxu0 %vm138_vm0, %v1597_v5  ;;  %547 = vmatprep.subr.bf16.mxu1 %v1621_v17 }
  0x10   :  { %1548 = vmatpush3.bf16.msra.mxu0 %v1620_v16 }
  0x11   :  { %1549 = vmatprep.subr.bf16.mxu0 %v1624_v21 }
  0x12   :  { %548 = vmatpush1.bf16.msra.mxu1 %v1623_v20 }
  0x13   :  { %549 = vmatprep.subr.bf16.mxu1 %v1625_v22 }
  0x14   :  { %1550 = vmatpush3.bf16.msra.mxu0 %v1624_v21 }
  0x15   :  { %1551 = vmatprep.subr.bf16.mxu0 %v1628_v24 }
  0x16   :  { %1520 = vmatmul.mubr.msk.bf16.gmra.mrb[8].mxu0 %vm138_vm0, %v1598_v6  ;;  %550 = vmatpush1.bf16.msra.mxu1 %v1627_v23 }
  0x17   :  { %1523 = vmatprep.mubr.msk.bf16.mxu0 %vm138_vm0, %v1599_v7  ;;  %551 = vmatprep.subr.bf16.mxu1 %v1629_v25 }
  0x18   :  { %1552 = vmatpush3.bf16.msra.mxu0 %v1628_v24 }
  0x19   :  { %1553 = vmatprep.subr.bf16.mxu0 %v1632_v29 }
  0x1a   :  { %552 = vmatpush1.bf16.msra.mxu1 %v1631_v28 }
  0x1b   :  { %553 = vmatprep.subr.bf16.mxu1 %v1633_v30 }
  0x1c   :  { %1554 = vmatpush3.bf16.msra.mxu0 %v1632_v29  ;;  %v396_v29 = vld [vmem:[%s2122_s3] sm:$0x7] }
  0x1d   :  { %1555 = vmatprep.subr.bf16.mxu0 %v1636_v32 }
  0x1e   :  { %1524 = vmatmul.mubr.msk.bf16.gmra.mrb[12].mxu0 %vm138_vm0, %v1600_v18  ;;  %554 = vmatpush1.bf16.msra.mxu1 %v1635_v31 }
  0x1f   :  { %1527 = vmatprep.mubr.msk.bf16.mxu0 %vm138_vm0, %v1601_v19  ;;  %555 = vmatprep.subr.bf16.mxu1 %v1637_v38 }
  0x20   :  { %1556 = vmatpush3.bf16.msra.mxu0 %v1636_v32 }
  0x21   :  { %1557 = vmatprep.subr.bf16.mxu0 %v1640_v40 }
  0x22   :  { %556 = vmatpush1.bf16.msra.mxu1 %v1639_v39 }
  0x24   :  { %1558 = vmatpush3.bf16.msra.mxu0 %v1640_v40 }
  0x26   :  { %1528 = vmatmul.mubr.msk.bf16.gmra.mrb[16].mxu0 %vm138_vm0, %v1602_v26  ;;  %v398_v26 = vlaneseq }
  0x27   :  { %1531 = vmatprep.mubr.msk.bf16.mxu0 %vm138_vm0, %v1603_v27 }
  0x28   :  { %v399_v27 = vshrl.u32 %v398_v26, 7 }
  0x2a   :  { %v400_v28 = vsub.s32 0, %v399_v27  ;;  %v404_v30 = vsub.s32 1, %v399_v27  ;;  %v408_v31 = vsub.s32 2, %v399_v27 }
  0x2c   :  { %v1825_v32 = vrot.slane %v396_v29, %v400_v28 }
  0x2e   :  { %1532 = vmatmul.mubr.msk.bf16.gmra.mrb[20].mxu0 %vm138_vm0, %v1604_v33  ;;  %v1827_v33 = vrot.slane %v396_v29, %v404_v30 }
  0x2f   :  { %1535 = vmatprep.mubr.msk.bf16.mxu0 %vm138_vm0, %v1605_v34  ;;  %v1829_v34 = vrot.slane %v396_v29, %v408_v31 }
  0x36   :  { %1536 = vmatmul.mubr.msk.bf16.gmra.mrb[24].mxu0 %vm138_vm0, %v1606_v35 }
  0x37   :  { %1539 = vmatprep.mubr.msk.bf16.mxu0 %vm138_vm0, %v1607_v36 }
  0x3e   :  { %1540 = vmatmul.mubr.msk.bf16.gmra.mrb[28].mxu0 %vm138_vm0, %v1608_v37 }
  0xd9   :  { %v1513_v42 = vpop.f32.mrb[0].mxu0 }
  0xda   :  { %v221_v43 = vpop.f32.mrb[1].mxu0 }
  0xdb   :  { %v1514_v44 = vpop.f32.mrb[2].mxu0 }
  0xdc   :  { %v349_v45 = vpack.c.bf16 %v1514_v44, %v1513_v42  ;;  %v224_v46 = vpop.f32.mrb[3].mxu0 }
  0xdd   :  { %v348_v47 = vpack.c.bf16 %v224_v46, %v221_v43 }
  0xdf   :  { %574 = vmatmul.mubr.bf16.vlgmr.msra.gmra.mrb[0].mxu1 %v348_v47  ;;  %1559 = vmatprep.mubr.bf16.mxu0 %v348_v47 }
  0xe0   :  { %1560 = vmatmul.mubr.bf16.vlgmr.msra.gmra.mrb[32].mxu0 %v349_v45  ;;  %583 = vmatprep.mubr.bf16.mxu1 %v1641_v41 }
  0xe1   :  { %v1517_v48 = vpop.f32.mrb[4].mxu0 }
  0xe2   :  { %v237_v49 = vpop.f32.mrb[5].mxu0 }
  0xe3   :  { %v1518_v50 = vpop.f32.mrb[6].mxu0 }
  0xe4   :  { %v351_v51 = vpack.c.bf16 %v1518_v50, %v1517_v48  ;;  %v240_v52 = vpop.f32.mrb[7].mxu0 }
  0xe5   :  { %v350_v53 = vpack.c.bf16 %v240_v52, %v237_v49 }
  0xe7   :  { %584 = vmatmul.mubr.bf16.gmra.mrb[4].mxu1 %v349_v45  ;;  %1563 = vmatprep.mubr.bf16.mxu0 %v350_v53 }
  0xe8   :  { %1564 = vmatmul.mubr.bf16.gmra.mrb[36].mxu0 %v351_v51  ;;  %593 = vmatprep.mubr.bf16.mxu1 %v1641_v41 }
  0xe9   :  { %v1521_v54 = vpop.f32.mrb[8].mxu0 }
  0xea   :  { %v253_v55 = vpop.f32.mrb[9].mxu0 }
  0xeb   :  { %v1522_v56 = vpop.f32.mrb[10].mxu0 }
  0xec   :  { %v353_v57 = vpack.c.bf16 %v1522_v56, %v1521_v54  ;;  %v256_v58 = vpop.f32.mrb[11].mxu0 }
  0xed   :  { %v352_v59 = vpack.c.bf16 %v256_v58, %v253_v55 }
  0xef   :  { %594 = vmatmul.mubr.bf16.gmra.mrb[8].mxu1 %v350_v53  ;;  %1567 = vmatprep.mubr.bf16.mxu0 %v352_v59 }
  0xf0   :  { %603 = vmatprep.mubr.bf16.mxu1 %v1641_v41  ;;  %1568 = vmatmul.mubr.bf16.gmra.mrb[40].mxu0 %v353_v57 }
  0xf1   :  { %v1525_v60 = vpop.f32.mrb[12].mxu0 }
  0xf2   :  { %v269_v61 = vpop.f32.mrb[13].mxu0 }
  0xf3   :  { %v1526_v62 = vpop.f32.mrb[14].mxu0 }
  0xf4   :  { %v355_v63 = vpack.c.bf16 %v1526_v62, %v1525_v60  ;;  %v272_v0 = vpop.f32.mrb[15].mxu0 }
  0xf5   :  { %v354_v1 = vpack.c.bf16 %v272_v0, %v269_v61 }
  0xf7   :  { %604 = vmatmul.mubr.bf16.gmra.mrb[12].mxu1 %v351_v51  ;;  %1571 = vmatprep.mubr.bf16.mxu0 %v354_v1 }
  0xf8   :  { %613 = vmatprep.mubr.bf16.mxu1 %v1641_v41  ;;  %1572 = vmatmul.mubr.bf16.gmra.mrb[44].mxu0 %v355_v63 }
  0xf9   :  { %v1529_v2 = vpop.f32.mrb[16].mxu0 }
  0xfa   :  { %v285_v3 = vpop.f32.mrb[17].mxu0 }
  0xfb   :  { %v1530_v4 = vpop.f32.mrb[18].mxu0 }
  0xfc   :  { %v357_v5 = vpack.c.bf16 %v1530_v4, %v1529_v2  ;;  %v288_v6 = vpop.f32.mrb[19].mxu0 }
  0xfd   :  { %v356_v7 = vpack.c.bf16 %v288_v6, %v285_v3 }
  0xff   :  { %614 = vmatmul.mubr.bf16.gmra.mrb[16].mxu1 %v352_v59  ;;  %1575 = vmatprep.mubr.bf16.mxu0 %v356_v7 }
 0x100   :  { %623 = vmatprep.mubr.bf16.mxu1 %v1641_v41  ;;  %1576 = vmatmul.mubr.bf16.gmra.mrb[48].mxu0 %v357_v5 }
 0x101   :  { %v1533_v8 = vpop.f32.mrb[20].mxu0 }
 0x102   :  { %v301_v9 = vpop.f32.mrb[21].mxu0 }
 0x103   :  { %v1534_v10 = vpop.f32.mrb[22].mxu0 }
 0x104   :  { %v359_v11 = vpack.c.bf16 %v1534_v10, %v1533_v8  ;;  %v304_v12 = vpop.f32.mrb[23].mxu0 }
 0x105   :  { %v358_v13 = vpack.c.bf16 %v304_v12, %v301_v9 }
 0x107   :  { %624 = vmatmul.mubr.bf16.gmra.mrb[20].mxu1 %v353_v57  ;;  %1579 = vmatprep.mubr.bf16.mxu0 %v358_v13 }
 0x108   :  { %633 = vmatprep.mubr.bf16.mxu1 %v1641_v41  ;;  %1580 = vmatmul.mubr.bf16.gmra.mrb[52].mxu0 %v359_v11 }
 0x109   :  { %v1537_v14 = vpop.f32.mrb[24].mxu0 }
 0x10a   :  { %v317_v15 = vpop.f32.mrb[25].mxu0 }
 0x10b   :  { %v1538_v16 = vpop.f32.mrb[26].mxu0 }
 0x10c   :  { %v361_v17 = vpack.c.bf16 %v1538_v16, %v1537_v14  ;;  %v320_v18 = vpop.f32.mrb[27].mxu0 }
 0x10d   :  { %v360_v19 = vpack.c.bf16 %v320_v18, %v317_v15 }
 0x10f   :  { %634 = vmatmul.mubr.bf16.gmra.mrb[24].mxu1 %v354_v1  ;;  %1583 = vmatprep.mubr.bf16.mxu0 %v360_v19 }
 0x110   :  { %643 = vmatprep.mubr.bf16.mxu1 %v1641_v41  ;;  %1584 = vmatmul.mubr.bf16.gmra.mrb[56].mxu0 %v361_v17 }
 0x111   :  { %v1541_v20 = vpop.f32.mrb[28].mxu0 }
 0x112   :  { %v333_v21 = vpop.f32.mrb[29].mxu0 }
 0x113   :  { %v1542_v22 = vpop.f32.mrb[30].mxu0 }
 0x114   :  { %v363_v23 = vpack.c.bf16 %v1542_v22, %v1541_v20  ;;  %v336_v24 = vpop.f32.mrb[31].mxu0 }
 0x115   :  { %v362_v25 = vpack.c.bf16 %v336_v24, %v333_v21 }
 0x117   :  { %644 = vmatmul.mubr.bf16.gmra.mrb[28].mxu1 %v355_v63  ;;  %1587 = vmatprep.mubr.bf16.mxu0 %v362_v25 }
 0x118   :  { %653 = vmatprep.mubr.bf16.mxu1 %v1641_v41  ;;  %1588 = vmatmul.mubr.bf16.gmra.mrb[60].mxu0 %v363_v23 }
 0x11f   :  { %654 = vmatmul.mubr.bf16.gmra.mrb[32].mxu1 %v356_v7 }
 0x120   :  { %663 = vmatprep.mubr.bf16.mxu1 %v1641_v41 }
 0x127   :  { %664 = vmatmul.mubr.bf16.gmra.mrb[36].mxu1 %v357_v5 }
 0x128   :  { %673 = vmatprep.mubr.bf16.mxu1 %v1641_v41 }
 0x12f   :  { %674 = vmatmul.mubr.bf16.gmra.mrb[40].mxu1 %v358_v13 }
 0x130   :  { %683 = vmatprep.mubr.bf16.mxu1 %v1641_v41 }
 0x137   :  { %684 = vmatmul.mubr.bf16.gmra.mrb[44].mxu1 %v359_v11 }
 0x138   :  { %693 = vmatprep.mubr.bf16.mxu1 %v1641_v41 }
 0x13f   :  { %694 = vmatmul.mubr.bf16.gmra.mrb[48].mxu1 %v360_v19 }
 0x140   :  { %703 = vmatprep.mubr.bf16.mxu1 %v1641_v41 }
 0x147   :  { %704 = vmatmul.mubr.bf16.gmra.mrb[52].mxu1 %v361_v17 }
 0x148   :  { %713 = vmatprep.mubr.bf16.mxu1 %v1641_v41 }
 0x14f   :  { %714 = vmatmul.mubr.bf16.gmra.mrb[56].mxu1 %v362_v25 }
 0x150   :  { %723 = vmatprep.mubr.bf16.mxu1 %v1641_v41 }
 0x157   :  { %724 = vmatmul.mubr.bf16.gmra.mrb[60].mxu1 %v363_v23 }
 0x1b2   :  { %v575_v35 = vpop.f32.mrb[0].mxu1 }
 0x1b3   :  { %v576_v36 = vadd.f32 %v575_v35, %v1825_v32  ;;  %v577_v37 = vpop.f32.mrb[1].mxu1  ;;  %v1561_v38 = vpop.f32.mrb[32].mxu0 }
 0x1b4   :  { %v578_v39 = vadd.f32 %v577_v37, %v1827_v33  ;;  %v777_v40 = vadd.f32 %v1561_v38, %v1829_v34  ;;  %v579_v41 = vpop.f32.mrb[2].mxu1  ;;  %v768_v42 = vpop.f32.mrb[33].mxu0 }
 0x1b5   :  { %v580_v43 = vadd.f32 %v579_v41, %v1825_v32  ;;  %v769_v44 = vadd.f32 %v768_v42, %v1829_v34  ;;  %v581_v45 = vpop.f32.mrb[3].mxu1  ;;  %v1562_v46 = vpop.f32.mrb[34].mxu0 }
 0x1b6   :  { %v1404_v47 = vpack.c.bf16 %v578_v39, %v576_v36  ;;  %v1409_v48 = vpack.c.bf16 %v777_v40, %v777_v40  ;;  %v582_v49 = vadd.f32 %v581_v45, %v1827_v33  ;;  %v780_v50 = vadd.f32 %v1562_v46, %v1829_v34  ;;  %v771_v51 = vpop.f32.mrb[35].mxu0 }
 0x1b7   :  { %v1405_v52 = vpack.c.bf16 %v769_v44, %v769_v44  ;;  %v772_v53 = vadd.f32 %v771_v51, %v1829_v34 }
 0x1b8   :  { %1215 = vst [vmem:[%s2123_s4] sm:$0xff] %v1404_v47  ;;  %1220 = vst [vmem:[%s2123_s4 + $0x20] sm:$0xf] %v1409_v48  ;;  %v1406_v54 = vpack.c.bf16 %v582_v49, %v580_v43  ;;  %v1411_v55 = vpack.c.bf16 %v780_v50, %v780_v50 }
 0x1b9   :  { %1216 = vst [vmem:[%s2123_s4 + $0x8] sm:$0xf] %v1405_v52  ;;  %v1407_v56 = vpack.c.bf16 %v772_v53, %v772_v53 }
 0x1ba   :  { %1217 = vst [vmem:[%s2123_s4 + $0xc] sm:$0xff] %v1406_v54  ;;  %1222 = vst [vmem:[%s2123_s4 + $0x2c] sm:$0xf] %v1411_v55  ;;  %v585_v57 = vpop.f32.mrb[4].mxu1 }
 0x1bb   :  { %1218 = vst [vmem:[%s2123_s4 + $0x14] sm:$0xf] %v1407_v56  ;;  %v586_v58 = vadd.f32 %v585_v57, %v1825_v32  ;;  %v587_v59 = vpop.f32.mrb[5].mxu1  ;;  %v1565_v60 = vpop.f32.mrb[36].mxu0 }
 0x1bc   :  { %v588_v61 = vadd.f32 %v587_v59, %v1827_v33  ;;  %v589_v62 = vpop.f32.mrb[6].mxu1  ;;  %v793_v63 = vadd.f32 %v1565_v60, %v1829_v34  ;;  %v784_v0 = vpop.f32.mrb[37].mxu0 }
 0x1bd   :  { %v590_v1 = vadd.f32 %v589_v62, %v1825_v32  ;;  %v591_v2 = vpop.f32.mrb[7].mxu1  ;;  %v785_v3 = vadd.f32 %v784_v0, %v1829_v34  ;;  %v1566_v4 = vpop.f32.mrb[38].mxu0 }
 0x1be   :  { %v1408_v5 = vpack.c.bf16 %v588_v61, %v586_v58  ;;  %v1417_v6 = vpack.c.bf16 %v793_v63, %v793_v63  ;;  %v592_v7 = vadd.f32 %v591_v2, %v1827_v33  ;;  %v796_v8 = vadd.f32 %v1566_v4, %v1829_v34  ;;  %v787_v9 = vpop.f32.mrb[39].mxu0 }
 0x1bf   :  { %v1413_v10 = vpack.c.bf16 %v785_v3, %v785_v3  ;;  %v788_v11 = vadd.f32 %v787_v9, %v1829_v34 }
 0x1c0   :  { %1219 = vst [vmem:[%s2123_s4 + $0x18] sm:$0xff] %v1408_v5  ;;  %1228 = vst [vmem:[%s2123_s4 + $0x50] sm:$0xf] %v1417_v6  ;;  %v1410_v12 = vpack.c.bf16 %v592_v7, %v590_v1  ;;  %v1419_v13 = vpack.c.bf16 %v796_v8, %v796_v8 }
 0x1c1   :  { %1224 = vst [vmem:[%s2123_s4 + $0x38] sm:$0xf] %v1413_v10  ;;  %v1415_v14 = vpack.c.bf16 %v788_v11, %v788_v11 }
 0x1c2   :  { %1221 = vst [vmem:[%s2123_s4 + $0x24] sm:$0xff] %v1410_v12  ;;  %1230 = vst [vmem:[%s2123_s4 + $0x5c] sm:$0xf] %v1419_v13  ;;  %v595_v15 = vpop.f32.mrb[8].mxu1 }
 0x1c3   :  { %1226 = vst [vmem:[%s2123_s4 + $0x44] sm:$0xf] %v1415_v14  ;;  %v596_v16 = vadd.f32 %v595_v15, %v1825_v32  ;;  %v597_v17 = vpop.f32.mrb[9].mxu1  ;;  %v1569_v18 = vpop.f32.mrb[40].mxu0 }
 0x1c4   :  { %v598_v19 = vadd.f32 %v597_v17, %v1827_v33  ;;  %v599_v20 = vpop.f32.mrb[10].mxu1  ;;  %v809_v21 = vadd.f32 %v1569_v18, %v1829_v34  ;;  %v800_v22 = vpop.f32.mrb[41].mxu0 }
 0x1c5   :  { %v600_v23 = vadd.f32 %v599_v20, %v1825_v32  ;;  %v601_v24 = vpop.f32.mrb[11].mxu1  ;;  %v801_v25 = vadd.f32 %v800_v22, %v1829_v34  ;;  %v1570_v26 = vpop.f32.mrb[42].mxu0 }
 0x1c6   :  { %v1412_v27 = vpack.c.bf16 %v598_v19, %v596_v16  ;;  %v602_v28 = vadd.f32 %v601_v24, %v1827_v33  ;;  %v1425_v29 = vpack.c.bf16 %v809_v21, %v809_v21  ;;  %v812_v30 = vadd.f32 %v1570_v26, %v1829_v34  ;;  %v803_v31 = vpop.f32.mrb[43].mxu0 }
 0x1c7   :  { %v1421_v35 = vpack.c.bf16 %v801_v25, %v801_v25  ;;  %v804_v36 = vadd.f32 %v803_v31, %v1829_v34 }
 0x1c8   :  { %1223 = vst [vmem:[%s2123_s4 + $0x30] sm:$0xff] %v1412_v27  ;;  %v1414_v37 = vpack.c.bf16 %v602_v28, %v600_v23  ;;  %1236 = vst [vmem:[%s2123_s4 + $0x80] sm:$0xf] %v1425_v29  ;;  %v1427_v38 = vpack.c.bf16 %v812_v30, %v812_v30 }
 0x1c9   :  { %1232 = vst [vmem:[%s2123_s4 + $0x68] sm:$0xf] %v1421_v35  ;;  %v1423_v39 = vpack.c.bf16 %v804_v36, %v804_v36 }
 0x1ca   :  { %1225 = vst [vmem:[%s2123_s4 + $0x3c] sm:$0xff] %v1414_v37  ;;  %v605_v40 = vpop.f32.mrb[12].mxu1  ;;  %1238 = vst [vmem:[%s2123_s4 + $0x8c] sm:$0xf] %v1427_v38 }
 0x1cb   :  { %v606_v41 = vadd.f32 %v605_v40, %v1825_v32  ;;  %v607_v42 = vpop.f32.mrb[13].mxu1  ;;  %1234 = vst [vmem:[%s2123_s4 + $0x74] sm:$0xf] %v1423_v39  ;;  %v1573_v43 = vpop.f32.mrb[44].mxu0 }
 0x1cc   :  { %v608_v44 = vadd.f32 %v607_v42, %v1827_v33  ;;  %v609_v45 = vpop.f32.mrb[14].mxu1  ;;  %v825_v46 = vadd.f32 %v1573_v43, %v1829_v34  ;;  %v816_v47 = vpop.f32.mrb[45].mxu0 }
 0x1cd   :  { %v610_v48 = vadd.f32 %v609_v45, %v1825_v32  ;;  %v611_v49 = vpop.f32.mrb[15].mxu1  ;;  %v817_v50 = vadd.f32 %v816_v47, %v1829_v34  ;;  %v1574_v51 = vpop.f32.mrb[46].mxu0 }
 0x1ce   :  { %v1416_v52 = vpack.c.bf16 %v608_v44, %v606_v41  ;;  %v612_v53 = vadd.f32 %v611_v49, %v1827_v33  ;;  %v1433_v54 = vpack.c.bf16 %v825_v46, %v825_v46  ;;  %v828_v55 = vadd.f32 %v1574_v51, %v1829_v34  ;;  %v819_v56 = vpop.f32.mrb[47].mxu0 }
 0x1cf   :  { %v1429_v57 = vpack.c.bf16 %v817_v50, %v817_v50  ;;  %v820_v58 = vadd.f32 %v819_v56, %v1829_v34 }
 0x1d0   :  { %1227 = vst [vmem:[%s2123_s4 + $0x48] sm:$0xff] %v1416_v52  ;;  %v1418_v59 = vpack.c.bf16 %v612_v53, %v610_v48  ;;  %1244 = vst [vmem:[%s2123_s4 + $0xb0] sm:$0xf] %v1433_v54  ;;  %v1435_v60 = vpack.c.bf16 %v828_v55, %v828_v55 }
 0x1d1   :  { %1240 = vst [vmem:[%s2123_s4 + $0x98] sm:$0xf] %v1429_v57  ;;  %v1431_v61 = vpack.c.bf16 %v820_v58, %v820_v58 }
 0x1d2   :  { %1229 = vst [vmem:[%s2123_s4 + $0x54] sm:$0xff] %v1418_v59  ;;  %v615_v62 = vpop.f32.mrb[16].mxu1  ;;  %1246 = vst [vmem:[%s2123_s4 + $0xbc] sm:$0xf] %v1435_v60 }
 0x1d3   :  { %v616_v63 = vadd.f32 %v615_v62, %v1825_v32  ;;  %v617_v0 = vpop.f32.mrb[17].mxu1  ;;  %1242 = vst [vmem:[%s2123_s4 + $0xa4] sm:$0xf] %v1431_v61  ;;  %v1577_v1 = vpop.f32.mrb[48].mxu0 }
 0x1d4   :  { %v618_v2 = vadd.f32 %v617_v0, %v1827_v33  ;;  %v619_v3 = vpop.f32.mrb[18].mxu1  ;;  %v841_v4 = vadd.f32 %v1577_v1, %v1829_v34  ;;  %v832_v5 = vpop.f32.mrb[49].mxu0 }
 0x1d5   :  { %v620_v6 = vadd.f32 %v619_v3, %v1825_v32  ;;  %v621_v7 = vpop.f32.mrb[19].mxu1  ;;  %v833_v8 = vadd.f32 %v832_v5, %v1829_v34  ;;  %v1578_v9 = vpop.f32.mrb[50].mxu0 }
 0x1d6   :  { %v1420_v10 = vpack.c.bf16 %v618_v2, %v616_v63  ;;  %v622_v11 = vadd.f32 %v621_v7, %v1827_v33  ;;  %v1441_v12 = vpack.c.bf16 %v841_v4, %v841_v4  ;;  %v844_v13 = vadd.f32 %v1578_v9, %v1829_v34  ;;  %v835_v14 = vpop.f32.mrb[51].mxu0 }
 0x1d7   :  { %v1437_v15 = vpack.c.bf16 %v833_v8, %v833_v8  ;;  %v836_v16 = vadd.f32 %v835_v14, %v1829_v34 }
 0x1d8   :  { %1231 = vst [vmem:[%s2123_s4 + $0x60] sm:$0xff] %v1420_v10  ;;  %v1422_v17 = vpack.c.bf16 %v622_v11, %v620_v6  ;;  %1252 = vst [vmem:[%s2123_s4 + $0xe0] sm:$0xf] %v1441_v12  ;;  %v1443_v18 = vpack.c.bf16 %v844_v13, %v844_v13 }
 0x1d9   :  { %1248 = vst [vmem:[%s2123_s4 + $0xc8] sm:$0xf] %v1437_v15  ;;  %v1439_v19 = vpack.c.bf16 %v836_v16, %v836_v16 }
 0x1da   :  { %1233 = vst [vmem:[%s2123_s4 + $0x6c] sm:$0xff] %v1422_v17  ;;  %v625_v20 = vpop.f32.mrb[20].mxu1  ;;  %1254 = vst [vmem:[%s2123_s4 + $0xec] sm:$0xf] %v1443_v18 }
 0x1db   :  { %v626_v21 = vadd.f32 %v625_v20, %v1825_v32  ;;  %v627_v22 = vpop.f32.mrb[21].mxu1  ;;  %1250 = vst [vmem:[%s2123_s4 + $0xd4] sm:$0xf] %v1439_v19  ;;  %v1581_v23 = vpop.f32.mrb[52].mxu0 }
 0x1dc   :  { %v628_v24 = vadd.f32 %v627_v22, %v1827_v33  ;;  %v629_v25 = vpop.f32.mrb[22].mxu1  ;;  %v857_v26 = vadd.f32 %v1581_v23, %v1829_v34  ;;  %v848_v27 = vpop.f32.mrb[53].mxu0 }
 0x1dd   :  { %v630_v28 = vadd.f32 %v629_v25, %v1825_v32  ;;  %v631_v29 = vpop.f32.mrb[23].mxu1  ;;  %v849_v30 = vadd.f32 %v848_v27, %v1829_v34  ;;  %v1582_v31 = vpop.f32.mrb[54].mxu0 }
 0x1de   :  { %v1424_v35 = vpack.c.bf16 %v628_v24, %v626_v21  ;;  %v632_v36 = vadd.f32 %v631_v29, %v1827_v33  ;;  %v1449_v37 = vpack.c.bf16 %v857_v26, %v857_v26  ;;  %v860_v38 = vadd.f32 %v1582_v31, %v1829_v34  ;;  %v851_v39 = vpop.f32.mrb[55].mxu0 }
 0x1df   :  { %v1445_v40 = vpack.c.bf16 %v849_v30, %v849_v30  ;;  %v852_v41 = vadd.f32 %v851_v39, %v1829_v34 }
 0x1e0   :  { %1235 = vst [vmem:[%s2123_s4 + $0x78] sm:$0xff] %v1424_v35  ;;  %v1426_v42 = vpack.c.bf16 %v632_v36, %v630_v28  ;;  %1260 = vst [vmem:[%s2123_s4 + $0x110] sm:$0xf] %v1449_v37  ;;  %v1451_v43 = vpack.c.bf16 %v860_v38, %v860_v38 }
 0x1e1   :  { %1256 = vst [vmem:[%s2123_s4 + $0xf8] sm:$0xf] %v1445_v40  ;;  %v1447_v44 = vpack.c.bf16 %v852_v41, %v852_v41 }
 0x1e2   :  { %1237 = vst [vmem:[%s2123_s4 + $0x84] sm:$0xff] %v1426_v42  ;;  %v635_v45 = vpop.f32.mrb[24].mxu1  ;;  %1262 = vst [vmem:[%s2123_s4 + $0x11c] sm:$0xf] %v1451_v43 }
 0x1e3   :  { %v636_v46 = vadd.f32 %v635_v45, %v1825_v32  ;;  %v637_v47 = vpop.f32.mrb[25].mxu1  ;;  %1258 = vst [vmem:[%s2123_s4 + $0x104] sm:$0xf] %v1447_v44  ;;  %v1585_v48 = vpop.f32.mrb[56].mxu0 }
 0x1e4   :  { %v638_v49 = vadd.f32 %v637_v47, %v1827_v33  ;;  %v639_v50 = vpop.f32.mrb[26].mxu1  ;;  %v873_v51 = vadd.f32 %v1585_v48, %v1829_v34  ;;  %v864_v52 = vpop.f32.mrb[57].mxu0 }
 0x1e5   :  { %v640_v53 = vadd.f32 %v639_v50, %v1825_v32  ;;  %v641_v54 = vpop.f32.mrb[27].mxu1  ;;  %v865_v55 = vadd.f32 %v864_v52, %v1829_v34  ;;  %v1586_v56 = vpop.f32.mrb[58].mxu0 }
 0x1e6   :  { %v1428_v57 = vpack.c.bf16 %v638_v49, %v636_v46  ;;  %v642_v58 = vadd.f32 %v641_v54, %v1827_v33  ;;  %v1457_v59 = vpack.c.bf16 %v873_v51, %v873_v51  ;;  %v876_v60 = vadd.f32 %v1586_v56, %v1829_v34  ;;  %v867_v61 = vpop.f32.mrb[59].mxu0 }
 0x1e7   :  { %v1453_v62 = vpack.c.bf16 %v865_v55, %v865_v55  ;;  %v868_v63 = vadd.f32 %v867_v61, %v1829_v34 }
 0x1e8   :  { %1239 = vst [vmem:[%s2123_s4 + $0x90] sm:$0xff] %v1428_v57  ;;  %v1430_v0 = vpack.c.bf16 %v642_v58, %v640_v53  ;;  %1268 = vst [vmem:[%s2123_s4 + $0x140] sm:$0xf] %v1457_v59  ;;  %v1459_v1 = vpack.c.bf16 %v876_v60, %v876_v60 }
 0x1e9   :  { %1264 = vst [vmem:[%s2123_s4 + $0x128] sm:$0xf] %v1453_v62  ;;  %v1455_v2 = vpack.c.bf16 %v868_v63, %v868_v63 }
 0x1ea   :  { %1241 = vst [vmem:[%s2123_s4 + $0x9c] sm:$0xff] %v1430_v0  ;;  %v645_v3 = vpop.f32.mrb[28].mxu1  ;;  %1270 = vst [vmem:[%s2123_s4 + $0x14c] sm:$0xf] %v1459_v1 }
 0x1eb   :  { %v646_v4 = vadd.f32 %v645_v3, %v1825_v32  ;;  %v647_v5 = vpop.f32.mrb[29].mxu1  ;;  %1266 = vst [vmem:[%s2123_s4 + $0x134] sm:$0xf] %v1455_v2  ;;  %v1589_v6 = vpop.f32.mrb[60].mxu0 }
 0x1ec   :  { %v648_v7 = vadd.f32 %v647_v5, %v1827_v33  ;;  %v649_v8 = vpop.f32.mrb[30].mxu1  ;;  %v889_v9 = vadd.f32 %v1589_v6, %v1829_v34  ;;  %v880_v10 = vpop.f32.mrb[61].mxu0 }
 0x1ed   :  { %v650_v11 = vadd.f32 %v649_v8, %v1825_v32  ;;  %v651_v12 = vpop.f32.mrb[31].mxu1  ;;  %v881_v13 = vadd.f32 %v880_v10, %v1829_v34  ;;  %v1590_v14 = vpop.f32.mrb[62].mxu0 }
 0x1ee   :  { %v1432_v15 = vpack.c.bf16 %v648_v7, %v646_v4  ;;  %v652_v16 = vadd.f32 %v651_v12, %v1827_v33  ;;  %v1465_v17 = vpack.c.bf16 %v889_v9, %v889_v9  ;;  %v892_v18 = vadd.f32 %v1590_v14, %v1829_v34  ;;  %v883_v19 = vpop.f32.mrb[63].mxu0 }
 0x1ef   :  { %v1461_v20 = vpack.c.bf16 %v881_v13, %v881_v13  ;;  %v884_v21 = vadd.f32 %v883_v19, %v1829_v34 }
 0x1f0   :  { %1243 = vst [vmem:[%s2123_s4 + $0xa8] sm:$0xff] %v1432_v15  ;;  %v1434_v22 = vpack.c.bf16 %v652_v16, %v650_v11  ;;  %1276 = vst [vmem:[%s2123_s4 + $0x170] sm:$0xf] %v1465_v17  ;;  %v1467_v23 = vpack.c.bf16 %v892_v18, %v892_v18 }
 0x1f1   :  { %1272 = vst [vmem:[%s2123_s4 + $0x158] sm:$0xf] %v1461_v20  ;;  %v1463_v24 = vpack.c.bf16 %v884_v21, %v884_v21 }
 0x1f2   :  { %1245 = vst [vmem:[%s2123_s4 + $0xb4] sm:$0xff] %v1434_v22  ;;  %v655_v34 = vpop.f32.mrb[32].mxu1  ;;  %1278 = vst [vmem:[%s2123_s4 + $0x17c] sm:$0xf] %v1467_v23 }
 0x1f3   :  { %v656_v25 = vadd.f32 %v655_v34, %v1825_v32  ;;  %v657_v26 = vpop.f32.mrb[33].mxu1  ;;  %1274 = vst [vmem:[%s2123_s4 + $0x164] sm:$0xf] %v1463_v24 }
 0x1f4   :  { %v658_v27 = vadd.f32 %v657_v26, %v1827_v33  ;;  %v659_v28 = vpop.f32.mrb[34].mxu1 }
 0x1f5   :  { %v660_v29 = vadd.f32 %v659_v28, %v1825_v32  ;;  %v661_v30 = vpop.f32.mrb[35].mxu1 }
 0x1f6   :  { %v1436_v31 = vpack.c.bf16 %v658_v27, %v656_v25  ;;  %v662_v35 = vadd.f32 %v661_v30, %v1827_v33 }
 0x1f8   :  { %1247 = vst [vmem:[%s2123_s4 + $0xc0] sm:$0xff] %v1436_v31  ;;  %v1438_v36 = vpack.c.bf16 %v662_v35, %v660_v29 }
 0x1fa   :  { %1249 = vst [vmem:[%s2123_s4 + $0xcc] sm:$0xff] %v1438_v36  ;;  %v665_v37 = vpop.f32.mrb[36].mxu1 }
 0x1fb   :  { %v666_v38 = vadd.f32 %v665_v37, %v1825_v32  ;;  %v667_v39 = vpop.f32.mrb[37].mxu1 }
 0x1fc   :  { %v668_v40 = vadd.f32 %v667_v39, %v1827_v33  ;;  %v669_v41 = vpop.f32.mrb[38].mxu1 }
 0x1fd   :  { %v670_v42 = vadd.f32 %v669_v41, %v1825_v32  ;;  %v671_v43 = vpop.f32.mrb[39].mxu1 }
 0x1fe   :  { %v1440_v44 = vpack.c.bf16 %v668_v40, %v666_v38  ;;  %v672_v45 = vadd.f32 %v671_v43, %v1827_v33 }
 0x200   :  { %1251 = vst [vmem:[%s2123_s4 + $0xd8] sm:$0xff] %v1440_v44  ;;  %v1442_v46 = vpack.c.bf16 %v672_v45, %v670_v42 }
 0x202   :  { %1253 = vst [vmem:[%s2123_s4 + $0xe4] sm:$0xff] %v1442_v46  ;;  %v675_v47 = vpop.f32.mrb[40].mxu1 }
 0x203   :  { %v676_v48 = vadd.f32 %v675_v47, %v1825_v32  ;;  %v677_v49 = vpop.f32.mrb[41].mxu1 }
 0x204   :  { %v678_v50 = vadd.f32 %v677_v49, %v1827_v33  ;;  %v679_v51 = vpop.f32.mrb[42].mxu1 }
 0x205   :  { %v680_v52 = vadd.f32 %v679_v51, %v1825_v32  ;;  %v681_v53 = vpop.f32.mrb[43].mxu1 }
 0x206   :  { %v1444_v54 = vpack.c.bf16 %v678_v50, %v676_v48  ;;  %v682_v55 = vadd.f32 %v681_v53, %v1827_v33 }
 0x208   :  { %1255 = vst [vmem:[%s2123_s4 + $0xf0] sm:$0xff] %v1444_v54  ;;  %v1446_v56 = vpack.c.bf16 %v682_v55, %v680_v52 }
 0x20a   :  { %1257 = vst [vmem:[%s2123_s4 + $0xfc] sm:$0xff] %v1446_v56  ;;  %v685_v57 = vpop.f32.mrb[44].mxu1 }
 0x20b   :  { %v686_v58 = vadd.f32 %v685_v57, %v1825_v32  ;;  %v687_v59 = vpop.f32.mrb[45].mxu1 }
 0x20c   :  { %v688_v60 = vadd.f32 %v687_v59, %v1827_v33  ;;  %v689_v61 = vpop.f32.mrb[46].mxu1 }
 0x20d   :  { %v690_v62 = vadd.f32 %v689_v61, %v1825_v32  ;;  %v691_v63 = vpop.f32.mrb[47].mxu1 }
 0x20e   :  { %v1448_v0 = vpack.c.bf16 %v688_v60, %v686_v58  ;;  %v692_v1 = vadd.f32 %v691_v63, %v1827_v33 }
 0x210   :  { %1259 = vst [vmem:[%s2123_s4 + $0x108] sm:$0xff] %v1448_v0  ;;  %v1450_v2 = vpack.c.bf16 %v692_v1, %v690_v62 }
 0x212   :  { %1261 = vst [vmem:[%s2123_s4 + $0x114] sm:$0xff] %v1450_v2  ;;  %v695_v3 = vpop.f32.mrb[48].mxu1 }
 0x213   :  { %v696_v4 = vadd.f32 %v695_v3, %v1825_v32  ;;  %v697_v5 = vpop.f32.mrb[49].mxu1 }
 0x214   :  { %v698_v6 = vadd.f32 %v697_v5, %v1827_v33  ;;  %v699_v7 = vpop.f32.mrb[50].mxu1 }
 0x215   :  { %v700_v8 = vadd.f32 %v699_v7, %v1825_v32  ;;  %v701_v9 = vpop.f32.mrb[51].mxu1 }
 0x216   :  { %v1452_v10 = vpack.c.bf16 %v698_v6, %v696_v4  ;;  %v702_v11 = vadd.f32 %v701_v9, %v1827_v33 }
 0x218   :  { %1263 = vst [vmem:[%s2123_s4 + $0x120] sm:$0xff] %v1452_v10  ;;  %v1454_v12 = vpack.c.bf16 %v702_v11, %v700_v8 }
 0x21a   :  { %1265 = vst [vmem:[%s2123_s4 + $0x12c] sm:$0xff] %v1454_v12  ;;  %v705_v13 = vpop.f32.mrb[52].mxu1 }
 0x21b   :  { %v706_v14 = vadd.f32 %v705_v13, %v1825_v32  ;;  %v707_v15 = vpop.f32.mrb[53].mxu1 }
 0x21c   :  { %v708_v16 = vadd.f32 %v707_v15, %v1827_v33  ;;  %v709_v17 = vpop.f32.mrb[54].mxu1 }
 0x21d   :  { %v710_v18 = vadd.f32 %v709_v17, %v1825_v32  ;;  %v711_v19 = vpop.f32.mrb[55].mxu1 }
 0x21e   :  { %v1456_v20 = vpack.c.bf16 %v708_v16, %v706_v14  ;;  %v712_v21 = vadd.f32 %v711_v19, %v1827_v33 }
 0x220   :  { %1267 = vst [vmem:[%s2123_s4 + $0x138] sm:$0xff] %v1456_v20  ;;  %v1458_v22 = vpack.c.bf16 %v712_v21, %v710_v18 }
 0x222   :  { %1269 = vst [vmem:[%s2123_s4 + $0x144] sm:$0xff] %v1458_v22  ;;  %v715_v23 = vpop.f32.mrb[56].mxu1 }
 0x223   :  { %v716_v24 = vadd.f32 %v715_v23, %v1825_v32  ;;  %v717_v34 = vpop.f32.mrb[57].mxu1 }
 0x224   :  { %v718_v25 = vadd.f32 %v717_v34, %v1827_v33  ;;  %v719_v26 = vpop.f32.mrb[58].mxu1 }
 0x225   :  { %v720_v27 = vadd.f32 %v719_v26, %v1825_v32  ;;  %v721_v28 = vpop.f32.mrb[59].mxu1 }
 0x226   :  { %v1460_v29 = vpack.c.bf16 %v718_v25, %v716_v24  ;;  %v722_v30 = vadd.f32 %v721_v28, %v1827_v33 }
 0x228   :  { %1271 = vst [vmem:[%s2123_s4 + $0x150] sm:$0xff] %v1460_v29  ;;  %v1462_v31 = vpack.c.bf16 %v722_v30, %v720_v27 }
 0x22a   :  { %1273 = vst [vmem:[%s2123_s4 + $0x15c] sm:$0xff] %v1462_v31  ;;  %v725_v35 = vpop.f32.mrb[60].mxu1 }
 0x22b   :  { %v726_v36 = vadd.f32 %v725_v35, %v1825_v32  ;;  %v727_v37 = vpop.f32.mrb[61].mxu1 }
 0x22c   :  { %v728_v38 = vadd.f32 %v727_v37, %v1827_v33  ;;  %v729_v39 = vpop.f32.mrb[62].mxu1 }
 0x22d   :  { %v730_v40 = vadd.f32 %v729_v39, %v1825_v32  ;;  %v731_v41 = vpop.f32.mrb[63].mxu1 }
 0x22e   :  { %v1464_v42 = vpack.c.bf16 %v728_v38, %v726_v36  ;;  %v732_v43 = vadd.f32 %v731_v41, %v1827_v33 }
 0x230   :  { %1275 = vst [vmem:[%s2123_s4 + $0x168] sm:$0xff] %v1464_v42  ;;  %v1466_v44 = vpack.c.bf16 %v732_v43, %v730_v40 }
 0x232   :  { %1277 = vst [vmem:[%s2123_s4 + $0x174] sm:$0xff] %v1466_v44 }

// kernel: rnn_encoder_forward.3
= control target key start
LH: loop header
LB: loop body
LE: loop exit
PB: predicated region body
PF: predicated region fallthrough
CT: control target
= control target key end

     0   :  { %v9712_v0 = vmov 0.0   ;;  %s11631_s0 = inlined_call_operand.<no memory space> [shape: s32[1], index: 0, kind: input, shape index: {}]   ;;  %s11632_s1 = inlined_call_operand.vmem [shape: bf16[32,8,384], index: 1, kind: input, shape index: {}]   ;;  %s11633_s2 = inlined_call_operand.vmem [shape: f32[128,384], index: 2, kind: input, shape index: {}]   ;;  %s11634_s3 = inlined_call_operand.vmem [shape: f32[1,384], index: 3, kind: input, shape index: {}]   ;;  %s11635_s4 = inlined_call_operand.vmem [shape: s32[8,1], index: 4, kind: input, shape index: {}]   ;;  %s11636_s5 = inlined_call_operand.vmem [shape: f32[8,128], index: 5, kind: output, shape index: {}]  }
   0x1   :  { %23 = vst [vmem:[#allocation2] sm:$0xff] %v9712_v0  ;;  %p5770_p0 = scmp.le.s32.totalorder %s11631_s0, 0 }
   0x2   :  { %v31_v1 = vld [vmem:[%s11633_s2 + $0x8] sm:$0xff] (!%p5770_p0)  ;;  %v34_v2 = vld [vmem:[%s11633_s2 + $0x20] sm:$0xff] (!%p5770_p0)  ;;  %v33_v5 = vld [vmem:[%s11633_s2 + $0x18] sm:$0xff] (!%p5770_p0)  ;;  %v9713_v8 = vmov (!%p5770_p0), 0.0|0.0   ;;  %v9714_v9 = vmov (!%p5770_p0), 0.0   ;;  %vm9715_vm0 = vmmov (!%p5770_p0), 0  }
   0x3   :  { %29 = sbr.rel (%p5770_p0) target bundleno = 8422 (0x20e6), region = 25  ;;  %v30_v3 = vld [vmem:[%s11633_s2] sm:$0xff] (!%p5770_p0)  ;;  %v9759_v4 = vpack.c.bf16 (!%p5770_p0), %v34_v2, %v31_v1  ;;  %v37_v6 = vld [vmem:[%s11633_s2 + $0x38] sm:$0xff] (!%p5770_p0)  ;;  %v40_v7 = vld [vmem:[%s11633_s2 + $0x50] sm:$0xff] (!%p5770_p0)  ;;  %7625 = vmatprep.subr.bf16.mxu1 (!%p5770_p0), %v9713_v8  ;;  %166 = vmatprep.mubr.f32.mxu0 (!%p5770_p0), %v9714_v9  ;;  %v9716_v15 = vmov (!%p5770_p0), 0  }
   0x4   :  { %v9772_v10 = vpack.c.bf16 (!%p5770_p0), %v33_v5, %v30_v3  ;;  %v9774_v11 = vpack.c.bf16 (!%p5770_p0), %v40_v7, %v37_v6  ;;  %v36_v12 = vld [vmem:[%s11633_s2 + $0x30] sm:$0xff] (!%p5770_p0)  ;;  %v39_v13 = vld [vmem:[%s11633_s2 + $0x48] sm:$0xff] (!%p5770_p0)  ;;  %6505 = vmatprep.mubr.msk.f32.mxu1 (!%p5770_p0), %vm9715_vm0, %v9714_v9  ;;  %9390 = vset.pattern.permute.xlu0 (!%p5770_p0), %v9716_v15  ;;  %v46_v16 = vld [vmem:[%s11633_s2 + $0x80] sm:$0xff] (!%p5770_p0) }
   0x5   :  { %v43_v14 = vld [vmem:[%s11633_s2 + $0x68] sm:$0xff] (!%p5770_p0)  ;;  %7594 = vmatprep.subr.bf16.mxu0 (!%p5770_p0), %v9759_v4  ;;  %9391 = vset.pattern.permute.xlu1 (!%p5770_p0), %v9716_v15  ;;  %v9794_v17 = vpack.c.bf16 (!%p5770_p0), %v39_v13, %v36_v12  ;;  %v42_v19 = vld [vmem:[%s11633_s2 + $0x60] sm:$0xff] (!%p5770_p0)  ;;  %v45_v20 = vld [vmem:[%s11633_s2 + $0x78] sm:$0xff] (!%p5770_p0) }
   0x6   :  { %7596 = vmatpush1.bf16.msra.mxu0 (!%p5770_p0), %v9772_v10  ;;  %v9797_v18 = vpack.c.bf16 (!%p5770_p0), %v46_v16, %v43_v14  ;;  %v49_v21 = vld [vmem:[%s11633_s2 + $0x98] sm:$0xff] (!%p5770_p0)  ;;  %v52_v22 = vld [vmem:[%s11633_s2 + $0xb0] sm:$0xff] (!%p5770_p0)  ;;  %v9812_v23 = vpack.c.bf16 (!%p5770_p0), %v45_v20, %v42_v19  ;;  %v51_v26 = vld [vmem:[%s11633_s2 + $0xa8] sm:$0xff] (!%p5770_p0) }
   0x7   :  { %7598 = vmatprep.subr.bf16.mxu0 (!%p5770_p0), %v9774_v11  ;;  %v9815_v24 = vpack.c.bf16 (!%p5770_p0), %v52_v22, %v49_v21  ;;  %v48_v25 = vld [vmem:[%s11633_s2 + $0x90] sm:$0xff] (!%p5770_p0)  ;;  %v55_v27 = vld [vmem:[%s11633_s2 + $0xc8] sm:$0xff] (!%p5770_p0)  ;;  %v58_v28 = vld [vmem:[%s11633_s2 + $0xe0] sm:$0xff] (!%p5770_p0) }
   0x8   :  { %v32_v29 = vld [vmem:[%s11633_s2 + $0x10] sm:$0xff] (!%p5770_p0)  ;;  %v35_v30 = vld [vmem:[%s11633_s2 + $0x28] sm:$0xff] (!%p5770_p0)  ;;  %v38_v32 = vld [vmem:[%s11633_s2 + $0x40] sm:$0xff] (!%p5770_p0)  ;;  %v9841_v33 = vpack.c.bf16 (!%p5770_p0), %v51_v26, %v48_v25  ;;  %v9847_v35 = vpack.c.bf16 (!%p5770_p0), %v58_v28, %v55_v27 }
   0x9   :  { %v9835_v31 = vpack.c.bf16 (!%p5770_p0), %v35_v30, %v32_v29  ;;  %v41_v34 = vld [vmem:[%s11633_s2 + $0x58] sm:$0xff] (!%p5770_p0)  ;;  %v54_v36 = vld [vmem:[%s11633_s2 + $0xc0] sm:$0xff] (!%p5770_p0)  ;;  %v64_v40 = vld [vmem:[%s11633_s2 + $0x110] sm:$0xff] (!%p5770_p0) }
   0xa   :  { %7600 = vmatpush1.bf16.msra.mxu0 %v9794_v17  ;;  %v57_v37 = vld [vmem:[%s11633_s2 + $0xd8] sm:$0xff]  ;;  %v9859_v39 = vpack.c.bf16 %v41_v34, %v38_v32  ;;  %v44_v41 = vld [vmem:[%s11633_s2 + $0x70] sm:$0xff]  ;;  %v47_v42 = vld [vmem:[%s11633_s2 + $0x88] sm:$0xff] }
   0xb   :  { %7602 = vmatprep.subr.bf16.mxu0 %v9797_v18  ;;  %v61_v38 = vld [vmem:[%s11633_s2 + $0xf8] sm:$0xff]  ;;  %7627 = vmatpush3.bf16.msra.mxu1 %v9835_v31  ;;  %v9872_v43 = vpack.c.bf16 %v57_v37, %v54_v36  ;;  %v9877_v44 = vld [vmem:[%s11635_s4] sm:$0xff]  ;;  %v60_v46 = vld [vmem:[%s11633_s2 + $0xf0] sm:$0xff]  ;;  %v9892_v49 = vpack.c.bf16 %v47_v42, %v44_v41 }
   0xc   :  { %7628 = vmatprep.subr.bf16.mxu1 %v9713_v8  ;;  %v9880_v45 = vpack.c.bf16 %v64_v40, %v61_v38  ;;  %v63_v47 = vld [vmem:[%s11633_s2 + $0x108] sm:$0xff]  ;;  %vm5773_vm1 = vcmp.gt.s32.totalorder %v9877_v44, 0  ;;  %vm5778_vm2 = vcmp.gt.s32.totalorder %v9877_v44, 1  ;;  %v70_v50 = vld [vmem:[%s11633_s2 + $0x140] sm:$0xff]  ;;  %v53_v52 = vld [vmem:[%s11633_s2 + $0xb8] sm:$0xff]  ;;  %vm5793_vm3 = vcmp.gt.s32.totalorder %v9877_v44, 4 }
   0xd   :  { %v67_v48 = vld [vmem:[%s11633_s2 + $0x128] sm:$0xff]  ;;  %v50_v51 = vld [vmem:[%s11633_s2 + $0xa0] sm:$0xff]  ;;  %v266_v53 = vsel %vm5773_vm1, 1, %v9716_v15  ;;  %v9908_v54 = vpack.c.bf16 %v63_v47, %v60_v46  ;;  %v443_v55 = vsel %vm5778_vm2, 1, %v9716_v15  ;;  %v69_v58 = vld [vmem:[%s11633_s2 + $0x138] sm:$0xff]  ;;  %v974_v1 = vsel %vm5793_vm3, 1, %v9716_v15 }
   0xe   :  { %7604 = vmatpush1.bf16.msra.mxu0 %v9812_v23  ;;  %268 = vperm.xlu0 %9390, %v266_v53   ;;  %v9912_v56 = vpack.c.bf16 %v70_v50, %v67_v48  ;;  %v66_v57 = vld [vmem:[%s11633_s2 + $0x120] sm:$0xff]  ;;  %v73_v59 = vld [vmem:[%s11633_s2 + $0x158] sm:$0xff]  ;;  %v9924_v60 = vpack.c.bf16 %v53_v52, %v50_v51  ;;  %v76_v61 = vld [vmem:[%s11633_s2 + $0x170] sm:$0xff]  ;;  %vm5803_vm4 = vcmp.gt.s32.totalorder %v9877_v44, 6  ;;  %vm5813_vm5 = vcmp.gt.s32.totalorder %v9877_v44, 8 }
   0xf   :  { %7606 = vmatprep.subr.bf16.mxu0 %v9815_v24  ;;  %7630 = vmatpush3.bf16.msra.mxu1 %v9859_v39  ;;  %v56_v62 = vld [vmem:[%s11633_s2 + $0xd0] sm:$0xff]  ;;  %v59_v63 = vld [vmem:[%s11633_s2 + $0xe8] sm:$0xff]  ;;  %v9938_v0 = vpack.c.bf16 %v69_v58, %v66_v57  ;;  %v9942_v2 = vpack.c.bf16 %v76_v61, %v73_v59  ;;  %v62_v7 = vld [vmem:[%s11633_s2 + $0x100] sm:$0xff]  ;;  %v1328_v14 = vsel %vm5803_vm4, 1, %v9716_v15  ;;  %v1682_v22 = vsel %vm5813_vm5, 1, %v9716_v15 }
  0x10   :  { %7631 = vmatprep.subr.bf16.mxu1 %v9713_v8  ;;  %v72_v3 = vld [vmem:[%s11633_s2 + $0x150] sm:$0xff]  ;;  %v75_v5 = vld [vmem:[%s11633_s2 + $0x168] sm:$0xff]  ;;  %v9951_v6 = vpack.c.bf16 %v59_v63, %v56_v62  ;;  %v65_v12 = vld [vmem:[%s11633_s2 + $0x118] sm:$0xff]  ;;  %vm5823_vm6 = vcmp.gt.s32.totalorder %v9877_v44, 10  ;;  %vm5833_vm7 = vcmp.gt.s32.totalorder %v9877_v44, 12  ;;  %vm5843_vm8 = vcmp.gt.s32.totalorder %v9877_v44, 14 }
  0x11   :  { %v9962_v13 = vpack.c.bf16 %v75_v5, %v72_v3  ;;  %v9967_v16 = vpack.c.bf16 %v65_v12, %v62_v7  ;;  %v68_v19 = vld [vmem:[%s11633_s2 + $0x130] sm:$0xff]  ;;  %v71_v20 = vld [vmem:[%s11633_s2 + $0x148] sm:$0xff]  ;;  %v9978_v21 = vld [vmem:[#allocation2] sm:$0xff]  ;;  %v2036_v28 = vsel %vm5823_vm6, 1, %v9716_v15  ;;  %v2390_v30 = vsel %vm5833_vm7, 1, %v9716_v15 }
  0x12   :  { %7608 = vmatpush1.bf16.msra.mxu0 %v9841_v33  ;;  %445 = vperm.xlu0 %9390, %v443_v55   ;;  %v9982_v25 = vpack.c.bf16 %v71_v20, %v68_v19  ;;  %v74_v26 = vld [vmem:[%s11633_s2 + $0x160] sm:$0xff]  ;;  %v77_v27 = vld [vmem:[%s11633_s2 + $0x178] sm:$0xff]  ;;  %v2744_v32 = vsel %vm5843_vm8, 1, %v9716_v15  ;;  %vm5853_vm9 = vcmp.gt.s32.totalorder %v9877_v44, 16  ;;  %vm5863_vm10 = vcmp.gt.s32.totalorder %v9877_v44, 18 }
  0x13   :  { %7610 = vmatprep.subr.bf16.mxu0 %v9847_v35  ;;  %7633 = vmatpush3.bf16.msra.mxu1 %v9892_v49  ;;  %v9998_v29 = vpack.c.bf16 %v77_v27, %v74_v26  ;;  %v3098_v34 = vsel %vm5853_vm9, 1, %v9716_v15  ;;  %v3452_v36 = vsel %vm5863_vm10, 1, %v9716_v15  ;;  %vm5873_vm11 = vcmp.gt.s32.totalorder %v9877_v44, 20  ;;  %v78_v51 = vld [vmem:[%s11634_s3] sm:$0x7] }
  0x14   :  { %7634 = vmatprep.subr.bf16.mxu1 %v9713_v8  ;;  %v3806_v37 = vsel %vm5873_vm11, 1, %v9716_v15  ;;  %vm5883_vm12 = vcmp.gt.s32.totalorder %v9877_v44, 22  ;;  %vm5893_vm13 = vcmp.gt.s32.totalorder %v9877_v44, 24  ;;  %vm5903_vm14 = vcmp.gt.s32.totalorder %v9877_v44, 26  ;;  %v81_v53 = vld [vmem:[%s11632_s1] sm:$0xff] }
  0x15   :  { %v4160_v38 = vsel %vm5883_vm12, 1, %v9716_v15  ;;  %v4514_v40 = vsel %vm5893_vm13, 1, %v9716_v15  ;;  %v4868_v41 = vsel %vm5903_vm14, 1, %v9716_v15  ;;  %vm5913_vm15 = vcmp.gt.s32.totalorder %v9877_v44, 28 }
  0x16   :  { %7612 = vmatpush1.bf16.msra.mxu0 %v9872_v43  ;;  %976 = vperm.xlu0 %9390, %v974_v1   ;;  %v5222_v42 = vsel %vm5913_vm15, 1, %v9716_v15  ;;  %vm5923_vm1 = vcmp.gt.s32.totalorder %v9877_v44, 30  ;;  %v87_v47 = vlaneseq  ;;  %v83_v58 = vunpack.c.l.bf16 %v81_v53 }
  0x17   :  { %7614 = vmatprep.subr.bf16.mxu0 %v9880_v45  ;;  %7636 = vmatpush3.bf16.msra.mxu1 %v9924_v60  ;;  %v5576_v46 = vsel %vm5923_vm1, 1, %v9716_v15  ;;  %v84_v63 = vunpack.c.h.bf16 %v81_v53  ;;  %vm5783_vm3 = vcmp.gt.s32.totalorder %v9877_v44, 2  ;;  %vm5788_vm4 = vcmp.gt.s32.totalorder %v9877_v44, 3 }
  0x18   :  { %7637 = vmatprep.subr.bf16.mxu1 %v9713_v8  ;;  %v88_v48 = vshrl.u32 %v87_v47, 7  ;;  %v797_v53 = vsel %vm5788_vm4, 1, %v9716_v15  ;;  %vm5798_vm5 = vcmp.gt.s32.totalorder %v9877_v44, 5  ;;  %vm5808_vm6 = vcmp.gt.s32.totalorder %v9877_v44, 7 }
  0x19   :  { %vm5818_vm7 = vcmp.gt.s32.totalorder %v9877_v44, 9  ;;  %vm5828_vm8 = vcmp.gt.s32.totalorder %v9877_v44, 11  ;;  %vm5838_vm9 = vcmp.gt.s32.totalorder %v9877_v44, 13  ;;  %vm5848_vm10 = vcmp.gt.s32.totalorder %v9877_v44, 15 }
  0x1a   :  { %7616 = vmatpush1.bf16.msra.mxu0 %v9908_v54  ;;  %1330 = vperm.xlu0 %9390, %v1328_v14   ;;  %v89_v50 = vsub.s32 0, %v88_v48  ;;  %v93_v52 = vsub.s32 1, %v88_v48  ;;  %v97_v26 = vsub.s32 2, %v88_v48  ;;  %vm5858_vm11 = vcmp.gt.s32.totalorder %v9877_v44, 17 }
  0x1b   :  { %7618 = vmatprep.subr.bf16.mxu0 %v9912_v56  ;;  %7639 = vmatpush3.bf16.msra.mxu1 %v9951_v6  ;;  %vm5868_vm12 = vcmp.gt.s32.totalorder %v9877_v44, 19  ;;  %vm5878_vm13 = vcmp.gt.s32.totalorder %v9877_v44, 21  ;;  %vm5888_vm14 = vcmp.gt.s32.totalorder %v9877_v44, 23  ;;  %vm5898_vm15 = vcmp.gt.s32.totalorder %v9877_v44, 25 }
  0x1c   :  { %7640 = vmatprep.subr.bf16.mxu1 %v9713_v8  ;;  %v10063_v55 = vrot.slane %v78_v51, %v89_v50  ;;  %v10065_v57 = vrot.slane %v78_v51, %v93_v52  ;;  %v10069_v27 = vrot.slane %v78_v51, %v97_v26  ;;  %vm5908_vm1 = vcmp.gt.s32.totalorder %v9877_v44, 27  ;;  %v5774_v26 = vld [vmem:[%s11632_s1 + $0xc] sm:$0xff] }
  0x1e   :  { %7620 = vmatpush1.bf16.msra.mxu0 %v9938_v0  ;;  %1684 = vperm.xlu0 %9390, %v1682_v22  }
  0x1f   :  { %7622 = vmatprep.subr.bf16.mxu0 %v9942_v2  ;;  %7642 = vmatpush3.bf16.msra.mxu1 %v9967_v16 }
  0x20   :  { %7643 = vmatprep.subr.bf16.mxu1 %v9713_v8 }
  0x22   :  { %7624 = vmatpush1.bf16.msra.mxu0 %v9962_v13  ;;  %2038 = vperm.xlu0 %9390, %v2036_v28  }
  0x23   :  { %7650 = vmatprep.subr.bf16.mxu0 %v9759_v4  ;;  %7645 = vmatpush3.bf16.msra.mxu1 %v9982_v25 }
  0x24   :  { %7646 = vmatprep.subr.bf16.mxu1 %v9713_v8 }
  0x25   :  { %167 = vmatmul.mubr.f32.vlgmr.msra.gmra.mrb[0].mxu0 %v9978_v21 }
  0x26   :  { %7652 = vmatpush1.bf16.msra.mxu0 %v9772_v10  ;;  %343 = vmatprep.mubr.f32.mxu0 %v9714_v9 }
  0x27   :  { %7654 = vmatprep.subr.bf16.mxu0 %v9774_v11  ;;  %7648 = vmatpush3.bf16.msra.mxu1 %v9998_v29 }
  0x28   :  { %7681 = vmatprep.subr.bf16.mxu1 %v9713_v8  ;;  %2392 = vperm.xlu0 %9390, %v2390_v30   ;;  %v10074_v30 = vld [vmem:[%s11632_s1 + $0x8] ss:$12 sps:$4 sm:$0xff]  }
  0x2a   :  { %7656 = vmatpush1.bf16.msra.mxu0 %v9794_v17  ;;  %6506 = vmatmul.mubr.f32.vlgmr.msra.gmra.mrb[0].mxu1 %v9978_v21 }
  0x2b   :  { %7658 = vmatprep.subr.bf16.mxu0 %v9797_v18  ;;  %7683 = vmatpush3.bf16.msra.mxu1 %v9835_v31 }
  0x2c   :  { %7684 = vmatprep.subr.bf16.mxu1 %v9713_v8  ;;  %6540 = vmatprep.mubr.msk.f32.mxu1 %vm9715_vm0, %v9714_v9 }
  0x2d   :  { %2746 = vperm.xlu0 %9390, %v2744_v32  }
  0x2e   :  { %7660 = vmatpush1.bf16.msra.mxu0 %v9812_v23 }
  0x2f   :  { %7662 = vmatprep.subr.bf16.mxu0 %v9815_v24  ;;  %7686 = vmatpush3.bf16.msra.mxu1 %v9859_v39 }
  0x30   :  { %7687 = vmatprep.subr.bf16.mxu1 %v9713_v8 }
  0x31   :  { %3100 = vperm.xlu0 %9390, %v3098_v34  }
  0x32   :  { %7664 = vmatpush1.bf16.msra.mxu0 %v9841_v33 }
  0x33   :  { %7666 = vmatprep.subr.bf16.mxu0 %v9847_v35  ;;  %7689 = vmatpush3.bf16.msra.mxu1 %v9892_v49 }
  0x34   :  { %7690 = vmatprep.subr.bf16.mxu1 %v9713_v8 }
  0x35   :  { %3454 = vperm.xlu0 %9390, %v3452_v36   ;;  %v85_v36 = vunpack.c.l.bf16 %v10074_v30 }
  0x36   :  { %7668 = vmatpush1.bf16.msra.mxu0 %v9872_v43 }
  0x37   :  { %7670 = vmatprep.subr.bf16.mxu0 %v9880_v45  ;;  %7692 = vmatpush3.bf16.msra.mxu1 %v9924_v60 }
  0x38   :  { %7693 = vmatprep.subr.bf16.mxu1 %v9713_v8 }
  0x39   :  { %3808 = vperm.xlu0 %9390, %v3806_v37  }
  0x3a   :  { %7672 = vmatpush1.bf16.msra.mxu0 %v9908_v54 }
  0x3b   :  { %7674 = vmatprep.subr.bf16.mxu0 %v9912_v56  ;;  %7695 = vmatpush3.bf16.msra.mxu1 %v9951_v6 }
  0x3c   :  { %7696 = vmatprep.subr.bf16.mxu1 %v9713_v8 }
  0x3d   :  { %4162 = vperm.xlu0 %9390, %v4160_v38  }
  0x3e   :  { %7676 = vmatpush1.bf16.msra.mxu0 %v9938_v0 }
  0x3f   :  { %7678 = vmatprep.subr.bf16.mxu0 %v9942_v2  ;;  %7698 = vmatpush3.bf16.msra.mxu1 %v9967_v16 }
  0x40   :  { %7699 = vmatprep.subr.bf16.mxu1 %v9713_v8 }
  0x41   :  { %4516 = vperm.xlu0 %9390, %v4514_v40  }
  0x42   :  { %7680 = vmatpush1.bf16.msra.mxu0 %v9962_v13 }
  0x43   :  { %7706 = vmatprep.subr.bf16.mxu0 %v9759_v4  ;;  %7701 = vmatpush3.bf16.msra.mxu1 %v9982_v25 }
  0x44   :  { %7702 = vmatprep.subr.bf16.mxu1 %v9713_v8 }
  0x45   :  { %4870 = vperm.xlu0 %9390, %v4868_v41  }
  0x47   :  { %7704 = vmatpush3.bf16.msra.mxu1 %v9998_v29 }
  0x48   :  { %7737 = vmatprep.subr.bf16.mxu1 %v9713_v8 }
  0x49   :  { %5224 = vperm.xlu0 %9390, %v5222_v42  }
  0x4d   :  { %5578 = vperm.xlu0 %9390, %v5576_v46  }
  0x8d   :  { %v269_v47 = vpop.permute.xlu0 %268 }
  0x8e   :  { %vm270_vm2 = vcmp.eq.s32.totalorder %v269_v47, 1 }
  0xf8   :  { %v168_v59 = vpop.f32.mrb[0].mxu0 }
  0xf9   :  { %v169_v61 = vadd.f32 %v168_v59, %v10063_v55  ;;  %v170_v62 = vpop.f32.mrb[1].mxu0  ;;  %v1505_v59 = vsel %vm5808_vm6, 1, %v9716_v15 }
  0xfa   :  { %v171_v1 = vadd.f32 %v170_v62, %v10065_v57  ;;  %v2213_v62 = vsel %vm5828_vm8, 1, %v9716_v15 }
  0xfb   :  { %v243_v3 = vadd.f32 %v169_v61, %v83_v58  ;;  %v1151_v58 = vsel %vm5798_vm5, 1, %v9716_v15  ;;  %v1859_v61 = vsel %vm5818_vm7, 1, %v9716_v15 }
  0xfc   :  { %v250_v7 = vadd.f32 %v171_v1, %v84_v63  ;;  %v2567_v63 = vsel %vm5838_vm9, 1, %v9716_v15  ;;  %v2921_v1 = vsel %vm5848_vm10, 1, %v9716_v15 }
  0xfd   :  { %v5771_v5 = vmul.f32 -1.442695, %v243_v3  ;;  %v239_v12 = vpop.f32.mrb[0].mxu1  ;;  %v3275_v3 = vsel %vm5858_vm11, 1, %v9716_v15 }
  0xfe   :  { %v5772_v14 = vmul.f32 -1.442695, %v250_v7  ;;  %v6507_v19 = vpop.f32.mrb[1].mxu1  ;;  %v240_v34 = vadd.f32 %v239_v12, %v10069_v27  ;;  %v3983_v7 = vsel %vm5878_vm13, 1, %v9716_v15  ;;  %v4337_v12 = vsel %vm5888_vm14, 1, %v9716_v15 }
  0xff   :  { %9392 = vpow2.f32 %v5771_v5  ;;  %v3629_v5 = vsel %vm5868_vm12, 1, %v9716_v15  ;;  %v5045_v19 = vsel %vm5908_vm1, 1, %v9716_v15 }
 0x100   :  { %9394 = vpow2.f32 %v5772_v14  ;;  %v4691_v14 = vsel %vm5898_vm15, 1, %v9716_v15 }
 0x109   :  { %v9393_v20 = vpop.eup %9392 }
 0x10a   :  { %v247_v22 = vadd.f32 1.0, %v9393_v20  ;;  %v9395_v28 = vpop.eup %9394 }
 0x10b   :  { %v254_v32 = vadd.f32 1.0, %v9395_v28  ;;  %v276_v28 = vunpack.c.l.bf16 %v5774_v26 }
 0x10c   :  { %9396 = vrcp.f32 %v247_v22 }
 0x10d   :  { %9398 = vrcp.f32 %v254_v32 }
 0x116   :  { %v9397_v37 = vpop.eup %9396 }
 0x117   :  { %v257_v38 = vmul.f32 %v9397_v37, %v240_v34  ;;  %v9399_v41 = vpop.eup %9398 }
 0x118   :  { %v260_v42 = vsub.f32 1.0, %v9399_v41  ;;  %v262_v50 = vmul.f32 %v9399_v41, %v9978_v21 }
 0x119   :  { %v258_v40 = vadd.f32 %v257_v38, %v85_v36 }
 0x11b   :  { %9400 = vtanh.f32 %v258_v40  ;;  %v277_v40 = vunpack.c.h.bf16 %v5774_v26 }
 0x125   :  { %v9401_v46 = vpop.eup %9400 }
 0x126   :  { %v261_v48 = vmul.f32 %v9401_v46, %v260_v42 }
 0x128   :  { %v263_v51 = vadd.f32 %v262_v50, %v261_v48 }
 0x12a   :  { %v10080_v52 = vsel %vm270_vm2, %v263_v51, %v9978_v21  ;;  %v620_v21 = vsel %vm5783_vm3, 1, %v9716_v15  ;;  %vm5918_vm2 = vcmp.gt.s32.totalorder %v9877_v44, 29  ;;  %vm5928_vm3 = vcmp.gt.s32.totalorder %v9877_v44, 31 }
 0x12b   :  { %344 = vmatmul.mubr.f32.vlgmr.msra.gmra.mrb[2].mxu0 %v10080_v52  ;;  %6541 = vmatmul.mubr.f32.vlgmr.msra.gmra.mrb[2].mxu1 %v10080_v52  ;;  %v5399_v20 = vsel %vm5918_vm2, 1, %v9716_v15  ;;  %v5753_v22 = vsel %vm5928_vm3, 1, %v9716_v15 }
 0x12c   :  { %7708 = vmatpush1.bf16.msra.mxu0 %v9772_v10  ;;  %7739 = vmatpush3.bf16.msra.mxu1 %v9835_v31 }
 0x12d   :  { %7710 = vmatprep.subr.bf16.mxu0 %v9774_v11  ;;  %7740 = vmatprep.subr.bf16.mxu1 %v9713_v8 }
 0x12e   :  { %520 = vmatprep.mubr.f32.mxu0 %v9714_v9  ;;  %6575 = vmatprep.mubr.msk.f32.mxu1 %vm9715_vm0, %v9714_v9 }
 0x12f   :  { %622 = vperm.xlu1 %9391, %v620_v21   ;;  %v278_v21 = vunpack.c.h.bf16 %v10074_v30  ;;  %v5779_v30 = vld [vmem:[%s11632_s1 + $0x18] sm:$0xff] }
 0x130   :  { %7712 = vmatpush1.bf16.msra.mxu0 %v9794_v17  ;;  %7742 = vmatpush3.bf16.msra.mxu1 %v9859_v39 }
 0x131   :  { %7714 = vmatprep.subr.bf16.mxu0 %v9797_v18  ;;  %7743 = vmatprep.subr.bf16.mxu1 %v9713_v8 }
 0x133   :  { %799 = vperm.xlu1 %9391, %v797_v53  }
 0x134   :  { %7716 = vmatpush1.bf16.msra.mxu0 %v9812_v23  ;;  %7745 = vmatpush3.bf16.msra.mxu1 %v9892_v49 }
 0x135   :  { %7718 = vmatprep.subr.bf16.mxu0 %v9815_v24  ;;  %7746 = vmatprep.subr.bf16.mxu1 %v9713_v8 }
 0x137   :  { %1153 = vperm.xlu1 %9391, %v1151_v58  }
 0x138   :  { %7720 = vmatpush1.bf16.msra.mxu0 %v9841_v33  ;;  %7748 = vmatpush3.bf16.msra.mxu1 %v9924_v60 }
 0x139   :  { %7722 = vmatprep.subr.bf16.mxu0 %v9847_v35  ;;  %7749 = vmatprep.subr.bf16.mxu1 %v9713_v8 }
 0x13b   :  { %1507 = vperm.xlu1 %9391, %v1505_v59  }
 0x13c   :  { %7724 = vmatpush1.bf16.msra.mxu0 %v9872_v43  ;;  %7751 = vmatpush3.bf16.msra.mxu1 %v9951_v6 }
 0x13d   :  { %7726 = vmatprep.subr.bf16.mxu0 %v9880_v45  ;;  %7752 = vmatprep.subr.bf16.mxu1 %v9713_v8 }
 0x13f   :  { %1861 = vperm.xlu1 %9391, %v1859_v61  }
 0x140   :  { %7728 = vmatpush1.bf16.msra.mxu0 %v9908_v54  ;;  %7754 = vmatpush3.bf16.msra.mxu1 %v9967_v16 }
 0x141   :  { %7730 = vmatprep.subr.bf16.mxu0 %v9912_v56  ;;  %7755 = vmatprep.subr.bf16.mxu1 %v9713_v8 }
 0x143   :  { %2215 = vperm.xlu1 %9391, %v2213_v62  }
 0x144   :  { %7732 = vmatpush1.bf16.msra.mxu0 %v9938_v0  ;;  %7757 = vmatpush3.bf16.msra.mxu1 %v9982_v25 }
 0x145   :  { %7734 = vmatprep.subr.bf16.mxu0 %v9942_v2  ;;  %7758 = vmatprep.subr.bf16.mxu1 %v9713_v8 }
 0x147   :  { %2569 = vperm.xlu1 %9391, %v2567_v63  }
 0x148   :  { %7736 = vmatpush1.bf16.msra.mxu0 %v9962_v13  ;;  %7760 = vmatpush3.bf16.msra.mxu1 %v9998_v29 }
 0x149   :  { %7762 = vmatprep.subr.bf16.mxu0 %v9759_v4  ;;  %7793 = vmatprep.subr.bf16.mxu1 %v9713_v8 }
 0x14b   :  { %2923 = vperm.xlu1 %9391, %v2921_v1  }
 0x14f   :  { %3277 = vperm.xlu1 %9391, %v3275_v3  }
 0x153   :  { %3631 = vperm.xlu1 %9391, %v3629_v5  }
 0x157   :  { %3985 = vperm.xlu1 %9391, %v3983_v7   ;;  %v446_v7 = vpop.permute.xlu0 %445 }
 0x158   :  { %vm447_vm4 = vcmp.eq.s32.totalorder %v446_v7, 1 }
 0x15b   :  { %4339 = vperm.xlu1 %9391, %v4337_v12  }
 0x15f   :  { %4693 = vperm.xlu1 %9391, %v4691_v14  }
 0x163   :  { %5047 = vperm.xlu1 %9391, %v5045_v19  }
 0x167   :  { %5401 = vperm.xlu1 %9391, %v5399_v20  }
 0x16b   :  { %5755 = vperm.xlu1 %9391, %v5753_v22  }
 0x1fe   :  { %v345_v32 = vpop.f32.mrb[2].mxu0  ;;  %v416_v34 = vpop.f32.mrb[2].mxu1 }
 0x1ff   :  { %v346_v36 = vadd.f32 %v345_v32, %v10063_v55  ;;  %v347_v37 = vpop.f32.mrb[3].mxu0  ;;  %v6542_v38 = vpop.f32.mrb[3].mxu1  ;;  %v417_v53 = vadd.f32 %v416_v34, %v10069_v27  ;;  %v454_v32 = vunpack.c.h.bf16 %v5779_v30 }
 0x200   :  { %v348_v41 = vadd.f32 %v347_v37, %v10065_v57 }
 0x201   :  { %v420_v42 = vadd.f32 %v346_v36, %v276_v28 }
 0x202   :  { %v427_v46 = vadd.f32 %v348_v41, %v277_v40 }
 0x203   :  { %v5776_v44 = vmul.f32 -1.442695, %v420_v42 }
 0x204   :  { %v5777_v15 = vmul.f32 -1.442695, %v427_v46  ;;  %v10207_v46 = vld [vmem:[%s11632_s1 + $0x20] ss:$12 sps:$4 sm:$0xff]  }
 0x205   :  { %9402 = vpow2.f32 %v5776_v44 }
 0x206   :  { %9404 = vpow2.f32 %v5777_v15 }
 0x20f   :  { %v9403_v47 = vpop.eup %9402 }
 0x210   :  { %v424_v48 = vadd.f32 1.0, %v9403_v47  ;;  %v9405_v50 = vpop.eup %9404  ;;  %v455_v47 = vunpack.c.l.bf16 %v10207_v46 }
 0x211   :  { %v431_v51 = vadd.f32 1.0, %v9405_v50 }
 0x212   :  { %9406 = vrcp.f32 %v424_v48 }
 0x213   :  { %9408 = vrcp.f32 %v431_v51 }
 0x21c   :  { %v9407_v58 = vpop.eup %9406 }
 0x21d   :  { %v434_v59 = vmul.f32 %v9407_v58, %v417_v53  ;;  %v9409_v62 = vpop.eup %9408 }
 0x21e   :  { %v437_v63 = vsub.f32 1.0, %v9409_v62  ;;  %v439_v5 = vmul.f32 %v9409_v62, %v10080_v52 }
 0x21f   :  { %v435_v61 = vadd.f32 %v434_v59, %v278_v21 }
 0x221   :  { %9410 = vtanh.f32 %v435_v61  ;;  %v623_v61 = vpop.permute.xlu1 %622 }
 0x222   :  { %vm624_vm5 = vcmp.eq.s32.totalorder %v623_v61, 1 }
 0x22b   :  { %v9411_v1 = vpop.eup %9410 }
 0x22c   :  { %v438_v3 = vmul.f32 %v9411_v1, %v437_v63 }
 0x22e   :  { %v440_v12 = vadd.f32 %v439_v5, %v438_v3  ;;  %v5784_v5 = vld [vmem:[%s11632_s1 + $0x24] sm:$0xff] }
 0x22f   :  { %v630_v7 = vunpack.c.l.bf16 %v5784_v5 }
 0x230   :  { %v10160_v14 = vsel %vm447_vm4, %v440_v12, %v10080_v52  ;;  %v453_v52 = vunpack.c.l.bf16 %v5779_v30 }
 0x231   :  { %521 = vmatmul.mubr.f32.vlgmr.msra.gmra.mrb[4].mxu0 %v10160_v14  ;;  %6576 = vmatmul.mubr.f32.vlgmr.msra.gmra.mrb[4].mxu1 %v10160_v14 }
 0x232   :  { %7764 = vmatpush1.bf16.msra.mxu0 %v9772_v10  ;;  %7795 = vmatpush3.bf16.msra.mxu1 %v9835_v31 }
 0x233   :  { %7766 = vmatprep.subr.bf16.mxu0 %v9774_v11  ;;  %7796 = vmatprep.subr.bf16.mxu1 %v9713_v8 }
 0x234   :  { %697 = vmatprep.mubr.f32.mxu0 %v9714_v9  ;;  %6610 = vmatprep.mubr.msk.f32.mxu1 %vm9715_vm0, %v9714_v9 }
 0x236   :  { %7768 = vmatpush1.bf16.msra.mxu0 %v9794_v17  ;;  %7798 = vmatpush3.bf16.msra.mxu1 %v9859_v39 }
 0x237   :  { %7770 = vmatprep.subr.bf16.mxu0 %v9797_v18  ;;  %7799 = vmatprep.subr.bf16.mxu1 %v9713_v8 }
 0x23a   :  { %7772 = vmatpush1.bf16.msra.mxu0 %v9812_v23  ;;  %7801 = vmatpush3.bf16.msra.mxu1 %v9892_v49 }
 0x23b   :  { %7774 = vmatprep.subr.bf16.mxu0 %v9815_v24  ;;  %7802 = vmatprep.subr.bf16.mxu1 %v9713_v8 }
 0x23e   :  { %7776 = vmatpush1.bf16.msra.mxu0 %v9841_v33  ;;  %7804 = vmatpush3.bf16.msra.mxu1 %v9924_v60 }
 0x23f   :  { %7778 = vmatprep.subr.bf16.mxu0 %v9847_v35  ;;  %7805 = vmatprep.subr.bf16.mxu1 %v9713_v8 }
 0x242   :  { %7780 = vmatpush1.bf16.msra.mxu0 %v9872_v43  ;;  %7807 = vmatpush3.bf16.msra.mxu1 %v9951_v6 }
 0x243   :  { %7782 = vmatprep.subr.bf16.mxu0 %v9880_v45  ;;  %7808 = vmatprep.subr.bf16.mxu1 %v9713_v8 }
 0x246   :  { %7784 = vmatpush1.bf16.msra.mxu0 %v9908_v54  ;;  %7810 = vmatpush3.bf16.msra.mxu1 %v9967_v16 }
 0x247   :  { %7786 = vmatprep.subr.bf16.mxu0 %v9912_v56  ;;  %7811 = vmatprep.subr.bf16.mxu1 %v9713_v8 }
 0x24a   :  { %7788 = vmatpush1.bf16.msra.mxu0 %v9938_v0  ;;  %7813 = vmatpush3.bf16.msra.mxu1 %v9982_v25 }
 0x24b   :  { %7790 = vmatprep.subr.bf16.mxu0 %v9942_v2  ;;  %7814 = vmatprep.subr.bf16.mxu1 %v9713_v8 }
 0x24e   :  { %7792 = vmatpush1.bf16.msra.mxu0 %v9962_v13  ;;  %7816 = vmatpush3.bf16.msra.mxu1 %v9998_v29 }
 0x24f   :  { %7818 = vmatprep.subr.bf16.mxu0 %v9759_v4  ;;  %7849 = vmatprep.subr.bf16.mxu1 %v9713_v8 }
 0x304   :  { %v522_v19 = vpop.f32.mrb[4].mxu0  ;;  %v593_v20 = vpop.f32.mrb[4].mxu1 }
 0x305   :  { %v523_v22 = vadd.f32 %v522_v19, %v10063_v55  ;;  %v524_v26 = vpop.f32.mrb[5].mxu0  ;;  %v6577_v28 = vpop.f32.mrb[5].mxu1  ;;  %v594_v48 = vadd.f32 %v593_v20, %v10069_v27  ;;  %v631_v20 = vunpack.c.h.bf16 %v5784_v5 }
 0x306   :  { %v525_v34 = vadd.f32 %v524_v26, %v10065_v57 }
 0x307   :  { %v597_v36 = vadd.f32 %v523_v22, %v453_v52 }
 0x308   :  { %v604_v38 = vadd.f32 %v525_v34, %v454_v32 }
 0x309   :  { %v5781_v37 = vmul.f32 -1.442695, %v597_v36 }
 0x30a   :  { %v5782_v40 = vmul.f32 -1.442695, %v604_v38 }
 0x30b   :  { %9412 = vpow2.f32 %v5781_v37 }
 0x30c   :  { %9414 = vpow2.f32 %v5782_v40 }
 0x315   :  { %v9413_v41 = vpop.eup %9412 }
 0x316   :  { %v601_v42 = vadd.f32 1.0, %v9413_v41  ;;  %v9415_v44 = vpop.eup %9414  ;;  %v632_v41 = vunpack.c.h.bf16 %v10207_v46  ;;  %v5789_v46 = vld [vmem:[%s11632_s1 + $0x30] sm:$0xff] }
 0x317   :  { %v608_v15 = vadd.f32 1.0, %v9415_v44 }
 0x318   :  { %9416 = vrcp.f32 %v601_v42 }
 0x319   :  { %9418 = vrcp.f32 %v608_v15 }
 0x322   :  { %v9417_v50 = vpop.eup %9416 }
 0x323   :  { %v611_v51 = vmul.f32 %v9417_v50, %v594_v48  ;;  %v9419_v53 = vpop.eup %9418 }
 0x324   :  { %v614_v58 = vsub.f32 1.0, %v9419_v53  ;;  %v616_v63 = vmul.f32 %v9419_v53, %v10160_v14 }
 0x325   :  { %v612_v21 = vadd.f32 %v611_v51, %v455_v47 }
 0x327   :  { %9420 = vtanh.f32 %v612_v21 }
 0x331   :  { %v9421_v59 = vpop.eup %9420 }
 0x332   :  { %v615_v62 = vmul.f32 %v9421_v59, %v614_v58  ;;  %v800_v58 = vpop.permute.xlu1 %799 }
 0x333   :  { %vm801_vm6 = vcmp.eq.s32.totalorder %v800_v58, 1 }
 0x334   :  { %v617_v1 = vadd.f32 %v616_v63, %v615_v62  ;;  %v807_v62 = vunpack.c.l.bf16 %v5789_v46 }
 0x336   :  { %v10213_v3 = vsel %vm624_vm5, %v617_v1, %v10160_v14 }
 0x337   :  { %698 = vmatmul.mubr.f32.vlgmr.msra.gmra.mrb[6].mxu0 %v10213_v3  ;;  %6611 = vmatmul.mubr.f32.vlgmr.msra.gmra.mrb[6].mxu1 %v10213_v3 }
 0x338   :  { %7820 = vmatpush1.bf16.msra.mxu0 %v9772_v10  ;;  %7851 = vmatpush3.bf16.msra.mxu1 %v9835_v31 }
 0x339   :  { %7822 = vmatprep.subr.bf16.mxu0 %v9774_v11  ;;  %7852 = vmatprep.subr.bf16.mxu1 %v9713_v8 }
 0x33a   :  { %874 = vmatprep.mubr.f32.mxu0 %v9714_v9  ;;  %6645 = vmatprep.mubr.msk.f32.mxu1 %vm9715_vm0, %v9714_v9 }
 0x33c   :  { %7824 = vmatpush1.bf16.msra.mxu0 %v9794_v17  ;;  %7854 = vmatpush3.bf16.msra.mxu1 %v9859_v39 }
 0x33d   :  { %7826 = vmatprep.subr.bf16.mxu0 %v9797_v18  ;;  %7855 = vmatprep.subr.bf16.mxu1 %v9713_v8 }
 0x340   :  { %7828 = vmatpush1.bf16.msra.mxu0 %v9812_v23  ;;  %7857 = vmatpush3.bf16.msra.mxu1 %v9892_v49 }
 0x341   :  { %7830 = vmatprep.subr.bf16.mxu0 %v9815_v24  ;;  %7858 = vmatprep.subr.bf16.mxu1 %v9713_v8 }
 0x344   :  { %7832 = vmatpush1.bf16.msra.mxu0 %v9841_v33  ;;  %7860 = vmatpush3.bf16.msra.mxu1 %v9924_v60 }
 0x345   :  { %7834 = vmatprep.subr.bf16.mxu0 %v9847_v35  ;;  %7861 = vmatprep.subr.bf16.mxu1 %v9713_v8 }
 0x348   :  { %7836 = vmatpush1.bf16.msra.mxu0 %v9872_v43  ;;  %7863 = vmatpush3.bf16.msra.mxu1 %v9951_v6 }
 0x349   :  { %7838 = vmatprep.subr.bf16.mxu0 %v9880_v45  ;;  %7864 = vmatprep.subr.bf16.mxu1 %v9713_v8 }
 0x34c   :  { %7840 = vmatpush1.bf16.msra.mxu0 %v9908_v54  ;;  %7866 = vmatpush3.bf16.msra.mxu1 %v9967_v16 }
 0x34d   :  { %7842 = vmatprep.subr.bf16.mxu0 %v9912_v56  ;;  %7867 = vmatprep.subr.bf16.mxu1 %v9713_v8 }
 0x350   :  { %7844 = vmatpush1.bf16.msra.mxu0 %v9938_v0  ;;  %7869 = vmatpush3.bf16.msra.mxu1 %v9982_v25 }
 0x351   :  { %7846 = vmatprep.subr.bf16.mxu0 %v9942_v2  ;;  %7870 = vmatprep.subr.bf16.mxu1 %v9713_v8 }
 0x354   :  { %7848 = vmatpush1.bf16.msra.mxu0 %v9962_v13  ;;  %7872 = vmatpush3.bf16.msra.mxu1 %v9998_v29 }
 0x355   :  { %7874 = vmatprep.subr.bf16.mxu0 %v9759_v4  ;;  %7905 = vmatprep.subr.bf16.mxu1 %v9713_v8 }
 0x40a   :  { %v699_v12 = vpop.f32.mrb[6].mxu0  ;;  %v770_v14 = vpop.f32.mrb[6].mxu1 }
 0x40b   :  { %v700_v30 = vadd.f32 %v699_v12, %v10063_v55  ;;  %v701_v52 = vpop.f32.mrb[7].mxu0  ;;  %v6612_v19 = vpop.f32.mrb[7].mxu1  ;;  %v771_v42 = vadd.f32 %v770_v14, %v10069_v27  ;;  %v808_v12 = vunpack.c.h.bf16 %v5789_v46 }
 0x40c   :  { %v702_v22 = vadd.f32 %v701_v52, %v10065_v57 }
 0x40d   :  { %v774_v26 = vadd.f32 %v700_v30, %v630_v7 }
 0x40e   :  { %v781_v32 = vadd.f32 %v702_v22, %v631_v20 }
 0x40f   :  { %v5786_v28 = vmul.f32 -1.442695, %v774_v26 }
 0x410   :  { %v5787_v34 = vmul.f32 -1.442695, %v781_v32  ;;  %v10308_v32 = vld [vmem:[%s11632_s1 + $0x38] ss:$12 sps:$4 sm:$0xff]  }
 0x411   :  { %9422 = vpow2.f32 %v5786_v28 }
 0x412   :  { %9424 = vpow2.f32 %v5787_v34 }
 0x41b   :  { %v9423_v36 = vpop.eup %9422 }
 0x41c   :  { %v778_v37 = vadd.f32 1.0, %v9423_v36  ;;  %v9425_v38 = vpop.eup %9424  ;;  %v809_v36 = vunpack.c.l.bf16 %v10308_v32 }
 0x41d   :  { %v785_v40 = vadd.f32 1.0, %v9425_v38 }
 0x41e   :  { %9426 = vrcp.f32 %v778_v37 }
 0x41f   :  { %9428 = vrcp.f32 %v785_v40 }
 0x428   :  { %v9427_v44 = vpop.eup %9426 }
 0x429   :  { %v788_v15 = vmul.f32 %v9427_v44, %v771_v42  ;;  %v9429_v48 = vpop.eup %9428 }
 0x42a   :  { %v791_v50 = vsub.f32 1.0, %v9429_v48  ;;  %v793_v53 = vmul.f32 %v9429_v48, %v10213_v3 }
 0x42b   :  { %v789_v47 = vadd.f32 %v788_v15, %v632_v41 }
 0x42d   :  { %9430 = vtanh.f32 %v789_v47 }
 0x437   :  { %v9431_v51 = vpop.eup %9430 }
 0x438   :  { %v792_v21 = vmul.f32 %v9431_v51, %v791_v50  ;;  %v977_v50 = vpop.permute.xlu0 %976 }
 0x439   :  { %vm978_vm7 = vcmp.eq.s32.totalorder %v977_v50, 1 }
 0x43a   :  { %v794_v59 = vadd.f32 %v793_v53, %v792_v21  ;;  %v5794_v53 = vld [vmem:[%s11632_s1 + $0x3c] sm:$0xff] }
 0x43b   :  { %v984_v58 = vunpack.c.l.bf16 %v5794_v53 }
 0x43c   :  { %v10261_v61 = vsel %vm801_vm6, %v794_v59, %v10213_v3 }
 0x43d   :  { %875 = vmatmul.mubr.f32.vlgmr.msra.gmra.mrb[8].mxu0 %v10261_v61  ;;  %6646 = vmatmul.mubr.f32.vlgmr.msra.gmra.mrb[8].mxu1 %v10261_v61 }
 0x43e   :  { %7876 = vmatpush1.bf16.msra.mxu0 %v9772_v10  ;;  %7907 = vmatpush3.bf16.msra.mxu1 %v9835_v31 }
 0x43f   :  { %7878 = vmatprep.subr.bf16.mxu0 %v9774_v11  ;;  %7908 = vmatprep.subr.bf16.mxu1 %v9713_v8 }
 0x440   :  { %1051 = vmatprep.mubr.f32.mxu0 %v9714_v9  ;;  %6680 = vmatprep.mubr.msk.f32.mxu1 %vm9715_vm0, %v9714_v9 }
 0x442   :  { %7880 = vmatpush1.bf16.msra.mxu0 %v9794_v17  ;;  %7910 = vmatpush3.bf16.msra.mxu1 %v9859_v39 }
 0x443   :  { %7882 = vmatprep.subr.bf16.mxu0 %v9797_v18  ;;  %7911 = vmatprep.subr.bf16.mxu1 %v9713_v8 }
 0x446   :  { %7884 = vmatpush1.bf16.msra.mxu0 %v9812_v23  ;;  %7913 = vmatpush3.bf16.msra.mxu1 %v9892_v49 }
 0x447   :  { %7886 = vmatprep.subr.bf16.mxu0 %v9815_v24  ;;  %7914 = vmatprep.subr.bf16.mxu1 %v9713_v8 }
 0x44a   :  { %7888 = vmatpush1.bf16.msra.mxu0 %v9841_v33  ;;  %7916 = vmatpush3.bf16.msra.mxu1 %v9924_v60 }
 0x44b   :  { %7890 = vmatprep.subr.bf16.mxu0 %v9847_v35  ;;  %7917 = vmatprep.subr.bf16.mxu1 %v9713_v8 }
 0x44e   :  { %7892 = vmatpush1.bf16.msra.mxu0 %v9872_v43  ;;  %7919 = vmatpush3.bf16.msra.mxu1 %v9951_v6 }
 0x44f   :  { %7894 = vmatprep.subr.bf16.mxu0 %v9880_v45  ;;  %7920 = vmatprep.subr.bf16.mxu1 %v9713_v8 }
 0x452   :  { %7896 = vmatpush1.bf16.msra.mxu0 %v9908_v54  ;;  %7922 = vmatpush3.bf16.msra.mxu1 %v9967_v16 }
 0x453   :  { %7898 = vmatprep.subr.bf16.mxu0 %v9912_v56  ;;  %7923 = vmatprep.subr.bf16.mxu1 %v9713_v8 }
 0x456   :  { %7900 = vmatpush1.bf16.msra.mxu0 %v9938_v0  ;;  %7925 = vmatpush3.bf16.msra.mxu1 %v9982_v25 }
 0x457   :  { %7902 = vmatprep.subr.bf16.mxu0 %v9942_v2  ;;  %7926 = vmatprep.subr.bf16.mxu1 %v9713_v8 }
 0x45a   :  { %7904 = vmatpush1.bf16.msra.mxu0 %v9962_v13  ;;  %7928 = vmatpush3.bf16.msra.mxu1 %v9998_v29 }
 0x45b   :  { %7930 = vmatprep.subr.bf16.mxu0 %v9759_v4  ;;  %7961 = vmatprep.subr.bf16.mxu1 %v9713_v8 }
 0x510   :  { %v876_v63 = vpop.f32.mrb[8].mxu0  ;;  %v947_v1 = vpop.f32.mrb[8].mxu1 }
 0x511   :  { %v877_v3 = vadd.f32 %v876_v63, %v10063_v55  ;;  %v878_v5 = vpop.f32.mrb[9].mxu0  ;;  %v6647_v7 = vpop.f32.mrb[9].mxu1  ;;  %v948_v37 = vadd.f32 %v947_v1, %v10069_v27  ;;  %v985_v1 = vunpack.c.h.bf16 %v5794_v53 }
 0x512   :  { %v879_v14 = vadd.f32 %v878_v5, %v10065_v57 }
 0x513   :  { %v951_v30 = vadd.f32 %v877_v3, %v807_v62 }
 0x514   :  { %v958_v19 = vadd.f32 %v879_v14, %v808_v12 }
 0x515   :  { %v5791_v52 = vmul.f32 -1.442695, %v951_v30 }
 0x516   :  { %v5792_v20 = vmul.f32 -1.442695, %v958_v19 }
 0x517   :  { %9432 = vpow2.f32 %v5791_v52 }
 0x518   :  { %9434 = vpow2.f32 %v5792_v20 }
 0x521   :  { %v9433_v22 = vpop.eup %9432 }
 0x522   :  { %v955_v26 = vadd.f32 1.0, %v9433_v22  ;;  %v9435_v28 = vpop.eup %9434  ;;  %v986_v22 = vunpack.c.h.bf16 %v10308_v32  ;;  %v5799_v32 = vld [vmem:[%s11632_s1 + $0x48] sm:$0xff] }
 0x523   :  { %v962_v34 = vadd.f32 1.0, %v9435_v28 }
 0x524   :  { %9436 = vrcp.f32 %v955_v26 }
 0x525   :  { %9438 = vrcp.f32 %v962_v34 }
 0x52e   :  { %v9437_v38 = vpop.eup %9436 }
 0x52f   :  { %v965_v40 = vmul.f32 %v9437_v38, %v948_v37  ;;  %v9439_v42 = vpop.eup %9438 }
 0x530   :  { %v968_v44 = vsub.f32 1.0, %v9439_v42  ;;  %v970_v48 = vmul.f32 %v9439_v42, %v10261_v61 }
 0x531   :  { %v966_v41 = vadd.f32 %v965_v40, %v809_v36 }
 0x533   :  { %9440 = vtanh.f32 %v966_v41 }
 0x53d   :  { %v9441_v15 = vpop.eup %9440 }
 0x53e   :  { %v969_v47 = vmul.f32 %v9441_v15, %v968_v44  ;;  %v1154_v44 = vpop.permute.xlu1 %1153 }
 0x53f   :  { %vm1155_vm8 = vcmp.eq.s32.totalorder %v1154_v44, 1 }
 0x540   :  { %v971_v51 = vadd.f32 %v970_v48, %v969_v47  ;;  %v1161_v48 = vunpack.c.l.bf16 %v5799_v32 }
 0x542   :  { %v10314_v21 = vsel %vm978_vm7, %v971_v51, %v10261_v61 }
 0x543   :  { %1052 = vmatmul.mubr.f32.vlgmr.msra.gmra.mrb[10].mxu0 %v10314_v21  ;;  %6681 = vmatmul.mubr.f32.vlgmr.msra.gmra.mrb[10].mxu1 %v10314_v21 }
 0x544   :  { %7932 = vmatpush1.bf16.msra.mxu0 %v9772_v10  ;;  %7963 = vmatpush3.bf16.msra.mxu1 %v9835_v31 }
 0x545   :  { %7934 = vmatprep.subr.bf16.mxu0 %v9774_v11  ;;  %7964 = vmatprep.subr.bf16.mxu1 %v9713_v8 }
 0x546   :  { %1228 = vmatprep.mubr.f32.mxu0 %v9714_v9  ;;  %6715 = vmatprep.mubr.msk.f32.mxu1 %vm9715_vm0, %v9714_v9 }
 0x548   :  { %7936 = vmatpush1.bf16.msra.mxu0 %v9794_v17  ;;  %7966 = vmatpush3.bf16.msra.mxu1 %v9859_v39 }
 0x549   :  { %7938 = vmatprep.subr.bf16.mxu0 %v9797_v18  ;;  %7967 = vmatprep.subr.bf16.mxu1 %v9713_v8 }
 0x54c   :  { %7940 = vmatpush1.bf16.msra.mxu0 %v9812_v23  ;;  %7969 = vmatpush3.bf16.msra.mxu1 %v9892_v49 }
 0x54d   :  { %7942 = vmatprep.subr.bf16.mxu0 %v9815_v24  ;;  %7970 = vmatprep.subr.bf16.mxu1 %v9713_v8 }
 0x550   :  { %7944 = vmatpush1.bf16.msra.mxu0 %v9841_v33  ;;  %7972 = vmatpush3.bf16.msra.mxu1 %v9924_v60 }
 0x551   :  { %7946 = vmatprep.subr.bf16.mxu0 %v9847_v35  ;;  %7973 = vmatprep.subr.bf16.mxu1 %v9713_v8 }
 0x554   :  { %7948 = vmatpush1.bf16.msra.mxu0 %v9872_v43  ;;  %7975 = vmatpush3.bf16.msra.mxu1 %v9951_v6 }
 0x555   :  { %7950 = vmatprep.subr.bf16.mxu0 %v9880_v45  ;;  %7976 = vmatprep.subr.bf16.mxu1 %v9713_v8 }
 0x558   :  { %7952 = vmatpush1.bf16.msra.mxu0 %v9908_v54  ;;  %7978 = vmatpush3.bf16.msra.mxu1 %v9967_v16 }
 0x559   :  { %7954 = vmatprep.subr.bf16.mxu0 %v9912_v56  ;;  %7979 = vmatprep.subr.bf16.mxu1 %v9713_v8 }
 0x55c   :  { %7956 = vmatpush1.bf16.msra.mxu0 %v9938_v0  ;;  %7981 = vmatpush3.bf16.msra.mxu1 %v9982_v25 }
 0x55d   :  { %7958 = vmatprep.subr.bf16.mxu0 %v9942_v2  ;;  %7982 = vmatprep.subr.bf16.mxu1 %v9713_v8 }
 0x560   :  { %7960 = vmatpush1.bf16.msra.mxu0 %v9962_v13  ;;  %7984 = vmatpush3.bf16.msra.mxu1 %v9998_v29 }
 0x561   :  { %7986 = vmatprep.subr.bf16.mxu0 %v9759_v4  ;;  %8017 = vmatprep.subr.bf16.mxu1 %v9713_v8 }
 0x616   :  { %v1053_v59 = vpop.f32.mrb[10].mxu0  ;;  %v1124_v61 = vpop.f32.mrb[10].mxu1 }
 0x617   :  { %v1054_v46 = vadd.f32 %v1053_v59, %v10063_v55  ;;  %v1055_v62 = vpop.f32.mrb[11].mxu0  ;;  %v6682_v63 = vpop.f32.mrb[11].mxu1  ;;  %v1125_v26 = vadd.f32 %v1124_v61, %v10069_v27  ;;  %v1162_v59 = vunpack.c.h.bf16 %v5799_v32 }
 0x618   :  { %v1056_v3 = vadd.f32 %v1055_v62, %v10065_v57 }
 0x619   :  { %v1128_v5 = vadd.f32 %v1054_v46, %v984_v58 }
 0x61a   :  { %v1135_v12 = vadd.f32 %v1056_v3, %v985_v1 }
 0x61b   :  { %v5796_v7 = vmul.f32 -1.442695, %v1128_v5 }
 0x61c   :  { %v5797_v14 = vmul.f32 -1.442695, %v1135_v12  ;;  %v10409_v12 = vld [vmem:[%s11632_s1 + $0x50] ss:$12 sps:$4 sm:$0xff]  }
 0x61d   :  { %9442 = vpow2.f32 %v5796_v7 }
 0x61e   :  { %9444 = vpow2.f32 %v5797_v14 }
 0x627   :  { %v9443_v30 = vpop.eup %9442 }
 0x628   :  { %v1132_v52 = vadd.f32 1.0, %v9443_v30  ;;  %v9445_v19 = vpop.eup %9444  ;;  %v1163_v30 = vunpack.c.l.bf16 %v10409_v12 }
 0x629   :  { %v1139_v20 = vadd.f32 1.0, %v9445_v19 }
 0x62a   :  { %9446 = vrcp.f32 %v1132_v52 }
 0x62b   :  { %9448 = vrcp.f32 %v1139_v20 }
 0x634   :  { %v9447_v28 = vpop.eup %9446 }
 0x635   :  { %v1142_v34 = vmul.f32 %v9447_v28, %v1125_v26  ;;  %v9449_v37 = vpop.eup %9448 }
 0x636   :  { %v1145_v38 = vsub.f32 1.0, %v9449_v37  ;;  %v1147_v42 = vmul.f32 %v9449_v37, %v10314_v21 }
 0x637   :  { %v1143_v36 = vadd.f32 %v1142_v34, %v986_v22 }
 0x639   :  { %9450 = vtanh.f32 %v1143_v36 }
 0x643   :  { %v9451_v40 = vpop.eup %9450 }
 0x644   :  { %v1146_v41 = vmul.f32 %v9451_v40, %v1145_v38  ;;  %v1331_v38 = vpop.permute.xlu0 %1330 }
 0x645   :  { %vm1332_vm9 = vcmp.eq.s32.totalorder %v1331_v38, 1 }
 0x646   :  { %v1148_v15 = vadd.f32 %v1147_v42, %v1146_v41  ;;  %v5804_v42 = vld [vmem:[%s11632_s1 + $0x54] sm:$0xff] }
 0x647   :  { %v1338_v44 = vunpack.c.l.bf16 %v5804_v42 }
 0x648   :  { %v10362_v47 = vsel %vm1155_vm8, %v1148_v15, %v10314_v21 }
 0x649   :  { %1229 = vmatmul.mubr.f32.vlgmr.msra.gmra.mrb[12].mxu0 %v10362_v47  ;;  %6716 = vmatmul.mubr.f32.vlgmr.msra.gmra.mrb[12].mxu1 %v10362_v47 }
 0x64a   :  { %7988 = vmatpush1.bf16.msra.mxu0 %v9772_v10  ;;  %8019 = vmatpush3.bf16.msra.mxu1 %v9835_v31 }
 0x64b   :  { %7990 = vmatprep.subr.bf16.mxu0 %v9774_v11  ;;  %8020 = vmatprep.subr.bf16.mxu1 %v9713_v8 }
 0x64c   :  { %1405 = vmatprep.mubr.f32.mxu0 %v9714_v9  ;;  %6750 = vmatprep.mubr.msk.f32.mxu1 %vm9715_vm0, %v9714_v9 }
 0x64e   :  { %7992 = vmatpush1.bf16.msra.mxu0 %v9794_v17  ;;  %8022 = vmatpush3.bf16.msra.mxu1 %v9859_v39 }
 0x64f   :  { %7994 = vmatprep.subr.bf16.mxu0 %v9797_v18  ;;  %8023 = vmatprep.subr.bf16.mxu1 %v9713_v8 }
 0x652   :  { %7996 = vmatpush1.bf16.msra.mxu0 %v9812_v23  ;;  %8025 = vmatpush3.bf16.msra.mxu1 %v9892_v49 }
 0x653   :  { %7998 = vmatprep.subr.bf16.mxu0 %v9815_v24  ;;  %8026 = vmatprep.subr.bf16.mxu1 %v9713_v8 }
 0x656   :  { %8000 = vmatpush1.bf16.msra.mxu0 %v9841_v33  ;;  %8028 = vmatpush3.bf16.msra.mxu1 %v9924_v60 }
 0x657   :  { %8002 = vmatprep.subr.bf16.mxu0 %v9847_v35  ;;  %8029 = vmatprep.subr.bf16.mxu1 %v9713_v8 }
 0x65a   :  { %8004 = vmatpush1.bf16.msra.mxu0 %v9872_v43  ;;  %8031 = vmatpush3.bf16.msra.mxu1 %v9951_v6 }
 0x65b   :  { %8006 = vmatprep.subr.bf16.mxu0 %v9880_v45  ;;  %8032 = vmatprep.subr.bf16.mxu1 %v9713_v8 }
 0x65e   :  { %8008 = vmatpush1.bf16.msra.mxu0 %v9908_v54  ;;  %8034 = vmatpush3.bf16.msra.mxu1 %v9967_v16 }
 0x65f   :  { %8010 = vmatprep.subr.bf16.mxu0 %v9912_v56  ;;  %8035 = vmatprep.subr.bf16.mxu1 %v9713_v8 }
 0x662   :  { %8012 = vmatpush1.bf16.msra.mxu0 %v9938_v0  ;;  %8037 = vmatpush3.bf16.msra.mxu1 %v9982_v25 }
 0x663   :  { %8014 = vmatprep.subr.bf16.mxu0 %v9942_v2  ;;  %8038 = vmatprep.subr.bf16.mxu1 %v9713_v8 }
 0x666   :  { %8016 = vmatpush1.bf16.msra.mxu0 %v9962_v13  ;;  %8040 = vmatpush3.bf16.msra.mxu1 %v9998_v29 }
 0x667   :  { %8042 = vmatprep.subr.bf16.mxu0 %v9759_v4  ;;  %8073 = vmatprep.subr.bf16.mxu1 %v9713_v8 }
 0x71c   :  { %v1230_v50 = vpop.f32.mrb[12].mxu0  ;;  %v1301_v51 = vpop.f32.mrb[12].mxu1 }
 0x71d   :  { %v1231_v21 = vadd.f32 %v1230_v50, %v10063_v55  ;;  %v1232_v53 = vpop.f32.mrb[13].mxu0  ;;  %v6717_v58 = vpop.f32.mrb[13].mxu1  ;;  %v1302_v52 = vadd.f32 %v1301_v51, %v10069_v27  ;;  %v1339_v51 = vunpack.c.h.bf16 %v5804_v42 }
 0x71e   :  { %v1233_v61 = vadd.f32 %v1232_v53, %v10065_v57 }
 0x71f   :  { %v1305_v46 = vadd.f32 %v1231_v21, %v1161_v48 }
 0x720   :  { %v1312_v63 = vadd.f32 %v1233_v61, %v1162_v59 }
 0x721   :  { %v5801_v62 = vmul.f32 -1.442695, %v1305_v46 }
 0x722   :  { %v5802_v1 = vmul.f32 -1.442695, %v1312_v63 }
 0x723   :  { %9452 = vpow2.f32 %v5801_v62 }
 0x724   :  { %9454 = vpow2.f32 %v5802_v1 }
 0x72d   :  { %v9453_v3 = vpop.eup %9452 }
 0x72e   :  { %v1309_v5 = vadd.f32 1.0, %v9453_v3  ;;  %v9455_v7 = vpop.eup %9454  ;;  %v1340_v3 = vunpack.c.h.bf16 %v10409_v12  ;;  %v5809_v12 = vld [vmem:[%s11632_s1 + $0x60] sm:$0xff] }
 0x72f   :  { %v1316_v14 = vadd.f32 1.0, %v9455_v7 }
 0x730   :  { %9456 = vrcp.f32 %v1309_v5 }
 0x731   :  { %9458 = vrcp.f32 %v1316_v14 }
 0x73a   :  { %v9457_v19 = vpop.eup %9456 }
 0x73b   :  { %v1319_v20 = vmul.f32 %v9457_v19, %v1302_v52  ;;  %v9459_v26 = vpop.eup %9458 }
 0x73c   :  { %v1322_v28 = vsub.f32 1.0, %v9459_v26  ;;  %v1324_v37 = vmul.f32 %v9459_v26, %v10362_v47 }
 0x73d   :  { %v1320_v22 = vadd.f32 %v1319_v20, %v1163_v30 }
 0x73f   :  { %9460 = vtanh.f32 %v1320_v22 }
 0x749   :  { %v9461_v34 = vpop.eup %9460 }
 0x74a   :  { %v1323_v36 = vmul.f32 %v9461_v34, %v1322_v28  ;;  %v1508_v28 = vpop.permute.xlu1 %1507 }
 0x74b   :  { %vm1509_vm10 = vcmp.eq.s32.totalorder %v1508_v28, 1 }
 0x74c   :  { %v1325_v40 = vadd.f32 %v1324_v37, %v1323_v36  ;;  %v1515_v37 = vunpack.c.l.bf16 %v5809_v12 }
 0x74e   :  { %v10415_v41 = vsel %vm1332_vm9, %v1325_v40, %v10362_v47 }
 0x74f   :  { %1406 = vmatmul.mubr.f32.vlgmr.msra.gmra.mrb[14].mxu0 %v10415_v41  ;;  %6751 = vmatmul.mubr.f32.vlgmr.msra.gmra.mrb[14].mxu1 %v10415_v41 }
 0x750   :  { %8044 = vmatpush1.bf16.msra.mxu0 %v9772_v10  ;;  %8075 = vmatpush3.bf16.msra.mxu1 %v9835_v31 }
 0x751   :  { %8046 = vmatprep.subr.bf16.mxu0 %v9774_v11  ;;  %8076 = vmatprep.subr.bf16.mxu1 %v9713_v8 }
 0x752   :  { %1582 = vmatprep.mubr.f32.mxu0 %v9714_v9  ;;  %6785 = vmatprep.mubr.msk.f32.mxu1 %vm9715_vm0, %v9714_v9 }
 0x754   :  { %8048 = vmatpush1.bf16.msra.mxu0 %v9794_v17  ;;  %8078 = vmatpush3.bf16.msra.mxu1 %v9859_v39 }
 0x755   :  { %8050 = vmatprep.subr.bf16.mxu0 %v9797_v18  ;;  %8079 = vmatprep.subr.bf16.mxu1 %v9713_v8 }
 0x758   :  { %8052 = vmatpush1.bf16.msra.mxu0 %v9812_v23  ;;  %8081 = vmatpush3.bf16.msra.mxu1 %v9892_v49 }
 0x759   :  { %8054 = vmatprep.subr.bf16.mxu0 %v9815_v24  ;;  %8082 = vmatprep.subr.bf16.mxu1 %v9713_v8 }
 0x75c   :  { %8056 = vmatpush1.bf16.msra.mxu0 %v9841_v33  ;;  %8084 = vmatpush3.bf16.msra.mxu1 %v9924_v60 }
 0x75d   :  { %8058 = vmatprep.subr.bf16.mxu0 %v9847_v35  ;;  %8085 = vmatprep.subr.bf16.mxu1 %v9713_v8 }
 0x760   :  { %8060 = vmatpush1.bf16.msra.mxu0 %v9872_v43  ;;  %8087 = vmatpush3.bf16.msra.mxu1 %v9951_v6 }
 0x761   :  { %8062 = vmatprep.subr.bf16.mxu0 %v9880_v45  ;;  %8088 = vmatprep.subr.bf16.mxu1 %v9713_v8 }
 0x764   :  { %8064 = vmatpush1.bf16.msra.mxu0 %v9908_v54  ;;  %8090 = vmatpush3.bf16.msra.mxu1 %v9967_v16 }
 0x765   :  { %8066 = vmatprep.subr.bf16.mxu0 %v9912_v56  ;;  %8091 = vmatprep.subr.bf16.mxu1 %v9713_v8 }
 0x768   :  { %8068 = vmatpush1.bf16.msra.mxu0 %v9938_v0  ;;  %8093 = vmatpush3.bf16.msra.mxu1 %v9982_v25 }
 0x769   :  { %8070 = vmatprep.subr.bf16.mxu0 %v9942_v2  ;;  %8094 = vmatprep.subr.bf16.mxu1 %v9713_v8 }
 0x76c   :  { %8072 = vmatpush1.bf16.msra.mxu0 %v9962_v13  ;;  %8096 = vmatpush3.bf16.msra.mxu1 %v9998_v29 }
 0x76d   :  { %8098 = vmatprep.subr.bf16.mxu0 %v9759_v4  ;;  %8129 = vmatprep.subr.bf16.mxu1 %v9713_v8 }
 0x822   :  { %v1407_v15 = vpop.f32.mrb[14].mxu0  ;;  %v1478_v47 = vpop.f32.mrb[14].mxu1 }
 0x823   :  { %v1408_v32 = vadd.f32 %v1407_v15, %v10063_v55  ;;  %v1409_v48 = vpop.f32.mrb[15].mxu0  ;;  %v6752_v50 = vpop.f32.mrb[15].mxu1  ;;  %v1479_v5 = vadd.f32 %v1478_v47, %v10069_v27  ;;  %v1516_v15 = vunpack.c.h.bf16 %v5809_v12 }
 0x824   :  { %v1410_v21 = vadd.f32 %v1409_v48, %v10065_v57 }
 0x825   :  { %v1482_v53 = vadd.f32 %v1408_v32, %v1338_v44 }
 0x826   :  { %v1489_v59 = vadd.f32 %v1410_v21, %v1339_v51 }
 0x827   :  { %v5806_v58 = vmul.f32 -1.442695, %v1482_v53 }
 0x828   :  { %v5807_v61 = vmul.f32 -1.442695, %v1489_v59  ;;  %v10510_v59 = vld [vmem:[%s11632_s1 + $0x68] ss:$12 sps:$4 sm:$0xff]  }
 0x829   :  { %9462 = vpow2.f32 %v5806_v58 }
 0x82a   :  { %9464 = vpow2.f32 %v5807_v61 }
 0x833   :  { %v9463_v46 = vpop.eup %9462 }
 0x834   :  { %v1486_v62 = vadd.f32 1.0, %v9463_v46  ;;  %v9465_v63 = vpop.eup %9464  ;;  %v1517_v46 = vunpack.c.l.bf16 %v10510_v59 }
 0x835   :  { %v1493_v1 = vadd.f32 1.0, %v9465_v63 }
 0x836   :  { %9466 = vrcp.f32 %v1486_v62 }
 0x837   :  { %9468 = vrcp.f32 %v1493_v1 }
 0x840   :  { %v9467_v7 = vpop.eup %9466 }
 0x841   :  { %v1496_v14 = vmul.f32 %v9467_v7, %v1479_v5  ;;  %v9469_v52 = vpop.eup %9468 }
 0x842   :  { %v1499_v19 = vsub.f32 1.0, %v9469_v52  ;;  %v1501_v26 = vmul.f32 %v9469_v52, %v10415_v41 }
 0x843   :  { %v1497_v30 = vadd.f32 %v1496_v14, %v1340_v3 }
 0x845   :  { %9470 = vtanh.f32 %v1497_v30 }
 0x84f   :  { %v9471_v20 = vpop.eup %9470 }
 0x850   :  { %v1500_v22 = vmul.f32 %v9471_v20, %v1499_v19  ;;  %v1685_v19 = vpop.permute.xlu0 %1684 }
 0x851   :  { %vm1686_vm11 = vcmp.eq.s32.totalorder %v1685_v19, 1 }
 0x852   :  { %v1502_v34 = vadd.f32 %v1501_v26, %v1500_v22  ;;  %v5814_v26 = vld [vmem:[%s11632_s1 + $0x6c] sm:$0xff] }
 0x853   :  { %v1692_v28 = vunpack.c.l.bf16 %v5814_v26 }
 0x854   :  { %v10463_v36 = vsel %vm1509_vm10, %v1502_v34, %v10415_v41 }
 0x855   :  { %1583 = vmatmul.mubr.f32.vlgmr.msra.gmra.mrb[16].mxu0 %v10463_v36  ;;  %6786 = vmatmul.mubr.f32.vlgmr.msra.gmra.mrb[16].mxu1 %v10463_v36 }
 0x856   :  { %8100 = vmatpush1.bf16.msra.mxu0 %v9772_v10  ;;  %8131 = vmatpush3.bf16.msra.mxu1 %v9835_v31 }
 0x857   :  { %8102 = vmatprep.subr.bf16.mxu0 %v9774_v11  ;;  %8132 = vmatprep.subr.bf16.mxu1 %v9713_v8 }
 0x858   :  { %1759 = vmatprep.mubr.f32.mxu0 %v9714_v9  ;;  %6820 = vmatprep.mubr.msk.f32.mxu1 %vm9715_vm0, %v9714_v9 }
 0x85a   :  { %8104 = vmatpush1.bf16.msra.mxu0 %v9794_v17  ;;  %8134 = vmatpush3.bf16.msra.mxu1 %v9859_v39 }
 0x85b   :  { %8106 = vmatprep.subr.bf16.mxu0 %v9797_v18  ;;  %8135 = vmatprep.subr.bf16.mxu1 %v9713_v8 }
 0x85e   :  { %8108 = vmatpush1.bf16.msra.mxu0 %v9812_v23  ;;  %8137 = vmatpush3.bf16.msra.mxu1 %v9892_v49 }
 0x85f   :  { %8110 = vmatprep.subr.bf16.mxu0 %v9815_v24  ;;  %8138 = vmatprep.subr.bf16.mxu1 %v9713_v8 }
 0x862   :  { %8112 = vmatpush1.bf16.msra.mxu0 %v9841_v33  ;;  %8140 = vmatpush3.bf16.msra.mxu1 %v9924_v60 }
 0x863   :  { %8114 = vmatprep.subr.bf16.mxu0 %v9847_v35  ;;  %8141 = vmatprep.subr.bf16.mxu1 %v9713_v8 }
 0x866   :  { %8116 = vmatpush1.bf16.msra.mxu0 %v9872_v43  ;;  %8143 = vmatpush3.bf16.msra.mxu1 %v9951_v6 }
 0x867   :  { %8118 = vmatprep.subr.bf16.mxu0 %v9880_v45  ;;  %8144 = vmatprep.subr.bf16.mxu1 %v9713_v8 }
 0x86a   :  { %8120 = vmatpush1.bf16.msra.mxu0 %v9908_v54  ;;  %8146 = vmatpush3.bf16.msra.mxu1 %v9967_v16 }
 0x86b   :  { %8122 = vmatprep.subr.bf16.mxu0 %v9912_v56  ;;  %8147 = vmatprep.subr.bf16.mxu1 %v9713_v8 }
 0x86e   :  { %8124 = vmatpush1.bf16.msra.mxu0 %v9938_v0  ;;  %8149 = vmatpush3.bf16.msra.mxu1 %v9982_v25 }
 0x86f   :  { %8126 = vmatprep.subr.bf16.mxu0 %v9942_v2  ;;  %8150 = vmatprep.subr.bf16.mxu1 %v9713_v8 }
 0x872   :  { %8128 = vmatpush1.bf16.msra.mxu0 %v9962_v13  ;;  %8152 = vmatpush3.bf16.msra.mxu1 %v9998_v29 }
 0x873   :  { %8154 = vmatprep.subr.bf16.mxu0 %v9759_v4  ;;  %8185 = vmatprep.subr.bf16.mxu1 %v9713_v8 }
 0x928   :  { %v1584_v38 = vpop.f32.mrb[16].mxu0  ;;  %v1655_v40 = vpop.f32.mrb[16].mxu1 }
 0x929   :  { %v1585_v41 = vadd.f32 %v1584_v38, %v10063_v55  ;;  %v1586_v42 = vpop.f32.mrb[17].mxu0  ;;  %v6787_v44 = vpop.f32.mrb[17].mxu1  ;;  %v1656_v62 = vadd.f32 %v1655_v40, %v10069_v27  ;;  %v1693_v40 = vunpack.c.h.bf16 %v5814_v26 }
 0x92a   :  { %v1587_v47 = vadd.f32 %v1586_v42, %v10065_v57 }
 0x92b   :  { %v1659_v32 = vadd.f32 %v1585_v41, %v1515_v37 }
 0x92c   :  { %v1666_v50 = vadd.f32 %v1587_v47, %v1516_v15 }
 0x92d   :  { %v5811_v48 = vmul.f32 -1.442695, %v1659_v32 }
 0x92e   :  { %v5812_v51 = vmul.f32 -1.442695, %v1666_v50 }
 0x92f   :  { %9472 = vpow2.f32 %v5811_v48 }
 0x930   :  { %9474 = vpow2.f32 %v5812_v51 }
 0x939   :  { %v9473_v21 = vpop.eup %9472 }
 0x93a   :  { %v1663_v53 = vadd.f32 1.0, %v9473_v21  ;;  %v9475_v58 = vpop.eup %9474  ;;  %v1694_v21 = vunpack.c.h.bf16 %v10510_v59  ;;  %v5819_v59 = vld [vmem:[%s11632_s1 + $0x78] sm:$0xff] }
 0x93b   :  { %v1670_v61 = vadd.f32 1.0, %v9475_v58 }
 0x93c   :  { %9476 = vrcp.f32 %v1663_v53 }
 0x93d   :  { %9478 = vrcp.f32 %v1670_v61 }
 0x946   :  { %v9477_v63 = vpop.eup %9476 }
 0x947   :  { %v1673_v1 = vmul.f32 %v9477_v63, %v1656_v62  ;;  %v9479_v5 = vpop.eup %9478 }
 0x948   :  { %v1676_v7 = vsub.f32 1.0, %v9479_v5  ;;  %v1678_v52 = vmul.f32 %v9479_v5, %v10463_v36 }
 0x949   :  { %v1674_v3 = vadd.f32 %v1673_v1, %v1517_v46 }
 0x94b   :  { %9480 = vtanh.f32 %v1674_v3 }
 0x955   :  { %v9481_v14 = vpop.eup %9480 }
 0x956   :  { %v1677_v30 = vmul.f32 %v9481_v14, %v1676_v7  ;;  %v1862_v7 = vpop.permute.xlu1 %1861 }
 0x957   :  { %vm1863_vm12 = vcmp.eq.s32.totalorder %v1862_v7, 1 }
 0x958   :  { %v1679_v20 = vadd.f32 %v1678_v52, %v1677_v30  ;;  %v1869_v52 = vunpack.c.l.bf16 %v5819_v59 }
 0x95a   :  { %v10516_v22 = vsel %vm1686_vm11, %v1679_v20, %v10463_v36 }
 0x95b   :  { %1760 = vmatmul.mubr.f32.vlgmr.msra.gmra.mrb[18].mxu0 %v10516_v22  ;;  %6821 = vmatmul.mubr.f32.vlgmr.msra.gmra.mrb[18].mxu1 %v10516_v22 }
 0x95c   :  { %8156 = vmatpush1.bf16.msra.mxu0 %v9772_v10  ;;  %8187 = vmatpush3.bf16.msra.mxu1 %v9835_v31 }
 0x95d   :  { %8158 = vmatprep.subr.bf16.mxu0 %v9774_v11  ;;  %8188 = vmatprep.subr.bf16.mxu1 %v9713_v8 }
 0x95e   :  { %1936 = vmatprep.mubr.f32.mxu0 %v9714_v9  ;;  %6855 = vmatprep.mubr.msk.f32.mxu1 %vm9715_vm0, %v9714_v9 }
 0x960   :  { %8160 = vmatpush1.bf16.msra.mxu0 %v9794_v17  ;;  %8190 = vmatpush3.bf16.msra.mxu1 %v9859_v39 }
 0x961   :  { %8162 = vmatprep.subr.bf16.mxu0 %v9797_v18  ;;  %8191 = vmatprep.subr.bf16.mxu1 %v9713_v8 }
 0x964   :  { %8164 = vmatpush1.bf16.msra.mxu0 %v9812_v23  ;;  %8193 = vmatpush3.bf16.msra.mxu1 %v9892_v49 }
 0x965   :  { %8166 = vmatprep.subr.bf16.mxu0 %v9815_v24  ;;  %8194 = vmatprep.subr.bf16.mxu1 %v9713_v8 }
 0x968   :  { %8168 = vmatpush1.bf16.msra.mxu0 %v9841_v33  ;;  %8196 = vmatpush3.bf16.msra.mxu1 %v9924_v60 }
 0x969   :  { %8170 = vmatprep.subr.bf16.mxu0 %v9847_v35  ;;  %8197 = vmatprep.subr.bf16.mxu1 %v9713_v8 }
 0x96c   :  { %8172 = vmatpush1.bf16.msra.mxu0 %v9872_v43  ;;  %8199 = vmatpush3.bf16.msra.mxu1 %v9951_v6 }
 0x96d   :  { %8174 = vmatprep.subr.bf16.mxu0 %v9880_v45  ;;  %8200 = vmatprep.subr.bf16.mxu1 %v9713_v8 }
 0x970   :  { %8176 = vmatpush1.bf16.msra.mxu0 %v9908_v54  ;;  %8202 = vmatpush3.bf16.msra.mxu1 %v9967_v16 }
 0x971   :  { %8178 = vmatprep.subr.bf16.mxu0 %v9912_v56  ;;  %8203 = vmatprep.subr.bf16.mxu1 %v9713_v8 }
 0x974   :  { %8180 = vmatpush1.bf16.msra.mxu0 %v9938_v0  ;;  %8205 = vmatpush3.bf16.msra.mxu1 %v9982_v25 }
 0x975   :  { %8182 = vmatprep.subr.bf16.mxu0 %v9942_v2  ;;  %8206 = vmatprep.subr.bf16.mxu1 %v9713_v8 }
 0x978   :  { %8184 = vmatpush1.bf16.msra.mxu0 %v9962_v13  ;;  %8208 = vmatpush3.bf16.msra.mxu1 %v9998_v29 }
 0x979   :  { %8210 = vmatprep.subr.bf16.mxu0 %v9759_v4  ;;  %8241 = vmatprep.subr.bf16.mxu1 %v9713_v8 }
 0xa2e   :  { %v1761_v34 = vpop.f32.mrb[18].mxu0  ;;  %v1832_v36 = vpop.f32.mrb[18].mxu1 }
 0xa2f   :  { %v1762_v12 = vadd.f32 %v1761_v34, %v10063_v55  ;;  %v1763_v37 = vpop.f32.mrb[19].mxu0  ;;  %v6822_v38 = vpop.f32.mrb[19].mxu1  ;;  %v1833_v53 = vadd.f32 %v1832_v36, %v10069_v27  ;;  %v1870_v34 = vunpack.c.h.bf16 %v5819_v59 }
 0xa30   :  { %v1764_v41 = vadd.f32 %v1763_v37, %v10065_v57 }
 0xa31   :  { %v1836_v42 = vadd.f32 %v1762_v12, %v1692_v28 }
 0xa32   :  { %v1843_v15 = vadd.f32 %v1764_v41, %v1693_v40 }
 0xa33   :  { %v5816_v44 = vmul.f32 -1.442695, %v1836_v42 }
 0xa34   :  { %v5817_v47 = vmul.f32 -1.442695, %v1843_v15  ;;  %v10611_v15 = vld [vmem:[%s11632_s1 + $0x80] ss:$12 sps:$4 sm:$0xff]  }
 0xa35   :  { %9482 = vpow2.f32 %v5816_v44 }
 0xa36   :  { %9484 = vpow2.f32 %v5817_v47 }
 0xa3f   :  { %v9483_v32 = vpop.eup %9482 }
 0xa40   :  { %v1840_v48 = vadd.f32 1.0, %v9483_v32  ;;  %v9485_v50 = vpop.eup %9484  ;;  %v1871_v32 = vunpack.c.l.bf16 %v10611_v15 }
 0xa41   :  { %v1847_v51 = vadd.f32 1.0, %v9485_v50 }
 0xa42   :  { %9486 = vrcp.f32 %v1840_v48 }
 0xa43   :  { %9488 = vrcp.f32 %v1847_v51 }
 0xa4c   :  { %v9487_v58 = vpop.eup %9486 }
 0xa4d   :  { %v1850_v61 = vmul.f32 %v9487_v58, %v1833_v53  ;;  %v9489_v62 = vpop.eup %9488 }
 0xa4e   :  { %v1853_v63 = vsub.f32 1.0, %v9489_v62  ;;  %v1855_v5 = vmul.f32 %v9489_v62, %v10516_v22 }
 0xa4f   :  { %v1851_v46 = vadd.f32 %v1850_v61, %v1694_v21 }
 0xa51   :  { %9490 = vtanh.f32 %v1851_v46 }
 0xa5b   :  { %v9491_v1 = vpop.eup %9490 }
 0xa5c   :  { %v1854_v3 = vmul.f32 %v9491_v1, %v1853_v63  ;;  %v2039_v63 = vpop.permute.xlu0 %2038 }
 0xa5d   :  { %vm2040_vm13 = vcmp.eq.s32.totalorder %v2039_v63, 1 }
 0xa5e   :  { %v1856_v14 = vadd.f32 %v1855_v5, %v1854_v3  ;;  %v5824_v5 = vld [vmem:[%s11632_s1 + $0x84] sm:$0xff] }
 0xa5f   :  { %v2046_v7 = vunpack.c.l.bf16 %v5824_v5 }
 0xa60   :  { %v10564_v30 = vsel %vm1863_vm12, %v1856_v14, %v10516_v22 }
 0xa61   :  { %1937 = vmatmul.mubr.f32.vlgmr.msra.gmra.mrb[20].mxu0 %v10564_v30  ;;  %6856 = vmatmul.mubr.f32.vlgmr.msra.gmra.mrb[20].mxu1 %v10564_v30 }
 0xa62   :  { %8212 = vmatpush1.bf16.msra.mxu0 %v9772_v10  ;;  %8243 = vmatpush3.bf16.msra.mxu1 %v9835_v31 }
 0xa63   :  { %8214 = vmatprep.subr.bf16.mxu0 %v9774_v11  ;;  %8244 = vmatprep.subr.bf16.mxu1 %v9713_v8 }
 0xa64   :  { %2113 = vmatprep.mubr.f32.mxu0 %v9714_v9  ;;  %6890 = vmatprep.mubr.msk.f32.mxu1 %vm9715_vm0, %v9714_v9 }
 0xa66   :  { %8216 = vmatpush1.bf16.msra.mxu0 %v9794_v17  ;;  %8246 = vmatpush3.bf16.msra.mxu1 %v9859_v39 }
 0xa67   :  { %8218 = vmatprep.subr.bf16.mxu0 %v9797_v18  ;;  %8247 = vmatprep.subr.bf16.mxu1 %v9713_v8 }
 0xa6a   :  { %8220 = vmatpush1.bf16.msra.mxu0 %v9812_v23  ;;  %8249 = vmatpush3.bf16.msra.mxu1 %v9892_v49 }
 0xa6b   :  { %8222 = vmatprep.subr.bf16.mxu0 %v9815_v24  ;;  %8250 = vmatprep.subr.bf16.mxu1 %v9713_v8 }
 0xa6e   :  { %8224 = vmatpush1.bf16.msra.mxu0 %v9841_v33  ;;  %8252 = vmatpush3.bf16.msra.mxu1 %v9924_v60 }
 0xa6f   :  { %8226 = vmatprep.subr.bf16.mxu0 %v9847_v35  ;;  %8253 = vmatprep.subr.bf16.mxu1 %v9713_v8 }
 0xa72   :  { %8228 = vmatpush1.bf16.msra.mxu0 %v9872_v43  ;;  %8255 = vmatpush3.bf16.msra.mxu1 %v9951_v6 }
 0xa73   :  { %8230 = vmatprep.subr.bf16.mxu0 %v9880_v45  ;;  %8256 = vmatprep.subr.bf16.mxu1 %v9713_v8 }
 0xa76   :  { %8232 = vmatpush1.bf16.msra.mxu0 %v9908_v54  ;;  %8258 = vmatpush3.bf16.msra.mxu1 %v9967_v16 }
 0xa77   :  { %8234 = vmatprep.subr.bf16.mxu0 %v9912_v56  ;;  %8259 = vmatprep.subr.bf16.mxu1 %v9713_v8 }
 0xa7a   :  { %8236 = vmatpush1.bf16.msra.mxu0 %v9938_v0  ;;  %8261 = vmatpush3.bf16.msra.mxu1 %v9982_v25 }
 0xa7b   :  { %8238 = vmatprep.subr.bf16.mxu0 %v9942_v2  ;;  %8262 = vmatprep.subr.bf16.mxu1 %v9713_v8 }
 0xa7e   :  { %8240 = vmatpush1.bf16.msra.mxu0 %v9962_v13  ;;  %8264 = vmatpush3.bf16.msra.mxu1 %v9998_v29 }
 0xa7f   :  { %8266 = vmatprep.subr.bf16.mxu0 %v9759_v4  ;;  %8297 = vmatprep.subr.bf16.mxu1 %v9713_v8 }
 0xb34   :  { %v1938_v19 = vpop.f32.mrb[20].mxu0  ;;  %v2009_v20 = vpop.f32.mrb[20].mxu1 }
 0xb35   :  { %v1939_v22 = vadd.f32 %v1938_v19, %v10063_v55  ;;  %v1940_v26 = vpop.f32.mrb[21].mxu0  ;;  %v6857_v28 = vpop.f32.mrb[21].mxu1  ;;  %v2010_v48 = vadd.f32 %v2009_v20, %v10069_v27  ;;  %v2047_v20 = vunpack.c.h.bf16 %v5824_v5 }
 0xb36   :  { %v1941_v36 = vadd.f32 %v1940_v26, %v10065_v57 }
 0xb37   :  { %v2013_v12 = vadd.f32 %v1939_v22, %v1869_v52 }
 0xb38   :  { %v2020_v38 = vadd.f32 %v1941_v36, %v1870_v34 }
 0xb39   :  { %v5821_v37 = vmul.f32 -1.442695, %v2013_v12 }
 0xb3a   :  { %v5822_v40 = vmul.f32 -1.442695, %v2020_v38 }
 0xb3b   :  { %9492 = vpow2.f32 %v5821_v37 }
 0xb3c   :  { %9494 = vpow2.f32 %v5822_v40 }
 0xb45   :  { %v9493_v41 = vpop.eup %9492 }
 0xb46   :  { %v2017_v42 = vadd.f32 1.0, %v9493_v41  ;;  %v9495_v44 = vpop.eup %9494  ;;  %v2048_v41 = vunpack.c.h.bf16 %v10611_v15  ;;  %v5829_v15 = vld [vmem:[%s11632_s1 + $0x90] sm:$0xff] }
 0xb47   :  { %v2024_v47 = vadd.f32 1.0, %v9495_v44 }
 0xb48   :  { %9496 = vrcp.f32 %v2017_v42 }
 0xb49   :  { %9498 = vrcp.f32 %v2024_v47 }
 0xb52   :  { %v9497_v50 = vpop.eup %9496 }
 0xb53   :  { %v2027_v51 = vmul.f32 %v9497_v50, %v2010_v48  ;;  %v9499_v53 = vpop.eup %9498 }
 0xb54   :  { %v2030_v58 = vsub.f32 1.0, %v9499_v53  ;;  %v2032_v62 = vmul.f32 %v9499_v53, %v10564_v30 }
 0xb55   :  { %v2028_v21 = vadd.f32 %v2027_v51, %v1871_v32 }
 0xb57   :  { %9500 = vtanh.f32 %v2028_v21 }
 0xb61   :  { %v9501_v61 = vpop.eup %9500 }
 0xb62   :  { %v2031_v46 = vmul.f32 %v9501_v61, %v2030_v58  ;;  %v2216_v58 = vpop.permute.xlu1 %2215 }
 0xb63   :  { %vm2217_vm14 = vcmp.eq.s32.totalorder %v2216_v58, 1 }
 0xb64   :  { %v2033_v1 = vadd.f32 %v2032_v62, %v2031_v46  ;;  %v2223_v62 = vunpack.c.l.bf16 %v5829_v15 }
 0xb66   :  { %v10617_v3 = vsel %vm2040_vm13, %v2033_v1, %v10564_v30 }
 0xb67   :  { %2114 = vmatmul.mubr.f32.vlgmr.msra.gmra.mrb[22].mxu0 %v10617_v3  ;;  %6891 = vmatmul.mubr.f32.vlgmr.msra.gmra.mrb[22].mxu1 %v10617_v3 }
 0xb68   :  { %8268 = vmatpush1.bf16.msra.mxu0 %v9772_v10  ;;  %8299 = vmatpush3.bf16.msra.mxu1 %v9835_v31 }
 0xb69   :  { %8270 = vmatprep.subr.bf16.mxu0 %v9774_v11  ;;  %8300 = vmatprep.subr.bf16.mxu1 %v9713_v8 }
 0xb6a   :  { %2290 = vmatprep.mubr.f32.mxu0 %v9714_v9  ;;  %6925 = vmatprep.mubr.msk.f32.mxu1 %vm9715_vm0, %v9714_v9 }
 0xb6c   :  { %8272 = vmatpush1.bf16.msra.mxu0 %v9794_v17  ;;  %8302 = vmatpush3.bf16.msra.mxu1 %v9859_v39 }
 0xb6d   :  { %8274 = vmatprep.subr.bf16.mxu0 %v9797_v18  ;;  %8303 = vmatprep.subr.bf16.mxu1 %v9713_v8 }
 0xb70   :  { %8276 = vmatpush1.bf16.msra.mxu0 %v9812_v23  ;;  %8305 = vmatpush3.bf16.msra.mxu1 %v9892_v49 }
 0xb71   :  { %8278 = vmatprep.subr.bf16.mxu0 %v9815_v24  ;;  %8306 = vmatprep.subr.bf16.mxu1 %v9713_v8 }
 0xb74   :  { %8280 = vmatpush1.bf16.msra.mxu0 %v9841_v33  ;;  %8308 = vmatpush3.bf16.msra.mxu1 %v9924_v60 }
 0xb75   :  { %8282 = vmatprep.subr.bf16.mxu0 %v9847_v35  ;;  %8309 = vmatprep.subr.bf16.mxu1 %v9713_v8 }
 0xb78   :  { %8284 = vmatpush1.bf16.msra.mxu0 %v9872_v43  ;;  %8311 = vmatpush3.bf16.msra.mxu1 %v9951_v6 }
 0xb79   :  { %8286 = vmatprep.subr.bf16.mxu0 %v9880_v45  ;;  %8312 = vmatprep.subr.bf16.mxu1 %v9713_v8 }
 0xb7c   :  { %8288 = vmatpush1.bf16.msra.mxu0 %v9908_v54  ;;  %8314 = vmatpush3.bf16.msra.mxu1 %v9967_v16 }
 0xb7d   :  { %8290 = vmatprep.subr.bf16.mxu0 %v9912_v56  ;;  %8315 = vmatprep.subr.bf16.mxu1 %v9713_v8 }
 0xb80   :  { %8292 = vmatpush1.bf16.msra.mxu0 %v9938_v0  ;;  %8317 = vmatpush3.bf16.msra.mxu1 %v9982_v25 }
 0xb81   :  { %8294 = vmatprep.subr.bf16.mxu0 %v9942_v2  ;;  %8318 = vmatprep.subr.bf16.mxu1 %v9713_v8 }
 0xb84   :  { %8296 = vmatpush1.bf16.msra.mxu0 %v9962_v13  ;;  %8320 = vmatpush3.bf16.msra.mxu1 %v9998_v29 }
 0xb85   :  { %8322 = vmatprep.subr.bf16.mxu0 %v9759_v4  ;;  %8353 = vmatprep.subr.bf16.mxu1 %v9713_v8 }
 0xc3a   :  { %v2115_v14 = vpop.f32.mrb[22].mxu0  ;;  %v2186_v30 = vpop.f32.mrb[22].mxu1 }
 0xc3b   :  { %v2116_v59 = vadd.f32 %v2115_v14, %v10063_v55  ;;  %v2117_v52 = vpop.f32.mrb[23].mxu0  ;;  %v6892_v19 = vpop.f32.mrb[23].mxu1  ;;  %v2187_v42 = vadd.f32 %v2186_v30, %v10069_v27  ;;  %v2224_v14 = vunpack.c.h.bf16 %v5829_v15 }
 0xc3c   :  { %v2118_v22 = vadd.f32 %v2117_v52, %v10065_v57 }
 0xc3d   :  { %v2190_v26 = vadd.f32 %v2116_v59, %v2046_v7 }
 0xc3e   :  { %v2197_v34 = vadd.f32 %v2118_v22, %v2047_v20 }
 0xc3f   :  { %v5826_v28 = vmul.f32 -1.442695, %v2190_v26 }
 0xc40   :  { %v5827_v36 = vmul.f32 -1.442695, %v2197_v34  ;;  %v10712_v34 = vld [vmem:[%s11632_s1 + $0x98] ss:$12 sps:$4 sm:$0xff]  }
 0xc41   :  { %9502 = vpow2.f32 %v5826_v28 }
 0xc42   :  { %9504 = vpow2.f32 %v5827_v36 }
 0xc4b   :  { %v9503_v12 = vpop.eup %9502 }
 0xc4c   :  { %v2194_v37 = vadd.f32 1.0, %v9503_v12  ;;  %v9505_v38 = vpop.eup %9504  ;;  %v2225_v12 = vunpack.c.l.bf16 %v10712_v34 }
 0xc4d   :  { %v2201_v40 = vadd.f32 1.0, %v9505_v38 }
 0xc4e   :  { %9506 = vrcp.f32 %v2194_v37 }
 0xc4f   :  { %9508 = vrcp.f32 %v2201_v40 }
 0xc58   :  { %v9507_v44 = vpop.eup %9506 }
 0xc59   :  { %v2204_v47 = vmul.f32 %v9507_v44, %v2187_v42  ;;  %v9509_v48 = vpop.eup %9508 }
 0xc5a   :  { %v2207_v50 = vsub.f32 1.0, %v9509_v48  ;;  %v2209_v53 = vmul.f32 %v9509_v48, %v10617_v3 }
 0xc5b   :  { %v2205_v32 = vadd.f32 %v2204_v47, %v2048_v41 }
 0xc5d   :  { %9510 = vtanh.f32 %v2205_v32 }
 0xc67   :  { %v9511_v51 = vpop.eup %9510 }
 0xc68   :  { %v2208_v21 = vmul.f32 %v9511_v51, %v2207_v50  ;;  %v2393_v50 = vpop.permute.xlu0 %2392 }
 0xc69   :  { %vm2394_vm15 = vcmp.eq.s32.totalorder %v2393_v50, 1 }
 0xc6a   :  { %v2210_v61 = vadd.f32 %v2209_v53, %v2208_v21  ;;  %v5834_v53 = vld [vmem:[%s11632_s1 + $0x9c] sm:$0xff] }
 0xc6b   :  { %v2400_v58 = vunpack.c.l.bf16 %v5834_v53 }
 0xc6c   :  { %v10665_v46 = vsel %vm2217_vm14, %v2210_v61, %v10617_v3 }
 0xc6d   :  { %2291 = vmatmul.mubr.f32.vlgmr.msra.gmra.mrb[24].mxu0 %v10665_v46  ;;  %6926 = vmatmul.mubr.f32.vlgmr.msra.gmra.mrb[24].mxu1 %v10665_v46 }
 0xc6e   :  { %8324 = vmatpush1.bf16.msra.mxu0 %v9772_v10  ;;  %8355 = vmatpush3.bf16.msra.mxu1 %v9835_v31 }
 0xc6f   :  { %8326 = vmatprep.subr.bf16.mxu0 %v9774_v11  ;;  %8356 = vmatprep.subr.bf16.mxu1 %v9713_v8 }
 0xc70   :  { %2467 = vmatprep.mubr.f32.mxu0 %v9714_v9  ;;  %6960 = vmatprep.mubr.msk.f32.mxu1 %vm9715_vm0, %v9714_v9 }
 0xc72   :  { %8328 = vmatpush1.bf16.msra.mxu0 %v9794_v17  ;;  %8358 = vmatpush3.bf16.msra.mxu1 %v9859_v39 }
 0xc73   :  { %8330 = vmatprep.subr.bf16.mxu0 %v9797_v18  ;;  %8359 = vmatprep.subr.bf16.mxu1 %v9713_v8 }
 0xc76   :  { %8332 = vmatpush1.bf16.msra.mxu0 %v9812_v23  ;;  %8361 = vmatpush3.bf16.msra.mxu1 %v9892_v49 }
 0xc77   :  { %8334 = vmatprep.subr.bf16.mxu0 %v9815_v24  ;;  %8362 = vmatprep.subr.bf16.mxu1 %v9713_v8 }
 0xc7a   :  { %8336 = vmatpush1.bf16.msra.mxu0 %v9841_v33  ;;  %8364 = vmatpush3.bf16.msra.mxu1 %v9924_v60 }
 0xc7b   :  { %8338 = vmatprep.subr.bf16.mxu0 %v9847_v35  ;;  %8365 = vmatprep.subr.bf16.mxu1 %v9713_v8 }
 0xc7e   :  { %8340 = vmatpush1.bf16.msra.mxu0 %v9872_v43  ;;  %8367 = vmatpush3.bf16.msra.mxu1 %v9951_v6 }
 0xc7f   :  { %8342 = vmatprep.subr.bf16.mxu0 %v9880_v45  ;;  %8368 = vmatprep.subr.bf16.mxu1 %v9713_v8 }
 0xc82   :  { %8344 = vmatpush1.bf16.msra.mxu0 %v9908_v54  ;;  %8370 = vmatpush3.bf16.msra.mxu1 %v9967_v16 }
 0xc83   :  { %8346 = vmatprep.subr.bf16.mxu0 %v9912_v56  ;;  %8371 = vmatprep.subr.bf16.mxu1 %v9713_v8 }
 0xc86   :  { %8348 = vmatpush1.bf16.msra.mxu0 %v9938_v0  ;;  %8373 = vmatpush3.bf16.msra.mxu1 %v9982_v25 }
 0xc87   :  { %8350 = vmatprep.subr.bf16.mxu0 %v9942_v2  ;;  %8374 = vmatprep.subr.bf16.mxu1 %v9713_v8 }
 0xc8a   :  { %8352 = vmatpush1.bf16.msra.mxu0 %v9962_v13  ;;  %8376 = vmatpush3.bf16.msra.mxu1 %v9998_v29 }
 0xc8b   :  { %8378 = vmatprep.subr.bf16.mxu0 %v9759_v4  ;;  %8409 = vmatprep.subr.bf16.mxu1 %v9713_v8 }
 0xd40   :  { %v2292_v63 = vpop.f32.mrb[24].mxu0  ;;  %v2363_v1 = vpop.f32.mrb[24].mxu1 }
 0xd41   :  { %v2293_v3 = vadd.f32 %v2292_v63, %v10063_v55  ;;  %v2294_v5 = vpop.f32.mrb[25].mxu0  ;;  %v6927_v7 = vpop.f32.mrb[25].mxu1  ;;  %v2364_v37 = vadd.f32 %v2363_v1, %v10069_v27  ;;  %v2401_v1 = vunpack.c.h.bf16 %v5834_v53 }
 0xd42   :  { %v2295_v30 = vadd.f32 %v2294_v5, %v10065_v57 }
 0xd43   :  { %v2367_v59 = vadd.f32 %v2293_v3, %v2223_v62 }
 0xd44   :  { %v2374_v19 = vadd.f32 %v2295_v30, %v2224_v14 }
 0xd45   :  { %v5831_v52 = vmul.f32 -1.442695, %v2367_v59 }
 0xd46   :  { %v5832_v20 = vmul.f32 -1.442695, %v2374_v19 }
 0xd47   :  { %9512 = vpow2.f32 %v5831_v52 }
 0xd48   :  { %9514 = vpow2.f32 %v5832_v20 }
 0xd51   :  { %v9513_v22 = vpop.eup %9512 }
 0xd52   :  { %v2371_v26 = vadd.f32 1.0, %v9513_v22  ;;  %v9515_v28 = vpop.eup %9514  ;;  %v2402_v22 = vunpack.c.h.bf16 %v10712_v34  ;;  %v5839_v34 = vld [vmem:[%s11632_s1 + $0xa8] sm:$0xff] }
 0xd53   :  { %v2378_v36 = vadd.f32 1.0, %v9515_v28 }
 0xd54   :  { %9516 = vrcp.f32 %v2371_v26 }
 0xd55   :  { %9518 = vrcp.f32 %v2378_v36 }
 0xd5e   :  { %v9517_v38 = vpop.eup %9516 }
 0xd5f   :  { %v2381_v40 = vmul.f32 %v9517_v38, %v2364_v37  ;;  %v9519_v42 = vpop.eup %9518 }
 0xd60   :  { %v2384_v44 = vsub.f32 1.0, %v9519_v42  ;;  %v2386_v48 = vmul.f32 %v9519_v42, %v10665_v46 }
 0xd61   :  { %v2382_v41 = vadd.f32 %v2381_v40, %v2225_v12 }
 0xd63   :  { %9520 = vtanh.f32 %v2382_v41 }
 0xd6d   :  { %v9521_v47 = vpop.eup %9520 }
 0xd6e   :  { %v2385_v32 = vmul.f32 %v9521_v47, %v2384_v44  ;;  %v2570_v44 = vpop.permute.xlu1 %2569 }
 0xd6f   :  { %vm2571_vm1 = vcmp.eq.s32.totalorder %v2570_v44, 1 }
 0xd70   :  { %v2387_v51 = vadd.f32 %v2386_v48, %v2385_v32  ;;  %v2577_v48 = vunpack.c.l.bf16 %v5839_v34 }
 0xd72   :  { %v10718_v21 = vsel %vm2394_vm15, %v2387_v51, %v10665_v46 }
 0xd73   :  { %2468 = vmatmul.mubr.f32.vlgmr.msra.gmra.mrb[26].mxu0 %v10718_v21  ;;  %6961 = vmatmul.mubr.f32.vlgmr.msra.gmra.mrb[26].mxu1 %v10718_v21 }
 0xd74   :  { %8380 = vmatpush1.bf16.msra.mxu0 %v9772_v10  ;;  %8411 = vmatpush3.bf16.msra.mxu1 %v9835_v31 }
 0xd75   :  { %8382 = vmatprep.subr.bf16.mxu0 %v9774_v11  ;;  %8412 = vmatprep.subr.bf16.mxu1 %v9713_v8 }
 0xd76   :  { %2644 = vmatprep.mubr.f32.mxu0 %v9714_v9  ;;  %6995 = vmatprep.mubr.msk.f32.mxu1 %vm9715_vm0, %v9714_v9 }
 0xd78   :  { %8384 = vmatpush1.bf16.msra.mxu0 %v9794_v17  ;;  %8414 = vmatpush3.bf16.msra.mxu1 %v9859_v39 }
 0xd79   :  { %8386 = vmatprep.subr.bf16.mxu0 %v9797_v18  ;;  %8415 = vmatprep.subr.bf16.mxu1 %v9713_v8 }
 0xd7c   :  { %8388 = vmatpush1.bf16.msra.mxu0 %v9812_v23  ;;  %8417 = vmatpush3.bf16.msra.mxu1 %v9892_v49 }
 0xd7d   :  { %8390 = vmatprep.subr.bf16.mxu0 %v9815_v24  ;;  %8418 = vmatprep.subr.bf16.mxu1 %v9713_v8 }
 0xd80   :  { %8392 = vmatpush1.bf16.msra.mxu0 %v9841_v33  ;;  %8420 = vmatpush3.bf16.msra.mxu1 %v9924_v60 }
 0xd81   :  { %8394 = vmatprep.subr.bf16.mxu0 %v9847_v35  ;;  %8421 = vmatprep.subr.bf16.mxu1 %v9713_v8 }
 0xd84   :  { %8396 = vmatpush1.bf16.msra.mxu0 %v9872_v43  ;;  %8423 = vmatpush3.bf16.msra.mxu1 %v9951_v6 }
 0xd85   :  { %8398 = vmatprep.subr.bf16.mxu0 %v9880_v45  ;;  %8424 = vmatprep.subr.bf16.mxu1 %v9713_v8 }
 0xd88   :  { %8400 = vmatpush1.bf16.msra.mxu0 %v9908_v54  ;;  %8426 = vmatpush3.bf16.msra.mxu1 %v9967_v16 }
 0xd89   :  { %8402 = vmatprep.subr.bf16.mxu0 %v9912_v56  ;;  %8427 = vmatprep.subr.bf16.mxu1 %v9713_v8 }
 0xd8c   :  { %8404 = vmatpush1.bf16.msra.mxu0 %v9938_v0  ;;  %8429 = vmatpush3.bf16.msra.mxu1 %v9982_v25 }
 0xd8d   :  { %8406 = vmatprep.subr.bf16.mxu0 %v9942_v2  ;;  %8430 = vmatprep.subr.bf16.mxu1 %v9713_v8 }
 0xd90   :  { %8408 = vmatpush1.bf16.msra.mxu0 %v9962_v13  ;;  %8432 = vmatpush3.bf16.msra.mxu1 %v9998_v29 }
 0xd91   :  { %8434 = vmatprep.subr.bf16.mxu0 %v9759_v4  ;;  %8465 = vmatprep.subr.bf16.mxu1 %v9713_v8 }
 0xe46   :  { %v2469_v61 = vpop.f32.mrb[26].mxu0  ;;  %v2540_v46 = vpop.f32.mrb[26].mxu1 }
 0xe47   :  { %v2470_v15 = vadd.f32 %v2469_v61, %v10063_v55  ;;  %v2471_v62 = vpop.f32.mrb[27].mxu0  ;;  %v6962_v63 = vpop.f32.mrb[27].mxu1  ;;  %v2541_v26 = vadd.f32 %v2540_v46, %v10069_v27  ;;  %v2578_v61 = vunpack.c.h.bf16 %v5839_v34 }
 0xe48   :  { %v2472_v3 = vadd.f32 %v2471_v62, %v10065_v57 }
 0xe49   :  { %v2544_v5 = vadd.f32 %v2470_v15, %v2400_v58 }
 0xe4a   :  { %v2551_v14 = vadd.f32 %v2472_v3, %v2401_v1 }
 0xe4b   :  { %v5836_v7 = vmul.f32 -1.442695, %v2544_v5 }
 0xe4c   :  { %v5837_v30 = vmul.f32 -1.442695, %v2551_v14  ;;  %v10813_v14 = vld [vmem:[%s11632_s1 + $0xb0] ss:$12 sps:$4 sm:$0xff]  }
 0xe4d   :  { %9522 = vpow2.f32 %v5836_v7 }
 0xe4e   :  { %9524 = vpow2.f32 %v5837_v30 }
 0xe57   :  { %v9523_v59 = vpop.eup %9522 }
 0xe58   :  { %v2548_v52 = vadd.f32 1.0, %v9523_v59  ;;  %v9525_v19 = vpop.eup %9524  ;;  %v2579_v59 = vunpack.c.l.bf16 %v10813_v14 }
 0xe59   :  { %v2555_v20 = vadd.f32 1.0, %v9525_v19 }
 0xe5a   :  { %9526 = vrcp.f32 %v2548_v52 }
 0xe5b   :  { %9528 = vrcp.f32 %v2555_v20 }
 0xe64   :  { %v9527_v28 = vpop.eup %9526 }
 0xe65   :  { %v2558_v36 = vmul.f32 %v9527_v28, %v2541_v26  ;;  %v9529_v37 = vpop.eup %9528 }
 0xe66   :  { %v2561_v38 = vsub.f32 1.0, %v9529_v37  ;;  %v2563_v42 = vmul.f32 %v9529_v37, %v10718_v21 }
 0xe67   :  { %v2559_v12 = vadd.f32 %v2558_v36, %v2402_v22 }
 0xe69   :  { %9530 = vtanh.f32 %v2559_v12 }
 0xe73   :  { %v9531_v40 = vpop.eup %9530 }
 0xe74   :  { %v2562_v41 = vmul.f32 %v9531_v40, %v2561_v38  ;;  %v2747_v38 = vpop.permute.xlu0 %2746 }
 0xe75   :  { %vm2748_vm2 = vcmp.eq.s32.totalorder %v2747_v38, 1 }
 0xe76   :  { %v2564_v47 = vadd.f32 %v2563_v42, %v2562_v41  ;;  %v5844_v42 = vld [vmem:[%s11632_s1 + $0xb4] sm:$0xff] }
 0xe77   :  { %v2754_v44 = vunpack.c.l.bf16 %v5844_v42 }
 0xe78   :  { %v10766_v32 = vsel %vm2571_vm1, %v2564_v47, %v10718_v21 }
 0xe79   :  { %2645 = vmatmul.mubr.f32.vlgmr.msra.gmra.mrb[28].mxu0 %v10766_v32  ;;  %6996 = vmatmul.mubr.f32.vlgmr.msra.gmra.mrb[28].mxu1 %v10766_v32 }
 0xe7a   :  { %8436 = vmatpush1.bf16.msra.mxu0 %v9772_v10  ;;  %8467 = vmatpush3.bf16.msra.mxu1 %v9835_v31 }
 0xe7b   :  { %8438 = vmatprep.subr.bf16.mxu0 %v9774_v11  ;;  %8468 = vmatprep.subr.bf16.mxu1 %v9713_v8 }
 0xe7c   :  { %2821 = vmatprep.mubr.f32.mxu0 %v9714_v9  ;;  %7030 = vmatprep.mubr.msk.f32.mxu1 %vm9715_vm0, %v9714_v9 }
 0xe7e   :  { %8440 = vmatpush1.bf16.msra.mxu0 %v9794_v17  ;;  %8470 = vmatpush3.bf16.msra.mxu1 %v9859_v39 }
 0xe7f   :  { %8442 = vmatprep.subr.bf16.mxu0 %v9797_v18  ;;  %8471 = vmatprep.subr.bf16.mxu1 %v9713_v8 }
 0xe82   :  { %8444 = vmatpush1.bf16.msra.mxu0 %v9812_v23  ;;  %8473 = vmatpush3.bf16.msra.mxu1 %v9892_v49 }
 0xe83   :  { %8446 = vmatprep.subr.bf16.mxu0 %v9815_v24  ;;  %8474 = vmatprep.subr.bf16.mxu1 %v9713_v8 }
 0xe86   :  { %8448 = vmatpush1.bf16.msra.mxu0 %v9841_v33  ;;  %8476 = vmatpush3.bf16.msra.mxu1 %v9924_v60 }
 0xe87   :  { %8450 = vmatprep.subr.bf16.mxu0 %v9847_v35  ;;  %8477 = vmatprep.subr.bf16.mxu1 %v9713_v8 }
 0xe8a   :  { %8452 = vmatpush1.bf16.msra.mxu0 %v9872_v43  ;;  %8479 = vmatpush3.bf16.msra.mxu1 %v9951_v6 }
 0xe8b   :  { %8454 = vmatprep.subr.bf16.mxu0 %v9880_v45  ;;  %8480 = vmatprep.subr.bf16.mxu1 %v9713_v8 }
 0xe8e   :  { %8456 = vmatpush1.bf16.msra.mxu0 %v9908_v54  ;;  %8482 = vmatpush3.bf16.msra.mxu1 %v9967_v16 }
 0xe8f   :  { %8458 = vmatprep.subr.bf16.mxu0 %v9912_v56  ;;  %8483 = vmatprep.subr.bf16.mxu1 %v9713_v8 }
 0xe92   :  { %8460 = vmatpush1.bf16.msra.mxu0 %v9938_v0  ;;  %8485 = vmatpush3.bf16.msra.mxu1 %v9982_v25 }
 0xe93   :  { %8462 = vmatprep.subr.bf16.mxu0 %v9942_v2  ;;  %8486 = vmatprep.subr.bf16.mxu1 %v9713_v8 }
 0xe96   :  { %8464 = vmatpush1.bf16.msra.mxu0 %v9962_v13  ;;  %8488 = vmatpush3.bf16.msra.mxu1 %v9998_v29 }
 0xe97   :  { %8490 = vmatprep.subr.bf16.mxu0 %v9759_v4  ;;  %8521 = vmatprep.subr.bf16.mxu1 %v9713_v8 }
 0xf4c   :  { %v2646_v50 = vpop.f32.mrb[28].mxu0  ;;  %v2717_v51 = vpop.f32.mrb[28].mxu1 }
 0xf4d   :  { %v2647_v21 = vadd.f32 %v2646_v50, %v10063_v55  ;;  %v2648_v53 = vpop.f32.mrb[29].mxu0  ;;  %v6997_v58 = vpop.f32.mrb[29].mxu1  ;;  %v2718_v52 = vadd.f32 %v2717_v51, %v10069_v27  ;;  %v2755_v51 = vunpack.c.h.bf16 %v5844_v42 }
 0xf4e   :  { %v2649_v46 = vadd.f32 %v2648_v53, %v10065_v57 }
 0xf4f   :  { %v2721_v15 = vadd.f32 %v2647_v21, %v2577_v48 }
 0xf50   :  { %v2728_v63 = vadd.f32 %v2649_v46, %v2578_v61 }
 0xf51   :  { %v5841_v62 = vmul.f32 -1.442695, %v2721_v15 }
 0xf52   :  { %v5842_v1 = vmul.f32 -1.442695, %v2728_v63 }
 0xf53   :  { %9532 = vpow2.f32 %v5841_v62 }
 0xf54   :  { %9534 = vpow2.f32 %v5842_v1 }
 0xf5d   :  { %v9533_v3 = vpop.eup %9532 }
 0xf5e   :  { %v2725_v5 = vadd.f32 1.0, %v9533_v3  ;;  %v9535_v7 = vpop.eup %9534  ;;  %v2756_v3 = vunpack.c.h.bf16 %v10813_v14  ;;  %v5849_v14 = vld [vmem:[%s11632_s1 + $0xc0] sm:$0xff] }
 0xf5f   :  { %v2732_v30 = vadd.f32 1.0, %v9535_v7 }
 0xf60   :  { %9536 = vrcp.f32 %v2725_v5 }
 0xf61   :  { %9538 = vrcp.f32 %v2732_v30 }
 0xf6a   :  { %v9537_v19 = vpop.eup %9536 }
 0xf6b   :  { %v2735_v20 = vmul.f32 %v9537_v19, %v2718_v52  ;;  %v9539_v26 = vpop.eup %9538 }
 0xf6c   :  { %v2738_v28 = vsub.f32 1.0, %v9539_v26  ;;  %v2740_v37 = vmul.f32 %v9539_v26, %v10766_v32 }
 0xf6d   :  { %v2736_v22 = vadd.f32 %v2735_v20, %v2579_v59 }
 0xf6f   :  { %9540 = vtanh.f32 %v2736_v22 }
 0xf79   :  { %v9541_v36 = vpop.eup %9540 }
 0xf7a   :  { %v2739_v12 = vmul.f32 %v9541_v36, %v2738_v28  ;;  %v2924_v28 = vpop.permute.xlu1 %2923 }
 0xf7b   :  { %vm2925_vm3 = vcmp.eq.s32.totalorder %v2924_v28, 1 }
 0xf7c   :  { %v2741_v40 = vadd.f32 %v2740_v37, %v2739_v12  ;;  %v2931_v37 = vunpack.c.l.bf16 %v5849_v14 }
 0xf7e   :  { %v10819_v41 = vsel %vm2748_vm2, %v2741_v40, %v10766_v32 }
 0xf7f   :  { %2822 = vmatmul.mubr.f32.vlgmr.msra.gmra.mrb[30].mxu0 %v10819_v41  ;;  %7031 = vmatmul.mubr.f32.vlgmr.msra.gmra.mrb[30].mxu1 %v10819_v41 }
 0xf80   :  { %8492 = vmatpush1.bf16.msra.mxu0 %v9772_v10  ;;  %8523 = vmatpush3.bf16.msra.mxu1 %v9835_v31 }
 0xf81   :  { %8494 = vmatprep.subr.bf16.mxu0 %v9774_v11  ;;  %8524 = vmatprep.subr.bf16.mxu1 %v9713_v8 }
 0xf82   :  { %2998 = vmatprep.mubr.f32.mxu0 %v9714_v9  ;;  %7065 = vmatprep.mubr.msk.f32.mxu1 %vm9715_vm0, %v9714_v9 }
 0xf84   :  { %8496 = vmatpush1.bf16.msra.mxu0 %v9794_v17  ;;  %8526 = vmatpush3.bf16.msra.mxu1 %v9859_v39 }
 0xf85   :  { %8498 = vmatprep.subr.bf16.mxu0 %v9797_v18  ;;  %8527 = vmatprep.subr.bf16.mxu1 %v9713_v8 }
 0xf88   :  { %8500 = vmatpush1.bf16.msra.mxu0 %v9812_v23  ;;  %8529 = vmatpush3.bf16.msra.mxu1 %v9892_v49 }
 0xf89   :  { %8502 = vmatprep.subr.bf16.mxu0 %v9815_v24  ;;  %8530 = vmatprep.subr.bf16.mxu1 %v9713_v8 }
 0xf8c   :  { %8504 = vmatpush1.bf16.msra.mxu0 %v9841_v33  ;;  %8532 = vmatpush3.bf16.msra.mxu1 %v9924_v60 }
 0xf8d   :  { %8506 = vmatprep.subr.bf16.mxu0 %v9847_v35  ;;  %8533 = vmatprep.subr.bf16.mxu1 %v9713_v8 }
 0xf90   :  { %8508 = vmatpush1.bf16.msra.mxu0 %v9872_v43  ;;  %8535 = vmatpush3.bf16.msra.mxu1 %v9951_v6 }
 0xf91   :  { %8510 = vmatprep.subr.bf16.mxu0 %v9880_v45  ;;  %8536 = vmatprep.subr.bf16.mxu1 %v9713_v8 }
 0xf94   :  { %8512 = vmatpush1.bf16.msra.mxu0 %v9908_v54  ;;  %8538 = vmatpush3.bf16.msra.mxu1 %v9967_v16 }
 0xf95   :  { %8514 = vmatprep.subr.bf16.mxu0 %v9912_v56  ;;  %8539 = vmatprep.subr.bf16.mxu1 %v9713_v8 }
 0xf98   :  { %8516 = vmatpush1.bf16.msra.mxu0 %v9938_v0  ;;  %8541 = vmatpush3.bf16.msra.mxu1 %v9982_v25 }
 0xf99   :  { %8518 = vmatprep.subr.bf16.mxu0 %v9942_v2  ;;  %8542 = vmatprep.subr.bf16.mxu1 %v9713_v8 }
 0xf9c   :  { %8520 = vmatpush1.bf16.msra.mxu0 %v9962_v13  ;;  %8544 = vmatpush3.bf16.msra.mxu1 %v9998_v29 }
 0xf9d   :  { %8546 = vmatprep.subr.bf16.mxu0 %v9759_v4  ;;  %8577 = vmatprep.subr.bf16.mxu1 %v9713_v8 }
0x1052   :  { %v2823_v47 = vpop.f32.mrb[30].mxu0  ;;  %v2894_v32 = vpop.f32.mrb[30].mxu1 }
0x1053   :  { %v2824_v34 = vadd.f32 %v2823_v47, %v10063_v55  ;;  %v2825_v48 = vpop.f32.mrb[31].mxu0  ;;  %v7032_v50 = vpop.f32.mrb[31].mxu1  ;;  %v2895_v5 = vadd.f32 %v2894_v32, %v10069_v27  ;;  %v2932_v47 = vunpack.c.h.bf16 %v5849_v14 }
0x1054   :  { %v2826_v21 = vadd.f32 %v2825_v48, %v10065_v57 }
0x1055   :  { %v2898_v53 = vadd.f32 %v2824_v34, %v2754_v44 }
0x1056   :  { %v2905_v61 = vadd.f32 %v2826_v21, %v2755_v51 }
0x1057   :  { %v5846_v58 = vmul.f32 -1.442695, %v2898_v53 }
0x1058   :  { %v5847_v46 = vmul.f32 -1.442695, %v2905_v61  ;;  %v10914_v61 = vld [vmem:[%s11632_s1 + $0xc8] ss:$12 sps:$4 sm:$0xff]  }
0x1059   :  { %9542 = vpow2.f32 %v5846_v58 }
0x105a   :  { %9544 = vpow2.f32 %v5847_v46 }
0x1063   :  { %v9543_v15 = vpop.eup %9542 }
0x1064   :  { %v2902_v62 = vadd.f32 1.0, %v9543_v15  ;;  %v9545_v63 = vpop.eup %9544  ;;  %v2933_v15 = vunpack.c.l.bf16 %v10914_v61 }
0x1065   :  { %v2909_v1 = vadd.f32 1.0, %v9545_v63 }
0x1066   :  { %9546 = vrcp.f32 %v2902_v62 }
0x1067   :  { %9548 = vrcp.f32 %v2909_v1 }
0x1070   :  { %v9547_v7 = vpop.eup %9546 }
0x1071   :  { %v2912_v30 = vmul.f32 %v9547_v7, %v2895_v5  ;;  %v9549_v52 = vpop.eup %9548 }
0x1072   :  { %v2915_v19 = vsub.f32 1.0, %v9549_v52  ;;  %v2917_v26 = vmul.f32 %v9549_v52, %v10819_v41 }
0x1073   :  { %v2913_v59 = vadd.f32 %v2912_v30, %v2756_v3 }
0x1075   :  { %9550 = vtanh.f32 %v2913_v59 }
0x107f   :  { %v9551_v20 = vpop.eup %9550 }
0x1080   :  { %v2916_v22 = vmul.f32 %v9551_v20, %v2915_v19  ;;  %v3101_v19 = vpop.permute.xlu0 %3100 }
0x1081   :  { %vm3102_vm4 = vcmp.eq.s32.totalorder %v3101_v19, 1 }
0x1082   :  { %v2918_v36 = vadd.f32 %v2917_v26, %v2916_v22  ;;  %v5854_v26 = vld [vmem:[%s11632_s1 + $0xcc] sm:$0xff] }
0x1083   :  { %v3108_v28 = vunpack.c.l.bf16 %v5854_v26 }
0x1084   :  { %v10867_v12 = vsel %vm2925_vm3, %v2918_v36, %v10819_v41 }
0x1085   :  { %2999 = vmatmul.mubr.f32.vlgmr.msra.gmra.mrb[32].mxu0 %v10867_v12  ;;  %7066 = vmatmul.mubr.f32.vlgmr.msra.gmra.mrb[32].mxu1 %v10867_v12 }
0x1086   :  { %8548 = vmatpush1.bf16.msra.mxu0 %v9772_v10  ;;  %8579 = vmatpush3.bf16.msra.mxu1 %v9835_v31 }
0x1087   :  { %8550 = vmatprep.subr.bf16.mxu0 %v9774_v11  ;;  %8580 = vmatprep.subr.bf16.mxu1 %v9713_v8 }
0x1088   :  { %3175 = vmatprep.mubr.f32.mxu0 %v9714_v9  ;;  %7100 = vmatprep.mubr.msk.f32.mxu1 %vm9715_vm0, %v9714_v9 }
0x108a   :  { %8552 = vmatpush1.bf16.msra.mxu0 %v9794_v17  ;;  %8582 = vmatpush3.bf16.msra.mxu1 %v9859_v39 }
0x108b   :  { %8554 = vmatprep.subr.bf16.mxu0 %v9797_v18  ;;  %8583 = vmatprep.subr.bf16.mxu1 %v9713_v8 }
0x108e   :  { %8556 = vmatpush1.bf16.msra.mxu0 %v9812_v23  ;;  %8585 = vmatpush3.bf16.msra.mxu1 %v9892_v49 }
0x108f   :  { %8558 = vmatprep.subr.bf16.mxu0 %v9815_v24  ;;  %8586 = vmatprep.subr.bf16.mxu1 %v9713_v8 }
0x1092   :  { %8560 = vmatpush1.bf16.msra.mxu0 %v9841_v33  ;;  %8588 = vmatpush3.bf16.msra.mxu1 %v9924_v60 }
0x1093   :  { %8562 = vmatprep.subr.bf16.mxu0 %v9847_v35  ;;  %8589 = vmatprep.subr.bf16.mxu1 %v9713_v8 }
0x1096   :  { %8564 = vmatpush1.bf16.msra.mxu0 %v9872_v43  ;;  %8591 = vmatpush3.bf16.msra.mxu1 %v9951_v6 }
0x1097   :  { %8566 = vmatprep.subr.bf16.mxu0 %v9880_v45  ;;  %8592 = vmatprep.subr.bf16.mxu1 %v9713_v8 }
0x109a   :  { %8568 = vmatpush1.bf16.msra.mxu0 %v9908_v54  ;;  %8594 = vmatpush3.bf16.msra.mxu1 %v9967_v16 }
0x109b   :  { %8570 = vmatprep.subr.bf16.mxu0 %v9912_v56  ;;  %8595 = vmatprep.subr.bf16.mxu1 %v9713_v8 }
0x109e   :  { %8572 = vmatpush1.bf16.msra.mxu0 %v9938_v0  ;;  %8597 = vmatpush3.bf16.msra.mxu1 %v9982_v25 }
0x109f   :  { %8574 = vmatprep.subr.bf16.mxu0 %v9942_v2  ;;  %8598 = vmatprep.subr.bf16.mxu1 %v9713_v8 }
0x10a2   :  { %8576 = vmatpush1.bf16.msra.mxu0 %v9962_v13  ;;  %8600 = vmatpush3.bf16.msra.mxu1 %v9998_v29 }
0x10a3   :  { %8602 = vmatprep.subr.bf16.mxu0 %v9759_v4  ;;  %8633 = vmatprep.subr.bf16.mxu1 %v9713_v8 }
0x1158   :  { %v3000_v38 = vpop.f32.mrb[32].mxu0  ;;  %v3071_v40 = vpop.f32.mrb[32].mxu1 }
0x1159   :  { %v3001_v41 = vadd.f32 %v3000_v38, %v10063_v55  ;;  %v3002_v42 = vpop.f32.mrb[33].mxu0  ;;  %v7067_v44 = vpop.f32.mrb[33].mxu1  ;;  %v3072_v62 = vadd.f32 %v3071_v40, %v10069_v27  ;;  %v3109_v40 = vunpack.c.h.bf16 %v5854_v26 }
0x115a   :  { %v3003_v32 = vadd.f32 %v3002_v42, %v10065_v57 }
0x115b   :  { %v3075_v34 = vadd.f32 %v3001_v41, %v2931_v37 }
0x115c   :  { %v3082_v50 = vadd.f32 %v3003_v32, %v2932_v47 }
0x115d   :  { %v5851_v48 = vmul.f32 -1.442695, %v3075_v34 }
0x115e   :  { %v5852_v51 = vmul.f32 -1.442695, %v3082_v50 }
0x115f   :  { %9552 = vpow2.f32 %v5851_v48 }
0x1160   :  { %9554 = vpow2.f32 %v5852_v51 }
0x1169   :  { %v9553_v21 = vpop.eup %9552 }
0x116a   :  { %v3079_v53 = vadd.f32 1.0, %v9553_v21  ;;  %v9555_v58 = vpop.eup %9554  ;;  %v3110_v21 = vunpack.c.h.bf16 %v10914_v61  ;;  %v5859_v61 = vld [vmem:[%s11632_s1 + $0xd8] sm:$0xff] }
0x116b   :  { %v3086_v46 = vadd.f32 1.0, %v9555_v58 }
0x116c   :  { %9556 = vrcp.f32 %v3079_v53 }
0x116d   :  { %9558 = vrcp.f32 %v3086_v46 }
0x1176   :  { %v9557_v63 = vpop.eup %9556 }
0x1177   :  { %v3089_v1 = vmul.f32 %v9557_v63, %v3072_v62  ;;  %v9559_v5 = vpop.eup %9558 }
0x1178   :  { %v3092_v7 = vsub.f32 1.0, %v9559_v5  ;;  %v3094_v52 = vmul.f32 %v9559_v5, %v10867_v12 }
0x1179   :  { %v3090_v3 = vadd.f32 %v3089_v1, %v2933_v15 }
0x117b   :  { %9560 = vtanh.f32 %v3090_v3 }
0x1185   :  { %v9561_v30 = vpop.eup %9560 }
0x1186   :  { %v3093_v59 = vmul.f32 %v9561_v30, %v3092_v7  ;;  %v3278_v7 = vpop.permute.xlu1 %3277 }
0x1187   :  { %vm3279_vm5 = vcmp.eq.s32.totalorder %v3278_v7, 1 }
0x1188   :  { %v3095_v20 = vadd.f32 %v3094_v52, %v3093_v59  ;;  %v3285_v52 = vunpack.c.l.bf16 %v5859_v61 }
0x118a   :  { %v10920_v22 = vsel %vm3102_vm4, %v3095_v20, %v10867_v12 }
0x118b   :  { %3176 = vmatmul.mubr.f32.vlgmr.msra.gmra.mrb[34].mxu0 %v10920_v22  ;;  %7101 = vmatmul.mubr.f32.vlgmr.msra.gmra.mrb[34].mxu1 %v10920_v22 }
0x118c   :  { %8604 = vmatpush1.bf16.msra.mxu0 %v9772_v10  ;;  %8635 = vmatpush3.bf16.msra.mxu1 %v9835_v31 }
0x118d   :  { %8606 = vmatprep.subr.bf16.mxu0 %v9774_v11  ;;  %8636 = vmatprep.subr.bf16.mxu1 %v9713_v8 }
0x118e   :  { %3352 = vmatprep.mubr.f32.mxu0 %v9714_v9  ;;  %7135 = vmatprep.mubr.msk.f32.mxu1 %vm9715_vm0, %v9714_v9 }
0x1190   :  { %8608 = vmatpush1.bf16.msra.mxu0 %v9794_v17  ;;  %8638 = vmatpush3.bf16.msra.mxu1 %v9859_v39 }
0x1191   :  { %8610 = vmatprep.subr.bf16.mxu0 %v9797_v18  ;;  %8639 = vmatprep.subr.bf16.mxu1 %v9713_v8 }
0x1194   :  { %8612 = vmatpush1.bf16.msra.mxu0 %v9812_v23  ;;  %8641 = vmatpush3.bf16.msra.mxu1 %v9892_v49 }
0x1195   :  { %8614 = vmatprep.subr.bf16.mxu0 %v9815_v24  ;;  %8642 = vmatprep.subr.bf16.mxu1 %v9713_v8 }
0x1198   :  { %8616 = vmatpush1.bf16.msra.mxu0 %v9841_v33  ;;  %8644 = vmatpush3.bf16.msra.mxu1 %v9924_v60 }
0x1199   :  { %8618 = vmatprep.subr.bf16.mxu0 %v9847_v35  ;;  %8645 = vmatprep.subr.bf16.mxu1 %v9713_v8 }
0x119c   :  { %8620 = vmatpush1.bf16.msra.mxu0 %v9872_v43  ;;  %8647 = vmatpush3.bf16.msra.mxu1 %v9951_v6 }
0x119d   :  { %8622 = vmatprep.subr.bf16.mxu0 %v9880_v45  ;;  %8648 = vmatprep.subr.bf16.mxu1 %v9713_v8 }
0x11a0   :  { %8624 = vmatpush1.bf16.msra.mxu0 %v9908_v54  ;;  %8650 = vmatpush3.bf16.msra.mxu1 %v9967_v16 }
0x11a1   :  { %8626 = vmatprep.subr.bf16.mxu0 %v9912_v56  ;;  %8651 = vmatprep.subr.bf16.mxu1 %v9713_v8 }
0x11a4   :  { %8628 = vmatpush1.bf16.msra.mxu0 %v9938_v0  ;;  %8653 = vmatpush3.bf16.msra.mxu1 %v9982_v25 }
0x11a5   :  { %8630 = vmatprep.subr.bf16.mxu0 %v9942_v2  ;;  %8654 = vmatprep.subr.bf16.mxu1 %v9713_v8 }
0x11a8   :  { %8632 = vmatpush1.bf16.msra.mxu0 %v9962_v13  ;;  %8656 = vmatpush3.bf16.msra.mxu1 %v9998_v29 }
0x11a9   :  { %8658 = vmatprep.subr.bf16.mxu0 %v9759_v4  ;;  %8689 = vmatprep.subr.bf16.mxu1 %v9713_v8 }
0x125e   :  { %v3177_v36 = vpop.f32.mrb[34].mxu0  ;;  %v3248_v12 = vpop.f32.mrb[34].mxu1 }
0x125f   :  { %v3178_v14 = vadd.f32 %v3177_v36, %v10063_v55  ;;  %v3179_v37 = vpop.f32.mrb[35].mxu0  ;;  %v7102_v38 = vpop.f32.mrb[35].mxu1  ;;  %v3249_v53 = vadd.f32 %v3248_v12, %v10069_v27  ;;  %v3286_v36 = vunpack.c.h.bf16 %v5859_v61 }
0x1260   :  { %v3180_v41 = vadd.f32 %v3179_v37, %v10065_v57 }
0x1261   :  { %v3252_v42 = vadd.f32 %v3178_v14, %v3108_v28 }
0x1262   :  { %v3259_v47 = vadd.f32 %v3180_v41, %v3109_v40 }
0x1263   :  { %v5856_v44 = vmul.f32 -1.442695, %v3252_v42 }
0x1264   :  { %v5857_v32 = vmul.f32 -1.442695, %v3259_v47  ;;  %v11015_v47 = vld [vmem:[%s11632_s1 + $0xe0] ss:$12 sps:$4 sm:$0xff]  }
0x1265   :  { %9562 = vpow2.f32 %v5856_v44 }
0x1266   :  { %9564 = vpow2.f32 %v5857_v32 }
0x126f   :  { %v9563_v34 = vpop.eup %9562 }
0x1270   :  { %v3256_v48 = vadd.f32 1.0, %v9563_v34  ;;  %v9565_v50 = vpop.eup %9564  ;;  %v3287_v34 = vunpack.c.l.bf16 %v11015_v47 }
0x1271   :  { %v3263_v51 = vadd.f32 1.0, %v9565_v50 }
0x1272   :  { %9566 = vrcp.f32 %v3256_v48 }
0x1273   :  { %9568 = vrcp.f32 %v3263_v51 }
0x127c   :  { %v9567_v58 = vpop.eup %9566 }
0x127d   :  { %v3266_v46 = vmul.f32 %v9567_v58, %v3249_v53  ;;  %v9569_v62 = vpop.eup %9568 }
0x127e   :  { %v3269_v63 = vsub.f32 1.0, %v9569_v62  ;;  %v3271_v5 = vmul.f32 %v9569_v62, %v10920_v22 }
0x127f   :  { %v3267_v15 = vadd.f32 %v3266_v46, %v3110_v21 }
0x1281   :  { %9570 = vtanh.f32 %v3267_v15 }
0x128b   :  { %v9571_v1 = vpop.eup %9570 }
0x128c   :  { %v3270_v3 = vmul.f32 %v9571_v1, %v3269_v63  ;;  %v3455_v63 = vpop.permute.xlu0 %3454 }
0x128d   :  { %vm3456_vm6 = vcmp.eq.s32.totalorder %v3455_v63, 1 }
0x128e   :  { %v3272_v30 = vadd.f32 %v3271_v5, %v3270_v3  ;;  %v5864_v5 = vld [vmem:[%s11632_s1 + $0xe4] sm:$0xff] }
0x128f   :  { %v3462_v7 = vunpack.c.l.bf16 %v5864_v5 }
0x1290   :  { %v10968_v59 = vsel %vm3279_vm5, %v3272_v30, %v10920_v22 }
0x1291   :  { %3353 = vmatmul.mubr.f32.vlgmr.msra.gmra.mrb[36].mxu0 %v10968_v59  ;;  %7136 = vmatmul.mubr.f32.vlgmr.msra.gmra.mrb[36].mxu1 %v10968_v59 }
0x1292   :  { %8660 = vmatpush1.bf16.msra.mxu0 %v9772_v10  ;;  %8691 = vmatpush3.bf16.msra.mxu1 %v9835_v31 }
0x1293   :  { %8662 = vmatprep.subr.bf16.mxu0 %v9774_v11  ;;  %8692 = vmatprep.subr.bf16.mxu1 %v9713_v8 }
0x1294   :  { %3529 = vmatprep.mubr.f32.mxu0 %v9714_v9  ;;  %7170 = vmatprep.mubr.msk.f32.mxu1 %vm9715_vm0, %v9714_v9 }
0x1296   :  { %8664 = vmatpush1.bf16.msra.mxu0 %v9794_v17  ;;  %8694 = vmatpush3.bf16.msra.mxu1 %v9859_v39 }
0x1297   :  { %8666 = vmatprep.subr.bf16.mxu0 %v9797_v18  ;;  %8695 = vmatprep.subr.bf16.mxu1 %v9713_v8 }
0x129a   :  { %8668 = vmatpush1.bf16.msra.mxu0 %v9812_v23  ;;  %8697 = vmatpush3.bf16.msra.mxu1 %v9892_v49 }
0x129b   :  { %8670 = vmatprep.subr.bf16.mxu0 %v9815_v24  ;;  %8698 = vmatprep.subr.bf16.mxu1 %v9713_v8 }
0x129e   :  { %8672 = vmatpush1.bf16.msra.mxu0 %v9841_v33  ;;  %8700 = vmatpush3.bf16.msra.mxu1 %v9924_v60 }
0x129f   :  { %8674 = vmatprep.subr.bf16.mxu0 %v9847_v35  ;;  %8701 = vmatprep.subr.bf16.mxu1 %v9713_v8 }
0x12a2   :  { %8676 = vmatpush1.bf16.msra.mxu0 %v9872_v43  ;;  %8703 = vmatpush3.bf16.msra.mxu1 %v9951_v6 }
0x12a3   :  { %8678 = vmatprep.subr.bf16.mxu0 %v9880_v45  ;;  %8704 = vmatprep.subr.bf16.mxu1 %v9713_v8 }
0x12a6   :  { %8680 = vmatpush1.bf16.msra.mxu0 %v9908_v54  ;;  %8706 = vmatpush3.bf16.msra.mxu1 %v9967_v16 }
0x12a7   :  { %8682 = vmatprep.subr.bf16.mxu0 %v9912_v56  ;;  %8707 = vmatprep.subr.bf16.mxu1 %v9713_v8 }
0x12aa   :  { %8684 = vmatpush1.bf16.msra.mxu0 %v9938_v0  ;;  %8709 = vmatpush3.bf16.msra.mxu1 %v9982_v25 }
0x12ab   :  { %8686 = vmatprep.subr.bf16.mxu0 %v9942_v2  ;;  %8710 = vmatprep.subr.bf16.mxu1 %v9713_v8 }
0x12ae   :  { %8688 = vmatpush1.bf16.msra.mxu0 %v9962_v13  ;;  %8712 = vmatpush3.bf16.msra.mxu1 %v9998_v29 }
0x12af   :  { %8714 = vmatprep.subr.bf16.mxu0 %v9759_v4  ;;  %8745 = vmatprep.subr.bf16.mxu1 %v9713_v8 }
0x1364   :  { %v3354_v19 = vpop.f32.mrb[36].mxu0  ;;  %v3425_v20 = vpop.f32.mrb[36].mxu1 }
0x1365   :  { %v3355_v22 = vadd.f32 %v3354_v19, %v10063_v55  ;;  %v3356_v26 = vpop.f32.mrb[37].mxu0  ;;  %v7137_v28 = vpop.f32.mrb[37].mxu1  ;;  %v3426_v48 = vadd.f32 %v3425_v20, %v10069_v27  ;;  %v3463_v20 = vunpack.c.h.bf16 %v5864_v5 }
0x1366   :  { %v3357_v12 = vadd.f32 %v3356_v26, %v10065_v57 }
0x1367   :  { %v3429_v14 = vadd.f32 %v3355_v22, %v3285_v52 }
0x1368   :  { %v3436_v38 = vadd.f32 %v3357_v12, %v3286_v36 }
0x1369   :  { %v5861_v37 = vmul.f32 -1.442695, %v3429_v14 }
0x136a   :  { %v5862_v40 = vmul.f32 -1.442695, %v3436_v38 }
0x136b   :  { %9572 = vpow2.f32 %v5861_v37 }
0x136c   :  { %9574 = vpow2.f32 %v5862_v40 }
0x1375   :  { %v9573_v41 = vpop.eup %9572 }
0x1376   :  { %v3433_v42 = vadd.f32 1.0, %v9573_v41  ;;  %v9575_v44 = vpop.eup %9574  ;;  %v3464_v41 = vunpack.c.h.bf16 %v11015_v47  ;;  %v5869_v47 = vld [vmem:[%s11632_s1 + $0xf0] sm:$0xff] }
0x1377   :  { %v3440_v32 = vadd.f32 1.0, %v9575_v44 }
0x1378   :  { %9576 = vrcp.f32 %v3433_v42 }
0x1379   :  { %9578 = vrcp.f32 %v3440_v32 }
0x1382   :  { %v9577_v50 = vpop.eup %9576 }
0x1383   :  { %v3443_v51 = vmul.f32 %v9577_v50, %v3426_v48  ;;  %v9579_v53 = vpop.eup %9578 }
0x1384   :  { %v3446_v58 = vsub.f32 1.0, %v9579_v53  ;;  %v3448_v62 = vmul.f32 %v9579_v53, %v10968_v59 }
0x1385   :  { %v3444_v21 = vadd.f32 %v3443_v51, %v3287_v34 }
0x1387   :  { %9580 = vtanh.f32 %v3444_v21 }
0x1391   :  { %v9581_v46 = vpop.eup %9580 }
0x1392   :  { %v3447_v15 = vmul.f32 %v9581_v46, %v3446_v58  ;;  %v3632_v58 = vpop.permute.xlu1 %3631 }
0x1393   :  { %vm3633_vm7 = vcmp.eq.s32.totalorder %v3632_v58, 1 }
0x1394   :  { %v3449_v1 = vadd.f32 %v3448_v62, %v3447_v15  ;;  %v3639_v62 = vunpack.c.l.bf16 %v5869_v47 }
0x1396   :  { %v11021_v3 = vsel %vm3456_vm6, %v3449_v1, %v10968_v59 }
0x1397   :  { %3530 = vmatmul.mubr.f32.vlgmr.msra.gmra.mrb[38].mxu0 %v11021_v3  ;;  %7171 = vmatmul.mubr.f32.vlgmr.msra.gmra.mrb[38].mxu1 %v11021_v3 }
0x1398   :  { %8716 = vmatpush1.bf16.msra.mxu0 %v9772_v10  ;;  %8747 = vmatpush3.bf16.msra.mxu1 %v9835_v31 }
0x1399   :  { %8718 = vmatprep.subr.bf16.mxu0 %v9774_v11  ;;  %8748 = vmatprep.subr.bf16.mxu1 %v9713_v8 }
0x139a   :  { %3706 = vmatprep.mubr.f32.mxu0 %v9714_v9  ;;  %7205 = vmatprep.mubr.msk.f32.mxu1 %vm9715_vm0, %v9714_v9 }
0x139c   :  { %8720 = vmatpush1.bf16.msra.mxu0 %v9794_v17  ;;  %8750 = vmatpush3.bf16.msra.mxu1 %v9859_v39 }
0x139d   :  { %8722 = vmatprep.subr.bf16.mxu0 %v9797_v18  ;;  %8751 = vmatprep.subr.bf16.mxu1 %v9713_v8 }
0x13a0   :  { %8724 = vmatpush1.bf16.msra.mxu0 %v9812_v23  ;;  %8753 = vmatpush3.bf16.msra.mxu1 %v9892_v49 }
0x13a1   :  { %8726 = vmatprep.subr.bf16.mxu0 %v9815_v24  ;;  %8754 = vmatprep.subr.bf16.mxu1 %v9713_v8 }
0x13a4   :  { %8728 = vmatpush1.bf16.msra.mxu0 %v9841_v33  ;;  %8756 = vmatpush3.bf16.msra.mxu1 %v9924_v60 }
0x13a5   :  { %8730 = vmatprep.subr.bf16.mxu0 %v9847_v35  ;;  %8757 = vmatprep.subr.bf16.mxu1 %v9713_v8 }
0x13a8   :  { %8732 = vmatpush1.bf16.msra.mxu0 %v9872_v43  ;;  %8759 = vmatpush3.bf16.msra.mxu1 %v9951_v6 }
0x13a9   :  { %8734 = vmatprep.subr.bf16.mxu0 %v9880_v45  ;;  %8760 = vmatprep.subr.bf16.mxu1 %v9713_v8 }
0x13ac   :  { %8736 = vmatpush1.bf16.msra.mxu0 %v9908_v54  ;;  %8762 = vmatpush3.bf16.msra.mxu1 %v9967_v16 }
0x13ad   :  { %8738 = vmatprep.subr.bf16.mxu0 %v9912_v56  ;;  %8763 = vmatprep.subr.bf16.mxu1 %v9713_v8 }
0x13b0   :  { %8740 = vmatpush1.bf16.msra.mxu0 %v9938_v0  ;;  %8765 = vmatpush3.bf16.msra.mxu1 %v9982_v25 }
0x13b1   :  { %8742 = vmatprep.subr.bf16.mxu0 %v9942_v2  ;;  %8766 = vmatprep.subr.bf16.mxu1 %v9713_v8 }
0x13b4   :  { %8744 = vmatpush1.bf16.msra.mxu0 %v9962_v13  ;;  %8768 = vmatpush3.bf16.msra.mxu1 %v9998_v29 }
0x13b5   :  { %8770 = vmatprep.subr.bf16.mxu0 %v9759_v4  ;;  %8801 = vmatprep.subr.bf16.mxu1 %v9713_v8 }
0x146a   :  { %v3531_v30 = vpop.f32.mrb[38].mxu0  ;;  %v3602_v59 = vpop.f32.mrb[38].mxu1 }
0x146b   :  { %v3532_v61 = vadd.f32 %v3531_v30, %v10063_v55  ;;  %v3533_v52 = vpop.f32.mrb[39].mxu0  ;;  %v7172_v19 = vpop.f32.mrb[39].mxu1  ;;  %v3603_v42 = vadd.f32 %v3602_v59, %v10069_v27  ;;  %v3640_v30 = vunpack.c.h.bf16 %v5869_v47 }
0x146c   :  { %v3534_v22 = vadd.f32 %v3533_v52, %v10065_v57 }
0x146d   :  { %v3606_v26 = vadd.f32 %v3532_v61, %v3462_v7 }
0x146e   :  { %v3613_v36 = vadd.f32 %v3534_v22, %v3463_v20 }
0x146f   :  { %v5866_v28 = vmul.f32 -1.442695, %v3606_v26 }
0x1470   :  { %v5867_v12 = vmul.f32 -1.442695, %v3613_v36  ;;  %v11116_v36 = vld [vmem:[%s11632_s1 + $0xf8] ss:$12 sps:$4 sm:$0xff]  }
0x1471   :  { %9582 = vpow2.f32 %v5866_v28 }
0x1472   :  { %9584 = vpow2.f32 %v5867_v12 }
0x147b   :  { %v9583_v14 = vpop.eup %9582 }
0x147c   :  { %v3610_v37 = vadd.f32 1.0, %v9583_v14  ;;  %v9585_v38 = vpop.eup %9584  ;;  %v3641_v14 = vunpack.c.l.bf16 %v11116_v36 }
0x147d   :  { %v3617_v40 = vadd.f32 1.0, %v9585_v38 }
0x147e   :  { %9586 = vrcp.f32 %v3610_v37 }
0x147f   :  { %9588 = vrcp.f32 %v3617_v40 }
0x1488   :  { %v9587_v44 = vpop.eup %9586 }
0x1489   :  { %v3620_v32 = vmul.f32 %v9587_v44, %v3603_v42  ;;  %v9589_v48 = vpop.eup %9588 }
0x148a   :  { %v3623_v50 = vsub.f32 1.0, %v9589_v48  ;;  %v3625_v53 = vmul.f32 %v9589_v48, %v11021_v3 }
0x148b   :  { %v3621_v34 = vadd.f32 %v3620_v32, %v3464_v41 }
0x148d   :  { %9590 = vtanh.f32 %v3621_v34 }
0x1497   :  { %v9591_v51 = vpop.eup %9590 }
0x1498   :  { %v3624_v21 = vmul.f32 %v9591_v51, %v3623_v50  ;;  %v3809_v50 = vpop.permute.xlu0 %3808 }
0x1499   :  { %vm3810_vm8 = vcmp.eq.s32.totalorder %v3809_v50, 1 }
0x149a   :  { %v3626_v46 = vadd.f32 %v3625_v53, %v3624_v21  ;;  %v5874_v53 = vld [vmem:[%s11632_s1 + $0xfc] sm:$0xff] }
0x149b   :  { %v3816_v58 = vunpack.c.l.bf16 %v5874_v53 }
0x149c   :  { %v11069_v15 = vsel %vm3633_vm7, %v3626_v46, %v11021_v3 }
0x149d   :  { %3707 = vmatmul.mubr.f32.vlgmr.msra.gmra.mrb[40].mxu0 %v11069_v15  ;;  %7206 = vmatmul.mubr.f32.vlgmr.msra.gmra.mrb[40].mxu1 %v11069_v15 }
0x149e   :  { %8772 = vmatpush1.bf16.msra.mxu0 %v9772_v10  ;;  %8803 = vmatpush3.bf16.msra.mxu1 %v9835_v31 }
0x149f   :  { %8774 = vmatprep.subr.bf16.mxu0 %v9774_v11  ;;  %8804 = vmatprep.subr.bf16.mxu1 %v9713_v8 }
0x14a0   :  { %3883 = vmatprep.mubr.f32.mxu0 %v9714_v9  ;;  %7240 = vmatprep.mubr.msk.f32.mxu1 %vm9715_vm0, %v9714_v9 }
0x14a2   :  { %8776 = vmatpush1.bf16.msra.mxu0 %v9794_v17  ;;  %8806 = vmatpush3.bf16.msra.mxu1 %v9859_v39 }
0x14a3   :  { %8778 = vmatprep.subr.bf16.mxu0 %v9797_v18  ;;  %8807 = vmatprep.subr.bf16.mxu1 %v9713_v8 }
0x14a6   :  { %8780 = vmatpush1.bf16.msra.mxu0 %v9812_v23  ;;  %8809 = vmatpush3.bf16.msra.mxu1 %v9892_v49 }
0x14a7   :  { %8782 = vmatprep.subr.bf16.mxu0 %v9815_v24  ;;  %8810 = vmatprep.subr.bf16.mxu1 %v9713_v8 }
0x14aa   :  { %8784 = vmatpush1.bf16.msra.mxu0 %v9841_v33  ;;  %8812 = vmatpush3.bf16.msra.mxu1 %v9924_v60 }
0x14ab   :  { %8786 = vmatprep.subr.bf16.mxu0 %v9847_v35  ;;  %8813 = vmatprep.subr.bf16.mxu1 %v9713_v8 }
0x14ae   :  { %8788 = vmatpush1.bf16.msra.mxu0 %v9872_v43  ;;  %8815 = vmatpush3.bf16.msra.mxu1 %v9951_v6 }
0x14af   :  { %8790 = vmatprep.subr.bf16.mxu0 %v9880_v45  ;;  %8816 = vmatprep.subr.bf16.mxu1 %v9713_v8 }
0x14b2   :  { %8792 = vmatpush1.bf16.msra.mxu0 %v9908_v54  ;;  %8818 = vmatpush3.bf16.msra.mxu1 %v9967_v16 }
0x14b3   :  { %8794 = vmatprep.subr.bf16.mxu0 %v9912_v56  ;;  %8819 = vmatprep.subr.bf16.mxu1 %v9713_v8 }
0x14b6   :  { %8796 = vmatpush1.bf16.msra.mxu0 %v9938_v0  ;;  %8821 = vmatpush3.bf16.msra.mxu1 %v9982_v25 }
0x14b7   :  { %8798 = vmatprep.subr.bf16.mxu0 %v9942_v2  ;;  %8822 = vmatprep.subr.bf16.mxu1 %v9713_v8 }
0x14ba   :  { %8800 = vmatpush1.bf16.msra.mxu0 %v9962_v13  ;;  %8824 = vmatpush3.bf16.msra.mxu1 %v9998_v29 }
0x14bb   :  { %8826 = vmatprep.subr.bf16.mxu0 %v9759_v4  ;;  %8857 = vmatprep.subr.bf16.mxu1 %v9713_v8 }
0x1570   :  { %v3708_v63 = vpop.f32.mrb[40].mxu0  ;;  %v3779_v1 = vpop.f32.mrb[40].mxu1 }
0x1571   :  { %v3709_v3 = vadd.f32 %v3708_v63, %v10063_v55  ;;  %v3710_v5 = vpop.f32.mrb[41].mxu0  ;;  %v7207_v7 = vpop.f32.mrb[41].mxu1  ;;  %v3780_v37 = vadd.f32 %v3779_v1, %v10069_v27  ;;  %v3817_v1 = vunpack.c.h.bf16 %v5874_v53 }
0x1572   :  { %v3711_v59 = vadd.f32 %v3710_v5, %v10065_v57 }
0x1573   :  { %v3783_v61 = vadd.f32 %v3709_v3, %v3639_v62 }
0x1574   :  { %v3790_v19 = vadd.f32 %v3711_v59, %v3640_v30 }
0x1575   :  { %v5871_v52 = vmul.f32 -1.442695, %v3783_v61 }
0x1576   :  { %v5872_v20 = vmul.f32 -1.442695, %v3790_v19 }
0x1577   :  { %9592 = vpow2.f32 %v5871_v52 }
0x1578   :  { %9594 = vpow2.f32 %v5872_v20 }
0x1581   :  { %v9593_v22 = vpop.eup %9592 }
0x1582   :  { %v3787_v26 = vadd.f32 1.0, %v9593_v22  ;;  %v9595_v28 = vpop.eup %9594  ;;  %v3818_v22 = vunpack.c.h.bf16 %v11116_v36  ;;  %v5879_v36 = vld [vmem:[%s11632_s1 + $0x108] sm:$0xff] }
0x1583   :  { %v3794_v12 = vadd.f32 1.0, %v9595_v28 }
0x1584   :  { %9596 = vrcp.f32 %v3787_v26 }
0x1585   :  { %9598 = vrcp.f32 %v3794_v12 }
0x158e   :  { %v9597_v38 = vpop.eup %9596 }
0x158f   :  { %v3797_v40 = vmul.f32 %v9597_v38, %v3780_v37  ;;  %v9599_v42 = vpop.eup %9598 }
0x1590   :  { %v3800_v44 = vsub.f32 1.0, %v9599_v42  ;;  %v3802_v48 = vmul.f32 %v9599_v42, %v11069_v15 }
0x1591   :  { %v3798_v41 = vadd.f32 %v3797_v40, %v3641_v14 }
0x1593   :  { %9600 = vtanh.f32 %v3798_v41 }
0x159d   :  { %v9601_v32 = vpop.eup %9600 }
0x159e   :  { %v3801_v34 = vmul.f32 %v9601_v32, %v3800_v44  ;;  %v3986_v44 = vpop.permute.xlu1 %3985 }
0x159f   :  { %vm3987_vm9 = vcmp.eq.s32.totalorder %v3986_v44, 1 }
0x15a0   :  { %v3803_v51 = vadd.f32 %v3802_v48, %v3801_v34  ;;  %v3993_v48 = vunpack.c.l.bf16 %v5879_v36 }
0x15a2   :  { %v11122_v21 = vsel %vm3810_vm8, %v3803_v51, %v11069_v15 }
0x15a3   :  { %3884 = vmatmul.mubr.f32.vlgmr.msra.gmra.mrb[42].mxu0 %v11122_v21  ;;  %7241 = vmatmul.mubr.f32.vlgmr.msra.gmra.mrb[42].mxu1 %v11122_v21 }
0x15a4   :  { %8828 = vmatpush1.bf16.msra.mxu0 %v9772_v10  ;;  %8859 = vmatpush3.bf16.msra.mxu1 %v9835_v31 }
0x15a5   :  { %8830 = vmatprep.subr.bf16.mxu0 %v9774_v11  ;;  %8860 = vmatprep.subr.bf16.mxu1 %v9713_v8 }
0x15a6   :  { %4060 = vmatprep.mubr.f32.mxu0 %v9714_v9  ;;  %7275 = vmatprep.mubr.msk.f32.mxu1 %vm9715_vm0, %v9714_v9 }
0x15a8   :  { %8832 = vmatpush1.bf16.msra.mxu0 %v9794_v17  ;;  %8862 = vmatpush3.bf16.msra.mxu1 %v9859_v39 }
0x15a9   :  { %8834 = vmatprep.subr.bf16.mxu0 %v9797_v18  ;;  %8863 = vmatprep.subr.bf16.mxu1 %v9713_v8 }
0x15ac   :  { %8836 = vmatpush1.bf16.msra.mxu0 %v9812_v23  ;;  %8865 = vmatpush3.bf16.msra.mxu1 %v9892_v49 }
0x15ad   :  { %8838 = vmatprep.subr.bf16.mxu0 %v9815_v24  ;;  %8866 = vmatprep.subr.bf16.mxu1 %v9713_v8 }
0x15b0   :  { %8840 = vmatpush1.bf16.msra.mxu0 %v9841_v33  ;;  %8868 = vmatpush3.bf16.msra.mxu1 %v9924_v60 }
0x15b1   :  { %8842 = vmatprep.subr.bf16.mxu0 %v9847_v35  ;;  %8869 = vmatprep.subr.bf16.mxu1 %v9713_v8 }
0x15b4   :  { %8844 = vmatpush1.bf16.msra.mxu0 %v9872_v43  ;;  %8871 = vmatpush3.bf16.msra.mxu1 %v9951_v6 }
0x15b5   :  { %8846 = vmatprep.subr.bf16.mxu0 %v9880_v45  ;;  %8872 = vmatprep.subr.bf16.mxu1 %v9713_v8 }
0x15b8   :  { %8848 = vmatpush1.bf16.msra.mxu0 %v9908_v54  ;;  %8874 = vmatpush3.bf16.msra.mxu1 %v9967_v16 }
0x15b9   :  { %8850 = vmatprep.subr.bf16.mxu0 %v9912_v56  ;;  %8875 = vmatprep.subr.bf16.mxu1 %v9713_v8 }
0x15bc   :  { %8852 = vmatpush1.bf16.msra.mxu0 %v9938_v0  ;;  %8877 = vmatpush3.bf16.msra.mxu1 %v9982_v25 }
0x15bd   :  { %8854 = vmatprep.subr.bf16.mxu0 %v9942_v2  ;;  %8878 = vmatprep.subr.bf16.mxu1 %v9713_v8 }
0x15c0   :  { %8856 = vmatpush1.bf16.msra.mxu0 %v9962_v13  ;;  %8880 = vmatpush3.bf16.msra.mxu1 %v9998_v29 }
0x15c1   :  { %8882 = vmatprep.subr.bf16.mxu0 %v9759_v4  ;;  %8913 = vmatprep.subr.bf16.mxu1 %v9713_v8 }
0x1676   :  { %v3885_v46 = vpop.f32.mrb[42].mxu0  ;;  %v3956_v15 = vpop.f32.mrb[42].mxu1 }
0x1677   :  { %v3886_v47 = vadd.f32 %v3885_v46, %v10063_v55  ;;  %v3887_v62 = vpop.f32.mrb[43].mxu0  ;;  %v7242_v63 = vpop.f32.mrb[43].mxu1  ;;  %v3957_v26 = vadd.f32 %v3956_v15, %v10069_v27  ;;  %v3994_v46 = vunpack.c.h.bf16 %v5879_v36 }
0x1678   :  { %v3888_v3 = vadd.f32 %v3887_v62, %v10065_v57 }
0x1679   :  { %v3960_v5 = vadd.f32 %v3886_v47, %v3816_v58 }
0x167a   :  { %v3967_v30 = vadd.f32 %v3888_v3, %v3817_v1 }
0x167b   :  { %v5876_v7 = vmul.f32 -1.442695, %v3960_v5 }
0x167c   :  { %v5877_v59 = vmul.f32 -1.442695, %v3967_v30  ;;  %v11217_v30 = vld [vmem:[%s11632_s1 + $0x110] ss:$12 sps:$4 sm:$0xff]  }
0x167d   :  { %9602 = vpow2.f32 %v5876_v7 }
0x167e   :  { %9604 = vpow2.f32 %v5877_v59 }
0x1687   :  { %v9603_v61 = vpop.eup %9602 }
0x1688   :  { %v3964_v52 = vadd.f32 1.0, %v9603_v61  ;;  %v9605_v19 = vpop.eup %9604  ;;  %v3995_v61 = vunpack.c.l.bf16 %v11217_v30 }
0x1689   :  { %v3971_v20 = vadd.f32 1.0, %v9605_v19 }
0x168a   :  { %9606 = vrcp.f32 %v3964_v52 }
0x168b   :  { %9608 = vrcp.f32 %v3971_v20 }
0x1694   :  { %v9607_v28 = vpop.eup %9606 }
0x1695   :  { %v3974_v12 = vmul.f32 %v9607_v28, %v3957_v26  ;;  %v9609_v37 = vpop.eup %9608 }
0x1696   :  { %v3977_v38 = vsub.f32 1.0, %v9609_v37  ;;  %v3979_v42 = vmul.f32 %v9609_v37, %v11122_v21 }
0x1697   :  { %v3975_v14 = vadd.f32 %v3974_v12, %v3818_v22 }
0x1699   :  { %9610 = vtanh.f32 %v3975_v14 }
0x16a3   :  { %v9611_v40 = vpop.eup %9610 }
0x16a4   :  { %v3978_v41 = vmul.f32 %v9611_v40, %v3977_v38  ;;  %v4163_v38 = vpop.permute.xlu0 %4162 }
0x16a5   :  { %vm4164_vm10 = vcmp.eq.s32.totalorder %v4163_v38, 1 }
0x16a6   :  { %v3980_v32 = vadd.f32 %v3979_v42, %v3978_v41  ;;  %v5884_v42 = vld [vmem:[%s11632_s1 + $0x114] sm:$0xff] }
0x16a7   :  { %v4170_v44 = vunpack.c.l.bf16 %v5884_v42 }
0x16a8   :  { %v11170_v34 = vsel %vm3987_vm9, %v3980_v32, %v11122_v21 }
0x16a9   :  { %4061 = vmatmul.mubr.f32.vlgmr.msra.gmra.mrb[44].mxu0 %v11170_v34  ;;  %7276 = vmatmul.mubr.f32.vlgmr.msra.gmra.mrb[44].mxu1 %v11170_v34 }
0x16aa   :  { %8884 = vmatpush1.bf16.msra.mxu0 %v9772_v10  ;;  %8915 = vmatpush3.bf16.msra.mxu1 %v9835_v31 }
0x16ab   :  { %8886 = vmatprep.subr.bf16.mxu0 %v9774_v11  ;;  %8916 = vmatprep.subr.bf16.mxu1 %v9713_v8 }
0x16ac   :  { %4237 = vmatprep.mubr.f32.mxu0 %v9714_v9  ;;  %7310 = vmatprep.mubr.msk.f32.mxu1 %vm9715_vm0, %v9714_v9 }
0x16ae   :  { %8888 = vmatpush1.bf16.msra.mxu0 %v9794_v17  ;;  %8918 = vmatpush3.bf16.msra.mxu1 %v9859_v39 }
0x16af   :  { %8890 = vmatprep.subr.bf16.mxu0 %v9797_v18  ;;  %8919 = vmatprep.subr.bf16.mxu1 %v9713_v8 }
0x16b2   :  { %8892 = vmatpush1.bf16.msra.mxu0 %v9812_v23  ;;  %8921 = vmatpush3.bf16.msra.mxu1 %v9892_v49 }
0x16b3   :  { %8894 = vmatprep.subr.bf16.mxu0 %v9815_v24  ;;  %8922 = vmatprep.subr.bf16.mxu1 %v9713_v8 }
0x16b6   :  { %8896 = vmatpush1.bf16.msra.mxu0 %v9841_v33  ;;  %8924 = vmatpush3.bf16.msra.mxu1 %v9924_v60 }
0x16b7   :  { %8898 = vmatprep.subr.bf16.mxu0 %v9847_v35  ;;  %8925 = vmatprep.subr.bf16.mxu1 %v9713_v8 }
0x16ba   :  { %8900 = vmatpush1.bf16.msra.mxu0 %v9872_v43  ;;  %8927 = vmatpush3.bf16.msra.mxu1 %v9951_v6 }
0x16bb   :  { %8902 = vmatprep.subr.bf16.mxu0 %v9880_v45  ;;  %8928 = vmatprep.subr.bf16.mxu1 %v9713_v8 }
0x16be   :  { %8904 = vmatpush1.bf16.msra.mxu0 %v9908_v54  ;;  %8930 = vmatpush3.bf16.msra.mxu1 %v9967_v16 }
0x16bf   :  { %8906 = vmatprep.subr.bf16.mxu0 %v9912_v56  ;;  %8931 = vmatprep.subr.bf16.mxu1 %v9713_v8 }
0x16c2   :  { %8908 = vmatpush1.bf16.msra.mxu0 %v9938_v0  ;;  %8933 = vmatpush3.bf16.msra.mxu1 %v9982_v25 }
0x16c3   :  { %8910 = vmatprep.subr.bf16.mxu0 %v9942_v2  ;;  %8934 = vmatprep.subr.bf16.mxu1 %v9713_v8 }
0x16c6   :  { %8912 = vmatpush1.bf16.msra.mxu0 %v9962_v13  ;;  %8936 = vmatpush3.bf16.msra.mxu1 %v9998_v29 }
0x16c7   :  { %8938 = vmatprep.subr.bf16.mxu0 %v9759_v4  ;;  %8969 = vmatprep.subr.bf16.mxu1 %v9713_v8 }
0x177c   :  { %v4062_v50 = vpop.f32.mrb[44].mxu0  ;;  %v4133_v51 = vpop.f32.mrb[44].mxu1 }
0x177d   :  { %v4063_v21 = vadd.f32 %v4062_v50, %v10063_v55  ;;  %v4064_v53 = vpop.f32.mrb[45].mxu0  ;;  %v7277_v58 = vpop.f32.mrb[45].mxu1  ;;  %v4134_v52 = vadd.f32 %v4133_v51, %v10069_v27  ;;  %v4171_v51 = vunpack.c.h.bf16 %v5884_v42 }
0x177e   :  { %v4065_v15 = vadd.f32 %v4064_v53, %v10065_v57 }
0x177f   :  { %v4137_v47 = vadd.f32 %v4063_v21, %v3993_v48 }
0x1780   :  { %v4144_v63 = vadd.f32 %v4065_v15, %v3994_v46 }
0x1781   :  { %v5881_v62 = vmul.f32 -1.442695, %v4137_v47 }
0x1782   :  { %v5882_v1 = vmul.f32 -1.442695, %v4144_v63 }
0x1783   :  { %9612 = vpow2.f32 %v5881_v62 }
0x1784   :  { %9614 = vpow2.f32 %v5882_v1 }
0x178d   :  { %v9613_v3 = vpop.eup %9612 }
0x178e   :  { %v4141_v5 = vadd.f32 1.0, %v9613_v3  ;;  %v9615_v7 = vpop.eup %9614  ;;  %v4172_v3 = vunpack.c.h.bf16 %v11217_v30  ;;  %v5889_v30 = vld [vmem:[%s11632_s1 + $0x120] sm:$0xff] }
0x178f   :  { %v4148_v59 = vadd.f32 1.0, %v9615_v7 }
0x1790   :  { %9616 = vrcp.f32 %v4141_v5 }
0x1791   :  { %9618 = vrcp.f32 %v4148_v59 }
0x179a   :  { %v9617_v19 = vpop.eup %9616 }
0x179b   :  { %v4151_v20 = vmul.f32 %v9617_v19, %v4134_v52  ;;  %v9619_v26 = vpop.eup %9618 }
0x179c   :  { %v4154_v28 = vsub.f32 1.0, %v9619_v26  ;;  %v4156_v37 = vmul.f32 %v9619_v26, %v11170_v34 }
0x179d   :  { %v4152_v22 = vadd.f32 %v4151_v20, %v3995_v61 }
0x179f   :  { %9620 = vtanh.f32 %v4152_v22 }
0x17a9   :  { %v9621_v12 = vpop.eup %9620 }
0x17aa   :  { %v4155_v14 = vmul.f32 %v9621_v12, %v4154_v28  ;;  %v4340_v28 = vpop.permute.xlu1 %4339 }
0x17ab   :  { %vm4341_vm11 = vcmp.eq.s32.totalorder %v4340_v28, 1 }
0x17ac   :  { %v4157_v40 = vadd.f32 %v4156_v37, %v4155_v14  ;;  %v4347_v37 = vunpack.c.l.bf16 %v5889_v30 }
0x17ae   :  { %v11223_v41 = vsel %vm4164_vm10, %v4157_v40, %v11170_v34 }
0x17af   :  { %4238 = vmatmul.mubr.f32.vlgmr.msra.gmra.mrb[46].mxu0 %v11223_v41  ;;  %7311 = vmatmul.mubr.f32.vlgmr.msra.gmra.mrb[46].mxu1 %v11223_v41 }
0x17b0   :  { %8940 = vmatpush1.bf16.msra.mxu0 %v9772_v10  ;;  %8971 = vmatpush3.bf16.msra.mxu1 %v9835_v31 }
0x17b1   :  { %8942 = vmatprep.subr.bf16.mxu0 %v9774_v11  ;;  %8972 = vmatprep.subr.bf16.mxu1 %v9713_v8 }
0x17b2   :  { %4414 = vmatprep.mubr.f32.mxu0 %v9714_v9  ;;  %7345 = vmatprep.mubr.msk.f32.mxu1 %vm9715_vm0, %v9714_v9 }
0x17b4   :  { %8944 = vmatpush1.bf16.msra.mxu0 %v9794_v17  ;;  %8974 = vmatpush3.bf16.msra.mxu1 %v9859_v39 }
0x17b5   :  { %8946 = vmatprep.subr.bf16.mxu0 %v9797_v18  ;;  %8975 = vmatprep.subr.bf16.mxu1 %v9713_v8 }
0x17b8   :  { %8948 = vmatpush1.bf16.msra.mxu0 %v9812_v23  ;;  %8977 = vmatpush3.bf16.msra.mxu1 %v9892_v49 }
0x17b9   :  { %8950 = vmatprep.subr.bf16.mxu0 %v9815_v24  ;;  %8978 = vmatprep.subr.bf16.mxu1 %v9713_v8 }
0x17bc   :  { %8952 = vmatpush1.bf16.msra.mxu0 %v9841_v33  ;;  %8980 = vmatpush3.bf16.msra.mxu1 %v9924_v60 }
0x17bd   :  { %8954 = vmatprep.subr.bf16.mxu0 %v9847_v35  ;;  %8981 = vmatprep.subr.bf16.mxu1 %v9713_v8 }
0x17c0   :  { %8956 = vmatpush1.bf16.msra.mxu0 %v9872_v43  ;;  %8983 = vmatpush3.bf16.msra.mxu1 %v9951_v6 }
0x17c1   :  { %8958 = vmatprep.subr.bf16.mxu0 %v9880_v45  ;;  %8984 = vmatprep.subr.bf16.mxu1 %v9713_v8 }
0x17c4   :  { %8960 = vmatpush1.bf16.msra.mxu0 %v9908_v54  ;;  %8986 = vmatpush3.bf16.msra.mxu1 %v9967_v16 }
0x17c5   :  { %8962 = vmatprep.subr.bf16.mxu0 %v9912_v56  ;;  %8987 = vmatprep.subr.bf16.mxu1 %v9713_v8 }
0x17c8   :  { %8964 = vmatpush1.bf16.msra.mxu0 %v9938_v0  ;;  %8989 = vmatpush3.bf16.msra.mxu1 %v9982_v25 }
0x17c9   :  { %8966 = vmatprep.subr.bf16.mxu0 %v9942_v2  ;;  %8990 = vmatprep.subr.bf16.mxu1 %v9713_v8 }
0x17cc   :  { %8968 = vmatpush1.bf16.msra.mxu0 %v9962_v13  ;;  %8992 = vmatpush3.bf16.msra.mxu1 %v9998_v29 }
0x17cd   :  { %8994 = vmatprep.subr.bf16.mxu0 %v9759_v4  ;;  %9025 = vmatprep.subr.bf16.mxu1 %v9713_v8 }
0x1882   :  { %v4239_v32 = vpop.f32.mrb[46].mxu0  ;;  %v4310_v34 = vpop.f32.mrb[46].mxu1 }
0x1883   :  { %v4240_v36 = vadd.f32 %v4239_v32, %v10063_v55  ;;  %v4241_v48 = vpop.f32.mrb[47].mxu0  ;;  %v7312_v50 = vpop.f32.mrb[47].mxu1  ;;  %v4311_v5 = vadd.f32 %v4310_v34, %v10069_v27  ;;  %v4348_v32 = vunpack.c.h.bf16 %v5889_v30 }
0x1884   :  { %v4242_v21 = vadd.f32 %v4241_v48, %v10065_v57 }
0x1885   :  { %v4314_v53 = vadd.f32 %v4240_v36, %v4170_v44 }
0x1886   :  { %v4321_v46 = vadd.f32 %v4242_v21, %v4171_v51 }
0x1887   :  { %v5886_v58 = vmul.f32 -1.442695, %v4314_v53 }
0x1888   :  { %v5887_v15 = vmul.f32 -1.442695, %v4321_v46  ;;  %v11318_v46 = vld [vmem:[%s11632_s1 + $0x128] ss:$12 sps:$4 sm:$0xff]  }
0x1889   :  { %9622 = vpow2.f32 %v5886_v58 }
0x188a   :  { %9624 = vpow2.f32 %v5887_v15 }
0x1893   :  { %v9623_v47 = vpop.eup %9622 }
0x1894   :  { %v4318_v62 = vadd.f32 1.0, %v9623_v47  ;;  %v9625_v63 = vpop.eup %9624  ;;  %v4349_v47 = vunpack.c.l.bf16 %v11318_v46 }
0x1895   :  { %v4325_v1 = vadd.f32 1.0, %v9625_v63 }
0x1896   :  { %9626 = vrcp.f32 %v4318_v62 }
0x1897   :  { %9628 = vrcp.f32 %v4325_v1 }
0x18a0   :  { %v9627_v7 = vpop.eup %9626 }
0x18a1   :  { %v4328_v59 = vmul.f32 %v9627_v7, %v4311_v5  ;;  %v9629_v52 = vpop.eup %9628 }
0x18a2   :  { %v4331_v19 = vsub.f32 1.0, %v9629_v52  ;;  %v4333_v26 = vmul.f32 %v9629_v52, %v11223_v41 }
0x18a3   :  { %v4329_v61 = vadd.f32 %v4328_v59, %v4172_v3 }
0x18a5   :  { %9630 = vtanh.f32 %v4329_v61 }
0x18af   :  { %v9631_v20 = vpop.eup %9630 }
0x18b0   :  { %v4332_v22 = vmul.f32 %v9631_v20, %v4331_v19  ;;  %v4517_v19 = vpop.permute.xlu0 %4516 }
0x18b1   :  { %vm4518_vm12 = vcmp.eq.s32.totalorder %v4517_v19, 1 }
0x18b2   :  { %v4334_v12 = vadd.f32 %v4333_v26, %v4332_v22  ;;  %v5894_v26 = vld [vmem:[%s11632_s1 + $0x12c] sm:$0xff] }
0x18b3   :  { %v4524_v28 = vunpack.c.l.bf16 %v5894_v26 }
0x18b4   :  { %v11271_v14 = vsel %vm4341_vm11, %v4334_v12, %v11223_v41 }
0x18b5   :  { %4415 = vmatmul.mubr.f32.vlgmr.msra.gmra.mrb[48].mxu0 %v11271_v14  ;;  %7346 = vmatmul.mubr.f32.vlgmr.msra.gmra.mrb[48].mxu1 %v11271_v14 }
0x18b6   :  { %8996 = vmatpush1.bf16.msra.mxu0 %v9772_v10  ;;  %9027 = vmatpush3.bf16.msra.mxu1 %v9835_v31 }
0x18b7   :  { %8998 = vmatprep.subr.bf16.mxu0 %v9774_v11  ;;  %9028 = vmatprep.subr.bf16.mxu1 %v9713_v8 }
0x18b8   :  { %4591 = vmatprep.mubr.f32.mxu0 %v9714_v9  ;;  %7380 = vmatprep.mubr.msk.f32.mxu1 %vm9715_vm0, %v9714_v9 }
0x18ba   :  { %9000 = vmatpush1.bf16.msra.mxu0 %v9794_v17  ;;  %9030 = vmatpush3.bf16.msra.mxu1 %v9859_v39 }
0x18bb   :  { %9002 = vmatprep.subr.bf16.mxu0 %v9797_v18  ;;  %9031 = vmatprep.subr.bf16.mxu1 %v9713_v8 }
0x18be   :  { %9004 = vmatpush1.bf16.msra.mxu0 %v9812_v23  ;;  %9033 = vmatpush3.bf16.msra.mxu1 %v9892_v49 }
0x18bf   :  { %9006 = vmatprep.subr.bf16.mxu0 %v9815_v24  ;;  %9034 = vmatprep.subr.bf16.mxu1 %v9713_v8 }
0x18c2   :  { %9008 = vmatpush1.bf16.msra.mxu0 %v9841_v33  ;;  %9036 = vmatpush3.bf16.msra.mxu1 %v9924_v60 }
0x18c3   :  { %9010 = vmatprep.subr.bf16.mxu0 %v9847_v35  ;;  %9037 = vmatprep.subr.bf16.mxu1 %v9713_v8 }
0x18c6   :  { %9012 = vmatpush1.bf16.msra.mxu0 %v9872_v43  ;;  %9039 = vmatpush3.bf16.msra.mxu1 %v9951_v6 }
0x18c7   :  { %9014 = vmatprep.subr.bf16.mxu0 %v9880_v45  ;;  %9040 = vmatprep.subr.bf16.mxu1 %v9713_v8 }
0x18ca   :  { %9016 = vmatpush1.bf16.msra.mxu0 %v9908_v54  ;;  %9042 = vmatpush3.bf16.msra.mxu1 %v9967_v16 }
0x18cb   :  { %9018 = vmatprep.subr.bf16.mxu0 %v9912_v56  ;;  %9043 = vmatprep.subr.bf16.mxu1 %v9713_v8 }
0x18ce   :  { %9020 = vmatpush1.bf16.msra.mxu0 %v9938_v0  ;;  %9045 = vmatpush3.bf16.msra.mxu1 %v9982_v25 }
0x18cf   :  { %9022 = vmatprep.subr.bf16.mxu0 %v9942_v2  ;;  %9046 = vmatprep.subr.bf16.mxu1 %v9713_v8 }
0x18d2   :  { %9024 = vmatpush1.bf16.msra.mxu0 %v9962_v13  ;;  %9048 = vmatpush3.bf16.msra.mxu1 %v9998_v29 }
0x18d3   :  { %9050 = vmatprep.subr.bf16.mxu0 %v9759_v4  ;;  %9081 = vmatprep.subr.bf16.mxu1 %v9713_v8 }
0x1988   :  { %v4416_v38 = vpop.f32.mrb[48].mxu0  ;;  %v4487_v40 = vpop.f32.mrb[48].mxu1 }
0x1989   :  { %v4417_v41 = vadd.f32 %v4416_v38, %v10063_v55  ;;  %v4418_v42 = vpop.f32.mrb[49].mxu0  ;;  %v7347_v44 = vpop.f32.mrb[49].mxu1  ;;  %v4488_v62 = vadd.f32 %v4487_v40, %v10069_v27  ;;  %v4525_v40 = vunpack.c.h.bf16 %v5894_v26 }
0x198a   :  { %v4419_v34 = vadd.f32 %v4418_v42, %v10065_v57 }
0x198b   :  { %v4491_v36 = vadd.f32 %v4417_v41, %v4347_v37 }
0x198c   :  { %v4498_v50 = vadd.f32 %v4419_v34, %v4348_v32 }
0x198d   :  { %v5891_v48 = vmul.f32 -1.442695, %v4491_v36 }
0x198e   :  { %v5892_v51 = vmul.f32 -1.442695, %v4498_v50 }
0x198f   :  { %9632 = vpow2.f32 %v5891_v48 }
0x1990   :  { %9634 = vpow2.f32 %v5892_v51 }
0x1999   :  { %v9633_v21 = vpop.eup %9632 }
0x199a   :  { %v4495_v53 = vadd.f32 1.0, %v9633_v21  ;;  %v9635_v58 = vpop.eup %9634  ;;  %v4526_v21 = vunpack.c.h.bf16 %v11318_v46  ;;  %v5899_v46 = vld [vmem:[%s11632_s1 + $0x138] sm:$0xff] }
0x199b   :  { %v4502_v15 = vadd.f32 1.0, %v9635_v58 }
0x199c   :  { %9636 = vrcp.f32 %v4495_v53 }
0x199d   :  { %9638 = vrcp.f32 %v4502_v15 }
0x19a6   :  { %v9637_v63 = vpop.eup %9636 }
0x19a7   :  { %v4505_v1 = vmul.f32 %v9637_v63, %v4488_v62  ;;  %v9639_v5 = vpop.eup %9638 }
0x19a8   :  { %v4508_v7 = vsub.f32 1.0, %v9639_v5  ;;  %v4510_v52 = vmul.f32 %v9639_v5, %v11271_v14 }
0x19a9   :  { %v4506_v3 = vadd.f32 %v4505_v1, %v4349_v47 }
0x19ab   :  { %9640 = vtanh.f32 %v4506_v3 }
0x19b5   :  { %v9641_v59 = vpop.eup %9640 }
0x19b6   :  { %v4509_v61 = vmul.f32 %v9641_v59, %v4508_v7  ;;  %v4694_v7 = vpop.permute.xlu1 %4693 }
0x19b7   :  { %vm4695_vm13 = vcmp.eq.s32.totalorder %v4694_v7, 1 }
0x19b8   :  { %v4511_v20 = vadd.f32 %v4510_v52, %v4509_v61  ;;  %v4701_v52 = vunpack.c.l.bf16 %v5899_v46 }
0x19ba   :  { %v11324_v22 = vsel %vm4518_vm12, %v4511_v20, %v11271_v14 }
0x19bb   :  { %4592 = vmatmul.mubr.f32.vlgmr.msra.gmra.mrb[50].mxu0 %v11324_v22  ;;  %7381 = vmatmul.mubr.f32.vlgmr.msra.gmra.mrb[50].mxu1 %v11324_v22 }
0x19bc   :  { %9052 = vmatpush1.bf16.msra.mxu0 %v9772_v10  ;;  %9083 = vmatpush3.bf16.msra.mxu1 %v9835_v31 }
0x19bd   :  { %9054 = vmatprep.subr.bf16.mxu0 %v9774_v11  ;;  %9084 = vmatprep.subr.bf16.mxu1 %v9713_v8 }
0x19be   :  { %4768 = vmatprep.mubr.f32.mxu0 %v9714_v9  ;;  %7415 = vmatprep.mubr.msk.f32.mxu1 %vm9715_vm0, %v9714_v9 }
0x19c0   :  { %9056 = vmatpush1.bf16.msra.mxu0 %v9794_v17  ;;  %9086 = vmatpush3.bf16.msra.mxu1 %v9859_v39 }
0x19c1   :  { %9058 = vmatprep.subr.bf16.mxu0 %v9797_v18  ;;  %9087 = vmatprep.subr.bf16.mxu1 %v9713_v8 }
0x19c4   :  { %9060 = vmatpush1.bf16.msra.mxu0 %v9812_v23  ;;  %9089 = vmatpush3.bf16.msra.mxu1 %v9892_v49 }
0x19c5   :  { %9062 = vmatprep.subr.bf16.mxu0 %v9815_v24  ;;  %9090 = vmatprep.subr.bf16.mxu1 %v9713_v8 }
0x19c8   :  { %9064 = vmatpush1.bf16.msra.mxu0 %v9841_v33  ;;  %9092 = vmatpush3.bf16.msra.mxu1 %v9924_v60 }
0x19c9   :  { %9066 = vmatprep.subr.bf16.mxu0 %v9847_v35  ;;  %9093 = vmatprep.subr.bf16.mxu1 %v9713_v8 }
0x19cc   :  { %9068 = vmatpush1.bf16.msra.mxu0 %v9872_v43  ;;  %9095 = vmatpush3.bf16.msra.mxu1 %v9951_v6 }
0x19cd   :  { %9070 = vmatprep.subr.bf16.mxu0 %v9880_v45  ;;  %9096 = vmatprep.subr.bf16.mxu1 %v9713_v8 }
0x19d0   :  { %9072 = vmatpush1.bf16.msra.mxu0 %v9908_v54  ;;  %9098 = vmatpush3.bf16.msra.mxu1 %v9967_v16 }
0x19d1   :  { %9074 = vmatprep.subr.bf16.mxu0 %v9912_v56  ;;  %9099 = vmatprep.subr.bf16.mxu1 %v9713_v8 }
0x19d4   :  { %9076 = vmatpush1.bf16.msra.mxu0 %v9938_v0  ;;  %9101 = vmatpush3.bf16.msra.mxu1 %v9982_v25 }
0x19d5   :  { %9078 = vmatprep.subr.bf16.mxu0 %v9942_v2  ;;  %9102 = vmatprep.subr.bf16.mxu1 %v9713_v8 }
0x19d8   :  { %9080 = vmatpush1.bf16.msra.mxu0 %v9962_v13  ;;  %9104 = vmatpush3.bf16.msra.mxu1 %v9998_v29 }
0x19d9   :  { %9106 = vmatprep.subr.bf16.mxu0 %v9759_v4  ;;  %9137 = vmatprep.subr.bf16.mxu1 %v9713_v8 }
0x1a8e   :  { %v4593_v12 = vpop.f32.mrb[50].mxu0  ;;  %v4664_v14 = vpop.f32.mrb[50].mxu1 }
0x1a8f   :  { %v4594_v30 = vadd.f32 %v4593_v12, %v10063_v55  ;;  %v4595_v37 = vpop.f32.mrb[51].mxu0  ;;  %v7382_v38 = vpop.f32.mrb[51].mxu1  ;;  %v4665_v53 = vadd.f32 %v4664_v14, %v10069_v27  ;;  %v4702_v12 = vunpack.c.h.bf16 %v5899_v46 }
0x1a90   :  { %v4596_v41 = vadd.f32 %v4595_v37, %v10065_v57 }
0x1a91   :  { %v4668_v42 = vadd.f32 %v4594_v30, %v4524_v28 }
0x1a92   :  { %v4675_v32 = vadd.f32 %v4596_v41, %v4525_v40 }
0x1a93   :  { %v5896_v44 = vmul.f32 -1.442695, %v4668_v42 }
0x1a94   :  { %v5897_v34 = vmul.f32 -1.442695, %v4675_v32  ;;  %v11419_v32 = vld [vmem:[%s11632_s1 + $0x140] ss:$12 sps:$4 sm:$0xff]  }
0x1a95   :  { %9642 = vpow2.f32 %v5896_v44 }
0x1a96   :  { %9644 = vpow2.f32 %v5897_v34 }
0x1a9f   :  { %v9643_v36 = vpop.eup %9642 }
0x1aa0   :  { %v4672_v48 = vadd.f32 1.0, %v9643_v36  ;;  %v9645_v50 = vpop.eup %9644  ;;  %v4703_v36 = vunpack.c.l.bf16 %v11419_v32 }
0x1aa1   :  { %v4679_v51 = vadd.f32 1.0, %v9645_v50 }
0x1aa2   :  { %9646 = vrcp.f32 %v4672_v48 }
0x1aa3   :  { %9648 = vrcp.f32 %v4679_v51 }
0x1aac   :  { %v9647_v58 = vpop.eup %9646 }
0x1aad   :  { %v4682_v15 = vmul.f32 %v9647_v58, %v4665_v53  ;;  %v9649_v62 = vpop.eup %9648 }
0x1aae   :  { %v4685_v63 = vsub.f32 1.0, %v9649_v62  ;;  %v4687_v5 = vmul.f32 %v9649_v62, %v11324_v22 }
0x1aaf   :  { %v4683_v47 = vadd.f32 %v4682_v15, %v4526_v21 }
0x1ab1   :  { %9650 = vtanh.f32 %v4683_v47 }
0x1abb   :  { %v9651_v1 = vpop.eup %9650 }
0x1abc   :  { %v4686_v3 = vmul.f32 %v9651_v1, %v4685_v63  ;;  %v4871_v63 = vpop.permute.xlu0 %4870 }
0x1abd   :  { %vm4872_vm14 = vcmp.eq.s32.totalorder %v4871_v63, 1 }
0x1abe   :  { %v4688_v59 = vadd.f32 %v4687_v5, %v4686_v3  ;;  %v5904_v5 = vld [vmem:[%s11632_s1 + $0x144] sm:$0xff] }
0x1abf   :  { %v4878_v7 = vunpack.c.l.bf16 %v5904_v5 }
0x1ac0   :  { %v11372_v61 = vsel %vm4695_vm13, %v4688_v59, %v11324_v22 }
0x1ac1   :  { %4769 = vmatmul.mubr.f32.vlgmr.msra.gmra.mrb[52].mxu0 %v11372_v61  ;;  %7416 = vmatmul.mubr.f32.vlgmr.msra.gmra.mrb[52].mxu1 %v11372_v61 }
0x1ac2   :  { %9108 = vmatpush1.bf16.msra.mxu0 %v9772_v10  ;;  %9139 = vmatpush3.bf16.msra.mxu1 %v9835_v31 }
0x1ac3   :  { %9110 = vmatprep.subr.bf16.mxu0 %v9774_v11  ;;  %9140 = vmatprep.subr.bf16.mxu1 %v9713_v8 }
0x1ac4   :  { %4945 = vmatprep.mubr.f32.mxu0 %v9714_v9  ;;  %7450 = vmatprep.mubr.msk.f32.mxu1 %vm9715_vm0, %v9714_v9 }
0x1ac6   :  { %9112 = vmatpush1.bf16.msra.mxu0 %v9794_v17  ;;  %9142 = vmatpush3.bf16.msra.mxu1 %v9859_v39 }
0x1ac7   :  { %9114 = vmatprep.subr.bf16.mxu0 %v9797_v18  ;;  %9143 = vmatprep.subr.bf16.mxu1 %v9713_v8 }
0x1aca   :  { %9116 = vmatpush1.bf16.msra.mxu0 %v9812_v23  ;;  %9145 = vmatpush3.bf16.msra.mxu1 %v9892_v49 }
0x1acb   :  { %9118 = vmatprep.subr.bf16.mxu0 %v9815_v24  ;;  %9146 = vmatprep.subr.bf16.mxu1 %v9713_v8 }
0x1ace   :  { %9120 = vmatpush1.bf16.msra.mxu0 %v9841_v33  ;;  %9148 = vmatpush3.bf16.msra.mxu1 %v9924_v60 }
0x1acf   :  { %9122 = vmatprep.subr.bf16.mxu0 %v9847_v35  ;;  %9149 = vmatprep.subr.bf16.mxu1 %v9713_v8 }
0x1ad2   :  { %9124 = vmatpush1.bf16.msra.mxu0 %v9872_v43  ;;  %9151 = vmatpush3.bf16.msra.mxu1 %v9951_v6 }
0x1ad3   :  { %9126 = vmatprep.subr.bf16.mxu0 %v9880_v45  ;;  %9152 = vmatprep.subr.bf16.mxu1 %v9713_v8 }
0x1ad6   :  { %9128 = vmatpush1.bf16.msra.mxu0 %v9908_v54  ;;  %9154 = vmatpush3.bf16.msra.mxu1 %v9967_v16 }
0x1ad7   :  { %9130 = vmatprep.subr.bf16.mxu0 %v9912_v56  ;;  %9155 = vmatprep.subr.bf16.mxu1 %v9713_v8 }
0x1ada   :  { %9132 = vmatpush1.bf16.msra.mxu0 %v9938_v0  ;;  %9157 = vmatpush3.bf16.msra.mxu1 %v9982_v25 }
0x1adb   :  { %9134 = vmatprep.subr.bf16.mxu0 %v9942_v2  ;;  %9158 = vmatprep.subr.bf16.mxu1 %v9713_v8 }
0x1ade   :  { %9136 = vmatpush1.bf16.msra.mxu0 %v9962_v13  ;;  %9160 = vmatpush3.bf16.msra.mxu1 %v9998_v29 }
0x1adf   :  { %9162 = vmatprep.subr.bf16.mxu0 %v9759_v4  ;;  %9193 = vmatprep.subr.bf16.mxu1 %v9713_v8 }
0x1b94   :  { %v4770_v19 = vpop.f32.mrb[52].mxu0  ;;  %v4841_v20 = vpop.f32.mrb[52].mxu1 }
0x1b95   :  { %v4771_v22 = vadd.f32 %v4770_v19, %v10063_v55  ;;  %v4772_v26 = vpop.f32.mrb[53].mxu0  ;;  %v7417_v28 = vpop.f32.mrb[53].mxu1  ;;  %v4842_v48 = vadd.f32 %v4841_v20, %v10069_v27  ;;  %v4879_v20 = vunpack.c.h.bf16 %v5904_v5 }
0x1b96   :  { %v4773_v14 = vadd.f32 %v4772_v26, %v10065_v57 }
0x1b97   :  { %v4845_v30 = vadd.f32 %v4771_v22, %v4701_v52 }
0x1b98   :  { %v4852_v38 = vadd.f32 %v4773_v14, %v4702_v12 }
0x1b99   :  { %v5901_v37 = vmul.f32 -1.442695, %v4845_v30 }
0x1b9a   :  { %v5902_v40 = vmul.f32 -1.442695, %v4852_v38 }
0x1b9b   :  { %9652 = vpow2.f32 %v5901_v37 }
0x1b9c   :  { %9654 = vpow2.f32 %v5902_v40 }
0x1ba5   :  { %v9653_v41 = vpop.eup %9652 }
0x1ba6   :  { %v4849_v42 = vadd.f32 1.0, %v9653_v41  ;;  %v9655_v44 = vpop.eup %9654  ;;  %v4880_v41 = vunpack.c.h.bf16 %v11419_v32  ;;  %v5909_v32 = vld [vmem:[%s11632_s1 + $0x150] sm:$0xff] }
0x1ba7   :  { %v4856_v34 = vadd.f32 1.0, %v9655_v44 }
0x1ba8   :  { %9656 = vrcp.f32 %v4849_v42 }
0x1ba9   :  { %9658 = vrcp.f32 %v4856_v34 }
0x1bb2   :  { %v9657_v50 = vpop.eup %9656 }
0x1bb3   :  { %v4859_v51 = vmul.f32 %v9657_v50, %v4842_v48  ;;  %v9659_v53 = vpop.eup %9658 }
0x1bb4   :  { %v4862_v58 = vsub.f32 1.0, %v9659_v53  ;;  %v4864_v62 = vmul.f32 %v9659_v53, %v11372_v61 }
0x1bb5   :  { %v4860_v21 = vadd.f32 %v4859_v51, %v4703_v36 }
0x1bb7   :  { %9660 = vtanh.f32 %v4860_v21 }
0x1bc1   :  { %v9661_v15 = vpop.eup %9660 }
0x1bc2   :  { %v4863_v47 = vmul.f32 %v9661_v15, %v4862_v58  ;;  %v5048_v58 = vpop.permute.xlu1 %5047 }
0x1bc3   :  { %vm5049_vm15 = vcmp.eq.s32.totalorder %v5048_v58, 1 }
0x1bc4   :  { %v4865_v1 = vadd.f32 %v4864_v62, %v4863_v47  ;;  %v5055_v62 = vunpack.c.l.bf16 %v5909_v32 }
0x1bc6   :  { %v11425_v3 = vsel %vm4872_vm14, %v4865_v1, %v11372_v61 }
0x1bc7   :  { %4946 = vmatmul.mubr.f32.vlgmr.msra.gmra.mrb[54].mxu0 %v11425_v3  ;;  %7451 = vmatmul.mubr.f32.vlgmr.msra.gmra.mrb[54].mxu1 %v11425_v3 }
0x1bc8   :  { %9164 = vmatpush1.bf16.msra.mxu0 %v9772_v10  ;;  %9195 = vmatpush3.bf16.msra.mxu1 %v9835_v31 }
0x1bc9   :  { %9166 = vmatprep.subr.bf16.mxu0 %v9774_v11  ;;  %9196 = vmatprep.subr.bf16.mxu1 %v9713_v8 }
0x1bca   :  { %5122 = vmatprep.mubr.f32.mxu0 %v9714_v9  ;;  %7485 = vmatprep.mubr.msk.f32.mxu1 %vm9715_vm0, %v9714_v9 }
0x1bcc   :  { %9168 = vmatpush1.bf16.msra.mxu0 %v9794_v17  ;;  %9198 = vmatpush3.bf16.msra.mxu1 %v9859_v39 }
0x1bcd   :  { %9170 = vmatprep.subr.bf16.mxu0 %v9797_v18  ;;  %9199 = vmatprep.subr.bf16.mxu1 %v9713_v8 }
0x1bd0   :  { %9172 = vmatpush1.bf16.msra.mxu0 %v9812_v23  ;;  %9201 = vmatpush3.bf16.msra.mxu1 %v9892_v49 }
0x1bd1   :  { %9174 = vmatprep.subr.bf16.mxu0 %v9815_v24  ;;  %9202 = vmatprep.subr.bf16.mxu1 %v9713_v8 }
0x1bd4   :  { %9176 = vmatpush1.bf16.msra.mxu0 %v9841_v33  ;;  %9204 = vmatpush3.bf16.msra.mxu1 %v9924_v60 }
0x1bd5   :  { %9178 = vmatprep.subr.bf16.mxu0 %v9847_v35  ;;  %9205 = vmatprep.subr.bf16.mxu1 %v9713_v8 }
0x1bd8   :  { %9180 = vmatpush1.bf16.msra.mxu0 %v9872_v43  ;;  %9207 = vmatpush3.bf16.msra.mxu1 %v9951_v6 }
0x1bd9   :  { %9182 = vmatprep.subr.bf16.mxu0 %v9880_v45  ;;  %9208 = vmatprep.subr.bf16.mxu1 %v9713_v8 }
0x1bdc   :  { %9184 = vmatpush1.bf16.msra.mxu0 %v9908_v54  ;;  %9210 = vmatpush3.bf16.msra.mxu1 %v9967_v16 }
0x1bdd   :  { %9186 = vmatprep.subr.bf16.mxu0 %v9912_v56  ;;  %9211 = vmatprep.subr.bf16.mxu1 %v9713_v8 }
0x1be0   :  { %9188 = vmatpush1.bf16.msra.mxu0 %v9938_v0  ;;  %9213 = vmatpush3.bf16.msra.mxu1 %v9982_v25 }
0x1be1   :  { %9190 = vmatprep.subr.bf16.mxu0 %v9942_v2  ;;  %9214 = vmatprep.subr.bf16.mxu1 %v9713_v8 }
0x1be4   :  { %9192 = vmatpush1.bf16.msra.mxu0 %v9962_v13  ;;  %9216 = vmatpush3.bf16.msra.mxu1 %v9998_v29 }
0x1be5   :  { %9218 = vmatprep.subr.bf16.mxu0 %v9759_v4  ;;  %9249 = vmatprep.subr.bf16.mxu1 %v9713_v8 }
0x1c9a   :  { %v4947_v59 = vpop.f32.mrb[54].mxu0  ;;  %v5018_v61 = vpop.f32.mrb[54].mxu1 }
0x1c9b   :  { %v4948_v46 = vadd.f32 %v4947_v59, %v10063_v55  ;;  %v4949_v52 = vpop.f32.mrb[55].mxu0  ;;  %v7452_v19 = vpop.f32.mrb[55].mxu1  ;;  %v5019_v42 = vadd.f32 %v5018_v61, %v10069_v27  ;;  %v5056_v59 = vunpack.c.h.bf16 %v5909_v32 }
0x1c9c   :  { %v4950_v22 = vadd.f32 %v4949_v52, %v10065_v57 }
0x1c9d   :  { %v5022_v26 = vadd.f32 %v4948_v46, %v4878_v7 }
0x1c9e   :  { %v5029_v12 = vadd.f32 %v4950_v22, %v4879_v20 }
0x1c9f   :  { %v5906_v28 = vmul.f32 -1.442695, %v5022_v26 }
0x1ca0   :  { %v5907_v14 = vmul.f32 -1.442695, %v5029_v12  ;;  %v11520_v12 = vld [vmem:[%s11632_s1 + $0x158] ss:$12 sps:$4 sm:$0xff]  }
0x1ca1   :  { %9662 = vpow2.f32 %v5906_v28 }
0x1ca2   :  { %9664 = vpow2.f32 %v5907_v14 }
0x1cab   :  { %v9663_v30 = vpop.eup %9662 }
0x1cac   :  { %v5026_v37 = vadd.f32 1.0, %v9663_v30  ;;  %v9665_v38 = vpop.eup %9664  ;;  %v5057_v30 = vunpack.c.l.bf16 %v11520_v12 }
0x1cad   :  { %v5033_v40 = vadd.f32 1.0, %v9665_v38 }
0x1cae   :  { %9666 = vrcp.f32 %v5026_v37 }
0x1caf   :  { %9668 = vrcp.f32 %v5033_v40 }
0x1cb8   :  { %v9667_v44 = vpop.eup %9666 }
0x1cb9   :  { %v5036_v34 = vmul.f32 %v9667_v44, %v5019_v42  ;;  %v9669_v48 = vpop.eup %9668 }
0x1cba   :  { %v5039_v50 = vsub.f32 1.0, %v9669_v48  ;;  %v5041_v53 = vmul.f32 %v9669_v48, %v11425_v3 }
0x1cbb   :  { %v5037_v36 = vadd.f32 %v5036_v34, %v4880_v41 }
0x1cbd   :  { %9670 = vtanh.f32 %v5037_v36 }
0x1cc7   :  { %v9671_v51 = vpop.eup %9670 }
0x1cc8   :  { %v5040_v21 = vmul.f32 %v9671_v51, %v5039_v50  ;;  %v5225_v50 = vpop.permute.xlu0 %5224 }
0x1cc9   :  { %vm5226_vm1 = vcmp.eq.s32.totalorder %v5225_v50, 1 }
0x1cca   :  { %v5042_v15 = vadd.f32 %v5041_v53, %v5040_v21  ;;  %v5914_v53 = vld [vmem:[%s11632_s1 + $0x15c] sm:$0xff] }
0x1ccb   :  { %v5232_v58 = vunpack.c.l.bf16 %v5914_v53 }
0x1ccc   :  { %v11473_v47 = vsel %vm5049_vm15, %v5042_v15, %v11425_v3 }
0x1ccd   :  { %5123 = vmatmul.mubr.f32.vlgmr.msra.gmra.mrb[56].mxu0 %v11473_v47  ;;  %7486 = vmatmul.mubr.f32.vlgmr.msra.gmra.mrb[56].mxu1 %v11473_v47 }
0x1cce   :  { %9220 = vmatpush1.bf16.msra.mxu0 %v9772_v10  ;;  %9251 = vmatpush3.bf16.msra.mxu1 %v9835_v31 }
0x1ccf   :  { %9222 = vmatprep.subr.bf16.mxu0 %v9774_v11  ;;  %9252 = vmatprep.subr.bf16.mxu1 %v9713_v8 }
0x1cd0   :  { %5299 = vmatprep.mubr.f32.mxu0 %v9714_v9  ;;  %7520 = vmatprep.mubr.msk.f32.mxu1 %vm9715_vm0, %v9714_v9 }
0x1cd2   :  { %9224 = vmatpush1.bf16.msra.mxu0 %v9794_v17  ;;  %9254 = vmatpush3.bf16.msra.mxu1 %v9859_v39 }
0x1cd3   :  { %9226 = vmatprep.subr.bf16.mxu0 %v9797_v18  ;;  %9255 = vmatprep.subr.bf16.mxu1 %v9713_v8 }
0x1cd6   :  { %9228 = vmatpush1.bf16.msra.mxu0 %v9812_v23  ;;  %9257 = vmatpush3.bf16.msra.mxu1 %v9892_v49 }
0x1cd7   :  { %9230 = vmatprep.subr.bf16.mxu0 %v9815_v24  ;;  %9258 = vmatprep.subr.bf16.mxu1 %v9713_v8 }
0x1cda   :  { %9232 = vmatpush1.bf16.msra.mxu0 %v9841_v33  ;;  %9260 = vmatpush3.bf16.msra.mxu1 %v9924_v60 }
0x1cdb   :  { %9234 = vmatprep.subr.bf16.mxu0 %v9847_v35  ;;  %9261 = vmatprep.subr.bf16.mxu1 %v9713_v8 }
0x1cde   :  { %9236 = vmatpush1.bf16.msra.mxu0 %v9872_v43  ;;  %9263 = vmatpush3.bf16.msra.mxu1 %v9951_v6 }
0x1cdf   :  { %9238 = vmatprep.subr.bf16.mxu0 %v9880_v45  ;;  %9264 = vmatprep.subr.bf16.mxu1 %v9713_v8 }
0x1ce2   :  { %9240 = vmatpush1.bf16.msra.mxu0 %v9908_v54  ;;  %9266 = vmatpush3.bf16.msra.mxu1 %v9967_v16 }
0x1ce3   :  { %9242 = vmatprep.subr.bf16.mxu0 %v9912_v56  ;;  %9267 = vmatprep.subr.bf16.mxu1 %v9713_v8 }
0x1ce6   :  { %9244 = vmatpush1.bf16.msra.mxu0 %v9938_v0  ;;  %9269 = vmatpush3.bf16.msra.mxu1 %v9982_v25 }
0x1ce7   :  { %9246 = vmatprep.subr.bf16.mxu0 %v9942_v2  ;;  %9270 = vmatprep.subr.bf16.mxu1 %v9713_v8 }
0x1cea   :  { %9248 = vmatpush1.bf16.msra.mxu0 %v9962_v13  ;;  %9272 = vmatpush3.bf16.msra.mxu1 %v9998_v29 }
0x1ceb   :  { %9274 = vmatprep.subr.bf16.mxu0 %v9759_v4  ;;  %9305 = vmatprep.subr.bf16.mxu1 %v9713_v8 }
0x1da0   :  { %v5124_v63 = vpop.f32.mrb[56].mxu0  ;;  %v5195_v1 = vpop.f32.mrb[56].mxu1 }
0x1da1   :  { %v5125_v3 = vadd.f32 %v5124_v63, %v10063_v55  ;;  %v5126_v5 = vpop.f32.mrb[57].mxu0  ;;  %v7487_v7 = vpop.f32.mrb[57].mxu1  ;;  %v5196_v37 = vadd.f32 %v5195_v1, %v10069_v27  ;;  %v5233_v1 = vunpack.c.h.bf16 %v5914_v53  ;;  %v5924_v53 = vld [vmem:[%s11632_s1 + $0x174] sm:$0xff] }
0x1da2   :  { %v5127_v61 = vadd.f32 %v5126_v5, %v10065_v57 }
0x1da3   :  { %v5199_v46 = vadd.f32 %v5125_v3, %v5055_v62 }
0x1da4   :  { %v5206_v19 = vadd.f32 %v5127_v61, %v5056_v59 }
0x1da5   :  { %v5911_v52 = vmul.f32 -1.442695, %v5199_v46 }
0x1da6   :  { %v5912_v20 = vmul.f32 -1.442695, %v5206_v19 }
0x1da7   :  { %9672 = vpow2.f32 %v5911_v52 }
0x1da8   :  { %9674 = vpow2.f32 %v5912_v20  ;;  %v5234_v20 = vunpack.c.h.bf16 %v11520_v12 }
0x1db1   :  { %v9673_v22 = vpop.eup %9672 }
0x1db2   :  { %v5203_v26 = vadd.f32 1.0, %v9673_v22  ;;  %v9675_v28 = vpop.eup %9674 }
0x1db3   :  { %v5210_v14 = vadd.f32 1.0, %v9675_v28 }
0x1db4   :  { %9676 = vrcp.f32 %v5203_v26 }
0x1db5   :  { %9678 = vrcp.f32 %v5210_v14 }
0x1dbe   :  { %v9677_v38 = vpop.eup %9676 }
0x1dbf   :  { %v5213_v40 = vmul.f32 %v9677_v38, %v5196_v37  ;;  %v9679_v42 = vpop.eup %9678 }
0x1dc0   :  { %v5216_v44 = vsub.f32 1.0, %v9679_v42  ;;  %v5218_v48 = vmul.f32 %v9679_v42, %v11473_v47  ;;  %v5402_v42 = vpop.permute.xlu1 %5401 }
0x1dc1   :  { %v5214_v41 = vadd.f32 %v5213_v40, %v5057_v30  ;;  %vm5403_vm2 = vcmp.eq.s32.totalorder %v5402_v42, 1 }
0x1dc3   :  { %9680 = vtanh.f32 %v5214_v41 }
0x1dcd   :  { %v9681_v34 = vpop.eup %9680 }
0x1dce   :  { %v5217_v36 = vmul.f32 %v9681_v34, %v5216_v44 }
0x1dd0   :  { %v5219_v51 = vadd.f32 %v5218_v48, %v5217_v36  ;;  %v5579_v36 = vpop.permute.xlu0 %5578 }
0x1dd2   :  { %v11526_v21 = vsel %vm5226_vm1, %v5219_v51, %v11473_v47 }
0x1dd3   :  { %5300 = vmatmul.mubr.f32.vlgmr.msra.gmra.mrb[58].mxu0 %v11526_v21  ;;  %7521 = vmatmul.mubr.f32.vlgmr.msra.gmra.mrb[58].mxu1 %v11526_v21 }
0x1dd4   :  { %9276 = vmatpush1.bf16.msra.mxu0 %v9772_v10  ;;  %9307 = vmatpush3.bf16.msra.mxu1 %v9835_v31 }
0x1dd5   :  { %9278 = vmatprep.subr.bf16.mxu0 %v9774_v11  ;;  %9308 = vmatprep.subr.bf16.mxu1 %v9713_v8 }
0x1dd6   :  { %5476 = vmatprep.mubr.f32.mxu0 %v9714_v9  ;;  %7555 = vmatprep.mubr.msk.f32.mxu1 %vm9715_vm0, %v9714_v9 }
0x1dd8   :  { %9280 = vmatpush1.bf16.msra.mxu0 %v9794_v17  ;;  %9310 = vmatpush3.bf16.msra.mxu1 %v9859_v39 }
0x1dd9   :  { %9282 = vmatprep.subr.bf16.mxu0 %v9797_v18  ;;  %9311 = vmatprep.subr.bf16.mxu1 %v9713_v8 }
0x1ddc   :  { %9284 = vmatpush1.bf16.msra.mxu0 %v9812_v23  ;;  %9313 = vmatpush3.bf16.msra.mxu1 %v9892_v49 }
0x1ddd   :  { %9286 = vmatprep.subr.bf16.mxu0 %v9815_v24  ;;  %9314 = vmatprep.subr.bf16.mxu1 %v9713_v8 }
0x1de0   :  { %9288 = vmatpush1.bf16.msra.mxu0 %v9841_v33  ;;  %9316 = vmatpush3.bf16.msra.mxu1 %v9924_v60 }
0x1de1   :  { %9290 = vmatprep.subr.bf16.mxu0 %v9847_v35  ;;  %9317 = vmatprep.subr.bf16.mxu1 %v9713_v8 }
0x1de4   :  { %9292 = vmatpush1.bf16.msra.mxu0 %v9872_v43  ;;  %9319 = vmatpush3.bf16.msra.mxu1 %v9951_v6 }
0x1de5   :  { %9294 = vmatprep.subr.bf16.mxu0 %v9880_v45  ;;  %9320 = vmatprep.subr.bf16.mxu1 %v9713_v8 }
0x1de8   :  { %9296 = vmatpush1.bf16.msra.mxu0 %v9908_v54  ;;  %9322 = vmatpush3.bf16.msra.mxu1 %v9967_v16 }
0x1de9   :  { %9298 = vmatprep.subr.bf16.mxu0 %v9912_v56  ;;  %9323 = vmatprep.subr.bf16.mxu1 %v9713_v8 }
0x1dec   :  { %9300 = vmatpush1.bf16.msra.mxu0 %v9938_v0  ;;  %9325 = vmatpush3.bf16.msra.mxu1 %v9982_v25 }
0x1ded   :  { %9302 = vmatprep.subr.bf16.mxu0 %v9942_v2  ;;  %9326 = vmatprep.subr.bf16.mxu1 %v9713_v8 }
0x1df0   :  { %9304 = vmatpush1.bf16.msra.mxu0 %v9962_v13  ;;  %9328 = vmatpush3.bf16.msra.mxu1 %v9998_v29 }
0x1df1   :  { %9330 = vmatprep.subr.bf16.mxu0 %v9759_v4  ;;  %9361 = vmatprep.subr.bf16.mxu1 %v9713_v8 }
0x1ea6   :  { %v5301_v15 = vpop.f32.mrb[58].mxu0  ;;  %v5372_v47 = vpop.f32.mrb[58].mxu1 }
0x1ea7   :  { %v5302_v32 = vadd.f32 %v5301_v15, %v10063_v55  ;;  %v5303_v62 = vpop.f32.mrb[59].mxu0  ;;  %v7522_v63 = vpop.f32.mrb[59].mxu1  ;;  %v5373_v22 = vadd.f32 %v5372_v47, %v10069_v27 }
0x1ea8   :  { %v5304_v3 = vadd.f32 %v5303_v62, %v10065_v57 }
0x1ea9   :  { %v5376_v5 = vadd.f32 %v5302_v32, %v5232_v58  ;;  %v5586_v58 = vunpack.c.l.bf16 %v5924_v53 }
0x1eaa   :  { %v5383_v59 = vadd.f32 %v5304_v3, %v5233_v1  ;;  %v5587_v1 = vunpack.c.h.bf16 %v5924_v53 }
0x1eab   :  { %v5916_v7 = vmul.f32 -1.442695, %v5376_v5 }
0x1eac   :  { %v5917_v4 = vmul.f32 -1.442695, %v5383_v59 }
0x1ead   :  { %9682 = vpow2.f32 %v5916_v7 }
0x1eae   :  { %9684 = vpow2.f32 %v5917_v4 }
0x1eb7   :  { %v9683_v61 = vpop.eup %9682 }
0x1eb8   :  { %v5380_v46 = vadd.f32 1.0, %v9683_v61  ;;  %v9685_v52 = vpop.eup %9684 }
0x1eb9   :  { %v5387_v19 = vadd.f32 1.0, %v9685_v52 }
0x1eba   :  { %9686 = vrcp.f32 %v5380_v46 }
0x1ebb   :  { %9688 = vrcp.f32 %v5387_v19 }
0x1ec4   :  { %v9687_v26 = vpop.eup %9686 }
0x1ec5   :  { %v5390_v28 = vmul.f32 %v9687_v26, %v5373_v22  ;;  %v9689_v30 = vpop.eup %9688 }
0x1ec6   :  { %v5393_v37 = vsub.f32 1.0, %v9689_v30  ;;  %v5395_v41 = vmul.f32 %v9689_v30, %v11526_v21 }
0x1ec7   :  { %v5391_v14 = vadd.f32 %v5390_v28, %v5234_v20 }
0x1ec9   :  { %9690 = vtanh.f32 %v5391_v14 }
0x1ed3   :  { %v9691_v38 = vpop.eup %9690 }
0x1ed4   :  { %v5394_v40 = vmul.f32 %v9691_v38, %v5393_v37  ;;  %v5756_v37 = vpop.permute.xlu1 %5755 }
0x1ed5   :  { %vm5757_vm3 = vcmp.eq.s32.totalorder %v5756_v37, 1 }
0x1ed6   :  { %v5396_v44 = vadd.f32 %v5395_v41, %v5394_v40 }
0x1ed8   :  { %v11574_v34 = vsel %vm5403_vm2, %v5396_v44, %v11526_v21 }
0x1ed9   :  { %5477 = vmatmul.mubr.f32.vlgmr.msra.gmra.mrb[60].mxu0 %v11574_v34  ;;  %7556 = vmatmul.mubr.f32.vlgmr.msra.gmra.mrb[60].mxu1 %v11574_v34 }
0x1eda   :  { %9332 = vmatpush1.bf16.msra.mxu0 %v9772_v10  ;;  %9363 = vmatpush3.bf16.msra.mxu1 %v9835_v31 }
0x1edb   :  { %9334 = vmatprep.subr.bf16.mxu0 %v9774_v11  ;;  %9364 = vmatprep.subr.bf16.mxu1 %v9713_v8 }
0x1edc   :  { %5653 = vmatprep.mubr.f32.mxu0 %v9714_v9  ;;  %7590 = vmatprep.mubr.msk.f32.mxu1 %vm9715_vm0, %v9714_v9  ;;  %v5919_v9 = vld [vmem:[%s11632_s1 + $0x168] sm:$0xff]  ;;  %vm5580_vm0 = vcmp.eq.s32.totalorder %v5579_v36, 1 }
0x1edd   :  { %v5409_v10 = vunpack.c.l.bf16 %v5919_v9  ;;  %v5410_v31 = vunpack.c.h.bf16 %v5919_v9 }
0x1ede   :  { %9336 = vmatpush1.bf16.msra.mxu0 %v9794_v17  ;;  %9366 = vmatpush3.bf16.msra.mxu1 %v9859_v39 }
0x1edf   :  { %9338 = vmatprep.subr.bf16.mxu0 %v9797_v18  ;;  %9367 = vmatprep.subr.bf16.mxu1 %v9713_v8 }
0x1ee2   :  { %9340 = vmatpush1.bf16.msra.mxu0 %v9812_v23  ;;  %9369 = vmatpush3.bf16.msra.mxu1 %v9892_v49 }
0x1ee3   :  { %9342 = vmatprep.subr.bf16.mxu0 %v9815_v24  ;;  %9370 = vmatprep.subr.bf16.mxu1 %v9713_v8 }
0x1ee6   :  { %9344 = vmatpush1.bf16.msra.mxu0 %v9841_v33  ;;  %9372 = vmatpush3.bf16.msra.mxu1 %v9924_v60 }
0x1ee7   :  { %9346 = vmatprep.subr.bf16.mxu0 %v9847_v35  ;;  %9373 = vmatprep.subr.bf16.mxu1 %v9713_v8 }
0x1eea   :  { %9348 = vmatpush1.bf16.msra.mxu0 %v9872_v43  ;;  %9375 = vmatpush3.bf16.msra.mxu1 %v9951_v6 }
0x1eeb   :  { %9350 = vmatprep.subr.bf16.mxu0 %v9880_v45  ;;  %9376 = vmatprep.subr.bf16.mxu1 %v9713_v8 }
0x1eee   :  { %9352 = vmatpush1.bf16.msra.mxu0 %v9908_v54  ;;  %9378 = vmatpush3.bf16.msra.mxu1 %v9967_v16 }
0x1eef   :  { %9354 = vmatprep.subr.bf16.mxu0 %v9912_v56  ;;  %9379 = vmatprep.subr.bf16.mxu1 %v9713_v8  ;;  %v5920_v56 = vld [vmem:[%s11632_s1 + $0x170] ss:$12 sps:$4 sm:$0xff]  }
0x1ef0   :  { %v5588_v20 = vunpack.c.h.bf16 %v5920_v56 }
0x1ef2   :  { %9356 = vmatpush1.bf16.msra.mxu0 %v9938_v0  ;;  %9381 = vmatpush3.bf16.msra.mxu1 %v9982_v25  ;;  %v5411_v0 = vunpack.c.l.bf16 %v5920_v56 }
0x1ef3   :  { %9358 = vmatprep.subr.bf16.mxu0 %v9942_v2  ;;  %9382 = vmatprep.subr.bf16.mxu1 %v9713_v8 }
0x1ef6   :  { %9360 = vmatpush1.bf16.msra.mxu0 %v9962_v13  ;;  %9384 = vmatpush3.bf16.msra.mxu1 %v9998_v29 }
0x1fac   :  { %v5478_v11 = vpop.f32.mrb[60].mxu0  ;;  %v5549_v17 = vpop.f32.mrb[60].mxu1 }
0x1fad   :  { %v5479_v18 = vadd.f32 %v5478_v11, %v10063_v55  ;;  %v5480_v23 = vpop.f32.mrb[61].mxu0  ;;  %v7557_v24 = vpop.f32.mrb[61].mxu1  ;;  %v5550_v2 = vadd.f32 %v5549_v17, %v10069_v27 }
0x1fae   :  { %v5481_v33 = vadd.f32 %v5480_v23, %v10065_v57 }
0x1faf   :  { %v5553_v35 = vadd.f32 %v5479_v18, %v5409_v10 }
0x1fb0   :  { %v5560_v39 = vadd.f32 %v5481_v33, %v5410_v31 }
0x1fb1   :  { %v5921_v8 = vmul.f32 -1.442695, %v5553_v35 }
0x1fb2   :  { %v5922_v43 = vmul.f32 -1.442695, %v5560_v39 }
0x1fb3   :  { %9692 = vpow2.f32 %v5921_v8 }
0x1fb4   :  { %9694 = vpow2.f32 %v5922_v43 }
0x1fbd   :  { %v9693_v45 = vpop.eup %9692 }
0x1fbe   :  { %v5557_v49 = vadd.f32 1.0, %v9693_v45  ;;  %v9695_v54 = vpop.eup %9694 }
0x1fbf   :  { %v5564_v60 = vadd.f32 1.0, %v9695_v54 }
0x1fc0   :  { %9696 = vrcp.f32 %v5557_v49 }
0x1fc1   :  { %9698 = vrcp.f32 %v5564_v60 }
0x1fca   :  { %v9697_v6 = vpop.eup %9696 }
0x1fcb   :  { %v5567_v13 = vmul.f32 %v9697_v6, %v5550_v2  ;;  %v9699_v25 = vpop.eup %9698 }
0x1fcc   :  { %v5570_v29 = vsub.f32 1.0, %v9699_v25  ;;  %v5572_v50 = vmul.f32 %v9699_v25, %v11574_v34 }
0x1fcd   :  { %v5568_v16 = vadd.f32 %v5567_v13, %v5411_v0 }
0x1fcf   :  { %9700 = vtanh.f32 %v5568_v16 }
0x1fd9   :  { %v9701_v12 = vpop.eup %9700 }
0x1fda   :  { %v5571_v48 = vmul.f32 %v9701_v12, %v5570_v29 }
0x1fdc   :  { %v5573_v51 = vadd.f32 %v5572_v50, %v5571_v48 }
0x1fde   :  { %v5581_v21 = vsel %vm5580_vm0, %v5573_v51, %v11574_v34 }
0x1fdf   :  { %5654 = vmatmul.mubr.f32.vlgmr.msra.gmra.mrb[62].mxu0 %v5581_v21  ;;  %7591 = vmatmul.mubr.f32.vlgmr.msra.gmra.mrb[62].mxu1 %v5581_v21 }
0x20b2   :  { %v5655_v15 = vpop.f32.mrb[62].mxu0  ;;  %v5726_v47 = vpop.f32.mrb[62].mxu1 }
0x20b3   :  { %v5656_v32 = vadd.f32 %v5655_v15, %v10063_v55  ;;  %v5657_v62 = vpop.f32.mrb[63].mxu0  ;;  %v7592_v63 = vpop.f32.mrb[63].mxu1  ;;  %v5727_v22 = vadd.f32 %v5726_v47, %v10069_v27 }
0x20b4   :  { %v5658_v3 = vadd.f32 %v5657_v62, %v10065_v57 }
0x20b5   :  { %v5730_v5 = vadd.f32 %v5656_v32, %v5586_v58 }
0x20b6   :  { %v5737_v59 = vadd.f32 %v5658_v3, %v5587_v1 }
0x20b7   :  { %v5926_v7 = vmul.f32 -1.442695, %v5730_v5 }
0x20b8   :  { %v5927_v4 = vmul.f32 -1.442695, %v5737_v59 }
0x20b9   :  { %9702 = vpow2.f32 %v5926_v7 }
0x20ba   :  { %9704 = vpow2.f32 %v5927_v4 }
0x20c3   :  { %v9703_v61 = vpop.eup %9702 }
0x20c4   :  { %v5734_v46 = vadd.f32 1.0, %v9703_v61  ;;  %v9705_v52 = vpop.eup %9704 }
0x20c5   :  { %v5741_v19 = vadd.f32 1.0, %v9705_v52 }
0x20c6   :  { %9706 = vrcp.f32 %v5734_v46 }
0x20c7   :  { %9708 = vrcp.f32 %v5741_v19 }
0x20d0   :  { %v9707_v55 = vpop.eup %9706 }
0x20d1   :  { %v5744_v26 = vmul.f32 %v9707_v55, %v5727_v22  ;;  %v9709_v57 = vpop.eup %9708 }
0x20d2   :  { %v5747_v14 = vsub.f32 1.0, %v9709_v57  ;;  %v5749_v40 = vmul.f32 %v9709_v57, %v5581_v21 }
0x20d3   :  { %v5745_v28 = vadd.f32 %v5744_v26, %v5588_v20 }
0x20d5   :  { %9710 = vtanh.f32 %v5745_v28 }
0x20df   :  { %v9711_v30 = vpop.eup %9710 }
0x20e0   :  { %v5748_v38 = vmul.f32 %v9711_v30, %v5747_v14 }
0x20e2   :  { %v5750_v41 = vadd.f32 %v5749_v40, %v5748_v38 }
0x20e4   :  { %v5758_v42 = vsel %vm5757_vm3, %v5750_v41, %v5581_v21 }
0x20e5   :  { %5759 = vst [vmem:[#allocation2] sm:$0xff] %v5758_v42 }
0x20e6 PF:  {}
0x20ec   :  { %v5763_v44 = vld [vmem:[#allocation2] sm:$0xff] }
0x20ed   :  { %5764 = vst [vmem:[%s11636_s5] sm:$0xff] %v5763_v44 }

</bundles_post_ra>
